<compile_context>
chip_gen: v7x
topology: tpu7x:2x2x1
jax: 0.10.0
libtpu: 0.0.40
codegen_flags: <defaults>
</compile_context>

<pallas_src>
import functools

import jax
import jax.numpy as jnp
from jax.experimental import pallas as pl
from jax.experimental.pallas import tpu as pltpu

EPS = 1e-5
NEG_SLOPE = 0.2
VMEM_LIMIT = 48 * 1024 * 1024   # <= v7x's 64 MiB physical VMEM; fine on v5e/v6e.


# ---------------------------------------------------------------------------
# In-kernel helpers
# ---------------------------------------------------------------------------
def _sum_all(a):
    """(H, W) -> (1, 1) via two single-axis reductions (XLU-friendly)."""
    return jnp.sum(jnp.sum(a, axis=1, keepdims=True), axis=0, keepdims=True)


def _conv3x3_planes(apad_ref, w_ref, C, H, W):
    """3x3 / stride-1 / pad-1 conv as 9*C*C shifted fp32 VPU FMAs.

    apad_ref: (C, H+2, W+2) zero-padded activation in VMEM scratch
    w_ref:    (C*C*9,) f32 weights in SMEM, PyTorch (Cout, Cin, 3, 3) row-major
    Returns a list of C fp32 (H, W) accumulators (bias NOT added).
    """
    accs = [jnp.zeros((H, W), jnp.float32) for _ in range(C)]
    for ci in range(C):
        for dy in range(3):
            for dx in range(3):
                tap = apad_ref[ci, dy:dy + H, dx:dx + W]       # static slice
                for co in range(C):
                    w = w_ref[(co * C + ci) * 9 + dy * 3 + dx]  # SMEM scalar
                    accs[co] = accs[co] + tap * w
    return accs


def _emit_conv_and_stats(accs, b_ref, conv_ref, stats_ref, C):
    """Store conv+bias planes and per-channel (sum, sumsq) of the pre-bias conv."""
    parts = []
    for co in range(C):
        conv_ref[0, co] = accs[co] + b_ref[co]
        parts.append(_sum_all(accs[co]))
    for co in range(C):
        parts.append(_sum_all(accs[co] * accs[co]))
    stats_ref[...] = jnp.concatenate(parts, axis=1).reshape(1, 1, 2 * C)


# ---------------------------------------------------------------------------
# Kernels (one image per grid step)
# ---------------------------------------------------------------------------
def conv_stats_kernel(x_ref, w_ref, b_ref, conv_ref, stats_ref, apad_ref,
                      *, C, H, W):
    """Stage 1: conv1 + bias, plus per-image partial BN stats."""
    apad_ref[...] = jnp.zeros((C, H + 2, W + 2), jnp.float32)
    for ci in range(C):
        apad_ref[ci, 1:H + 1, 1:W + 1] = x_ref[0, ci]
    accs = _conv3x3_planes(apad_ref, w_ref, C, H, W)
    _emit_conv_and_stats(accs, b_ref, conv_ref, stats_ref, C)


def bn_lrelu_conv_stats_kernel(y_ref, w_ref, b_ref, scale_ref, shift_ref,
                               conv_ref, stats_ref, apad_ref, *, C, H, W):
    """Stage 2: BN1-apply + LeakyReLU fused into conv2 (+ bias + stats)."""
    apad_ref[...] = jnp.zeros((C, H + 2, W + 2), jnp.float32)
    for ci in range(C):
        a = y_ref[0, ci] * scale_ref[ci] + shift_ref[ci]
        apad_ref[ci, 1:H + 1, 1:W + 1] = jnp.where(a > 0, a, NEG_SLOPE * a)
    accs = _conv3x3_planes(apad_ref, w_ref, C, H, W)
    _emit_conv_and_stats(accs, b_ref, conv_ref, stats_ref, C)


def bn_add_lrelu_kernel(y_ref, x_ref, scale_ref, shift_ref, o_ref, *, C):
    """Stage 3: BN2-apply + residual add + LeakyReLU."""
    for c in range(C):
        y = y_ref[0, c] * scale_ref[c] + shift_ref[c] + x_ref[0, c]
        o_ref[0, c] = jnp.where(y > 0, y, NEG_SLOPE * y)


# ---------------------------------------------------------------------------
# pallas_call builders
# ---------------------------------------------------------------------------
def _img_spec(C, H, W):
    return pl.BlockSpec((1, C, H, W), lambda n: (n, 0, 0, 0))


def _smem_spec():
    return pl.BlockSpec(memory_space=pltpu.MemorySpace.SMEM)


def _compiler_params():
    return pltpu.CompilerParams(dimension_semantics=("parallel",),
                                vmem_limit_bytes=VMEM_LIMIT)


def _make_conv_stats_call(N, C, H, W):
    return pl.pallas_call(
        functools.partial(conv_stats_kernel, C=C, H=H, W=W),
        out_shape=(jax.ShapeDtypeStruct((N, C, H, W), jnp.float32),
                   jax.ShapeDtypeStruct((N, 1, 2 * C), jnp.float32)),
        grid=(N,),
        in_specs=[_img_spec(C, H, W),   # x
                  _smem_spec(),         # w1 (C*C*9,)
                  _smem_spec()],        # b1 (C,)
        out_specs=(_img_spec(C, H, W),  # conv1
                   pl.BlockSpec((1, 1, 2 * C), lambda n: (n, 0, 0))),
        scratch_shapes=[pltpu.VMEM((C, H + 2, W + 2), jnp.float32)],
        compiler_params=_compiler_params(),
    )


def _make_bn_lrelu_conv_stats_call(N, C, H, W):
    return pl.pallas_call(
        functools.partial(bn_lrelu_conv_stats_kernel, C=C, H=H, W=W),
        out_shape=(jax.ShapeDtypeStruct((N, C, H, W), jnp.float32),
                   jax.ShapeDtypeStruct((N, 1, 2 * C), jnp.float32)),
        grid=(N,),
        in_specs=[_img_spec(C, H, W),   # conv1
                  _smem_spec(),         # w2
                  _smem_spec(),         # b2
                  _smem_spec(),         # scale1
                  _smem_spec()],        # shift1
        out_specs=(_img_spec(C, H, W),  # conv2 (aliases conv1 buffer)
                   pl.BlockSpec((1, 1, 2 * C), lambda n: (n, 0, 0))),
        scratch_shapes=[pltpu.VMEM((C, H + 2, W + 2), jnp.float32)],
        input_output_aliases={0: 0},
        compiler_params=_compiler_params(),
    )


def _make_bn_add_lrelu_call(N, C, H, W):
    return pl.pallas_call(
        functools.partial(bn_add_lrelu_kernel, C=C),
        out_shape=jax.ShapeDtypeStruct((N, C, H, W), jnp.float32),
        grid=(N,),
        in_specs=[_img_spec(C, H, W),   # conv2
                  _img_spec(C, H, W),   # identity (x)
                  _smem_spec(),         # scale2
                  _smem_spec()],        # shift2
        out_specs=_img_spec(C, H, W),   # out (aliases conv2 buffer)
        input_output_aliases={0: 0},
        compiler_params=_compiler_params(),
    )


# ---------------------------------------------------------------------------
# Wrapper
# ---------------------------------------------------------------------------
def _finalize_stats(stats, bias, gamma, beta, m_total):
    """Per-image (sum, sumsq) of the *pre-bias* conv -> per-channel scale/shift.

    Variance is shift invariant, so computing it on the pre-bias conv removes
    the bias term from the E[x^2]-E[x]^2 cancellation; bias is added back to the
    mean here.
    """
    C = gamma.shape[0]
    tot = jnp.sum(stats, axis=(0, 1))                 # (2C,)
    s, q = tot[:C], tot[C:]
    mean0 = s / m_total
    var = jnp.maximum(q / m_total - mean0 * mean0, 0.0)   # biased (training BN)
    mean = mean0 + bias
    scale = gamma * jax.lax.rsqrt(var + EPS)
    shift = beta - mean * scale
    return scale.astype(jnp.float32), shift.astype(jnp.float32)


@jax.jit
def residual_block(x_nchw, params):
    N, C, H, W = x_nchw.shape
    m_total = float(N * H * W)
    x = x_nchw.astype(jnp.float32)

    # PyTorch conv weight (Cout, Cin, 3, 3) row-major flatten -> SMEM scalars.
    w1 = params["w1"].astype(jnp.float32).reshape(-1)
    w2 = params["w2"].astype(jnp.float32).reshape(-1)
    b1 = params["b1"].astype(jnp.float32)
    b2 = params["b2"].astype(jnp.float32)

    conv1_call = _make_conv_stats_call(N, C, H, W)
    conv2_call = _make_bn_lrelu_conv_stats_call(N, C, H, W)
    out_call = _make_bn_add_lrelu_call(N, C, H, W)

    # Stage 1: conv1 (+ per-image BN1 partial stats).
    conv1, stats1 = conv1_call(x, w1, b1)
    scale1, shift1 = _finalize_stats(stats1, b1, params["g1"], params["beta1"],
                                     m_total)

    # Stage 2: BN1-apply + LeakyReLU fused into conv2 (+ BN2 partial stats).
    conv2, stats2 = conv2_call(conv1, w2, b2, scale1, shift1)
    scale2, shift2 = _finalize_stats(stats2, b2, params["g2"], params["beta2"],
                                     m_total)

    # Stage 3: BN2-apply + residual add + LeakyReLU.
    return out_call(conv2, x, scale2, shift2)


# ---------------------------------------------------------------------------
# Pure-JAX reference (fp32) for correctness check
# ---------------------------------------------------------------------------
def ref_forward(x, params):
    def conv(x, w, b):
        y = jax.lax.conv_general_dilated(
            x, w, (1, 1), ((1, 1), (1, 1)),
            dimension_numbers=("NCHW", "OIHW", "NCHW"),
            precision=jax.lax.Precision.HIGHEST)
        return y + b[None, :, None, None]

    def bn(x, g, bt):
        mean = x.mean(axis=(0, 2, 3), keepdims=True)
        var = ((x - mean) ** 2).mean(axis=(0, 2, 3), keepdims=True)
        return ((x - mean) * jax.lax.rsqrt(var + EPS)
                * g[None, :, None, None] + bt[None, :, None, None])

    def lrelu(x):
        return jnp.where(x > 0, x, NEG_SLOPE * x)

    out = lrelu(bn(conv(x, params["w1"], params["b1"]),
                   params["g1"], params["beta1"]))
    out = bn(conv(out, params["w2"], params["b2"]),
             params["g2"], params["beta2"])
    return lrelu(out + x)


def init_params(key, channels):
    k1, k2, k3, k4 = jax.random.split(key, 4)
    fan_in = channels * 9
    bound = 1.0 / jnp.sqrt(fan_in)
    return {
        "w1": jax.random.uniform(k1, (channels, channels, 3, 3),
                                 jnp.float32, -bound, bound),
        "b1": jax.random.uniform(k2, (channels,), jnp.float32, -bound, bound),
        "w2": jax.random.uniform(k3, (channels, channels, 3, 3),
                                 jnp.float32, -bound, bound),
        "b2": jax.random.uniform(k4, (channels,), jnp.float32, -bound, bound),
        "g1": jnp.ones((channels,), jnp.float32),
        "beta1": jnp.zeros((channels,), jnp.float32),
        "g2": jnp.ones((channels,), jnp.float32),
        "beta2": jnp.zeros((channels,), jnp.float32),
    }


if __name__ == "__main__":
    key = jax.random.PRNGKey(0)
    kx, kp = jax.random.split(key)

    N, C, H, W = 2, 4, 16, 16
    x = jax.random.normal(kx, (N, C, H, W), jnp.float32)
    params = init_params(kp, C)

    out = jax.block_until_ready(residual_block(x, params))
    assert out.shape == (N, C, H, W), out.shape

    ref = jax.block_until_ready(ref_forward(x, params))
    max_err = float(jnp.max(jnp.abs(out - ref)))
    assert jnp.allclose(out, ref, atol=1e-3, rtol=1e-3), max_err

    print("KERNEL_OK")
</pallas_src>

<mosaic_0001>
module attributes {stable_mosaic.version = 11 : i64} {
  func.func @conv_stats_kernel(%arg0: i32, %arg1: memref<1x4x16x16xf32, #tpu.memory_space<vmem>>, %arg2: memref<144xf32, #tpu.memory_space<smem>>, %arg3: memref<4xf32, #tpu.memory_space<smem>>, %arg4: memref<1x4x16x16xf32, #tpu.memory_space<vmem>>, %arg5: memref<1x1x8xf32, #tpu.memory_space<vmem>>, %arg6: memref<4x18x18xf32, #tpu.memory_space<vmem>>) attributes {dimension_semantics = [#tpu.dimension_semantics<parallel>], iteration_bounds = array<i64: 2>, scalar_prefetch = 0 : i64, scratch_operands = 1 : i64, tpu.core_type = #tpu.core_type<tc>, window_params = [{transform_indices = @transform_0, window_bounds = array<i64: 1, 4, 16, 16>}, {transform_indices = @transform_1, window_bounds = array<i64: 144>}, {transform_indices = @transform_2, window_bounds = array<i64: 4>}, {transform_indices = @transform_3, window_bounds = array<i64: 1, 4, 16, 16>}, {transform_indices = @transform_4, window_bounds = array<i64: 1, 1, 8>}]} {
    %cst = arith.constant 0.000000e+00 : f32
    %0 = vector.broadcast %cst : f32 to vector<4x18x18xf32>
    %c0 = arith.constant 0 : index
    %c0_0 = arith.constant 0 : index
    %c0_1 = arith.constant 0 : index
    %1 = vector.load %arg6[%c0, %c0_0, %c0_1] : memref<4x18x18xf32, #tpu.memory_space<vmem>>, vector<4x18x18xf32>
    tpu.vector_store %arg6[%c0, %c0_0, %c0_1], %0 {strides = array<i32>} : memref<4x18x18xf32, #tpu.memory_space<vmem>>, vector<4x18x18xf32>,
    %c0_2 = arith.constant 0 : index
    %c0_3 = arith.constant 0 : index
    %c0_4 = arith.constant 0 : index
    %c0_5 = arith.constant 0 : index
    %2 = vector.load %arg1[%c0_2, %c0_3, %c0_4, %c0_5] : memref<1x4x16x16xf32, #tpu.memory_space<vmem>>, vector<1x1x16x16xf32>
    %3 = vector.shape_cast %2 : vector<1x1x16x16xf32> to vector<16x16xf32>
    %c0_6 = arith.constant 0 : index
    %c1 = arith.constant 1 : index
    %c1_7 = arith.constant 1 : index
    %4 = vector.load %arg6[%c0_6, %c1, %c1_7] : memref<4x18x18xf32, #tpu.memory_space<vmem>>, vector<1x16x16xf32>
    %5 = vector.shape_cast %4 : vector<1x16x16xf32> to vector<16x16xf32>
    %6 = vector.shape_cast %3 : vector<16x16xf32> to vector<1x16x16xf32>
    tpu.vector_store %arg6[%c0_6, %c1, %c1_7], %6 {strides = array<i32>} : memref<4x18x18xf32, #tpu.memory_space<vmem>>, vector<1x16x16xf32>,
    %c0_8 = arith.constant 0 : index
    %c1_9 = arith.constant 1 : index
    %c0_10 = arith.constant 0 : index
    %c0_11 = arith.constant 0 : index
    %7 = vector.load %arg1[%c0_8, %c1_9, %c0_10, %c0_11] : memref<1x4x16x16xf32, #tpu.memory_space<vmem>>, vector<1x1x16x16xf32>
    %8 = vector.shape_cast %7 : vector<1x1x16x16xf32> to vector<16x16xf32>
    %c1_12 = arith.constant 1 : index
    %c1_13 = arith.constant 1 : index
    %c1_14 = arith.constant 1 : index
    %9 = vector.load %arg6[%c1_12, %c1_13, %c1_14] : memref<4x18x18xf32, #tpu.memory_space<vmem>>, vector<1x16x16xf32>
    %10 = vector.shape_cast %9 : vector<1x16x16xf32> to vector<16x16xf32>
    %11 = vector.shape_cast %8 : vector<16x16xf32> to vector<1x16x16xf32>
    tpu.vector_store %arg6[%c1_12, %c1_13, %c1_14], %11 {strides = array<i32>} : memref<4x18x18xf32, #tpu.memory_space<vmem>>, vector<1x16x16xf32>,
    %c0_15 = arith.constant 0 : index
    %c2 = arith.constant 2 : index
    %c0_16 = arith.constant 0 : index
    %c0_17 = arith.constant 0 : index
    %12 = vector.load %arg1[%c0_15, %c2, %c0_16, %c0_17] : memref<1x4x16x16xf32, #tpu.memory_space<vmem>>, vector<1x1x16x16xf32>
    %13 = vector.shape_cast %12 : vector<1x1x16x16xf32> to vector<16x16xf32>
    %c2_18 = arith.constant 2 : index
    %c1_19 = arith.constant 1 : index
    %c1_20 = arith.constant 1 : index
    %14 = vector.load %arg6[%c2_18, %c1_19, %c1_20] : memref<4x18x18xf32, #tpu.memory_space<vmem>>, vector<1x16x16xf32>
    %15 = vector.shape_cast %14 : vector<1x16x16xf32> to vector<16x16xf32>
    %16 = vector.shape_cast %13 : vector<16x16xf32> to vector<1x16x16xf32>
    tpu.vector_store %arg6[%c2_18, %c1_19, %c1_20], %16 {strides = array<i32>} : memref<4x18x18xf32, #tpu.memory_space<vmem>>, vector<1x16x16xf32>,
    %c0_21 = arith.constant 0 : index
    %c3 = arith.constant 3 : index
    %c0_22 = arith.constant 0 : index
    %c0_23 = arith.constant 0 : index
    %17 = vector.load %arg1[%c0_21, %c3, %c0_22, %c0_23] : memref<1x4x16x16xf32, #tpu.memory_space<vmem>>, vector<1x1x16x16xf32>
    %18 = vector.shape_cast %17 : vector<1x1x16x16xf32> to vector<16x16xf32>
    %c3_24 = arith.constant 3 : index
    %c1_25 = arith.constant 1 : index
    %c1_26 = arith.constant 1 : index
    %19 = vector.load %arg6[%c3_24, %c1_25, %c1_26] : memref<4x18x18xf32, #tpu.memory_space<vmem>>, vector<1x16x16xf32>
    %20 = vector.shape_cast %19 : vector<1x16x16xf32> to vector<16x16xf32>
    %21 = vector.shape_cast %18 : vector<16x16xf32> to vector<1x16x16xf32>
    tpu.vector_store %arg6[%c3_24, %c1_25, %c1_26], %21 {strides = array<i32>} : memref<4x18x18xf32, #tpu.memory_space<vmem>>, vector<1x16x16xf32>,
    %cst_27 = arith.constant 0.000000e+00 : f32
    %22 = vector.broadcast %cst_27 : f32 to vector<16x16xf32>
    %cst_28 = arith.constant 0.000000e+00 : f32
    %23 = vector.broadcast %cst_28 : f32 to vector<16x16xf32>
    %cst_29 = arith.constant 0.000000e+00 : f32
    %24 = vector.broadcast %cst_29 : f32 to vector<16x16xf32>
    %cst_30 = arith.constant 0.000000e+00 : f32
    %25 = vector.broadcast %cst_30 : f32 to vector<16x16xf32>
    %c0_31 = arith.constant 0 : index
    %c0_32 = arith.constant 0 : index
    %c0_33 = arith.constant 0 : index
    %26 = vector.load %arg6[%c0_31, %c0_32, %c0_33] : memref<4x18x18xf32, #tpu.memory_space<vmem>>, vector<1x16x16xf32>
    %27 = vector.shape_cast %26 : vector<1x16x16xf32> to vector<16x16xf32>
    %c0_34 = arith.constant 0 : index
    %28 = memref.load %arg2[%c0_34] : memref<144xf32, #tpu.memory_space<smem>>
    %29 = vector.broadcast %28 : f32 to vector<16x16xf32>
    %30 = arith.mulf %27, %29 : vector<16x16xf32>
    %31 = arith.addf %22, %30 : vector<16x16xf32>
    %c36 = arith.constant 36 : index
    %32 = memref.load %arg2[%c36] : memref<144xf32, #tpu.memory_space<smem>>
    %33 = vector.broadcast %32 : f32 to vector<16x16xf32>
    %34 = arith.mulf %27, %33 : vector<16x16xf32>
    %35 = arith.addf %23, %34 : vector<16x16xf32>
    %c72 = arith.constant 72 : index
    %36 = memref.load %arg2[%c72] : memref<144xf32, #tpu.memory_space<smem>>
    %37 = vector.broadcast %36 : f32 to vector<16x16xf32>
    %38 = arith.mulf %27, %37 : vector<16x16xf32>
    %39 = arith.addf %24, %38 : vector<16x16xf32>
    %c108 = arith.constant 108 : index
    %40 = memref.load %arg2[%c108] : memref<144xf32, #tpu.memory_space<smem>>
    %41 = vector.broadcast %40 : f32 to vector<16x16xf32>
    %42 = arith.mulf %27, %41 : vector<16x16xf32>
    %43 = arith.addf %25, %42 : vector<16x16xf32>
    %c0_35 = arith.constant 0 : index
    %c0_36 = arith.constant 0 : index
    %c1_37 = arith.constant 1 : index
    %44 = vector.load %arg6[%c0_35, %c0_36, %c1_37] : memref<4x18x18xf32, #tpu.memory_space<vmem>>, vector<1x16x16xf32>
    %45 = vector.shape_cast %44 : vector<1x16x16xf32> to vector<16x16xf32>
    %c1_38 = arith.constant 1 : index
    %46 = memref.load %arg2[%c1_38] : memref<144xf32, #tpu.memory_space<smem>>
    %47 = vector.broadcast %46 : f32 to vector<16x16xf32>
    %48 = arith.mulf %45, %47 : vector<16x16xf32>
    %49 = arith.addf %31, %48 : vector<16x16xf32>
    %c37 = arith.constant 37 : index
    %50 = memref.load %arg2[%c37] : memref<144xf32, #tpu.memory_space<smem>>
    %51 = vector.broadcast %50 : f32 to vector<16x16xf32>
    %52 = arith.mulf %45, %51 : vector<16x16xf32>
    %53 = arith.addf %35, %52 : vector<16x16xf32>
    %c73 = arith.constant 73 : index
    %54 = memref.load %arg2[%c73] : memref<144xf32, #tpu.memory_space<smem>>
    %55 = vector.broadcast %54 : f32 to vector<16x16xf32>
    %56 = arith.mulf %45, %55 : vector<16x16xf32>
    %57 = arith.addf %39, %56 : vector<16x16xf32>
    %c109 = arith.constant 109 : index
    %58 = memref.load %arg2[%c109] : memref<144xf32, #tpu.memory_space<smem>>
    %59 = vector.broadcast %58 : f32 to vector<16x16xf32>
    %60 = arith.mulf %45, %59 : vector<16x16xf32>
    %61 = arith.addf %43, %60 : vector<16x16xf32>
    %c0_39 = arith.constant 0 : index
    %c0_40 = arith.constant 0 : index
    %c2_41 = arith.constant 2 : index
    %62 = vector.load %arg6[%c0_39, %c0_40, %c2_41] : memref<4x18x18xf32, #tpu.memory_space<vmem>>, vector<1x16x16xf32>
    %63 = vector.shape_cast %62 : vector<1x16x16xf32> to vector<16x16xf32>
    %c2_42 = arith.constant 2 : index
    %64 = memref.load %arg2[%c2_42] : memref<144xf32, #tpu.memory_space<smem>>
    %65 = vector.broadcast %64 : f32 to vector<16x16xf32>
    %66 = arith.mulf %63, %65 : vector<16x16xf32>
    %67 = arith.addf %49, %66 : vector<16x16xf32>
    %c38 = arith.constant 38 : index
    %68 = memref.load %arg2[%c38] : memref<144xf32, #tpu.memory_space<smem>>
    %69 = vector.broadcast %68 : f32 to vector<16x16xf32>
    %70 = arith.mulf %63, %69 : vector<16x16xf32>
    %71 = arith.addf %53, %70 : vector<16x16xf32>
    %c74 = arith.constant 74 : index
    %72 = memref.load %arg2[%c74] : memref<144xf32, #tpu.memory_space<smem>>
    %73 = vector.broadcast %72 : f32 to vector<16x16xf32>
    %74 = arith.mulf %63, %73 : vector<16x16xf32>
    %75 = arith.addf %57, %74 : vector<16x16xf32>
    %c110 = arith.constant 110 : index
    %76 = memref.load %arg2[%c110] : memref<144xf32, #tpu.memory_space<smem>>
    %77 = vector.broadcast %76 : f32 to vector<16x16xf32>
    %78 = arith.mulf %63, %77 : vector<16x16xf32>
    %79 = arith.addf %61, %78 : vector<16x16xf32>
    %c0_43 = arith.constant 0 : index
    %c1_44 = arith.constant 1 : index
    %c0_45 = arith.constant 0 : index
    %80 = vector.load %arg6[%c0_43, %c1_44, %c0_45] : memref<4x18x18xf32, #tpu.memory_space<vmem>>, vector<1x16x16xf32>
    %81 = vector.shape_cast %80 : vector<1x16x16xf32> to vector<16x16xf32>
    %c3_46 = arith.constant 3 : index
    %82 = memref.load %arg2[%c3_46] : memref<144xf32, #tpu.memory_space<smem>>
    %83 = vector.broadcast %82 : f32 to vector<16x16xf32>
    %84 = arith.mulf %81, %83 : vector<16x16xf32>
    %85 = arith.addf %67, %84 : vector<16x16xf32>
    %c39 = arith.constant 39 : index
    %86 = memref.load %arg2[%c39] : memref<144xf32, #tpu.memory_space<smem>>
    %87 = vector.broadcast %86 : f32 to vector<16x16xf32>
    %88 = arith.mulf %81, %87 : vector<16x16xf32>
    %89 = arith.addf %71, %88 : vector<16x16xf32>
    %c75 = arith.constant 75 : index
    %90 = memref.load %arg2[%c75] : memref<144xf32, #tpu.memory_space<smem>>
    %91 = vector.broadcast %90 : f32 to vector<16x16xf32>
    %92 = arith.mulf %81, %91 : vector<16x16xf32>
    %93 = arith.addf %75, %92 : vector<16x16xf32>
    %c111 = arith.constant 111 : index
    %94 = memref.load %arg2[%c111] : memref<144xf32, #tpu.memory_space<smem>>
    %95 = vector.broadcast %94 : f32 to vector<16x16xf32>
    %96 = arith.mulf %81, %95 : vector<16x16xf32>
    %97 = arith.addf %79, %96 : vector<16x16xf32>
    %c0_47 = arith.constant 0 : index
    %c1_48 = arith.constant 1 : index
    %c1_49 = arith.constant 1 : index
    %98 = vector.load %arg6[%c0_47, %c1_48, %c1_49] : memref<4x18x18xf32, #tpu.memory_space<vmem>>, vector<1x16x16xf32>
    %99 = vector.shape_cast %98 : vector<1x16x16xf32> to vector<16x16xf32>
    %c4 = arith.constant 4 : index
    %100 = memref.load %arg2[%c4] : memref<144xf32, #tpu.memory_space<smem>>
    %101 = vector.broadcast %100 : f32 to vector<16x16xf32>
    %102 = arith.mulf %99, %101 : vector<16x16xf32>
    %103 = arith.addf %85, %102 : vector<16x16xf32>
    %c40 = arith.constant 40 : index
    %104 = memref.load %arg2[%c40] : memref<144xf32, #tpu.memory_space<smem>>
    %105 = vector.broadcast %104 : f32 to vector<16x16xf32>
    %106 = arith.mulf %99, %105 : vector<16x16xf32>
    %107 = arith.addf %89, %106 : vector<16x16xf32>
    %c76 = arith.constant 76 : index
    %108 = memref.load %arg2[%c76] : memref<144xf32, #tpu.memory_space<smem>>
    %109 = vector.broadcast %108 : f32 to vector<16x16xf32>
    %110 = arith.mulf %99, %109 : vector<16x16xf32>
    %111 = arith.addf %93, %110 : vector<16x16xf32>
    %c112 = arith.constant 112 : index
    %112 = memref.load %arg2[%c112] : memref<144xf32, #tpu.memory_space<smem>>
    %113 = vector.broadcast %112 : f32 to vector<16x16xf32>
    %114 = arith.mulf %99, %113 : vector<16x16xf32>
    %115 = arith.addf %97, %114 : vector<16x16xf32>
    %c0_50 = arith.constant 0 : index
    %c1_51 = arith.constant 1 : index
    %c2_52 = arith.constant 2 : index
    %116 = vector.load %arg6[%c0_50, %c1_51, %c2_52] : memref<4x18x18xf32, #tpu.memory_space<vmem>>, vector<1x16x16xf32>
    %117 = vector.shape_cast %116 : vector<1x16x16xf32> to vector<16x16xf32>
    %c5 = arith.constant 5 : index
    %118 = memref.load %arg2[%c5] : memref<144xf32, #tpu.memory_space<smem>>
    %119 = vector.broadcast %118 : f32 to vector<16x16xf32>
    %120 = arith.mulf %117, %119 : vector<16x16xf32>
    %121 = arith.addf %103, %120 : vector<16x16xf32>
    %c41 = arith.constant 41 : index
    %122 = memref.load %arg2[%c41] : memref<144xf32, #tpu.memory_space<smem>>
    %123 = vector.broadcast %122 : f32 to vector<16x16xf32>
    %124 = arith.mulf %117, %123 : vector<16x16xf32>
    %125 = arith.addf %107, %124 : vector<16x16xf32>
    %c77 = arith.constant 77 : index
    %126 = memref.load %arg2[%c77] : memref<144xf32, #tpu.memory_space<smem>>
    %127 = vector.broadcast %126 : f32 to vector<16x16xf32>
    %128 = arith.mulf %117, %127 : vector<16x16xf32>
    %129 = arith.addf %111, %128 : vector<16x16xf32>
    %c113 = arith.constant 113 : index
    %130 = memref.load %arg2[%c113] : memref<144xf32, #tpu.memory_space<smem>>
    %131 = vector.broadcast %130 : f32 to vector<16x16xf32>
    %132 = arith.mulf %117, %131 : vector<16x16xf32>
    %133 = arith.addf %115, %132 : vector<16x16xf32>
    %c0_53 = arith.constant 0 : index
    %c2_54 = arith.constant 2 : index
    %c0_55 = arith.constant 0 : index
    %134 = vector.load %arg6[%c0_53, %c2_54, %c0_55] : memref<4x18x18xf32, #tpu.memory_space<vmem>>, vector<1x16x16xf32>
    %135 = vector.shape_cast %134 : vector<1x16x16xf32> to vector<16x16xf32>
    %c6 = arith.constant 6 : index
    %136 = memref.load %arg2[%c6] : memref<144xf32, #tpu.memory_space<smem>>
    %137 = vector.broadcast %136 : f32 to vector<16x16xf32>
    %138 = arith.mulf %135, %137 : vector<16x16xf32>
    %139 = arith.addf %121, %138 : vector<16x16xf32>
    %c42 = arith.constant 42 : index
    %140 = memref.load %arg2[%c42] : memref<144xf32, #tpu.memory_space<smem>>
    %141 = vector.broadcast %140 : f32 to vector<16x16xf32>
    %142 = arith.mulf %135, %141 : vector<16x16xf32>
    %143 = arith.addf %125, %142 : vector<16x16xf32>
    %c78 = arith.constant 78 : index
    %144 = memref.load %arg2[%c78] : memref<144xf32, #tpu.memory_space<smem>>
    %145 = vector.broadcast %144 : f32 to vector<16x16xf32>
    %146 = arith.mulf %135, %145 : vector<16x16xf32>
    %147 = arith.addf %129, %146 : vector<16x16xf32>
    %c114 = arith.constant 114 : index
    %148 = memref.load %arg2[%c114] : memref<144xf32, #tpu.memory_space<smem>>
    %149 = vector.broadcast %148 : f32 to vector<16x16xf32>
    %150 = arith.mulf %135, %149 : vector<16x16xf32>
    %151 = arith.addf %133, %150 : vector<16x16xf32>
    %c0_56 = arith.constant 0 : index
    %c2_57 = arith.constant 2 : index
    %c1_58 = arith.constant 1 : index
    %152 = vector.load %arg6[%c0_56, %c2_57, %c1_58] : memref<4x18x18xf32, #tpu.memory_space<vmem>>, vector<1x16x16xf32>
    %153 = vector.shape_cast %152 : vector<1x16x16xf32> to vector<16x16xf32>
    %c7 = arith.constant 7 : index
    %154 = memref.load %arg2[%c7] : memref<144xf32, #tpu.memory_space<smem>>
    %155 = vector.broadcast %154 : f32 to vector<16x16xf32>
    %156 = arith.mulf %153, %155 : vector<16x16xf32>
    %157 = arith.addf %139, %156 : vector<16x16xf32>
    %c43 = arith.constant 43 : index
    %158 = memref.load %arg2[%c43] : memref<144xf32, #tpu.memory_space<smem>>
    %159 = vector.broadcast %158 : f32 to vector<16x16xf32>
    %160 = arith.mulf %153, %159 : vector<16x16xf32>
    %161 = arith.addf %143, %160 : vector<16x16xf32>
    %c79 = arith.constant 79 : index
    %162 = memref.load %arg2[%c79] : memref<144xf32, #tpu.memory_space<smem>>
    %163 = vector.broadcast %162 : f32 to vector<16x16xf32>
    %164 = arith.mulf %153, %163 : vector<16x16xf32>
    %165 = arith.addf %147, %164 : vector<16x16xf32>
    %c115 = arith.constant 115 : index
    %166 = memref.load %arg2[%c115] : memref<144xf32, #tpu.memory_space<smem>>
    %167 = vector.broadcast %166 : f32 to vector<16x16xf32>
    %168 = arith.mulf %153, %167 : vector<16x16xf32>
    %169 = arith.addf %151, %168 : vector<16x16xf32>
    %c0_59 = arith.constant 0 : index
    %c2_60 = arith.constant 2 : index
    %c2_61 = arith.constant 2 : index
    %170 = vector.load %arg6[%c0_59, %c2_60, %c2_61] : memref<4x18x18xf32, #tpu.memory_space<vmem>>, vector<1x16x16xf32>
    %171 = vector.shape_cast %170 : vector<1x16x16xf32> to vector<16x16xf32>
    %c8 = arith.constant 8 : index
    %172 = memref.load %arg2[%c8] : memref<144xf32, #tpu.memory_space<smem>>
    %173 = vector.broadcast %172 : f32 to vector<16x16xf32>
    %174 = arith.mulf %171, %173 : vector<16x16xf32>
    %175 = arith.addf %157, %174 : vector<16x16xf32>
    %c44 = arith.constant 44 : index
    %176 = memref.load %arg2[%c44] : memref<144xf32, #tpu.memory_space<smem>>
    %177 = vector.broadcast %176 : f32 to vector<16x16xf32>
    %178 = arith.mulf %171, %177 : vector<16x16xf32>
    %179 = arith.addf %161, %178 : vector<16x16xf32>
    %c80 = arith.constant 80 : index
    %180 = memref.load %arg2[%c80] : memref<144xf32, #tpu.memory_space<smem>>
    %181 = vector.broadcast %180 : f32 to vector<16x16xf32>
    %182 = arith.mulf %171, %181 : vector<16x16xf32>
    %183 = arith.addf %165, %182 : vector<16x16xf32>
    %c116 = arith.constant 116 : index
    %184 = memref.load %arg2[%c116] : memref<144xf32, #tpu.memory_space<smem>>
    %185 = vector.broadcast %184 : f32 to vector<16x16xf32>
    %186 = arith.mulf %171, %185 : vector<16x16xf32>
    %187 = arith.addf %169, %186 : vector<16x16xf32>
    %c1_62 = arith.constant 1 : index
    %c0_63 = arith.constant 0 : index
    %c0_64 = arith.constant 0 : index
    %188 = vector.load %arg6[%c1_62, %c0_63, %c0_64] : memref<4x18x18xf32, #tpu.memory_space<vmem>>, vector<1x16x16xf32>
    %189 = vector.shape_cast %188 : vector<1x16x16xf32> to vector<16x16xf32>
    %c9 = arith.constant 9 : index
    %190 = memref.load %arg2[%c9] : memref<144xf32, #tpu.memory_space<smem>>
    %191 = vector.broadcast %190 : f32 to vector<16x16xf32>
    %192 = arith.mulf %189, %191 : vector<16x16xf32>
    %193 = arith.addf %175, %192 : vector<16x16xf32>
    %c45 = arith.constant 45 : index
    %194 = memref.load %arg2[%c45] : memref<144xf32, #tpu.memory_space<smem>>
    %195 = vector.broadcast %194 : f32 to vector<16x16xf32>
    %196 = arith.mulf %189, %195 : vector<16x16xf32>
    %197 = arith.addf %179, %196 : vector<16x16xf32>
    %c81 = arith.constant 81 : index
    %198 = memref.load %arg2[%c81] : memref<144xf32, #tpu.memory_space<smem>>
    %199 = vector.broadcast %198 : f32 to vector<16x16xf32>
    %200 = arith.mulf %189, %199 : vector<16x16xf32>
    %201 = arith.addf %183, %200 : vector<16x16xf32>
    %c117 = arith.constant 117 : index
    %202 = memref.load %arg2[%c117] : memref<144xf32, #tpu.memory_space<smem>>
    %203 = vector.broadcast %202 : f32 to vector<16x16xf32>
    %204 = arith.mulf %189, %203 : vector<16x16xf32>
    %205 = arith.addf %187, %204 : vector<16x16xf32>
    %c1_65 = arith.constant 1 : index
    %c0_66 = arith.constant 0 : index
    %c1_67 = arith.constant 1 : index
    %206 = vector.load %arg6[%c1_65, %c0_66, %c1_67] : memref<4x18x18xf32, #tpu.memory_space<vmem>>, vector<1x16x16xf32>
    %207 = vector.shape_cast %206 : vector<1x16x16xf32> to vector<16x16xf32>
    %c10 = arith.constant 10 : index
    %208 = memref.load %arg2[%c10] : memref<144xf32, #tpu.memory_space<smem>>
    %209 = vector.broadcast %208 : f32 to vector<16x16xf32>
    %210 = arith.mulf %207, %209 : vector<16x16xf32>
    %211 = arith.addf %193, %210 : vector<16x16xf32>
    %c46 = arith.constant 46 : index
    %212 = memref.load %arg2[%c46] : memref<144xf32, #tpu.memory_space<smem>>
    %213 = vector.broadcast %212 : f32 to vector<16x16xf32>
    %214 = arith.mulf %207, %213 : vector<16x16xf32>
    %215 = arith.addf %197, %214 : vector<16x16xf32>
    %c82 = arith.constant 82 : index
    %216 = memref.load %arg2[%c82] : memref<144xf32, #tpu.memory_space<smem>>
    %217 = vector.broadcast %216 : f32 to vector<16x16xf32>
    %218 = arith.mulf %207, %217 : vector<16x16xf32>
    %219 = arith.addf %201, %218 : vector<16x16xf32>
    %c118 = arith.constant 118 : index
    %220 = memref.load %arg2[%c118] : memref<144xf32, #tpu.memory_space<smem>>
    %221 = vector.broadcast %220 : f32 to vector<16x16xf32>
    %222 = arith.mulf %207, %221 : vector<16x16xf32>
    %223 = arith.addf %205, %222 : vector<16x16xf32>
    %c1_68 = arith.constant 1 : index
    %c0_69 = arith.constant 0 : index
    %c2_70 = arith.constant 2 : index
    %224 = vector.load %arg6[%c1_68, %c0_69, %c2_70] : memref<4x18x18xf32, #tpu.memory_space<vmem>>, vector<1x16x16xf32>
    %225 = vector.shape_cast %224 : vector<1x16x16xf32> to vector<16x16xf32>
    %c11 = arith.constant 11 : index
    %226 = memref.load %arg2[%c11] : memref<144xf32, #tpu.memory_space<smem>>
    %227 = vector.broadcast %226 : f32 to vector<16x16xf32>
    %228 = arith.mulf %225, %227 : vector<16x16xf32>
    %229 = arith.addf %211, %228 : vector<16x16xf32>
    %c47 = arith.constant 47 : index
    %230 = memref.load %arg2[%c47] : memref<144xf32, #tpu.memory_space<smem>>
    %231 = vector.broadcast %230 : f32 to vector<16x16xf32>
    %232 = arith.mulf %225, %231 : vector<16x16xf32>
    %233 = arith.addf %215, %232 : vector<16x16xf32>
    %c83 = arith.constant 83 : index
    %234 = memref.load %arg2[%c83] : memref<144xf32, #tpu.memory_space<smem>>
    %235 = vector.broadcast %234 : f32 to vector<16x16xf32>
    %236 = arith.mulf %225, %235 : vector<16x16xf32>
    %237 = arith.addf %219, %236 : vector<16x16xf32>
    %c119 = arith.constant 119 : index
    %238 = memref.load %arg2[%c119] : memref<144xf32, #tpu.memory_space<smem>>
    %239 = vector.broadcast %238 : f32 to vector<16x16xf32>
    %240 = arith.mulf %225, %239 : vector<16x16xf32>
    %241 = arith.addf %223, %240 : vector<16x16xf32>
    %c1_71 = arith.constant 1 : index
    %c1_72 = arith.constant 1 : index
    %c0_73 = arith.constant 0 : index
    %242 = vector.load %arg6[%c1_71, %c1_72, %c0_73] : memref<4x18x18xf32, #tpu.memory_space<vmem>>, vector<1x16x16xf32>
    %243 = vector.shape_cast %242 : vector<1x16x16xf32> to vector<16x16xf32>
    %c12 = arith.constant 12 : index
    %244 = memref.load %arg2[%c12] : memref<144xf32, #tpu.memory_space<smem>>
    %245 = vector.broadcast %244 : f32 to vector<16x16xf32>
    %246 = arith.mulf %243, %245 : vector<16x16xf32>
    %247 = arith.addf %229, %246 : vector<16x16xf32>
    %c48 = arith.constant 48 : index
    %248 = memref.load %arg2[%c48] : memref<144xf32, #tpu.memory_space<smem>>
    %249 = vector.broadcast %248 : f32 to vector<16x16xf32>
    %250 = arith.mulf %243, %249 : vector<16x16xf32>
    %251 = arith.addf %233, %250 : vector<16x16xf32>
    %c84 = arith.constant 84 : index
    %252 = memref.load %arg2[%c84] : memref<144xf32, #tpu.memory_space<smem>>
    %253 = vector.broadcast %252 : f32 to vector<16x16xf32>
    %254 = arith.mulf %243, %253 : vector<16x16xf32>
    %255 = arith.addf %237, %254 : vector<16x16xf32>
    %c120 = arith.constant 120 : index
    %256 = memref.load %arg2[%c120] : memref<144xf32, #tpu.memory_space<smem>>
    %257 = vector.broadcast %256 : f32 to vector<16x16xf32>
    %258 = arith.mulf %243, %257 : vector<16x16xf32>
    %259 = arith.addf %241, %258 : vector<16x16xf32>
    %c1_74 = arith.constant 1 : index
    %c1_75 = arith.constant 1 : index
    %c1_76 = arith.constant 1 : index
    %260 = vector.load %arg6[%c1_74, %c1_75, %c1_76] : memref<4x18x18xf32, #tpu.memory_space<vmem>>, vector<1x16x16xf32>
    %261 = vector.shape_cast %260 : vector<1x16x16xf32> to vector<16x16xf32>
    %c13 = arith.constant 13 : index
    %262 = memref.load %arg2[%c13] : memref<144xf32, #tpu.memory_space<smem>>
    %263 = vector.broadcast %262 : f32 to vector<16x16xf32>
    %264 = arith.mulf %261, %263 : vector<16x16xf32>
    %265 = arith.addf %247, %264 : vector<16x16xf32>
    %c49 = arith.constant 49 : index
    %266 = memref.load %arg2[%c49] : memref<144xf32, #tpu.memory_space<smem>>
    %267 = vector.broadcast %266 : f32 to vector<16x16xf32>
    %268 = arith.mulf %261, %267 : vector<16x16xf32>
    %269 = arith.addf %251, %268 : vector<16x16xf32>
    %c85 = arith.constant 85 : index
    %270 = memref.load %arg2[%c85] : memref<144xf32, #tpu.memory_space<smem>>
    %271 = vector.broadcast %270 : f32 to vector<16x16xf32>
    %272 = arith.mulf %261, %271 : vector<16x16xf32>
    %273 = arith.addf %255, %272 : vector<16x16xf32>
    %c121 = arith.constant 121 : index
    %274 = memref.load %arg2[%c121] : memref<144xf32, #tpu.memory_space<smem>>
    %275 = vector.broadcast %274 : f32 to vector<16x16xf32>
    %276 = arith.mulf %261, %275 : vector<16x16xf32>
    %277 = arith.addf %259, %276 : vector<16x16xf32>
    %c1_77 = arith.constant 1 : index
    %c1_78 = arith.constant 1 : index
    %c2_79 = arith.constant 2 : index
    %278 = vector.load %arg6[%c1_77, %c1_78, %c2_79] : memref<4x18x18xf32, #tpu.memory_space<vmem>>, vector<1x16x16xf32>
    %279 = vector.shape_cast %278 : vector<1x16x16xf32> to vector<16x16xf32>
    %c14 = arith.constant 14 : index
    %280 = memref.load %arg2[%c14] : memref<144xf32, #tpu.memory_space<smem>>
    %281 = vector.broadcast %280 : f32 to vector<16x16xf32>
    %282 = arith.mulf %279, %281 : vector<16x16xf32>
    %283 = arith.addf %265, %282 : vector<16x16xf32>
    %c50 = arith.constant 50 : index
    %284 = memref.load %arg2[%c50] : memref<144xf32, #tpu.memory_space<smem>>
    %285 = vector.broadcast %284 : f32 to vector<16x16xf32>
    %286 = arith.mulf %279, %285 : vector<16x16xf32>
    %287 = arith.addf %269, %286 : vector<16x16xf32>
    %c86 = arith.constant 86 : index
    %288 = memref.load %arg2[%c86] : memref<144xf32, #tpu.memory_space<smem>>
    %289 = vector.broadcast %288 : f32 to vector<16x16xf32>
    %290 = arith.mulf %279, %289 : vector<16x16xf32>
    %291 = arith.addf %273, %290 : vector<16x16xf32>
    %c122 = arith.constant 122 : index
    %292 = memref.load %arg2[%c122] : memref<144xf32, #tpu.memory_space<smem>>
    %293 = vector.broadcast %292 : f32 to vector<16x16xf32>
    %294 = arith.mulf %279, %293 : vector<16x16xf32>
    %295 = arith.addf %277, %294 : vector<16x16xf32>
    %c1_80 = arith.constant 1 : index
    %c2_81 = arith.constant 2 : index
    %c0_82 = arith.constant 0 : index
    %296 = vector.load %arg6[%c1_80, %c2_81, %c0_82] : memref<4x18x18xf32, #tpu.memory_space<vmem>>, vector<1x16x16xf32>
    %297 = vector.shape_cast %296 : vector<1x16x16xf32> to vector<16x16xf32>
    %c15 = arith.constant 15 : index
    %298 = memref.load %arg2[%c15] : memref<144xf32, #tpu.memory_space<smem>>
    %299 = vector.broadcast %298 : f32 to vector<16x16xf32>
    %300 = arith.mulf %297, %299 : vector<16x16xf32>
    %301 = arith.addf %283, %300 : vector<16x16xf32>
    %c51 = arith.constant 51 : index
    %302 = memref.load %arg2[%c51] : memref<144xf32, #tpu.memory_space<smem>>
    %303 = vector.broadcast %302 : f32 to vector<16x16xf32>
    %304 = arith.mulf %297, %303 : vector<16x16xf32>
    %305 = arith.addf %287, %304 : vector<16x16xf32>
    %c87 = arith.constant 87 : index
    %306 = memref.load %arg2[%c87] : memref<144xf32, #tpu.memory_space<smem>>
    %307 = vector.broadcast %306 : f32 to vector<16x16xf32>
    %308 = arith.mulf %297, %307 : vector<16x16xf32>
    %309 = arith.addf %291, %308 : vector<16x16xf32>
    %c123 = arith.constant 123 : index
    %310 = memref.load %arg2[%c123] : memref<144xf32, #tpu.memory_space<smem>>
    %311 = vector.broadcast %310 : f32 to vector<16x16xf32>
    %312 = arith.mulf %297, %311 : vector<16x16xf32>
    %313 = arith.addf %295, %312 : vector<16x16xf32>
    %c1_83 = arith.constant 1 : index
    %c2_84 = arith.constant 2 : index
    %c1_85 = arith.constant 1 : index
    %314 = vector.load %arg6[%c1_83, %c2_84, %c1_85] : memref<4x18x18xf32, #tpu.memory_space<vmem>>, vector<1x16x16xf32>
    %315 = vector.shape_cast %314 : vector<1x16x16xf32> to vector<16x16xf32>
    %c16 = arith.constant 16 : index
    %316 = memref.load %arg2[%c16] : memref<144xf32, #tpu.memory_space<smem>>
    %317 = vector.broadcast %316 : f32 to vector<16x16xf32>
    %318 = arith.mulf %315, %317 : vector<16x16xf32>
    %319 = arith.addf %301, %318 : vector<16x16xf32>
    %c52 = arith.constant 52 : index
    %320 = memref.load %arg2[%c52] : memref<144xf32, #tpu.memory_space<smem>>
    %321 = vector.broadcast %320 : f32 to vector<16x16xf32>
    %322 = arith.mulf %315, %321 : vector<16x16xf32>
    %323 = arith.addf %305, %322 : vector<16x16xf32>
    %c88 = arith.constant 88 : index
    %324 = memref.load %arg2[%c88] : memref<144xf32, #tpu.memory_space<smem>>
    %325 = vector.broadcast %324 : f32 to vector<16x16xf32>
    %326 = arith.mulf %315, %325 : vector<16x16xf32>
    %327 = arith.addf %309, %326 : vector<16x16xf32>
    %c124 = arith.constant 124 : index
    %328 = memref.load %arg2[%c124] : memref<144xf32, #tpu.memory_space<smem>>
    %329 = vector.broadcast %328 : f32 to vector<16x16xf32>
    %330 = arith.mulf %315, %329 : vector<16x16xf32>
    %331 = arith.addf %313, %330 : vector<16x16xf32>
    %c1_86 = arith.constant 1 : index
    %c2_87 = arith.constant 2 : index
    %c2_88 = arith.constant 2 : index
    %332 = vector.load %arg6[%c1_86, %c2_87, %c2_88] : memref<4x18x18xf32, #tpu.memory_space<vmem>>, vector<1x16x16xf32>
    %333 = vector.shape_cast %332 : vector<1x16x16xf32> to vector<16x16xf32>
    %c17 = arith.constant 17 : index
    %334 = memref.load %arg2[%c17] : memref<144xf32, #tpu.memory_space<smem>>
    %335 = vector.broadcast %334 : f32 to vector<16x16xf32>
    %336 = arith.mulf %333, %335 : vector<16x16xf32>
    %337 = arith.addf %319, %336 : vector<16x16xf32>
    %c53 = arith.constant 53 : index
    %338 = memref.load %arg2[%c53] : memref<144xf32, #tpu.memory_space<smem>>
    %339 = vector.broadcast %338 : f32 to vector<16x16xf32>
    %340 = arith.mulf %333, %339 : vector<16x16xf32>
    %341 = arith.addf %323, %340 : vector<16x16xf32>
    %c89 = arith.constant 89 : index
    %342 = memref.load %arg2[%c89] : memref<144xf32, #tpu.memory_space<smem>>
    %343 = vector.broadcast %342 : f32 to vector<16x16xf32>
    %344 = arith.mulf %333, %343 : vector<16x16xf32>
    %345 = arith.addf %327, %344 : vector<16x16xf32>
    %c125 = arith.constant 125 : index
    %346 = memref.load %arg2[%c125] : memref<144xf32, #tpu.memory_space<smem>>
    %347 = vector.broadcast %346 : f32 to vector<16x16xf32>
    %348 = arith.mulf %333, %347 : vector<16x16xf32>
    %349 = arith.addf %331, %348 : vector<16x16xf32>
    %c2_89 = arith.constant 2 : index
    %c0_90 = arith.constant 0 : index
    %c0_91 = arith.constant 0 : index
    %350 = vector.load %arg6[%c2_89, %c0_90, %c0_91] : memref<4x18x18xf32, #tpu.memory_space<vmem>>, vector<1x16x16xf32>
    %351 = vector.shape_cast %350 : vector<1x16x16xf32> to vector<16x16xf32>
    %c18 = arith.constant 18 : index
    %352 = memref.load %arg2[%c18] : memref<144xf32, #tpu.memory_space<smem>>
    %353 = vector.broadcast %352 : f32 to vector<16x16xf32>
    %354 = arith.mulf %351, %353 : vector<16x16xf32>
    %355 = arith.addf %337, %354 : vector<16x16xf32>
    %c54 = arith.constant 54 : index
    %356 = memref.load %arg2[%c54] : memref<144xf32, #tpu.memory_space<smem>>
    %357 = vector.broadcast %356 : f32 to vector<16x16xf32>
    %358 = arith.mulf %351, %357 : vector<16x16xf32>
    %359 = arith.addf %341, %358 : vector<16x16xf32>
    %c90 = arith.constant 90 : index
    %360 = memref.load %arg2[%c90] : memref<144xf32, #tpu.memory_space<smem>>
    %361 = vector.broadcast %360 : f32 to vector<16x16xf32>
    %362 = arith.mulf %351, %361 : vector<16x16xf32>
    %363 = arith.addf %345, %362 : vector<16x16xf32>
    %c126 = arith.constant 126 : index
    %364 = memref.load %arg2[%c126] : memref<144xf32, #tpu.memory_space<smem>>
    %365 = vector.broadcast %364 : f32 to vector<16x16xf32>
    %366 = arith.mulf %351, %365 : vector<16x16xf32>
    %367 = arith.addf %349, %366 : vector<16x16xf32>
    %c2_92 = arith.constant 2 : index
    %c0_93 = arith.constant 0 : index
    %c1_94 = arith.constant 1 : index
    %368 = vector.load %arg6[%c2_92, %c0_93, %c1_94] : memref<4x18x18xf32, #tpu.memory_space<vmem>>, vector<1x16x16xf32>
    %369 = vector.shape_cast %368 : vector<1x16x16xf32> to vector<16x16xf32>
    %c19 = arith.constant 19 : index
    %370 = memref.load %arg2[%c19] : memref<144xf32, #tpu.memory_space<smem>>
    %371 = vector.broadcast %370 : f32 to vector<16x16xf32>
    %372 = arith.mulf %369, %371 : vector<16x16xf32>
    %373 = arith.addf %355, %372 : vector<16x16xf32>
    %c55 = arith.constant 55 : index
    %374 = memref.load %arg2[%c55] : memref<144xf32, #tpu.memory_space<smem>>
    %375 = vector.broadcast %374 : f32 to vector<16x16xf32>
    %376 = arith.mulf %369, %375 : vector<16x16xf32>
    %377 = arith.addf %359, %376 : vector<16x16xf32>
    %c91 = arith.constant 91 : index
    %378 = memref.load %arg2[%c91] : memref<144xf32, #tpu.memory_space<smem>>
    %379 = vector.broadcast %378 : f32 to vector<16x16xf32>
    %380 = arith.mulf %369, %379 : vector<16x16xf32>
    %381 = arith.addf %363, %380 : vector<16x16xf32>
    %c127 = arith.constant 127 : index
    %382 = memref.load %arg2[%c127] : memref<144xf32, #tpu.memory_space<smem>>
    %383 = vector.broadcast %382 : f32 to vector<16x16xf32>
    %384 = arith.mulf %369, %383 : vector<16x16xf32>
    %385 = arith.addf %367, %384 : vector<16x16xf32>
    %c2_95 = arith.constant 2 : index
    %c0_96 = arith.constant 0 : index
    %c2_97 = arith.constant 2 : index
    %386 = vector.load %arg6[%c2_95, %c0_96, %c2_97] : memref<4x18x18xf32, #tpu.memory_space<vmem>>, vector<1x16x16xf32>
    %387 = vector.shape_cast %386 : vector<1x16x16xf32> to vector<16x16xf32>
    %c20 = arith.constant 20 : index
    %388 = memref.load %arg2[%c20] : memref<144xf32, #tpu.memory_space<smem>>
    %389 = vector.broadcast %388 : f32 to vector<16x16xf32>
    %390 = arith.mulf %387, %389 : vector<16x16xf32>
    %391 = arith.addf %373, %390 : vector<16x16xf32>
    %c56 = arith.constant 56 : index
    %392 = memref.load %arg2[%c56] : memref<144xf32, #tpu.memory_space<smem>>
    %393 = vector.broadcast %392 : f32 to vector<16x16xf32>
    %394 = arith.mulf %387, %393 : vector<16x16xf32>
    %395 = arith.addf %377, %394 : vector<16x16xf32>
    %c92 = arith.constant 92 : index
    %396 = memref.load %arg2[%c92] : memref<144xf32, #tpu.memory_space<smem>>
    %397 = vector.broadcast %396 : f32 to vector<16x16xf32>
    %398 = arith.mulf %387, %397 : vector<16x16xf32>
    %399 = arith.addf %381, %398 : vector<16x16xf32>
    %c128 = arith.constant 128 : index
    %400 = memref.load %arg2[%c128] : memref<144xf32, #tpu.memory_space<smem>>
    %401 = vector.broadcast %400 : f32 to vector<16x16xf32>
    %402 = arith.mulf %387, %401 : vector<16x16xf32>
    %403 = arith.addf %385, %402 : vector<16x16xf32>
    %c2_98 = arith.constant 2 : index
    %c1_99 = arith.constant 1 : index
    %c0_100 = arith.constant 0 : index
    %404 = vector.load %arg6[%c2_98, %c1_99, %c0_100] : memref<4x18x18xf32, #tpu.memory_space<vmem>>, vector<1x16x16xf32>
    %405 = vector.shape_cast %404 : vector<1x16x16xf32> to vector<16x16xf32>
    %c21 = arith.constant 21 : index
    %406 = memref.load %arg2[%c21] : memref<144xf32, #tpu.memory_space<smem>>
    %407 = vector.broadcast %406 : f32 to vector<16x16xf32>
    %408 = arith.mulf %405, %407 : vector<16x16xf32>
    %409 = arith.addf %391, %408 : vector<16x16xf32>
    %c57 = arith.constant 57 : index
    %410 = memref.load %arg2[%c57] : memref<144xf32, #tpu.memory_space<smem>>
    %411 = vector.broadcast %410 : f32 to vector<16x16xf32>
    %412 = arith.mulf %405, %411 : vector<16x16xf32>
    %413 = arith.addf %395, %412 : vector<16x16xf32>
    %c93 = arith.constant 93 : index
    %414 = memref.load %arg2[%c93] : memref<144xf32, #tpu.memory_space<smem>>
    %415 = vector.broadcast %414 : f32 to vector<16x16xf32>
    %416 = arith.mulf %405, %415 : vector<16x16xf32>
    %417 = arith.addf %399, %416 : vector<16x16xf32>
    %c129 = arith.constant 129 : index
    %418 = memref.load %arg2[%c129] : memref<144xf32, #tpu.memory_space<smem>>
    %419 = vector.broadcast %418 : f32 to vector<16x16xf32>
    %420 = arith.mulf %405, %419 : vector<16x16xf32>
    %421 = arith.addf %403, %420 : vector<16x16xf32>
    %c2_101 = arith.constant 2 : index
    %c1_102 = arith.constant 1 : index
    %c1_103 = arith.constant 1 : index
    %422 = vector.load %arg6[%c2_101, %c1_102, %c1_103] : memref<4x18x18xf32, #tpu.memory_space<vmem>>, vector<1x16x16xf32>
    %423 = vector.shape_cast %422 : vector<1x16x16xf32> to vector<16x16xf32>
    %c22 = arith.constant 22 : index
    %424 = memref.load %arg2[%c22] : memref<144xf32, #tpu.memory_space<smem>>
    %425 = vector.broadcast %424 : f32 to vector<16x16xf32>
    %426 = arith.mulf %423, %425 : vector<16x16xf32>
    %427 = arith.addf %409, %426 : vector<16x16xf32>
    %c58 = arith.constant 58 : index
    %428 = memref.load %arg2[%c58] : memref<144xf32, #tpu.memory_space<smem>>
    %429 = vector.broadcast %428 : f32 to vector<16x16xf32>
    %430 = arith.mulf %423, %429 : vector<16x16xf32>
    %431 = arith.addf %413, %430 : vector<16x16xf32>
    %c94 = arith.constant 94 : index
    %432 = memref.load %arg2[%c94] : memref<144xf32, #tpu.memory_space<smem>>
    %433 = vector.broadcast %432 : f32 to vector<16x16xf32>
    %434 = arith.mulf %423, %433 : vector<16x16xf32>
    %435 = arith.addf %417, %434 : vector<16x16xf32>
    %c130 = arith.constant 130 : index
    %436 = memref.load %arg2[%c130] : memref<144xf32, #tpu.memory_space<smem>>
    %437 = vector.broadcast %436 : f32 to vector<16x16xf32>
    %438 = arith.mulf %423, %437 : vector<16x16xf32>
    %439 = arith.addf %421, %438 : vector<16x16xf32>
    %c2_104 = arith.constant 2 : index
    %c1_105 = arith.constant 1 : index
    %c2_106 = arith.constant 2 : index
    %440 = vector.load %arg6[%c2_104, %c1_105, %c2_106] : memref<4x18x18xf32, #tpu.memory_space<vmem>>, vector<1x16x16xf32>
    %441 = vector.shape_cast %440 : vector<1x16x16xf32> to vector<16x16xf32>
    %c23 = arith.constant 23 : index
    %442 = memref.load %arg2[%c23] : memref<144xf32, #tpu.memory_space<smem>>
    %443 = vector.broadcast %442 : f32 to vector<16x16xf32>
    %444 = arith.mulf %441, %443 : vector<16x16xf32>
    %445 = arith.addf %427, %444 : vector<16x16xf32>
    %c59 = arith.constant 59 : index
    %446 = memref.load %arg2[%c59] : memref<144xf32, #tpu.memory_space<smem>>
    %447 = vector.broadcast %446 : f32 to vector<16x16xf32>
    %448 = arith.mulf %441, %447 : vector<16x16xf32>
    %449 = arith.addf %431, %448 : vector<16x16xf32>
    %c95 = arith.constant 95 : index
    %450 = memref.load %arg2[%c95] : memref<144xf32, #tpu.memory_space<smem>>
    %451 = vector.broadcast %450 : f32 to vector<16x16xf32>
    %452 = arith.mulf %441, %451 : vector<16x16xf32>
    %453 = arith.addf %435, %452 : vector<16x16xf32>
    %c131 = arith.constant 131 : index
    %454 = memref.load %arg2[%c131] : memref<144xf32, #tpu.memory_space<smem>>
    %455 = vector.broadcast %454 : f32 to vector<16x16xf32>
    %456 = arith.mulf %441, %455 : vector<16x16xf32>
    %457 = arith.addf %439, %456 : vector<16x16xf32>
    %c2_107 = arith.constant 2 : index
    %c2_108 = arith.constant 2 : index
    %c0_109 = arith.constant 0 : index
    %458 = vector.load %arg6[%c2_107, %c2_108, %c0_109] : memref<4x18x18xf32, #tpu.memory_space<vmem>>, vector<1x16x16xf32>
    %459 = vector.shape_cast %458 : vector<1x16x16xf32> to vector<16x16xf32>
    %c24 = arith.constant 24 : index
    %460 = memref.load %arg2[%c24] : memref<144xf32, #tpu.memory_space<smem>>
    %461 = vector.broadcast %460 : f32 to vector<16x16xf32>
    %462 = arith.mulf %459, %461 : vector<16x16xf32>
    %463 = arith.addf %445, %462 : vector<16x16xf32>
    %c60 = arith.constant 60 : index
    %464 = memref.load %arg2[%c60] : memref<144xf32, #tpu.memory_space<smem>>
    %465 = vector.broadcast %464 : f32 to vector<16x16xf32>
    %466 = arith.mulf %459, %465 : vector<16x16xf32>
    %467 = arith.addf %449, %466 : vector<16x16xf32>
    %c96 = arith.constant 96 : index
    %468 = memref.load %arg2[%c96] : memref<144xf32, #tpu.memory_space<smem>>
    %469 = vector.broadcast %468 : f32 to vector<16x16xf32>
    %470 = arith.mulf %459, %469 : vector<16x16xf32>
    %471 = arith.addf %453, %470 : vector<16x16xf32>
    %c132 = arith.constant 132 : index
    %472 = memref.load %arg2[%c132] : memref<144xf32, #tpu.memory_space<smem>>
    %473 = vector.broadcast %472 : f32 to vector<16x16xf32>
    %474 = arith.mulf %459, %473 : vector<16x16xf32>
    %475 = arith.addf %457, %474 : vector<16x16xf32>
    %c2_110 = arith.constant 2 : index
    %c2_111 = arith.constant 2 : index
    %c1_112 = arith.constant 1 : index
    %476 = vector.load %arg6[%c2_110, %c2_111, %c1_112] : memref<4x18x18xf32, #tpu.memory_space<vmem>>, vector<1x16x16xf32>
    %477 = vector.shape_cast %476 : vector<1x16x16xf32> to vector<16x16xf32>
    %c25 = arith.constant 25 : index
    %478 = memref.load %arg2[%c25] : memref<144xf32, #tpu.memory_space<smem>>
    %479 = vector.broadcast %478 : f32 to vector<16x16xf32>
    %480 = arith.mulf %477, %479 : vector<16x16xf32>
    %481 = arith.addf %463, %480 : vector<16x16xf32>
    %c61 = arith.constant 61 : index
    %482 = memref.load %arg2[%c61] : memref<144xf32, #tpu.memory_space<smem>>
    %483 = vector.broadcast %482 : f32 to vector<16x16xf32>
    %484 = arith.mulf %477, %483 : vector<16x16xf32>
    %485 = arith.addf %467, %484 : vector<16x16xf32>
    %c97 = arith.constant 97 : index
    %486 = memref.load %arg2[%c97] : memref<144xf32, #tpu.memory_space<smem>>
    %487 = vector.broadcast %486 : f32 to vector<16x16xf32>
    %488 = arith.mulf %477, %487 : vector<16x16xf32>
    %489 = arith.addf %471, %488 : vector<16x16xf32>
    %c133 = arith.constant 133 : index
    %490 = memref.load %arg2[%c133] : memref<144xf32, #tpu.memory_space<smem>>
    %491 = vector.broadcast %490 : f32 to vector<16x16xf32>
    %492 = arith.mulf %477, %491 : vector<16x16xf32>
    %493 = arith.addf %475, %492 : vector<16x16xf32>
    %c2_113 = arith.constant 2 : index
    %c2_114 = arith.constant 2 : index
    %c2_115 = arith.constant 2 : index
    %494 = vector.load %arg6[%c2_113, %c2_114, %c2_115] : memref<4x18x18xf32, #tpu.memory_space<vmem>>, vector<1x16x16xf32>
    %495 = vector.shape_cast %494 : vector<1x16x16xf32> to vector<16x16xf32>
    %c26 = arith.constant 26 : index
    %496 = memref.load %arg2[%c26] : memref<144xf32, #tpu.memory_space<smem>>
    %497 = vector.broadcast %496 : f32 to vector<16x16xf32>
    %498 = arith.mulf %495, %497 : vector<16x16xf32>
    %499 = arith.addf %481, %498 : vector<16x16xf32>
    %c62 = arith.constant 62 : index
    %500 = memref.load %arg2[%c62] : memref<144xf32, #tpu.memory_space<smem>>
    %501 = vector.broadcast %500 : f32 to vector<16x16xf32>
    %502 = arith.mulf %495, %501 : vector<16x16xf32>
    %503 = arith.addf %485, %502 : vector<16x16xf32>
    %c98 = arith.constant 98 : index
    %504 = memref.load %arg2[%c98] : memref<144xf32, #tpu.memory_space<smem>>
    %505 = vector.broadcast %504 : f32 to vector<16x16xf32>
    %506 = arith.mulf %495, %505 : vector<16x16xf32>
    %507 = arith.addf %489, %506 : vector<16x16xf32>
    %c134 = arith.constant 134 : index
    %508 = memref.load %arg2[%c134] : memref<144xf32, #tpu.memory_space<smem>>
    %509 = vector.broadcast %508 : f32 to vector<16x16xf32>
    %510 = arith.mulf %495, %509 : vector<16x16xf32>
    %511 = arith.addf %493, %510 : vector<16x16xf32>
    %c3_116 = arith.constant 3 : index
    %c0_117 = arith.constant 0 : index
    %c0_118 = arith.constant 0 : index
    %512 = vector.load %arg6[%c3_116, %c0_117, %c0_118] : memref<4x18x18xf32, #tpu.memory_space<vmem>>, vector<1x16x16xf32>
    %513 = vector.shape_cast %512 : vector<1x16x16xf32> to vector<16x16xf32>
    %c27 = arith.constant 27 : index
    %514 = memref.load %arg2[%c27] : memref<144xf32, #tpu.memory_space<smem>>
    %515 = vector.broadcast %514 : f32 to vector<16x16xf32>
    %516 = arith.mulf %513, %515 : vector<16x16xf32>
    %517 = arith.addf %499, %516 : vector<16x16xf32>
    %c63 = arith.constant 63 : index
    %518 = memref.load %arg2[%c63] : memref<144xf32, #tpu.memory_space<smem>>
    %519 = vector.broadcast %518 : f32 to vector<16x16xf32>
    %520 = arith.mulf %513, %519 : vector<16x16xf32>
    %521 = arith.addf %503, %520 : vector<16x16xf32>
    %c99 = arith.constant 99 : index
    %522 = memref.load %arg2[%c99] : memref<144xf32, #tpu.memory_space<smem>>
    %523 = vector.broadcast %522 : f32 to vector<16x16xf32>
    %524 = arith.mulf %513, %523 : vector<16x16xf32>
    %525 = arith.addf %507, %524 : vector<16x16xf32>
    %c135 = arith.constant 135 : index
    %526 = memref.load %arg2[%c135] : memref<144xf32, #tpu.memory_space<smem>>
    %527 = vector.broadcast %526 : f32 to vector<16x16xf32>
    %528 = arith.mulf %513, %527 : vector<16x16xf32>
    %529 = arith.addf %511, %528 : vector<16x16xf32>
    %c3_119 = arith.constant 3 : index
    %c0_120 = arith.constant 0 : index
    %c1_121 = arith.constant 1 : index
    %530 = vector.load %arg6[%c3_119, %c0_120, %c1_121] : memref<4x18x18xf32, #tpu.memory_space<vmem>>, vector<1x16x16xf32>
    %531 = vector.shape_cast %530 : vector<1x16x16xf32> to vector<16x16xf32>
    %c28 = arith.constant 28 : index
    %532 = memref.load %arg2[%c28] : memref<144xf32, #tpu.memory_space<smem>>
    %533 = vector.broadcast %532 : f32 to vector<16x16xf32>
    %534 = arith.mulf %531, %533 : vector<16x16xf32>
    %535 = arith.addf %517, %534 : vector<16x16xf32>
    %c64 = arith.constant 64 : index
    %536 = memref.load %arg2[%c64] : memref<144xf32, #tpu.memory_space<smem>>
    %537 = vector.broadcast %536 : f32 to vector<16x16xf32>
    %538 = arith.mulf %531, %537 : vector<16x16xf32>
    %539 = arith.addf %521, %538 : vector<16x16xf32>
    %c100 = arith.constant 100 : index
    %540 = memref.load %arg2[%c100] : memref<144xf32, #tpu.memory_space<smem>>
    %541 = vector.broadcast %540 : f32 to vector<16x16xf32>
    %542 = arith.mulf %531, %541 : vector<16x16xf32>
    %543 = arith.addf %525, %542 : vector<16x16xf32>
    %c136 = arith.constant 136 : index
    %544 = memref.load %arg2[%c136] : memref<144xf32, #tpu.memory_space<smem>>
    %545 = vector.broadcast %544 : f32 to vector<16x16xf32>
    %546 = arith.mulf %531, %545 : vector<16x16xf32>
    %547 = arith.addf %529, %546 : vector<16x16xf32>
    %c3_122 = arith.constant 3 : index
    %c0_123 = arith.constant 0 : index
    %c2_124 = arith.constant 2 : index
    %548 = vector.load %arg6[%c3_122, %c0_123, %c2_124] : memref<4x18x18xf32, #tpu.memory_space<vmem>>, vector<1x16x16xf32>
    %549 = vector.shape_cast %548 : vector<1x16x16xf32> to vector<16x16xf32>
    %c29 = arith.constant 29 : index
    %550 = memref.load %arg2[%c29] : memref<144xf32, #tpu.memory_space<smem>>
    %551 = vector.broadcast %550 : f32 to vector<16x16xf32>
    %552 = arith.mulf %549, %551 : vector<16x16xf32>
    %553 = arith.addf %535, %552 : vector<16x16xf32>
    %c65 = arith.constant 65 : index
    %554 = memref.load %arg2[%c65] : memref<144xf32, #tpu.memory_space<smem>>
    %555 = vector.broadcast %554 : f32 to vector<16x16xf32>
    %556 = arith.mulf %549, %555 : vector<16x16xf32>
    %557 = arith.addf %539, %556 : vector<16x16xf32>
    %c101 = arith.constant 101 : index
    %558 = memref.load %arg2[%c101] : memref<144xf32, #tpu.memory_space<smem>>
    %559 = vector.broadcast %558 : f32 to vector<16x16xf32>
    %560 = arith.mulf %549, %559 : vector<16x16xf32>
    %561 = arith.addf %543, %560 : vector<16x16xf32>
    %c137 = arith.constant 137 : index
    %562 = memref.load %arg2[%c137] : memref<144xf32, #tpu.memory_space<smem>>
    %563 = vector.broadcast %562 : f32 to vector<16x16xf32>
    %564 = arith.mulf %549, %563 : vector<16x16xf32>
    %565 = arith.addf %547, %564 : vector<16x16xf32>
    %c3_125 = arith.constant 3 : index
    %c1_126 = arith.constant 1 : index
    %c0_127 = arith.constant 0 : index
    %566 = vector.load %arg6[%c3_125, %c1_126, %c0_127] : memref<4x18x18xf32, #tpu.memory_space<vmem>>, vector<1x16x16xf32>
    %567 = vector.shape_cast %566 : vector<1x16x16xf32> to vector<16x16xf32>
    %c30 = arith.constant 30 : index
    %568 = memref.load %arg2[%c30] : memref<144xf32, #tpu.memory_space<smem>>
    %569 = vector.broadcast %568 : f32 to vector<16x16xf32>
    %570 = arith.mulf %567, %569 : vector<16x16xf32>
    %571 = arith.addf %553, %570 : vector<16x16xf32>
    %c66 = arith.constant 66 : index
    %572 = memref.load %arg2[%c66] : memref<144xf32, #tpu.memory_space<smem>>
    %573 = vector.broadcast %572 : f32 to vector<16x16xf32>
    %574 = arith.mulf %567, %573 : vector<16x16xf32>
    %575 = arith.addf %557, %574 : vector<16x16xf32>
    %c102 = arith.constant 102 : index
    %576 = memref.load %arg2[%c102] : memref<144xf32, #tpu.memory_space<smem>>
    %577 = vector.broadcast %576 : f32 to vector<16x16xf32>
    %578 = arith.mulf %567, %577 : vector<16x16xf32>
    %579 = arith.addf %561, %578 : vector<16x16xf32>
    %c138 = arith.constant 138 : index
    %580 = memref.load %arg2[%c138] : memref<144xf32, #tpu.memory_space<smem>>
    %581 = vector.broadcast %580 : f32 to vector<16x16xf32>
    %582 = arith.mulf %567, %581 : vector<16x16xf32>
    %583 = arith.addf %565, %582 : vector<16x16xf32>
    %c3_128 = arith.constant 3 : index
    %c1_129 = arith.constant 1 : index
    %c1_130 = arith.constant 1 : index
    %584 = vector.load %arg6[%c3_128, %c1_129, %c1_130] : memref<4x18x18xf32, #tpu.memory_space<vmem>>, vector<1x16x16xf32>
    %585 = vector.shape_cast %584 : vector<1x16x16xf32> to vector<16x16xf32>
    %c31 = arith.constant 31 : index
    %586 = memref.load %arg2[%c31] : memref<144xf32, #tpu.memory_space<smem>>
    %587 = vector.broadcast %586 : f32 to vector<16x16xf32>
    %588 = arith.mulf %585, %587 : vector<16x16xf32>
    %589 = arith.addf %571, %588 : vector<16x16xf32>
    %c67 = arith.constant 67 : index
    %590 = memref.load %arg2[%c67] : memref<144xf32, #tpu.memory_space<smem>>
    %591 = vector.broadcast %590 : f32 to vector<16x16xf32>
    %592 = arith.mulf %585, %591 : vector<16x16xf32>
    %593 = arith.addf %575, %592 : vector<16x16xf32>
    %c103 = arith.constant 103 : index
    %594 = memref.load %arg2[%c103] : memref<144xf32, #tpu.memory_space<smem>>
    %595 = vector.broadcast %594 : f32 to vector<16x16xf32>
    %596 = arith.mulf %585, %595 : vector<16x16xf32>
    %597 = arith.addf %579, %596 : vector<16x16xf32>
    %c139 = arith.constant 139 : index
    %598 = memref.load %arg2[%c139] : memref<144xf32, #tpu.memory_space<smem>>
    %599 = vector.broadcast %598 : f32 to vector<16x16xf32>
    %600 = arith.mulf %585, %599 : vector<16x16xf32>
    %601 = arith.addf %583, %600 : vector<16x16xf32>
    %c3_131 = arith.constant 3 : index
    %c1_132 = arith.constant 1 : index
    %c2_133 = arith.constant 2 : index
    %602 = vector.load %arg6[%c3_131, %c1_132, %c2_133] : memref<4x18x18xf32, #tpu.memory_space<vmem>>, vector<1x16x16xf32>
    %603 = vector.shape_cast %602 : vector<1x16x16xf32> to vector<16x16xf32>
    %c32 = arith.constant 32 : index
    %604 = memref.load %arg2[%c32] : memref<144xf32, #tpu.memory_space<smem>>
    %605 = vector.broadcast %604 : f32 to vector<16x16xf32>
    %606 = arith.mulf %603, %605 : vector<16x16xf32>
    %607 = arith.addf %589, %606 : vector<16x16xf32>
    %c68 = arith.constant 68 : index
    %608 = memref.load %arg2[%c68] : memref<144xf32, #tpu.memory_space<smem>>
    %609 = vector.broadcast %608 : f32 to vector<16x16xf32>
    %610 = arith.mulf %603, %609 : vector<16x16xf32>
    %611 = arith.addf %593, %610 : vector<16x16xf32>
    %c104 = arith.constant 104 : index
    %612 = memref.load %arg2[%c104] : memref<144xf32, #tpu.memory_space<smem>>
    %613 = vector.broadcast %612 : f32 to vector<16x16xf32>
    %614 = arith.mulf %603, %613 : vector<16x16xf32>
    %615 = arith.addf %597, %614 : vector<16x16xf32>
    %c140 = arith.constant 140 : index
    %616 = memref.load %arg2[%c140] : memref<144xf32, #tpu.memory_space<smem>>
    %617 = vector.broadcast %616 : f32 to vector<16x16xf32>
    %618 = arith.mulf %603, %617 : vector<16x16xf32>
    %619 = arith.addf %601, %618 : vector<16x16xf32>
    %c3_134 = arith.constant 3 : index
    %c2_135 = arith.constant 2 : index
    %c0_136 = arith.constant 0 : index
    %620 = vector.load %arg6[%c3_134, %c2_135, %c0_136] : memref<4x18x18xf32, #tpu.memory_space<vmem>>, vector<1x16x16xf32>
    %621 = vector.shape_cast %620 : vector<1x16x16xf32> to vector<16x16xf32>
    %c33 = arith.constant 33 : index
    %622 = memref.load %arg2[%c33] : memref<144xf32, #tpu.memory_space<smem>>
    %623 = vector.broadcast %622 : f32 to vector<16x16xf32>
    %624 = arith.mulf %621, %623 : vector<16x16xf32>
    %625 = arith.addf %607, %624 : vector<16x16xf32>
    %c69 = arith.constant 69 : index
    %626 = memref.load %arg2[%c69] : memref<144xf32, #tpu.memory_space<smem>>
    %627 = vector.broadcast %626 : f32 to vector<16x16xf32>
    %628 = arith.mulf %621, %627 : vector<16x16xf32>
    %629 = arith.addf %611, %628 : vector<16x16xf32>
    %c105 = arith.constant 105 : index
    %630 = memref.load %arg2[%c105] : memref<144xf32, #tpu.memory_space<smem>>
    %631 = vector.broadcast %630 : f32 to vector<16x16xf32>
    %632 = arith.mulf %621, %631 : vector<16x16xf32>
    %633 = arith.addf %615, %632 : vector<16x16xf32>
    %c141 = arith.constant 141 : index
    %634 = memref.load %arg2[%c141] : memref<144xf32, #tpu.memory_space<smem>>
    %635 = vector.broadcast %634 : f32 to vector<16x16xf32>
    %636 = arith.mulf %621, %635 : vector<16x16xf32>
    %637 = arith.addf %619, %636 : vector<16x16xf32>
    %c3_137 = arith.constant 3 : index
    %c2_138 = arith.constant 2 : index
    %c1_139 = arith.constant 1 : index
    %638 = vector.load %arg6[%c3_137, %c2_138, %c1_139] : memref<4x18x18xf32, #tpu.memory_space<vmem>>, vector<1x16x16xf32>
    %639 = vector.shape_cast %638 : vector<1x16x16xf32> to vector<16x16xf32>
    %c34 = arith.constant 34 : index
    %640 = memref.load %arg2[%c34] : memref<144xf32, #tpu.memory_space<smem>>
    %641 = vector.broadcast %640 : f32 to vector<16x16xf32>
    %642 = arith.mulf %639, %641 : vector<16x16xf32>
    %643 = arith.addf %625, %642 : vector<16x16xf32>
    %c70 = arith.constant 70 : index
    %644 = memref.load %arg2[%c70] : memref<144xf32, #tpu.memory_space<smem>>
    %645 = vector.broadcast %644 : f32 to vector<16x16xf32>
    %646 = arith.mulf %639, %645 : vector<16x16xf32>
    %647 = arith.addf %629, %646 : vector<16x16xf32>
    %c106 = arith.constant 106 : index
    %648 = memref.load %arg2[%c106] : memref<144xf32, #tpu.memory_space<smem>>
    %649 = vector.broadcast %648 : f32 to vector<16x16xf32>
    %650 = arith.mulf %639, %649 : vector<16x16xf32>
    %651 = arith.addf %633, %650 : vector<16x16xf32>
    %c142 = arith.constant 142 : index
    %652 = memref.load %arg2[%c142] : memref<144xf32, #tpu.memory_space<smem>>
    %653 = vector.broadcast %652 : f32 to vector<16x16xf32>
    %654 = arith.mulf %639, %653 : vector<16x16xf32>
    %655 = arith.addf %637, %654 : vector<16x16xf32>
    %c3_140 = arith.constant 3 : index
    %c2_141 = arith.constant 2 : index
    %c2_142 = arith.constant 2 : index
    %656 = vector.load %arg6[%c3_140, %c2_141, %c2_142] : memref<4x18x18xf32, #tpu.memory_space<vmem>>, vector<1x16x16xf32>
    %657 = vector.shape_cast %656 : vector<1x16x16xf32> to vector<16x16xf32>
    %c35 = arith.constant 35 : index
    %658 = memref.load %arg2[%c35] : memref<144xf32, #tpu.memory_space<smem>>
    %659 = vector.broadcast %658 : f32 to vector<16x16xf32>
    %660 = arith.mulf %657, %659 : vector<16x16xf32>
    %661 = arith.addf %643, %660 : vector<16x16xf32>
    %c71 = arith.constant 71 : index
    %662 = memref.load %arg2[%c71] : memref<144xf32, #tpu.memory_space<smem>>
    %663 = vector.broadcast %662 : f32 to vector<16x16xf32>
    %664 = arith.mulf %657, %663 : vector<16x16xf32>
    %665 = arith.addf %647, %664 : vector<16x16xf32>
    %c107 = arith.constant 107 : index
    %666 = memref.load %arg2[%c107] : memref<144xf32, #tpu.memory_space<smem>>
    %667 = vector.broadcast %666 : f32 to vector<16x16xf32>
    %668 = arith.mulf %657, %667 : vector<16x16xf32>
    %669 = arith.addf %651, %668 : vector<16x16xf32>
    %c143 = arith.constant 143 : index
    %670 = memref.load %arg2[%c143] : memref<144xf32, #tpu.memory_space<smem>>
    %671 = vector.broadcast %670 : f32 to vector<16x16xf32>
    %672 = arith.mulf %657, %671 : vector<16x16xf32>
    %673 = arith.addf %655, %672 : vector<16x16xf32>
    %c0_143 = arith.constant 0 : index
    %674 = memref.load %arg3[%c0_143] : memref<4xf32, #tpu.memory_space<smem>>
    %675 = vector.broadcast %674 : f32 to vector<16x16xf32>
    %676 = arith.addf %661, %675 : vector<16x16xf32>
    %c0_144 = arith.constant 0 : index
    %c0_145 = arith.constant 0 : index
    %c0_146 = arith.constant 0 : index
    %c0_147 = arith.constant 0 : index
    %677 = vector.load %arg4[%c0_144, %c0_145, %c0_146, %c0_147] : memref<1x4x16x16xf32, #tpu.memory_space<vmem>>, vector<1x1x16x16xf32>
    %678 = vector.shape_cast %677 : vector<1x1x16x16xf32> to vector<16x16xf32>
    %679 = vector.shape_cast %676 : vector<16x16xf32> to vector<1x1x16x16xf32>
    tpu.vector_store %arg4[%c0_144, %c0_145, %c0_146, %c0_147], %679 {strides = array<i32>} : memref<1x4x16x16xf32, #tpu.memory_space<vmem>>, vector<1x1x16x16xf32>,
    %cst_148 = arith.constant dense<0.000000e+00> : vector<16xf32>
    %680 = vector.multi_reduction <add>, %661, %cst_148 [1] : vector<16x16xf32> to vector<16xf32>
    %681 = vector.shape_cast %680 : vector<16xf32> to vector<16x1xf32>
    %cst_149 = arith.constant dense<0.000000e+00> : vector<1xf32>
    %682 = vector.multi_reduction <add>, %681, %cst_149 [0] : vector<16x1xf32> to vector<1xf32>
    %683 = vector.shape_cast %682 : vector<1xf32> to vector<1x1xf32>
    %c1_150 = arith.constant 1 : index
    %684 = memref.load %arg3[%c1_150] : memref<4xf32, #tpu.memory_space<smem>>
    %685 = vector.broadcast %684 : f32 to vector<16x16xf32>
    %686 = arith.addf %665, %685 : vector<16x16xf32>
    %c0_151 = arith.constant 0 : index
    %c1_152 = arith.constant 1 : index
    %c0_153 = arith.constant 0 : index
    %c0_154 = arith.constant 0 : index
    %687 = vector.load %arg4[%c0_151, %c1_152, %c0_153, %c0_154] : memref<1x4x16x16xf32, #tpu.memory_space<vmem>>, vector<1x1x16x16xf32>
    %688 = vector.shape_cast %687 : vector<1x1x16x16xf32> to vector<16x16xf32>
    %689 = vector.shape_cast %686 : vector<16x16xf32> to vector<1x1x16x16xf32>
    tpu.vector_store %arg4[%c0_151, %c1_152, %c0_153, %c0_154], %689 {strides = array<i32>} : memref<1x4x16x16xf32, #tpu.memory_space<vmem>>, vector<1x1x16x16xf32>,
    %cst_155 = arith.constant dense<0.000000e+00> : vector<16xf32>
    %690 = vector.multi_reduction <add>, %665, %cst_155 [1] : vector<16x16xf32> to vector<16xf32>
    %691 = vector.shape_cast %690 : vector<16xf32> to vector<16x1xf32>
    %cst_156 = arith.constant dense<0.000000e+00> : vector<1xf32>
    %692 = vector.multi_reduction <add>, %691, %cst_156 [0] : vector<16x1xf32> to vector<1xf32>
    %693 = vector.shape_cast %692 : vector<1xf32> to vector<1x1xf32>
    %c2_157 = arith.constant 2 : index
    %694 = memref.load %arg3[%c2_157] : memref<4xf32, #tpu.memory_space<smem>>
    %695 = vector.broadcast %694 : f32 to vector<16x16xf32>
    %696 = arith.addf %669, %695 : vector<16x16xf32>
    %c0_158 = arith.constant 0 : index
    %c2_159 = arith.constant 2 : index
    %c0_160 = arith.constant 0 : index
    %c0_161 = arith.constant 0 : index
    %697 = vector.load %arg4[%c0_158, %c2_159, %c0_160, %c0_161] : memref<1x4x16x16xf32, #tpu.memory_space<vmem>>, vector<1x1x16x16xf32>
    %698 = vector.shape_cast %697 : vector<1x1x16x16xf32> to vector<16x16xf32>
    %699 = vector.shape_cast %696 : vector<16x16xf32> to vector<1x1x16x16xf32>
    tpu.vector_store %arg4[%c0_158, %c2_159, %c0_160, %c0_161], %699 {strides = array<i32>} : memref<1x4x16x16xf32, #tpu.memory_space<vmem>>, vector<1x1x16x16xf32>,
    %cst_162 = arith.constant dense<0.000000e+00> : vector<16xf32>
    %700 = vector.multi_reduction <add>, %669, %cst_162 [1] : vector<16x16xf32> to vector<16xf32>
    %701 = vector.shape_cast %700 : vector<16xf32> to vector<16x1xf32>
    %cst_163 = arith.constant dense<0.000000e+00> : vector<1xf32>
    %702 = vector.multi_reduction <add>, %701, %cst_163 [0] : vector<16x1xf32> to vector<1xf32>
    %703 = vector.shape_cast %702 : vector<1xf32> to vector<1x1xf32>
    %c3_164 = arith.constant 3 : index
    %704 = memref.load %arg3[%c3_164] : memref<4xf32, #tpu.memory_space<smem>>
    %705 = vector.broadcast %704 : f32 to vector<16x16xf32>
    %706 = arith.addf %673, %705 : vector<16x16xf32>
    %c0_165 = arith.constant 0 : index
    %c3_166 = arith.constant 3 : index
    %c0_167 = arith.constant 0 : index
    %c0_168 = arith.constant 0 : index
    %707 = vector.load %arg4[%c0_165, %c3_166, %c0_167, %c0_168] : memref<1x4x16x16xf32, #tpu.memory_space<vmem>>, vector<1x1x16x16xf32>
    %708 = vector.shape_cast %707 : vector<1x1x16x16xf32> to vector<16x16xf32>
    %709 = vector.shape_cast %706 : vector<16x16xf32> to vector<1x1x16x16xf32>
    tpu.vector_store %arg4[%c0_165, %c3_166, %c0_167, %c0_168], %709 {strides = array<i32>} : memref<1x4x16x16xf32, #tpu.memory_space<vmem>>, vector<1x1x16x16xf32>,
    %cst_169 = arith.constant dense<0.000000e+00> : vector<16xf32>
    %710 = vector.multi_reduction <add>, %673, %cst_169 [1] : vector<16x16xf32> to vector<16xf32>
    %711 = vector.shape_cast %710 : vector<16xf32> to vector<16x1xf32>
    %cst_170 = arith.constant dense<0.000000e+00> : vector<1xf32>
    %712 = vector.multi_reduction <add>, %711, %cst_170 [0] : vector<16x1xf32> to vector<1xf32>
    %713 = vector.shape_cast %712 : vector<1xf32> to vector<1x1xf32>
    %714 = arith.mulf %661, %661 : vector<16x16xf32>
    %cst_171 = arith.constant dense<0.000000e+00> : vector<16xf32>
    %715 = vector.multi_reduction <add>, %714, %cst_171 [1] : vector<16x16xf32> to vector<16xf32>
    %716 = vector.shape_cast %715 : vector<16xf32> to vector<16x1xf32>
    %cst_172 = arith.constant dense<0.000000e+00> : vector<1xf32>
    %717 = vector.multi_reduction <add>, %716, %cst_172 [0] : vector<16x1xf32> to vector<1xf32>
    %718 = vector.shape_cast %717 : vector<1xf32> to vector<1x1xf32>
    %719 = arith.mulf %665, %665 : vector<16x16xf32>
    %cst_173 = arith.constant dense<0.000000e+00> : vector<16xf32>
    %720 = vector.multi_reduction <add>, %719, %cst_173 [1] : vector<16x16xf32> to vector<16xf32>
    %721 = vector.shape_cast %720 : vector<16xf32> to vector<16x1xf32>
    %cst_174 = arith.constant dense<0.000000e+00> : vector<1xf32>
    %722 = vector.multi_reduction <add>, %721, %cst_174 [0] : vector<16x1xf32> to vector<1xf32>
    %723 = vector.shape_cast %722 : vector<1xf32> to vector<1x1xf32>
    %724 = arith.mulf %669, %669 : vector<16x16xf32>
    %cst_175 = arith.constant dense<0.000000e+00> : vector<16xf32>
    %725 = vector.multi_reduction <add>, %724, %cst_175 [1] : vector<16x16xf32> to vector<16xf32>
    %726 = vector.shape_cast %725 : vector<16xf32> to vector<16x1xf32>
    %cst_176 = arith.constant dense<0.000000e+00> : vector<1xf32>
    %727 = vector.multi_reduction <add>, %726, %cst_176 [0] : vector<16x1xf32> to vector<1xf32>
    %728 = vector.shape_cast %727 : vector<1xf32> to vector<1x1xf32>
    %729 = arith.mulf %673, %673 : vector<16x16xf32>
    %cst_177 = arith.constant dense<0.000000e+00> : vector<16xf32>
    %730 = vector.multi_reduction <add>, %729, %cst_177 [1] : vector<16x16xf32> to vector<16xf32>
    %731 = vector.shape_cast %730 : vector<16xf32> to vector<16x1xf32>
    %cst_178 = arith.constant dense<0.000000e+00> : vector<1xf32>
    %732 = vector.multi_reduction <add>, %731, %cst_178 [0] : vector<16x1xf32> to vector<1xf32>
    %733 = vector.shape_cast %732 : vector<1xf32> to vector<1x1xf32>
    %734 = tpu.concatenate %683, %693, %703, %713, %718, %723, %728, %733 in 1 : vector<1x1xf32>, vector<1x1xf32>, vector<1x1xf32>, vector<1x1xf32>, vector<1x1xf32>, vector<1x1xf32>, vector<1x1xf32>, vector<1x1xf32> -> vector<1x8xf32>
    %735 = vector.shape_cast %734 : vector<1x8xf32> to vector<1x1x8xf32>
    %c0_179 = arith.constant 0 : index
    %c0_180 = arith.constant 0 : index
    %c0_181 = arith.constant 0 : index
    %736 = vector.load %arg5[%c0_179, %c0_180, %c0_181] : memref<1x1x8xf32, #tpu.memory_space<vmem>>, vector<1x1x8xf32>
    tpu.vector_store %arg5[%c0_179, %c0_180, %c0_181], %735 {strides = array<i32>} : memref<1x1x8xf32, #tpu.memory_space<vmem>>, vector<1x1x8xf32>,
    return
  }
  func.func @transform_0(%arg0: i32) -> (i32, i32, i32, i32) {
    %c0_i32 = arith.constant 0 : i32
    %c0_i32_0 = arith.constant 0 : i32
    %c0_i32_1 = arith.constant 0 : i32
    %c0_i32_2 = arith.constant 0 : i32
    return %arg0, %c0_i32, %c0_i32_0, %c0_i32_1 : i32, i32, i32, i32
  }
  func.func @transform_1(%arg0: i32) -> i32 {
    %c0_i32 = arith.constant 0 : i32
    %c0_i32_0 = arith.constant 0 : i32
    return %c0_i32 : i32
  }
  func.func @transform_2(%arg0: i32) -> i32 {
    %c0_i32 = arith.constant 0 : i32
    %c0_i32_0 = arith.constant 0 : i32
    return %c0_i32 : i32
  }
  func.func @transform_3(%arg0: i32) -> (i32, i32, i32, i32) {
    %c0_i32 = arith.constant 0 : i32
    %c0_i32_0 = arith.constant 0 : i32
    %c0_i32_1 = arith.constant 0 : i32
    %c0_i32_2 = arith.constant 0 : i32
    return %arg0, %c0_i32, %c0_i32_0, %c0_i32_1 : i32, i32, i32, i32
  }
  func.func @transform_4(%arg0: i32) -> (i32, i32, i32) {
    %c0_i32 = arith.constant 0 : i32
    %c0_i32_0 = arith.constant 0 : i32
    %c0_i32_1 = arith.constant 0 : i32
    return %arg0, %c0_i32, %c0_i32_0 : i32, i32, i32
  }
}

module attributes {stable_mosaic.version = 11 : i64} {
  func.func @bn_lrelu_conv_stats_kernel(%arg0: i32, %arg1: memref<1x4x16x16xf32, #tpu.memory_space<vmem>>, %arg2: memref<144xf32, #tpu.memory_space<smem>>, %arg3: memref<4xf32, #tpu.memory_space<smem>>, %arg4: memref<4xf32, #tpu.memory_space<smem>>, %arg5: memref<4xf32, #tpu.memory_space<smem>>, %arg6: memref<1x4x16x16xf32, #tpu.memory_space<vmem>>, %arg7: memref<1x1x8xf32, #tpu.memory_space<vmem>>, %arg8: memref<4x18x18xf32, #tpu.memory_space<vmem>>) attributes {dimension_semantics = [#tpu.dimension_semantics<parallel>], iteration_bounds = array<i64: 2>, scalar_prefetch = 0 : i64, scratch_operands = 1 : i64, tpu.core_type = #tpu.core_type<tc>, window_params = [{transform_indices = @transform_0, window_bounds = array<i64: 1, 4, 16, 16>}, {transform_indices = @transform_1, window_bounds = array<i64: 144>}, {transform_indices = @transform_2, window_bounds = array<i64: 4>}, {transform_indices = @transform_3, window_bounds = array<i64: 4>}, {transform_indices = @transform_4, window_bounds = array<i64: 4>}, {transform_indices = @transform_5, window_bounds = array<i64: 1, 4, 16, 16>}, {transform_indices = @transform_6, window_bounds = array<i64: 1, 1, 8>}]} {
    %cst = arith.constant 0.000000e+00 : f32
    %0 = vector.broadcast %cst : f32 to vector<4x18x18xf32>
    %c0 = arith.constant 0 : index
    %c0_0 = arith.constant 0 : index
    %c0_1 = arith.constant 0 : index
    %1 = vector.load %arg8[%c0, %c0_0, %c0_1] : memref<4x18x18xf32, #tpu.memory_space<vmem>>, vector<4x18x18xf32>
    tpu.vector_store %arg8[%c0, %c0_0, %c0_1], %0 {strides = array<i32>} : memref<4x18x18xf32, #tpu.memory_space<vmem>>, vector<4x18x18xf32>,
    %c0_2 = arith.constant 0 : index
    %c0_3 = arith.constant 0 : index
    %c0_4 = arith.constant 0 : index
    %c0_5 = arith.constant 0 : index
    %2 = vector.load %arg1[%c0_2, %c0_3, %c0_4, %c0_5] : memref<1x4x16x16xf32, #tpu.memory_space<vmem>>, vector<1x1x16x16xf32>
    %3 = vector.shape_cast %2 : vector<1x1x16x16xf32> to vector<16x16xf32>
    %c0_6 = arith.constant 0 : index
    %4 = memref.load %arg4[%c0_6] : memref<4xf32, #tpu.memory_space<smem>>
    %5 = vector.broadcast %4 : f32 to vector<16x16xf32>
    %6 = arith.mulf %3, %5 : vector<16x16xf32>
    %c0_7 = arith.constant 0 : index
    %7 = memref.load %arg5[%c0_7] : memref<4xf32, #tpu.memory_space<smem>>
    %8 = vector.broadcast %7 : f32 to vector<16x16xf32>
    %9 = arith.addf %6, %8 : vector<16x16xf32>
    %cst_8 = arith.constant 0.000000e+00 : f32
    %10 = vector.broadcast %cst_8 : f32 to vector<16x16xf32>
    %11 = arith.cmpf ogt, %9, %10 : vector<16x16xf32>
    %cst_9 = arith.constant 2.000000e-01 : f32
    %12 = vector.broadcast %cst_9 : f32 to vector<16x16xf32>
    %13 = arith.mulf %12, %9 : vector<16x16xf32>
    %14 = arith.select %11, %9, %13 : vector<16x16xi1>, vector<16x16xf32>
    %c0_10 = arith.constant 0 : index
    %c1 = arith.constant 1 : index
    %c1_11 = arith.constant 1 : index
    %15 = vector.load %arg8[%c0_10, %c1, %c1_11] : memref<4x18x18xf32, #tpu.memory_space<vmem>>, vector<1x16x16xf32>
    %16 = vector.shape_cast %15 : vector<1x16x16xf32> to vector<16x16xf32>
    %17 = vector.shape_cast %14 : vector<16x16xf32> to vector<1x16x16xf32>
    tpu.vector_store %arg8[%c0_10, %c1, %c1_11], %17 {strides = array<i32>} : memref<4x18x18xf32, #tpu.memory_space<vmem>>, vector<1x16x16xf32>,
    %c0_12 = arith.constant 0 : index
    %c1_13 = arith.constant 1 : index
    %c0_14 = arith.constant 0 : index
    %c0_15 = arith.constant 0 : index
    %18 = vector.load %arg1[%c0_12, %c1_13, %c0_14, %c0_15] : memref<1x4x16x16xf32, #tpu.memory_space<vmem>>, vector<1x1x16x16xf32>
    %19 = vector.shape_cast %18 : vector<1x1x16x16xf32> to vector<16x16xf32>
    %c1_16 = arith.constant 1 : index
    %20 = memref.load %arg4[%c1_16] : memref<4xf32, #tpu.memory_space<smem>>
    %21 = vector.broadcast %20 : f32 to vector<16x16xf32>
    %22 = arith.mulf %19, %21 : vector<16x16xf32>
    %c1_17 = arith.constant 1 : index
    %23 = memref.load %arg5[%c1_17] : memref<4xf32, #tpu.memory_space<smem>>
    %24 = vector.broadcast %23 : f32 to vector<16x16xf32>
    %25 = arith.addf %22, %24 : vector<16x16xf32>
    %cst_18 = arith.constant 0.000000e+00 : f32
    %26 = vector.broadcast %cst_18 : f32 to vector<16x16xf32>
    %27 = arith.cmpf ogt, %25, %26 : vector<16x16xf32>
    %cst_19 = arith.constant 2.000000e-01 : f32
    %28 = vector.broadcast %cst_19 : f32 to vector<16x16xf32>
    %29 = arith.mulf %28, %25 : vector<16x16xf32>
    %30 = arith.select %27, %25, %29 : vector<16x16xi1>, vector<16x16xf32>
    %c1_20 = arith.constant 1 : index
    %c1_21 = arith.constant 1 : index
    %c1_22 = arith.constant 1 : index
    %31 = vector.load %arg8[%c1_20, %c1_21, %c1_22] : memref<4x18x18xf32, #tpu.memory_space<vmem>>, vector<1x16x16xf32>
    %32 = vector.shape_cast %31 : vector<1x16x16xf32> to vector<16x16xf32>
    %33 = vector.shape_cast %30 : vector<16x16xf32> to vector<1x16x16xf32>
    tpu.vector_store %arg8[%c1_20, %c1_21, %c1_22], %33 {strides = array<i32>} : memref<4x18x18xf32, #tpu.memory_space<vmem>>, vector<1x16x16xf32>,
    %c0_23 = arith.constant 0 : index
    %c2 = arith.constant 2 : index
    %c0_24 = arith.constant 0 : index
    %c0_25 = arith.constant 0 : index
    %34 = vector.load %arg1[%c0_23, %c2, %c0_24, %c0_25] : memref<1x4x16x16xf32, #tpu.memory_space<vmem>>, vector<1x1x16x16xf32>
    %35 = vector.shape_cast %34 : vector<1x1x16x16xf32> to vector<16x16xf32>
    %c2_26 = arith.constant 2 : index
    %36 = memref.load %arg4[%c2_26] : memref<4xf32, #tpu.memory_space<smem>>
    %37 = vector.broadcast %36 : f32 to vector<16x16xf32>
    %38 = arith.mulf %35, %37 : vector<16x16xf32>
    %c2_27 = arith.constant 2 : index
    %39 = memref.load %arg5[%c2_27] : memref<4xf32, #tpu.memory_space<smem>>
    %40 = vector.broadcast %39 : f32 to vector<16x16xf32>
    %41 = arith.addf %38, %40 : vector<16x16xf32>
    %cst_28 = arith.constant 0.000000e+00 : f32
    %42 = vector.broadcast %cst_28 : f32 to vector<16x16xf32>
    %43 = arith.cmpf ogt, %41, %42 : vector<16x16xf32>
    %cst_29 = arith.constant 2.000000e-01 : f32
    %44 = vector.broadcast %cst_29 : f32 to vector<16x16xf32>
    %45 = arith.mulf %44, %41 : vector<16x16xf32>
    %46 = arith.select %43, %41, %45 : vector<16x16xi1>, vector<16x16xf32>
    %c2_30 = arith.constant 2 : index
    %c1_31 = arith.constant 1 : index
    %c1_32 = arith.constant 1 : index
    %47 = vector.load %arg8[%c2_30, %c1_31, %c1_32] : memref<4x18x18xf32, #tpu.memory_space<vmem>>, vector<1x16x16xf32>
    %48 = vector.shape_cast %47 : vector<1x16x16xf32> to vector<16x16xf32>
    %49 = vector.shape_cast %46 : vector<16x16xf32> to vector<1x16x16xf32>
    tpu.vector_store %arg8[%c2_30, %c1_31, %c1_32], %49 {strides = array<i32>} : memref<4x18x18xf32, #tpu.memory_space<vmem>>, vector<1x16x16xf32>,
    %c0_33 = arith.constant 0 : index
    %c3 = arith.constant 3 : index
    %c0_34 = arith.constant 0 : index
    %c0_35 = arith.constant 0 : index
    %50 = vector.load %arg1[%c0_33, %c3, %c0_34, %c0_35] : memref<1x4x16x16xf32, #tpu.memory_space<vmem>>, vector<1x1x16x16xf32>
    %51 = vector.shape_cast %50 : vector<1x1x16x16xf32> to vector<16x16xf32>
    %c3_36 = arith.constant 3 : index
    %52 = memref.load %arg4[%c3_36] : memref<4xf32, #tpu.memory_space<smem>>
    %53 = vector.broadcast %52 : f32 to vector<16x16xf32>
    %54 = arith.mulf %51, %53 : vector<16x16xf32>
    %c3_37 = arith.constant 3 : index
    %55 = memref.load %arg5[%c3_37] : memref<4xf32, #tpu.memory_space<smem>>
    %56 = vector.broadcast %55 : f32 to vector<16x16xf32>
    %57 = arith.addf %54, %56 : vector<16x16xf32>
    %cst_38 = arith.constant 0.000000e+00 : f32
    %58 = vector.broadcast %cst_38 : f32 to vector<16x16xf32>
    %59 = arith.cmpf ogt, %57, %58 : vector<16x16xf32>
    %cst_39 = arith.constant 2.000000e-01 : f32
    %60 = vector.broadcast %cst_39 : f32 to vector<16x16xf32>
    %61 = arith.mulf %60, %57 : vector<16x16xf32>
    %62 = arith.select %59, %57, %61 : vector<16x16xi1>, vector<16x16xf32>
    %c3_40 = arith.constant 3 : index
    %c1_41 = arith.constant 1 : index
    %c1_42 = arith.constant 1 : index
    %63 = vector.load %arg8[%c3_40, %c1_41, %c1_42] : memref<4x18x18xf32, #tpu.memory_space<vmem>>, vector<1x16x16xf32>
    %64 = vector.shape_cast %63 : vector<1x16x16xf32> to vector<16x16xf32>
    %65 = vector.shape_cast %62 : vector<16x16xf32> to vector<1x16x16xf32>
    tpu.vector_store %arg8[%c3_40, %c1_41, %c1_42], %65 {strides = array<i32>} : memref<4x18x18xf32, #tpu.memory_space<vmem>>, vector<1x16x16xf32>,
    %cst_43 = arith.constant 0.000000e+00 : f32
    %66 = vector.broadcast %cst_43 : f32 to vector<16x16xf32>
    %cst_44 = arith.constant 0.000000e+00 : f32
    %67 = vector.broadcast %cst_44 : f32 to vector<16x16xf32>
    %cst_45 = arith.constant 0.000000e+00 : f32
    %68 = vector.broadcast %cst_45 : f32 to vector<16x16xf32>
    %cst_46 = arith.constant 0.000000e+00 : f32
    %69 = vector.broadcast %cst_46 : f32 to vector<16x16xf32>
    %c0_47 = arith.constant 0 : index
    %c0_48 = arith.constant 0 : index
    %c0_49 = arith.constant 0 : index
    %70 = vector.load %arg8[%c0_47, %c0_48, %c0_49] : memref<4x18x18xf32, #tpu.memory_space<vmem>>, vector<1x16x16xf32>
    %71 = vector.shape_cast %70 : vector<1x16x16xf32> to vector<16x16xf32>
    %c0_50 = arith.constant 0 : index
    %72 = memref.load %arg2[%c0_50] : memref<144xf32, #tpu.memory_space<smem>>
    %73 = vector.broadcast %72 : f32 to vector<16x16xf32>
    %74 = arith.mulf %71, %73 : vector<16x16xf32>
    %75 = arith.addf %66, %74 : vector<16x16xf32>
    %c36 = arith.constant 36 : index
    %76 = memref.load %arg2[%c36] : memref<144xf32, #tpu.memory_space<smem>>
    %77 = vector.broadcast %76 : f32 to vector<16x16xf32>
    %78 = arith.mulf %71, %77 : vector<16x16xf32>
    %79 = arith.addf %67, %78 : vector<16x16xf32>
    %c72 = arith.constant 72 : index
    %80 = memref.load %arg2[%c72] : memref<144xf32, #tpu.memory_space<smem>>
    %81 = vector.broadcast %80 : f32 to vector<16x16xf32>
    %82 = arith.mulf %71, %81 : vector<16x16xf32>
    %83 = arith.addf %68, %82 : vector<16x16xf32>
    %c108 = arith.constant 108 : index
    %84 = memref.load %arg2[%c108] : memref<144xf32, #tpu.memory_space<smem>>
    %85 = vector.broadcast %84 : f32 to vector<16x16xf32>
    %86 = arith.mulf %71, %85 : vector<16x16xf32>
    %87 = arith.addf %69, %86 : vector<16x16xf32>
    %c0_51 = arith.constant 0 : index
    %c0_52 = arith.constant 0 : index
    %c1_53 = arith.constant 1 : index
    %88 = vector.load %arg8[%c0_51, %c0_52, %c1_53] : memref<4x18x18xf32, #tpu.memory_space<vmem>>, vector<1x16x16xf32>
    %89 = vector.shape_cast %88 : vector<1x16x16xf32> to vector<16x16xf32>
    %c1_54 = arith.constant 1 : index
    %90 = memref.load %arg2[%c1_54] : memref<144xf32, #tpu.memory_space<smem>>
    %91 = vector.broadcast %90 : f32 to vector<16x16xf32>
    %92 = arith.mulf %89, %91 : vector<16x16xf32>
    %93 = arith.addf %75, %92 : vector<16x16xf32>
    %c37 = arith.constant 37 : index
    %94 = memref.load %arg2[%c37] : memref<144xf32, #tpu.memory_space<smem>>
    %95 = vector.broadcast %94 : f32 to vector<16x16xf32>
    %96 = arith.mulf %89, %95 : vector<16x16xf32>
    %97 = arith.addf %79, %96 : vector<16x16xf32>
    %c73 = arith.constant 73 : index
    %98 = memref.load %arg2[%c73] : memref<144xf32, #tpu.memory_space<smem>>
    %99 = vector.broadcast %98 : f32 to vector<16x16xf32>
    %100 = arith.mulf %89, %99 : vector<16x16xf32>
    %101 = arith.addf %83, %100 : vector<16x16xf32>
    %c109 = arith.constant 109 : index
    %102 = memref.load %arg2[%c109] : memref<144xf32, #tpu.memory_space<smem>>
    %103 = vector.broadcast %102 : f32 to vector<16x16xf32>
    %104 = arith.mulf %89, %103 : vector<16x16xf32>
    %105 = arith.addf %87, %104 : vector<16x16xf32>
    %c0_55 = arith.constant 0 : index
    %c0_56 = arith.constant 0 : index
    %c2_57 = arith.constant 2 : index
    %106 = vector.load %arg8[%c0_55, %c0_56, %c2_57] : memref<4x18x18xf32, #tpu.memory_space<vmem>>, vector<1x16x16xf32>
    %107 = vector.shape_cast %106 : vector<1x16x16xf32> to vector<16x16xf32>
    %c2_58 = arith.constant 2 : index
    %108 = memref.load %arg2[%c2_58] : memref<144xf32, #tpu.memory_space<smem>>
    %109 = vector.broadcast %108 : f32 to vector<16x16xf32>
    %110 = arith.mulf %107, %109 : vector<16x16xf32>
    %111 = arith.addf %93, %110 : vector<16x16xf32>
    %c38 = arith.constant 38 : index
    %112 = memref.load %arg2[%c38] : memref<144xf32, #tpu.memory_space<smem>>
    %113 = vector.broadcast %112 : f32 to vector<16x16xf32>
    %114 = arith.mulf %107, %113 : vector<16x16xf32>
    %115 = arith.addf %97, %114 : vector<16x16xf32>
    %c74 = arith.constant 74 : index
    %116 = memref.load %arg2[%c74] : memref<144xf32, #tpu.memory_space<smem>>
    %117 = vector.broadcast %116 : f32 to vector<16x16xf32>
    %118 = arith.mulf %107, %117 : vector<16x16xf32>
    %119 = arith.addf %101, %118 : vector<16x16xf32>
    %c110 = arith.constant 110 : index
    %120 = memref.load %arg2[%c110] : memref<144xf32, #tpu.memory_space<smem>>
    %121 = vector.broadcast %120 : f32 to vector<16x16xf32>
    %122 = arith.mulf %107, %121 : vector<16x16xf32>
    %123 = arith.addf %105, %122 : vector<16x16xf32>
    %c0_59 = arith.constant 0 : index
    %c1_60 = arith.constant 1 : index
    %c0_61 = arith.constant 0 : index
    %124 = vector.load %arg8[%c0_59, %c1_60, %c0_61] : memref<4x18x18xf32, #tpu.memory_space<vmem>>, vector<1x16x16xf32>
    %125 = vector.shape_cast %124 : vector<1x16x16xf32> to vector<16x16xf32>
    %c3_62 = arith.constant 3 : index
    %126 = memref.load %arg2[%c3_62] : memref<144xf32, #tpu.memory_space<smem>>
    %127 = vector.broadcast %126 : f32 to vector<16x16xf32>
    %128 = arith.mulf %125, %127 : vector<16x16xf32>
    %129 = arith.addf %111, %128 : vector<16x16xf32>
    %c39 = arith.constant 39 : index
    %130 = memref.load %arg2[%c39] : memref<144xf32, #tpu.memory_space<smem>>
    %131 = vector.broadcast %130 : f32 to vector<16x16xf32>
    %132 = arith.mulf %125, %131 : vector<16x16xf32>
    %133 = arith.addf %115, %132 : vector<16x16xf32>
    %c75 = arith.constant 75 : index
    %134 = memref.load %arg2[%c75] : memref<144xf32, #tpu.memory_space<smem>>
    %135 = vector.broadcast %134 : f32 to vector<16x16xf32>
    %136 = arith.mulf %125, %135 : vector<16x16xf32>
    %137 = arith.addf %119, %136 : vector<16x16xf32>
    %c111 = arith.constant 111 : index
    %138 = memref.load %arg2[%c111] : memref<144xf32, #tpu.memory_space<smem>>
    %139 = vector.broadcast %138 : f32 to vector<16x16xf32>
    %140 = arith.mulf %125, %139 : vector<16x16xf32>
    %141 = arith.addf %123, %140 : vector<16x16xf32>
    %c0_63 = arith.constant 0 : index
    %c1_64 = arith.constant 1 : index
    %c1_65 = arith.constant 1 : index
    %142 = vector.load %arg8[%c0_63, %c1_64, %c1_65] : memref<4x18x18xf32, #tpu.memory_space<vmem>>, vector<1x16x16xf32>
    %143 = vector.shape_cast %142 : vector<1x16x16xf32> to vector<16x16xf32>
    %c4 = arith.constant 4 : index
    %144 = memref.load %arg2[%c4] : memref<144xf32, #tpu.memory_space<smem>>
    %145 = vector.broadcast %144 : f32 to vector<16x16xf32>
    %146 = arith.mulf %143, %145 : vector<16x16xf32>
    %147 = arith.addf %129, %146 : vector<16x16xf32>
    %c40 = arith.constant 40 : index
    %148 = memref.load %arg2[%c40] : memref<144xf32, #tpu.memory_space<smem>>
    %149 = vector.broadcast %148 : f32 to vector<16x16xf32>
    %150 = arith.mulf %143, %149 : vector<16x16xf32>
    %151 = arith.addf %133, %150 : vector<16x16xf32>
    %c76 = arith.constant 76 : index
    %152 = memref.load %arg2[%c76] : memref<144xf32, #tpu.memory_space<smem>>
    %153 = vector.broadcast %152 : f32 to vector<16x16xf32>
    %154 = arith.mulf %143, %153 : vector<16x16xf32>
    %155 = arith.addf %137, %154 : vector<16x16xf32>
    %c112 = arith.constant 112 : index
    %156 = memref.load %arg2[%c112] : memref<144xf32, #tpu.memory_space<smem>>
    %157 = vector.broadcast %156 : f32 to vector<16x16xf32>
    %158 = arith.mulf %143, %157 : vector<16x16xf32>
    %159 = arith.addf %141, %158 : vector<16x16xf32>
    %c0_66 = arith.constant 0 : index
    %c1_67 = arith.constant 1 : index
    %c2_68 = arith.constant 2 : index
    %160 = vector.load %arg8[%c0_66, %c1_67, %c2_68] : memref<4x18x18xf32, #tpu.memory_space<vmem>>, vector<1x16x16xf32>
    %161 = vector.shape_cast %160 : vector<1x16x16xf32> to vector<16x16xf32>
    %c5 = arith.constant 5 : index
    %162 = memref.load %arg2[%c5] : memref<144xf32, #tpu.memory_space<smem>>
    %163 = vector.broadcast %162 : f32 to vector<16x16xf32>
    %164 = arith.mulf %161, %163 : vector<16x16xf32>
    %165 = arith.addf %147, %164 : vector<16x16xf32>
    %c41 = arith.constant 41 : index
    %166 = memref.load %arg2[%c41] : memref<144xf32, #tpu.memory_space<smem>>
    %167 = vector.broadcast %166 : f32 to vector<16x16xf32>
    %168 = arith.mulf %161, %167 : vector<16x16xf32>
    %169 = arith.addf %151, %168 : vector<16x16xf32>
    %c77 = arith.constant 77 : index
    %170 = memref.load %arg2[%c77] : memref<144xf32, #tpu.memory_space<smem>>
    %171 = vector.broadcast %170 : f32 to vector<16x16xf32>
    %172 = arith.mulf %161, %171 : vector<16x16xf32>
    %173 = arith.addf %155, %172 : vector<16x16xf32>
    %c113 = arith.constant 113 : index
    %174 = memref.load %arg2[%c113] : memref<144xf32, #tpu.memory_space<smem>>
    %175 = vector.broadcast %174 : f32 to vector<16x16xf32>
    %176 = arith.mulf %161, %175 : vector<16x16xf32>
    %177 = arith.addf %159, %176 : vector<16x16xf32>
    %c0_69 = arith.constant 0 : index
    %c2_70 = arith.constant 2 : index
    %c0_71 = arith.constant 0 : index
    %178 = vector.load %arg8[%c0_69, %c2_70, %c0_71] : memref<4x18x18xf32, #tpu.memory_space<vmem>>, vector<1x16x16xf32>
    %179 = vector.shape_cast %178 : vector<1x16x16xf32> to vector<16x16xf32>
    %c6 = arith.constant 6 : index
    %180 = memref.load %arg2[%c6] : memref<144xf32, #tpu.memory_space<smem>>
    %181 = vector.broadcast %180 : f32 to vector<16x16xf32>
    %182 = arith.mulf %179, %181 : vector<16x16xf32>
    %183 = arith.addf %165, %182 : vector<16x16xf32>
    %c42 = arith.constant 42 : index
    %184 = memref.load %arg2[%c42] : memref<144xf32, #tpu.memory_space<smem>>
    %185 = vector.broadcast %184 : f32 to vector<16x16xf32>
    %186 = arith.mulf %179, %185 : vector<16x16xf32>
    %187 = arith.addf %169, %186 : vector<16x16xf32>
    %c78 = arith.constant 78 : index
    %188 = memref.load %arg2[%c78] : memref<144xf32, #tpu.memory_space<smem>>
    %189 = vector.broadcast %188 : f32 to vector<16x16xf32>
    %190 = arith.mulf %179, %189 : vector<16x16xf32>
    %191 = arith.addf %173, %190 : vector<16x16xf32>
    %c114 = arith.constant 114 : index
    %192 = memref.load %arg2[%c114] : memref<144xf32, #tpu.memory_space<smem>>
    %193 = vector.broadcast %192 : f32 to vector<16x16xf32>
    %194 = arith.mulf %179, %193 : vector<16x16xf32>
    %195 = arith.addf %177, %194 : vector<16x16xf32>
    %c0_72 = arith.constant 0 : index
    %c2_73 = arith.constant 2 : index
    %c1_74 = arith.constant 1 : index
    %196 = vector.load %arg8[%c0_72, %c2_73, %c1_74] : memref<4x18x18xf32, #tpu.memory_space<vmem>>, vector<1x16x16xf32>
    %197 = vector.shape_cast %196 : vector<1x16x16xf32> to vector<16x16xf32>
    %c7 = arith.constant 7 : index
    %198 = memref.load %arg2[%c7] : memref<144xf32, #tpu.memory_space<smem>>
    %199 = vector.broadcast %198 : f32 to vector<16x16xf32>
    %200 = arith.mulf %197, %199 : vector<16x16xf32>
    %201 = arith.addf %183, %200 : vector<16x16xf32>
    %c43 = arith.constant 43 : index
    %202 = memref.load %arg2[%c43] : memref<144xf32, #tpu.memory_space<smem>>
    %203 = vector.broadcast %202 : f32 to vector<16x16xf32>
    %204 = arith.mulf %197, %203 : vector<16x16xf32>
    %205 = arith.addf %187, %204 : vector<16x16xf32>
    %c79 = arith.constant 79 : index
    %206 = memref.load %arg2[%c79] : memref<144xf32, #tpu.memory_space<smem>>
    %207 = vector.broadcast %206 : f32 to vector<16x16xf32>
    %208 = arith.mulf %197, %207 : vector<16x16xf32>
    %209 = arith.addf %191, %208 : vector<16x16xf32>
    %c115 = arith.constant 115 : index
    %210 = memref.load %arg2[%c115] : memref<144xf32, #tpu.memory_space<smem>>
    %211 = vector.broadcast %210 : f32 to vector<16x16xf32>
    %212 = arith.mulf %197, %211 : vector<16x16xf32>
    %213 = arith.addf %195, %212 : vector<16x16xf32>
    %c0_75 = arith.constant 0 : index
    %c2_76 = arith.constant 2 : index
    %c2_77 = arith.constant 2 : index
    %214 = vector.load %arg8[%c0_75, %c2_76, %c2_77] : memref<4x18x18xf32, #tpu.memory_space<vmem>>, vector<1x16x16xf32>
    %215 = vector.shape_cast %214 : vector<1x16x16xf32> to vector<16x16xf32>
    %c8 = arith.constant 8 : index
    %216 = memref.load %arg2[%c8] : memref<144xf32, #tpu.memory_space<smem>>
    %217 = vector.broadcast %216 : f32 to vector<16x16xf32>
    %218 = arith.mulf %215, %217 : vector<16x16xf32>
    %219 = arith.addf %201, %218 : vector<16x16xf32>
    %c44 = arith.constant 44 : index
    %220 = memref.load %arg2[%c44] : memref<144xf32, #tpu.memory_space<smem>>
    %221 = vector.broadcast %220 : f32 to vector<16x16xf32>
    %222 = arith.mulf %215, %221 : vector<16x16xf32>
    %223 = arith.addf %205, %222 : vector<16x16xf32>
    %c80 = arith.constant 80 : index
    %224 = memref.load %arg2[%c80] : memref<144xf32, #tpu.memory_space<smem>>
    %225 = vector.broadcast %224 : f32 to vector<16x16xf32>
    %226 = arith.mulf %215, %225 : vector<16x16xf32>
    %227 = arith.addf %209, %226 : vector<16x16xf32>
    %c116 = arith.constant 116 : index
    %228 = memref.load %arg2[%c116] : memref<144xf32, #tpu.memory_space<smem>>
    %229 = vector.broadcast %228 : f32 to vector<16x16xf32>
    %230 = arith.mulf %215, %229 : vector<16x16xf32>
    %231 = arith.addf %213, %230 : vector<16x16xf32>
    %c1_78 = arith.constant 1 : index
    %c0_79 = arith.constant 0 : index
    %c0_80 = arith.constant 0 : index
    %232 = vector.load %arg8[%c1_78, %c0_79, %c0_80] : memref<4x18x18xf32, #tpu.memory_space<vmem>>, vector<1x16x16xf32>
    %233 = vector.shape_cast %232 : vector<1x16x16xf32> to vector<16x16xf32>
    %c9 = arith.constant 9 : index
    %234 = memref.load %arg2[%c9] : memref<144xf32, #tpu.memory_space<smem>>
    %235 = vector.broadcast %234 : f32 to vector<16x16xf32>
    %236 = arith.mulf %233, %235 : vector<16x16xf32>
    %237 = arith.addf %219, %236 : vector<16x16xf32>
    %c45 = arith.constant 45 : index
    %238 = memref.load %arg2[%c45] : memref<144xf32, #tpu.memory_space<smem>>
    %239 = vector.broadcast %238 : f32 to vector<16x16xf32>
    %240 = arith.mulf %233, %239 : vector<16x16xf32>
    %241 = arith.addf %223, %240 : vector<16x16xf32>
    %c81 = arith.constant 81 : index
    %242 = memref.load %arg2[%c81] : memref<144xf32, #tpu.memory_space<smem>>
    %243 = vector.broadcast %242 : f32 to vector<16x16xf32>
    %244 = arith.mulf %233, %243 : vector<16x16xf32>
    %245 = arith.addf %227, %244 : vector<16x16xf32>
    %c117 = arith.constant 117 : index
    %246 = memref.load %arg2[%c117] : memref<144xf32, #tpu.memory_space<smem>>
    %247 = vector.broadcast %246 : f32 to vector<16x16xf32>
    %248 = arith.mulf %233, %247 : vector<16x16xf32>
    %249 = arith.addf %231, %248 : vector<16x16xf32>
    %c1_81 = arith.constant 1 : index
    %c0_82 = arith.constant 0 : index
    %c1_83 = arith.constant 1 : index
    %250 = vector.load %arg8[%c1_81, %c0_82, %c1_83] : memref<4x18x18xf32, #tpu.memory_space<vmem>>, vector<1x16x16xf32>
    %251 = vector.shape_cast %250 : vector<1x16x16xf32> to vector<16x16xf32>
    %c10 = arith.constant 10 : index
    %252 = memref.load %arg2[%c10] : memref<144xf32, #tpu.memory_space<smem>>
    %253 = vector.broadcast %252 : f32 to vector<16x16xf32>
    %254 = arith.mulf %251, %253 : vector<16x16xf32>
    %255 = arith.addf %237, %254 : vector<16x16xf32>
    %c46 = arith.constant 46 : index
    %256 = memref.load %arg2[%c46] : memref<144xf32, #tpu.memory_space<smem>>
    %257 = vector.broadcast %256 : f32 to vector<16x16xf32>
    %258 = arith.mulf %251, %257 : vector<16x16xf32>
    %259 = arith.addf %241, %258 : vector<16x16xf32>
    %c82 = arith.constant 82 : index
    %260 = memref.load %arg2[%c82] : memref<144xf32, #tpu.memory_space<smem>>
    %261 = vector.broadcast %260 : f32 to vector<16x16xf32>
    %262 = arith.mulf %251, %261 : vector<16x16xf32>
    %263 = arith.addf %245, %262 : vector<16x16xf32>
    %c118 = arith.constant 118 : index
    %264 = memref.load %arg2[%c118] : memref<144xf32, #tpu.memory_space<smem>>
    %265 = vector.broadcast %264 : f32 to vector<16x16xf32>
    %266 = arith.mulf %251, %265 : vector<16x16xf32>
    %267 = arith.addf %249, %266 : vector<16x16xf32>
    %c1_84 = arith.constant 1 : index
    %c0_85 = arith.constant 0 : index
    %c2_86 = arith.constant 2 : index
    %268 = vector.load %arg8[%c1_84, %c0_85, %c2_86] : memref<4x18x18xf32, #tpu.memory_space<vmem>>, vector<1x16x16xf32>
    %269 = vector.shape_cast %268 : vector<1x16x16xf32> to vector<16x16xf32>
    %c11 = arith.constant 11 : index
    %270 = memref.load %arg2[%c11] : memref<144xf32, #tpu.memory_space<smem>>
    %271 = vector.broadcast %270 : f32 to vector<16x16xf32>
    %272 = arith.mulf %269, %271 : vector<16x16xf32>
    %273 = arith.addf %255, %272 : vector<16x16xf32>
    %c47 = arith.constant 47 : index
    %274 = memref.load %arg2[%c47] : memref<144xf32, #tpu.memory_space<smem>>
    %275 = vector.broadcast %274 : f32 to vector<16x16xf32>
    %276 = arith.mulf %269, %275 : vector<16x16xf32>
    %277 = arith.addf %259, %276 : vector<16x16xf32>
    %c83 = arith.constant 83 : index
    %278 = memref.load %arg2[%c83] : memref<144xf32, #tpu.memory_space<smem>>
    %279 = vector.broadcast %278 : f32 to vector<16x16xf32>
    %280 = arith.mulf %269, %279 : vector<16x16xf32>
    %281 = arith.addf %263, %280 : vector<16x16xf32>
    %c119 = arith.constant 119 : index
    %282 = memref.load %arg2[%c119] : memref<144xf32, #tpu.memory_space<smem>>
    %283 = vector.broadcast %282 : f32 to vector<16x16xf32>
    %284 = arith.mulf %269, %283 : vector<16x16xf32>
    %285 = arith.addf %267, %284 : vector<16x16xf32>
    %c1_87 = arith.constant 1 : index
    %c1_88 = arith.constant 1 : index
    %c0_89 = arith.constant 0 : index
    %286 = vector.load %arg8[%c1_87, %c1_88, %c0_89] : memref<4x18x18xf32, #tpu.memory_space<vmem>>, vector<1x16x16xf32>
    %287 = vector.shape_cast %286 : vector<1x16x16xf32> to vector<16x16xf32>
    %c12 = arith.constant 12 : index
    %288 = memref.load %arg2[%c12] : memref<144xf32, #tpu.memory_space<smem>>
    %289 = vector.broadcast %288 : f32 to vector<16x16xf32>
    %290 = arith.mulf %287, %289 : vector<16x16xf32>
    %291 = arith.addf %273, %290 : vector<16x16xf32>
    %c48 = arith.constant 48 : index
    %292 = memref.load %arg2[%c48] : memref<144xf32, #tpu.memory_space<smem>>
    %293 = vector.broadcast %292 : f32 to vector<16x16xf32>
    %294 = arith.mulf %287, %293 : vector<16x16xf32>
    %295 = arith.addf %277, %294 : vector<16x16xf32>
    %c84 = arith.constant 84 : index
    %296 = memref.load %arg2[%c84] : memref<144xf32, #tpu.memory_space<smem>>
    %297 = vector.broadcast %296 : f32 to vector<16x16xf32>
    %298 = arith.mulf %287, %297 : vector<16x16xf32>
    %299 = arith.addf %281, %298 : vector<16x16xf32>
    %c120 = arith.constant 120 : index
    %300 = memref.load %arg2[%c120] : memref<144xf32, #tpu.memory_space<smem>>
    %301 = vector.broadcast %300 : f32 to vector<16x16xf32>
    %302 = arith.mulf %287, %301 : vector<16x16xf32>
    %303 = arith.addf %285, %302 : vector<16x16xf32>
    %c1_90 = arith.constant 1 : index
    %c1_91 = arith.constant 1 : index
    %c1_92 = arith.constant 1 : index
    %304 = vector.load %arg8[%c1_90, %c1_91, %c1_92] : memref<4x18x18xf32, #tpu.memory_space<vmem>>, vector<1x16x16xf32>
    %305 = vector.shape_cast %304 : vector<1x16x16xf32> to vector<16x16xf32>
    %c13 = arith.constant 13 : index
    %306 = memref.load %arg2[%c13] : memref<144xf32, #tpu.memory_space<smem>>
    %307 = vector.broadcast %306 : f32 to vector<16x16xf32>
    %308 = arith.mulf %305, %307 : vector<16x16xf32>
    %309 = arith.addf %291, %308 : vector<16x16xf32>
    %c49 = arith.constant 49 : index
    %310 = memref.load %arg2[%c49] : memref<144xf32, #tpu.memory_space<smem>>
    %311 = vector.broadcast %310 : f32 to vector<16x16xf32>
    %312 = arith.mulf %305, %311 : vector<16x16xf32>
    %313 = arith.addf %295, %312 : vector<16x16xf32>
    %c85 = arith.constant 85 : index
    %314 = memref.load %arg2[%c85] : memref<144xf32, #tpu.memory_space<smem>>
    %315 = vector.broadcast %314 : f32 to vector<16x16xf32>
    %316 = arith.mulf %305, %315 : vector<16x16xf32>
    %317 = arith.addf %299, %316 : vector<16x16xf32>
    %c121 = arith.constant 121 : index
    %318 = memref.load %arg2[%c121] : memref<144xf32, #tpu.memory_space<smem>>
    %319 = vector.broadcast %318 : f32 to vector<16x16xf32>
    %320 = arith.mulf %305, %319 : vector<16x16xf32>
    %321 = arith.addf %303, %320 : vector<16x16xf32>
    %c1_93 = arith.constant 1 : index
    %c1_94 = arith.constant 1 : index
    %c2_95 = arith.constant 2 : index
    %322 = vector.load %arg8[%c1_93, %c1_94, %c2_95] : memref<4x18x18xf32, #tpu.memory_space<vmem>>, vector<1x16x16xf32>
    %323 = vector.shape_cast %322 : vector<1x16x16xf32> to vector<16x16xf32>
    %c14 = arith.constant 14 : index
    %324 = memref.load %arg2[%c14] : memref<144xf32, #tpu.memory_space<smem>>
    %325 = vector.broadcast %324 : f32 to vector<16x16xf32>
    %326 = arith.mulf %323, %325 : vector<16x16xf32>
    %327 = arith.addf %309, %326 : vector<16x16xf32>
    %c50 = arith.constant 50 : index
    %328 = memref.load %arg2[%c50] : memref<144xf32, #tpu.memory_space<smem>>
    %329 = vector.broadcast %328 : f32 to vector<16x16xf32>
    %330 = arith.mulf %323, %329 : vector<16x16xf32>
    %331 = arith.addf %313, %330 : vector<16x16xf32>
    %c86 = arith.constant 86 : index
    %332 = memref.load %arg2[%c86] : memref<144xf32, #tpu.memory_space<smem>>
    %333 = vector.broadcast %332 : f32 to vector<16x16xf32>
    %334 = arith.mulf %323, %333 : vector<16x16xf32>
    %335 = arith.addf %317, %334 : vector<16x16xf32>
    %c122 = arith.constant 122 : index
    %336 = memref.load %arg2[%c122] : memref<144xf32, #tpu.memory_space<smem>>
    %337 = vector.broadcast %336 : f32 to vector<16x16xf32>
    %338 = arith.mulf %323, %337 : vector<16x16xf32>
    %339 = arith.addf %321, %338 : vector<16x16xf32>
    %c1_96 = arith.constant 1 : index
    %c2_97 = arith.constant 2 : index
    %c0_98 = arith.constant 0 : index
    %340 = vector.load %arg8[%c1_96, %c2_97, %c0_98] : memref<4x18x18xf32, #tpu.memory_space<vmem>>, vector<1x16x16xf32>
    %341 = vector.shape_cast %340 : vector<1x16x16xf32> to vector<16x16xf32>
    %c15 = arith.constant 15 : index
    %342 = memref.load %arg2[%c15] : memref<144xf32, #tpu.memory_space<smem>>
    %343 = vector.broadcast %342 : f32 to vector<16x16xf32>
    %344 = arith.mulf %341, %343 : vector<16x16xf32>
    %345 = arith.addf %327, %344 : vector<16x16xf32>
    %c51 = arith.constant 51 : index
    %346 = memref.load %arg2[%c51] : memref<144xf32, #tpu.memory_space<smem>>
    %347 = vector.broadcast %346 : f32 to vector<16x16xf32>
    %348 = arith.mulf %341, %347 : vector<16x16xf32>
    %349 = arith.addf %331, %348 : vector<16x16xf32>
    %c87 = arith.constant 87 : index
    %350 = memref.load %arg2[%c87] : memref<144xf32, #tpu.memory_space<smem>>
    %351 = vector.broadcast %350 : f32 to vector<16x16xf32>
    %352 = arith.mulf %341, %351 : vector<16x16xf32>
    %353 = arith.addf %335, %352 : vector<16x16xf32>
    %c123 = arith.constant 123 : index
    %354 = memref.load %arg2[%c123] : memref<144xf32, #tpu.memory_space<smem>>
    %355 = vector.broadcast %354 : f32 to vector<16x16xf32>
    %356 = arith.mulf %341, %355 : vector<16x16xf32>
    %357 = arith.addf %339, %356 : vector<16x16xf32>
    %c1_99 = arith.constant 1 : index
    %c2_100 = arith.constant 2 : index
    %c1_101 = arith.constant 1 : index
    %358 = vector.load %arg8[%c1_99, %c2_100, %c1_101] : memref<4x18x18xf32, #tpu.memory_space<vmem>>, vector<1x16x16xf32>
    %359 = vector.shape_cast %358 : vector<1x16x16xf32> to vector<16x16xf32>
    %c16 = arith.constant 16 : index
    %360 = memref.load %arg2[%c16] : memref<144xf32, #tpu.memory_space<smem>>
    %361 = vector.broadcast %360 : f32 to vector<16x16xf32>
    %362 = arith.mulf %359, %361 : vector<16x16xf32>
    %363 = arith.addf %345, %362 : vector<16x16xf32>
    %c52 = arith.constant 52 : index
    %364 = memref.load %arg2[%c52] : memref<144xf32, #tpu.memory_space<smem>>
    %365 = vector.broadcast %364 : f32 to vector<16x16xf32>
    %366 = arith.mulf %359, %365 : vector<16x16xf32>
    %367 = arith.addf %349, %366 : vector<16x16xf32>
    %c88 = arith.constant 88 : index
    %368 = memref.load %arg2[%c88] : memref<144xf32, #tpu.memory_space<smem>>
    %369 = vector.broadcast %368 : f32 to vector<16x16xf32>
    %370 = arith.mulf %359, %369 : vector<16x16xf32>
    %371 = arith.addf %353, %370 : vector<16x16xf32>
    %c124 = arith.constant 124 : index
    %372 = memref.load %arg2[%c124] : memref<144xf32, #tpu.memory_space<smem>>
    %373 = vector.broadcast %372 : f32 to vector<16x16xf32>
    %374 = arith.mulf %359, %373 : vector<16x16xf32>
    %375 = arith.addf %357, %374 : vector<16x16xf32>
    %c1_102 = arith.constant 1 : index
    %c2_103 = arith.constant 2 : index
    %c2_104 = arith.constant 2 : index
    %376 = vector.load %arg8[%c1_102, %c2_103, %c2_104] : memref<4x18x18xf32, #tpu.memory_space<vmem>>, vector<1x16x16xf32>
    %377 = vector.shape_cast %376 : vector<1x16x16xf32> to vector<16x16xf32>
    %c17 = arith.constant 17 : index
    %378 = memref.load %arg2[%c17] : memref<144xf32, #tpu.memory_space<smem>>
    %379 = vector.broadcast %378 : f32 to vector<16x16xf32>
    %380 = arith.mulf %377, %379 : vector<16x16xf32>
    %381 = arith.addf %363, %380 : vector<16x16xf32>
    %c53 = arith.constant 53 : index
    %382 = memref.load %arg2[%c53] : memref<144xf32, #tpu.memory_space<smem>>
    %383 = vector.broadcast %382 : f32 to vector<16x16xf32>
    %384 = arith.mulf %377, %383 : vector<16x16xf32>
    %385 = arith.addf %367, %384 : vector<16x16xf32>
    %c89 = arith.constant 89 : index
    %386 = memref.load %arg2[%c89] : memref<144xf32, #tpu.memory_space<smem>>
    %387 = vector.broadcast %386 : f32 to vector<16x16xf32>
    %388 = arith.mulf %377, %387 : vector<16x16xf32>
    %389 = arith.addf %371, %388 : vector<16x16xf32>
    %c125 = arith.constant 125 : index
    %390 = memref.load %arg2[%c125] : memref<144xf32, #tpu.memory_space<smem>>
    %391 = vector.broadcast %390 : f32 to vector<16x16xf32>
    %392 = arith.mulf %377, %391 : vector<16x16xf32>
    %393 = arith.addf %375, %392 : vector<16x16xf32>
    %c2_105 = arith.constant 2 : index
    %c0_106 = arith.constant 0 : index
    %c0_107 = arith.constant 0 : index
    %394 = vector.load %arg8[%c2_105, %c0_106, %c0_107] : memref<4x18x18xf32, #tpu.memory_space<vmem>>, vector<1x16x16xf32>
    %395 = vector.shape_cast %394 : vector<1x16x16xf32> to vector<16x16xf32>
    %c18 = arith.constant 18 : index
    %396 = memref.load %arg2[%c18] : memref<144xf32, #tpu.memory_space<smem>>
    %397 = vector.broadcast %396 : f32 to vector<16x16xf32>
    %398 = arith.mulf %395, %397 : vector<16x16xf32>
    %399 = arith.addf %381, %398 : vector<16x16xf32>
    %c54 = arith.constant 54 : index
    %400 = memref.load %arg2[%c54] : memref<144xf32, #tpu.memory_space<smem>>
    %401 = vector.broadcast %400 : f32 to vector<16x16xf32>
    %402 = arith.mulf %395, %401 : vector<16x16xf32>
    %403 = arith.addf %385, %402 : vector<16x16xf32>
    %c90 = arith.constant 90 : index
    %404 = memref.load %arg2[%c90] : memref<144xf32, #tpu.memory_space<smem>>
    %405 = vector.broadcast %404 : f32 to vector<16x16xf32>
    %406 = arith.mulf %395, %405 : vector<16x16xf32>
    %407 = arith.addf %389, %406 : vector<16x16xf32>
    %c126 = arith.constant 126 : index
    %408 = memref.load %arg2[%c126] : memref<144xf32, #tpu.memory_space<smem>>
    %409 = vector.broadcast %408 : f32 to vector<16x16xf32>
    %410 = arith.mulf %395, %409 : vector<16x16xf32>
    %411 = arith.addf %393, %410 : vector<16x16xf32>
    %c2_108 = arith.constant 2 : index
    %c0_109 = arith.constant 0 : index
    %c1_110 = arith.constant 1 : index
    %412 = vector.load %arg8[%c2_108, %c0_109, %c1_110] : memref<4x18x18xf32, #tpu.memory_space<vmem>>, vector<1x16x16xf32>
    %413 = vector.shape_cast %412 : vector<1x16x16xf32> to vector<16x16xf32>
    %c19 = arith.constant 19 : index
    %414 = memref.load %arg2[%c19] : memref<144xf32, #tpu.memory_space<smem>>
    %415 = vector.broadcast %414 : f32 to vector<16x16xf32>
    %416 = arith.mulf %413, %415 : vector<16x16xf32>
    %417 = arith.addf %399, %416 : vector<16x16xf32>
    %c55 = arith.constant 55 : index
    %418 = memref.load %arg2[%c55] : memref<144xf32, #tpu.memory_space<smem>>
    %419 = vector.broadcast %418 : f32 to vector<16x16xf32>
    %420 = arith.mulf %413, %419 : vector<16x16xf32>
    %421 = arith.addf %403, %420 : vector<16x16xf32>
    %c91 = arith.constant 91 : index
    %422 = memref.load %arg2[%c91] : memref<144xf32, #tpu.memory_space<smem>>
    %423 = vector.broadcast %422 : f32 to vector<16x16xf32>
    %424 = arith.mulf %413, %423 : vector<16x16xf32>
    %425 = arith.addf %407, %424 : vector<16x16xf32>
    %c127 = arith.constant 127 : index
    %426 = memref.load %arg2[%c127] : memref<144xf32, #tpu.memory_space<smem>>
    %427 = vector.broadcast %426 : f32 to vector<16x16xf32>
    %428 = arith.mulf %413, %427 : vector<16x16xf32>
    %429 = arith.addf %411, %428 : vector<16x16xf32>
    %c2_111 = arith.constant 2 : index
    %c0_112 = arith.constant 0 : index
    %c2_113 = arith.constant 2 : index
    %430 = vector.load %arg8[%c2_111, %c0_112, %c2_113] : memref<4x18x18xf32, #tpu.memory_space<vmem>>, vector<1x16x16xf32>
    %431 = vector.shape_cast %430 : vector<1x16x16xf32> to vector<16x16xf32>
    %c20 = arith.constant 20 : index
    %432 = memref.load %arg2[%c20] : memref<144xf32, #tpu.memory_space<smem>>
    %433 = vector.broadcast %432 : f32 to vector<16x16xf32>
    %434 = arith.mulf %431, %433 : vector<16x16xf32>
    %435 = arith.addf %417, %434 : vector<16x16xf32>
    %c56 = arith.constant 56 : index
    %436 = memref.load %arg2[%c56] : memref<144xf32, #tpu.memory_space<smem>>
    %437 = vector.broadcast %436 : f32 to vector<16x16xf32>
    %438 = arith.mulf %431, %437 : vector<16x16xf32>
    %439 = arith.addf %421, %438 : vector<16x16xf32>
    %c92 = arith.constant 92 : index
    %440 = memref.load %arg2[%c92] : memref<144xf32, #tpu.memory_space<smem>>
    %441 = vector.broadcast %440 : f32 to vector<16x16xf32>
    %442 = arith.mulf %431, %441 : vector<16x16xf32>
    %443 = arith.addf %425, %442 : vector<16x16xf32>
    %c128 = arith.constant 128 : index
    %444 = memref.load %arg2[%c128] : memref<144xf32, #tpu.memory_space<smem>>
    %445 = vector.broadcast %444 : f32 to vector<16x16xf32>
    %446 = arith.mulf %431, %445 : vector<16x16xf32>
    %447 = arith.addf %429, %446 : vector<16x16xf32>
    %c2_114 = arith.constant 2 : index
    %c1_115 = arith.constant 1 : index
    %c0_116 = arith.constant 0 : index
    %448 = vector.load %arg8[%c2_114, %c1_115, %c0_116] : memref<4x18x18xf32, #tpu.memory_space<vmem>>, vector<1x16x16xf32>
    %449 = vector.shape_cast %448 : vector<1x16x16xf32> to vector<16x16xf32>
    %c21 = arith.constant 21 : index
    %450 = memref.load %arg2[%c21] : memref<144xf32, #tpu.memory_space<smem>>
    %451 = vector.broadcast %450 : f32 to vector<16x16xf32>
    %452 = arith.mulf %449, %451 : vector<16x16xf32>
    %453 = arith.addf %435, %452 : vector<16x16xf32>
    %c57 = arith.constant 57 : index
    %454 = memref.load %arg2[%c57] : memref<144xf32, #tpu.memory_space<smem>>
    %455 = vector.broadcast %454 : f32 to vector<16x16xf32>
    %456 = arith.mulf %449, %455 : vector<16x16xf32>
    %457 = arith.addf %439, %456 : vector<16x16xf32>
    %c93 = arith.constant 93 : index
    %458 = memref.load %arg2[%c93] : memref<144xf32, #tpu.memory_space<smem>>
    %459 = vector.broadcast %458 : f32 to vector<16x16xf32>
    %460 = arith.mulf %449, %459 : vector<16x16xf32>
    %461 = arith.addf %443, %460 : vector<16x16xf32>
    %c129 = arith.constant 129 : index
    %462 = memref.load %arg2[%c129] : memref<144xf32, #tpu.memory_space<smem>>
    %463 = vector.broadcast %462 : f32 to vector<16x16xf32>
    %464 = arith.mulf %449, %463 : vector<16x16xf32>
    %465 = arith.addf %447, %464 : vector<16x16xf32>
    %c2_117 = arith.constant 2 : index
    %c1_118 = arith.constant 1 : index
    %c1_119 = arith.constant 1 : index
    %466 = vector.load %arg8[%c2_117, %c1_118, %c1_119] : memref<4x18x18xf32, #tpu.memory_space<vmem>>, vector<1x16x16xf32>
    %467 = vector.shape_cast %466 : vector<1x16x16xf32> to vector<16x16xf32>
    %c22 = arith.constant 22 : index
    %468 = memref.load %arg2[%c22] : memref<144xf32, #tpu.memory_space<smem>>
    %469 = vector.broadcast %468 : f32 to vector<16x16xf32>
    %470 = arith.mulf %467, %469 : vector<16x16xf32>
    %471 = arith.addf %453, %470 : vector<16x16xf32>
    %c58 = arith.constant 58 : index
    %472 = memref.load %arg2[%c58] : memref<144xf32, #tpu.memory_space<smem>>
    %473 = vector.broadcast %472 : f32 to vector<16x16xf32>
    %474 = arith.mulf %467, %473 : vector<16x16xf32>
    %475 = arith.addf %457, %474 : vector<16x16xf32>
    %c94 = arith.constant 94 : index
    %476 = memref.load %arg2[%c94] : memref<144xf32, #tpu.memory_space<smem>>
    %477 = vector.broadcast %476 : f32 to vector<16x16xf32>
    %478 = arith.mulf %467, %477 : vector<16x16xf32>
    %479 = arith.addf %461, %478 : vector<16x16xf32>
    %c130 = arith.constant 130 : index
    %480 = memref.load %arg2[%c130] : memref<144xf32, #tpu.memory_space<smem>>
    %481 = vector.broadcast %480 : f32 to vector<16x16xf32>
    %482 = arith.mulf %467, %481 : vector<16x16xf32>
    %483 = arith.addf %465, %482 : vector<16x16xf32>
    %c2_120 = arith.constant 2 : index
    %c1_121 = arith.constant 1 : index
    %c2_122 = arith.constant 2 : index
    %484 = vector.load %arg8[%c2_120, %c1_121, %c2_122] : memref<4x18x18xf32, #tpu.memory_space<vmem>>, vector<1x16x16xf32>
    %485 = vector.shape_cast %484 : vector<1x16x16xf32> to vector<16x16xf32>
    %c23 = arith.constant 23 : index
    %486 = memref.load %arg2[%c23] : memref<144xf32, #tpu.memory_space<smem>>
    %487 = vector.broadcast %486 : f32 to vector<16x16xf32>
    %488 = arith.mulf %485, %487 : vector<16x16xf32>
    %489 = arith.addf %471, %488 : vector<16x16xf32>
    %c59 = arith.constant 59 : index
    %490 = memref.load %arg2[%c59] : memref<144xf32, #tpu.memory_space<smem>>
    %491 = vector.broadcast %490 : f32 to vector<16x16xf32>
    %492 = arith.mulf %485, %491 : vector<16x16xf32>
    %493 = arith.addf %475, %492 : vector<16x16xf32>
    %c95 = arith.constant 95 : index
    %494 = memref.load %arg2[%c95] : memref<144xf32, #tpu.memory_space<smem>>
    %495 = vector.broadcast %494 : f32 to vector<16x16xf32>
    %496 = arith.mulf %485, %495 : vector<16x16xf32>
    %497 = arith.addf %479, %496 : vector<16x16xf32>
    %c131 = arith.constant 131 : index
    %498 = memref.load %arg2[%c131] : memref<144xf32, #tpu.memory_space<smem>>
    %499 = vector.broadcast %498 : f32 to vector<16x16xf32>
    %500 = arith.mulf %485, %499 : vector<16x16xf32>
    %501 = arith.addf %483, %500 : vector<16x16xf32>
    %c2_123 = arith.constant 2 : index
    %c2_124 = arith.constant 2 : index
    %c0_125 = arith.constant 0 : index
    %502 = vector.load %arg8[%c2_123, %c2_124, %c0_125] : memref<4x18x18xf32, #tpu.memory_space<vmem>>, vector<1x16x16xf32>
    %503 = vector.shape_cast %502 : vector<1x16x16xf32> to vector<16x16xf32>
    %c24 = arith.constant 24 : index
    %504 = memref.load %arg2[%c24] : memref<144xf32, #tpu.memory_space<smem>>
    %505 = vector.broadcast %504 : f32 to vector<16x16xf32>
    %506 = arith.mulf %503, %505 : vector<16x16xf32>
    %507 = arith.addf %489, %506 : vector<16x16xf32>
    %c60 = arith.constant 60 : index
    %508 = memref.load %arg2[%c60] : memref<144xf32, #tpu.memory_space<smem>>
    %509 = vector.broadcast %508 : f32 to vector<16x16xf32>
    %510 = arith.mulf %503, %509 : vector<16x16xf32>
    %511 = arith.addf %493, %510 : vector<16x16xf32>
    %c96 = arith.constant 96 : index
    %512 = memref.load %arg2[%c96] : memref<144xf32, #tpu.memory_space<smem>>
    %513 = vector.broadcast %512 : f32 to vector<16x16xf32>
    %514 = arith.mulf %503, %513 : vector<16x16xf32>
    %515 = arith.addf %497, %514 : vector<16x16xf32>
    %c132 = arith.constant 132 : index
    %516 = memref.load %arg2[%c132] : memref<144xf32, #tpu.memory_space<smem>>
    %517 = vector.broadcast %516 : f32 to vector<16x16xf32>
    %518 = arith.mulf %503, %517 : vector<16x16xf32>
    %519 = arith.addf %501, %518 : vector<16x16xf32>
    %c2_126 = arith.constant 2 : index
    %c2_127 = arith.constant 2 : index
    %c1_128 = arith.constant 1 : index
    %520 = vector.load %arg8[%c2_126, %c2_127, %c1_128] : memref<4x18x18xf32, #tpu.memory_space<vmem>>, vector<1x16x16xf32>
    %521 = vector.shape_cast %520 : vector<1x16x16xf32> to vector<16x16xf32>
    %c25 = arith.constant 25 : index
    %522 = memref.load %arg2[%c25] : memref<144xf32, #tpu.memory_space<smem>>
    %523 = vector.broadcast %522 : f32 to vector<16x16xf32>
    %524 = arith.mulf %521, %523 : vector<16x16xf32>
    %525 = arith.addf %507, %524 : vector<16x16xf32>
    %c61 = arith.constant 61 : index
    %526 = memref.load %arg2[%c61] : memref<144xf32, #tpu.memory_space<smem>>
    %527 = vector.broadcast %526 : f32 to vector<16x16xf32>
    %528 = arith.mulf %521, %527 : vector<16x16xf32>
    %529 = arith.addf %511, %528 : vector<16x16xf32>
    %c97 = arith.constant 97 : index
    %530 = memref.load %arg2[%c97] : memref<144xf32, #tpu.memory_space<smem>>
    %531 = vector.broadcast %530 : f32 to vector<16x16xf32>
    %532 = arith.mulf %521, %531 : vector<16x16xf32>
    %533 = arith.addf %515, %532 : vector<16x16xf32>
    %c133 = arith.constant 133 : index
    %534 = memref.load %arg2[%c133] : memref<144xf32, #tpu.memory_space<smem>>
    %535 = vector.broadcast %534 : f32 to vector<16x16xf32>
    %536 = arith.mulf %521, %535 : vector<16x16xf32>
    %537 = arith.addf %519, %536 : vector<16x16xf32>
    %c2_129 = arith.constant 2 : index
    %c2_130 = arith.constant 2 : index
    %c2_131 = arith.constant 2 : index
    %538 = vector.load %arg8[%c2_129, %c2_130, %c2_131] : memref<4x18x18xf32, #tpu.memory_space<vmem>>, vector<1x16x16xf32>
    %539 = vector.shape_cast %538 : vector<1x16x16xf32> to vector<16x16xf32>
    %c26 = arith.constant 26 : index
    %540 = memref.load %arg2[%c26] : memref<144xf32, #tpu.memory_space<smem>>
    %541 = vector.broadcast %540 : f32 to vector<16x16xf32>
    %542 = arith.mulf %539, %541 : vector<16x16xf32>
    %543 = arith.addf %525, %542 : vector<16x16xf32>
    %c62 = arith.constant 62 : index
    %544 = memref.load %arg2[%c62] : memref<144xf32, #tpu.memory_space<smem>>
    %545 = vector.broadcast %544 : f32 to vector<16x16xf32>
    %546 = arith.mulf %539, %545 : vector<16x16xf32>
    %547 = arith.addf %529, %546 : vector<16x16xf32>
    %c98 = arith.constant 98 : index
    %548 = memref.load %arg2[%c98] : memref<144xf32, #tpu.memory_space<smem>>
    %549 = vector.broadcast %548 : f32 to vector<16x16xf32>
    %550 = arith.mulf %539, %549 : vector<16x16xf32>
    %551 = arith.addf %533, %550 : vector<16x16xf32>
    %c134 = arith.constant 134 : index
    %552 = memref.load %arg2[%c134] : memref<144xf32, #tpu.memory_space<smem>>
    %553 = vector.broadcast %552 : f32 to vector<16x16xf32>
    %554 = arith.mulf %539, %553 : vector<16x16xf32>
    %555 = arith.addf %537, %554 : vector<16x16xf32>
    %c3_132 = arith.constant 3 : index
    %c0_133 = arith.constant 0 : index
    %c0_134 = arith.constant 0 : index
    %556 = vector.load %arg8[%c3_132, %c0_133, %c0_134] : memref<4x18x18xf32, #tpu.memory_space<vmem>>, vector<1x16x16xf32>
    %557 = vector.shape_cast %556 : vector<1x16x16xf32> to vector<16x16xf32>
    %c27 = arith.constant 27 : index
    %558 = memref.load %arg2[%c27] : memref<144xf32, #tpu.memory_space<smem>>
    %559 = vector.broadcast %558 : f32 to vector<16x16xf32>
    %560 = arith.mulf %557, %559 : vector<16x16xf32>
    %561 = arith.addf %543, %560 : vector<16x16xf32>
    %c63 = arith.constant 63 : index
    %562 = memref.load %arg2[%c63] : memref<144xf32, #tpu.memory_space<smem>>
    %563 = vector.broadcast %562 : f32 to vector<16x16xf32>
    %564 = arith.mulf %557, %563 : vector<16x16xf32>
    %565 = arith.addf %547, %564 : vector<16x16xf32>
    %c99 = arith.constant 99 : index
    %566 = memref.load %arg2[%c99] : memref<144xf32, #tpu.memory_space<smem>>
    %567 = vector.broadcast %566 : f32 to vector<16x16xf32>
    %568 = arith.mulf %557, %567 : vector<16x16xf32>
    %569 = arith.addf %551, %568 : vector<16x16xf32>
    %c135 = arith.constant 135 : index
    %570 = memref.load %arg2[%c135] : memref<144xf32, #tpu.memory_space<smem>>
    %571 = vector.broadcast %570 : f32 to vector<16x16xf32>
    %572 = arith.mulf %557, %571 : vector<16x16xf32>
    %573 = arith.addf %555, %572 : vector<16x16xf32>
    %c3_135 = arith.constant 3 : index
    %c0_136 = arith.constant 0 : index
    %c1_137 = arith.constant 1 : index
    %574 = vector.load %arg8[%c3_135, %c0_136, %c1_137] : memref<4x18x18xf32, #tpu.memory_space<vmem>>, vector<1x16x16xf32>
    %575 = vector.shape_cast %574 : vector<1x16x16xf32> to vector<16x16xf32>
    %c28 = arith.constant 28 : index
    %576 = memref.load %arg2[%c28] : memref<144xf32, #tpu.memory_space<smem>>
    %577 = vector.broadcast %576 : f32 to vector<16x16xf32>
    %578 = arith.mulf %575, %577 : vector<16x16xf32>
    %579 = arith.addf %561, %578 : vector<16x16xf32>
    %c64 = arith.constant 64 : index
    %580 = memref.load %arg2[%c64] : memref<144xf32, #tpu.memory_space<smem>>
    %581 = vector.broadcast %580 : f32 to vector<16x16xf32>
    %582 = arith.mulf %575, %581 : vector<16x16xf32>
    %583 = arith.addf %565, %582 : vector<16x16xf32>
    %c100 = arith.constant 100 : index
    %584 = memref.load %arg2[%c100] : memref<144xf32, #tpu.memory_space<smem>>
    %585 = vector.broadcast %584 : f32 to vector<16x16xf32>
    %586 = arith.mulf %575, %585 : vector<16x16xf32>
    %587 = arith.addf %569, %586 : vector<16x16xf32>
    %c136 = arith.constant 136 : index
    %588 = memref.load %arg2[%c136] : memref<144xf32, #tpu.memory_space<smem>>
    %589 = vector.broadcast %588 : f32 to vector<16x16xf32>
    %590 = arith.mulf %575, %589 : vector<16x16xf32>
    %591 = arith.addf %573, %590 : vector<16x16xf32>
    %c3_138 = arith.constant 3 : index
    %c0_139 = arith.constant 0 : index
    %c2_140 = arith.constant 2 : index
    %592 = vector.load %arg8[%c3_138, %c0_139, %c2_140] : memref<4x18x18xf32, #tpu.memory_space<vmem>>, vector<1x16x16xf32>
    %593 = vector.shape_cast %592 : vector<1x16x16xf32> to vector<16x16xf32>
    %c29 = arith.constant 29 : index
    %594 = memref.load %arg2[%c29] : memref<144xf32, #tpu.memory_space<smem>>
    %595 = vector.broadcast %594 : f32 to vector<16x16xf32>
    %596 = arith.mulf %593, %595 : vector<16x16xf32>
    %597 = arith.addf %579, %596 : vector<16x16xf32>
    %c65 = arith.constant 65 : index
    %598 = memref.load %arg2[%c65] : memref<144xf32, #tpu.memory_space<smem>>
    %599 = vector.broadcast %598 : f32 to vector<16x16xf32>
    %600 = arith.mulf %593, %599 : vector<16x16xf32>
    %601 = arith.addf %583, %600 : vector<16x16xf32>
    %c101 = arith.constant 101 : index
    %602 = memref.load %arg2[%c101] : memref<144xf32, #tpu.memory_space<smem>>
    %603 = vector.broadcast %602 : f32 to vector<16x16xf32>
    %604 = arith.mulf %593, %603 : vector<16x16xf32>
    %605 = arith.addf %587, %604 : vector<16x16xf32>
    %c137 = arith.constant 137 : index
    %606 = memref.load %arg2[%c137] : memref<144xf32, #tpu.memory_space<smem>>
    %607 = vector.broadcast %606 : f32 to vector<16x16xf32>
    %608 = arith.mulf %593, %607 : vector<16x16xf32>
    %609 = arith.addf %591, %608 : vector<16x16xf32>
    %c3_141 = arith.constant 3 : index
    %c1_142 = arith.constant 1 : index
    %c0_143 = arith.constant 0 : index
    %610 = vector.load %arg8[%c3_141, %c1_142, %c0_143] : memref<4x18x18xf32, #tpu.memory_space<vmem>>, vector<1x16x16xf32>
    %611 = vector.shape_cast %610 : vector<1x16x16xf32> to vector<16x16xf32>
    %c30 = arith.constant 30 : index
    %612 = memref.load %arg2[%c30] : memref<144xf32, #tpu.memory_space<smem>>
    %613 = vector.broadcast %612 : f32 to vector<16x16xf32>
    %614 = arith.mulf %611, %613 : vector<16x16xf32>
    %615 = arith.addf %597, %614 : vector<16x16xf32>
    %c66 = arith.constant 66 : index
    %616 = memref.load %arg2[%c66] : memref<144xf32, #tpu.memory_space<smem>>
    %617 = vector.broadcast %616 : f32 to vector<16x16xf32>
    %618 = arith.mulf %611, %617 : vector<16x16xf32>
    %619 = arith.addf %601, %618 : vector<16x16xf32>
    %c102 = arith.constant 102 : index
    %620 = memref.load %arg2[%c102] : memref<144xf32, #tpu.memory_space<smem>>
    %621 = vector.broadcast %620 : f32 to vector<16x16xf32>
    %622 = arith.mulf %611, %621 : vector<16x16xf32>
    %623 = arith.addf %605, %622 : vector<16x16xf32>
    %c138 = arith.constant 138 : index
    %624 = memref.load %arg2[%c138] : memref<144xf32, #tpu.memory_space<smem>>
    %625 = vector.broadcast %624 : f32 to vector<16x16xf32>
    %626 = arith.mulf %611, %625 : vector<16x16xf32>
    %627 = arith.addf %609, %626 : vector<16x16xf32>
    %c3_144 = arith.constant 3 : index
    %c1_145 = arith.constant 1 : index
    %c1_146 = arith.constant 1 : index
    %628 = vector.load %arg8[%c3_144, %c1_145, %c1_146] : memref<4x18x18xf32, #tpu.memory_space<vmem>>, vector<1x16x16xf32>
    %629 = vector.shape_cast %628 : vector<1x16x16xf32> to vector<16x16xf32>
    %c31 = arith.constant 31 : index
    %630 = memref.load %arg2[%c31] : memref<144xf32, #tpu.memory_space<smem>>
    %631 = vector.broadcast %630 : f32 to vector<16x16xf32>
    %632 = arith.mulf %629, %631 : vector<16x16xf32>
    %633 = arith.addf %615, %632 : vector<16x16xf32>
    %c67 = arith.constant 67 : index
    %634 = memref.load %arg2[%c67] : memref<144xf32, #tpu.memory_space<smem>>
    %635 = vector.broadcast %634 : f32 to vector<16x16xf32>
    %636 = arith.mulf %629, %635 : vector<16x16xf32>
    %637 = arith.addf %619, %636 : vector<16x16xf32>
    %c103 = arith.constant 103 : index
    %638 = memref.load %arg2[%c103] : memref<144xf32, #tpu.memory_space<smem>>
    %639 = vector.broadcast %638 : f32 to vector<16x16xf32>
    %640 = arith.mulf %629, %639 : vector<16x16xf32>
    %641 = arith.addf %623, %640 : vector<16x16xf32>
    %c139 = arith.constant 139 : index
    %642 = memref.load %arg2[%c139] : memref<144xf32, #tpu.memory_space<smem>>
    %643 = vector.broadcast %642 : f32 to vector<16x16xf32>
    %644 = arith.mulf %629, %643 : vector<16x16xf32>
    %645 = arith.addf %627, %644 : vector<16x16xf32>
    %c3_147 = arith.constant 3 : index
    %c1_148 = arith.constant 1 : index
    %c2_149 = arith.constant 2 : index
    %646 = vector.load %arg8[%c3_147, %c1_148, %c2_149] : memref<4x18x18xf32, #tpu.memory_space<vmem>>, vector<1x16x16xf32>
    %647 = vector.shape_cast %646 : vector<1x16x16xf32> to vector<16x16xf32>
    %c32 = arith.constant 32 : index
    %648 = memref.load %arg2[%c32] : memref<144xf32, #tpu.memory_space<smem>>
    %649 = vector.broadcast %648 : f32 to vector<16x16xf32>
    %650 = arith.mulf %647, %649 : vector<16x16xf32>
    %651 = arith.addf %633, %650 : vector<16x16xf32>
    %c68 = arith.constant 68 : index
    %652 = memref.load %arg2[%c68] : memref<144xf32, #tpu.memory_space<smem>>
    %653 = vector.broadcast %652 : f32 to vector<16x16xf32>
    %654 = arith.mulf %647, %653 : vector<16x16xf32>
    %655 = arith.addf %637, %654 : vector<16x16xf32>
    %c104 = arith.constant 104 : index
    %656 = memref.load %arg2[%c104] : memref<144xf32, #tpu.memory_space<smem>>
    %657 = vector.broadcast %656 : f32 to vector<16x16xf32>
    %658 = arith.mulf %647, %657 : vector<16x16xf32>
    %659 = arith.addf %641, %658 : vector<16x16xf32>
    %c140 = arith.constant 140 : index
    %660 = memref.load %arg2[%c140] : memref<144xf32, #tpu.memory_space<smem>>
    %661 = vector.broadcast %660 : f32 to vector<16x16xf32>
    %662 = arith.mulf %647, %661 : vector<16x16xf32>
    %663 = arith.addf %645, %662 : vector<16x16xf32>
    %c3_150 = arith.constant 3 : index
    %c2_151 = arith.constant 2 : index
    %c0_152 = arith.constant 0 : index
    %664 = vector.load %arg8[%c3_150, %c2_151, %c0_152] : memref<4x18x18xf32, #tpu.memory_space<vmem>>, vector<1x16x16xf32>
    %665 = vector.shape_cast %664 : vector<1x16x16xf32> to vector<16x16xf32>
    %c33 = arith.constant 33 : index
    %666 = memref.load %arg2[%c33] : memref<144xf32, #tpu.memory_space<smem>>
    %667 = vector.broadcast %666 : f32 to vector<16x16xf32>
    %668 = arith.mulf %665, %667 : vector<16x16xf32>
    %669 = arith.addf %651, %668 : vector<16x16xf32>
    %c69 = arith.constant 69 : index
    %670 = memref.load %arg2[%c69] : memref<144xf32, #tpu.memory_space<smem>>
    %671 = vector.broadcast %670 : f32 to vector<16x16xf32>
    %672 = arith.mulf %665, %671 : vector<16x16xf32>
    %673 = arith.addf %655, %672 : vector<16x16xf32>
    %c105 = arith.constant 105 : index
    %674 = memref.load %arg2[%c105] : memref<144xf32, #tpu.memory_space<smem>>
    %675 = vector.broadcast %674 : f32 to vector<16x16xf32>
    %676 = arith.mulf %665, %675 : vector<16x16xf32>
    %677 = arith.addf %659, %676 : vector<16x16xf32>
    %c141 = arith.constant 141 : index
    %678 = memref.load %arg2[%c141] : memref<144xf32, #tpu.memory_space<smem>>
    %679 = vector.broadcast %678 : f32 to vector<16x16xf32>
    %680 = arith.mulf %665, %679 : vector<16x16xf32>
    %681 = arith.addf %663, %680 : vector<16x16xf32>
    %c3_153 = arith.constant 3 : index
    %c2_154 = arith.constant 2 : index
    %c1_155 = arith.constant 1 : index
    %682 = vector.load %arg8[%c3_153, %c2_154, %c1_155] : memref<4x18x18xf32, #tpu.memory_space<vmem>>, vector<1x16x16xf32>
    %683 = vector.shape_cast %682 : vector<1x16x16xf32> to vector<16x16xf32>
    %c34 = arith.constant 34 : index
    %684 = memref.load %arg2[%c34] : memref<144xf32, #tpu.memory_space<smem>>
    %685 = vector.broadcast %684 : f32 to vector<16x16xf32>
    %686 = arith.mulf %683, %685 : vector<16x16xf32>
    %687 = arith.addf %669, %686 : vector<16x16xf32>
    %c70 = arith.constant 70 : index
    %688 = memref.load %arg2[%c70] : memref<144xf32, #tpu.memory_space<smem>>
    %689 = vector.broadcast %688 : f32 to vector<16x16xf32>
    %690 = arith.mulf %683, %689 : vector<16x16xf32>
    %691 = arith.addf %673, %690 : vector<16x16xf32>
    %c106 = arith.constant 106 : index
    %692 = memref.load %arg2[%c106] : memref<144xf32, #tpu.memory_space<smem>>
    %693 = vector.broadcast %692 : f32 to vector<16x16xf32>
    %694 = arith.mulf %683, %693 : vector<16x16xf32>
    %695 = arith.addf %677, %694 : vector<16x16xf32>
    %c142 = arith.constant 142 : index
    %696 = memref.load %arg2[%c142] : memref<144xf32, #tpu.memory_space<smem>>
    %697 = vector.broadcast %696 : f32 to vector<16x16xf32>
    %698 = arith.mulf %683, %697 : vector<16x16xf32>
    %699 = arith.addf %681, %698 : vector<16x16xf32>
    %c3_156 = arith.constant 3 : index
    %c2_157 = arith.constant 2 : index
    %c2_158 = arith.constant 2 : index
    %700 = vector.load %arg8[%c3_156, %c2_157, %c2_158] : memref<4x18x18xf32, #tpu.memory_space<vmem>>, vector<1x16x16xf32>
    %701 = vector.shape_cast %700 : vector<1x16x16xf32> to vector<16x16xf32>
    %c35 = arith.constant 35 : index
    %702 = memref.load %arg2[%c35] : memref<144xf32, #tpu.memory_space<smem>>
    %703 = vector.broadcast %702 : f32 to vector<16x16xf32>
    %704 = arith.mulf %701, %703 : vector<16x16xf32>
    %705 = arith.addf %687, %704 : vector<16x16xf32>
    %c71 = arith.constant 71 : index
    %706 = memref.load %arg2[%c71] : memref<144xf32, #tpu.memory_space<smem>>
    %707 = vector.broadcast %706 : f32 to vector<16x16xf32>
    %708 = arith.mulf %701, %707 : vector<16x16xf32>
    %709 = arith.addf %691, %708 : vector<16x16xf32>
    %c107 = arith.constant 107 : index
    %710 = memref.load %arg2[%c107] : memref<144xf32, #tpu.memory_space<smem>>
    %711 = vector.broadcast %710 : f32 to vector<16x16xf32>
    %712 = arith.mulf %701, %711 : vector<16x16xf32>
    %713 = arith.addf %695, %712 : vector<16x16xf32>
    %c143 = arith.constant 143 : index
    %714 = memref.load %arg2[%c143] : memref<144xf32, #tpu.memory_space<smem>>
    %715 = vector.broadcast %714 : f32 to vector<16x16xf32>
    %716 = arith.mulf %701, %715 : vector<16x16xf32>
    %717 = arith.addf %699, %716 : vector<16x16xf32>
    %c0_159 = arith.constant 0 : index
    %718 = memref.load %arg3[%c0_159] : memref<4xf32, #tpu.memory_space<smem>>
    %719 = vector.broadcast %718 : f32 to vector<16x16xf32>
    %720 = arith.addf %705, %719 : vector<16x16xf32>
    %c0_160 = arith.constant 0 : index
    %c0_161 = arith.constant 0 : index
    %c0_162 = arith.constant 0 : index
    %c0_163 = arith.constant 0 : index
    %721 = vector.load %arg6[%c0_160, %c0_161, %c0_162, %c0_163] : memref<1x4x16x16xf32, #tpu.memory_space<vmem>>, vector<1x1x16x16xf32>
    %722 = vector.shape_cast %721 : vector<1x1x16x16xf32> to vector<16x16xf32>
    %723 = vector.shape_cast %720 : vector<16x16xf32> to vector<1x1x16x16xf32>
    tpu.vector_store %arg6[%c0_160, %c0_161, %c0_162, %c0_163], %723 {strides = array<i32>} : memref<1x4x16x16xf32, #tpu.memory_space<vmem>>, vector<1x1x16x16xf32>,
    %cst_164 = arith.constant dense<0.000000e+00> : vector<16xf32>
    %724 = vector.multi_reduction <add>, %705, %cst_164 [1] : vector<16x16xf32> to vector<16xf32>
    %725 = vector.shape_cast %724 : vector<16xf32> to vector<16x1xf32>
    %cst_165 = arith.constant dense<0.000000e+00> : vector<1xf32>
    %726 = vector.multi_reduction <add>, %725, %cst_165 [0] : vector<16x1xf32> to vector<1xf32>
    %727 = vector.shape_cast %726 : vector<1xf32> to vector<1x1xf32>
    %c1_166 = arith.constant 1 : index
    %728 = memref.load %arg3[%c1_166] : memref<4xf32, #tpu.memory_space<smem>>
    %729 = vector.broadcast %728 : f32 to vector<16x16xf32>
    %730 = arith.addf %709, %729 : vector<16x16xf32>
    %c0_167 = arith.constant 0 : index
    %c1_168 = arith.constant 1 : index
    %c0_169 = arith.constant 0 : index
    %c0_170 = arith.constant 0 : index
    %731 = vector.load %arg6[%c0_167, %c1_168, %c0_169, %c0_170] : memref<1x4x16x16xf32, #tpu.memory_space<vmem>>, vector<1x1x16x16xf32>
    %732 = vector.shape_cast %731 : vector<1x1x16x16xf32> to vector<16x16xf32>
    %733 = vector.shape_cast %730 : vector<16x16xf32> to vector<1x1x16x16xf32>
    tpu.vector_store %arg6[%c0_167, %c1_168, %c0_169, %c0_170], %733 {strides = array<i32>} : memref<1x4x16x16xf32, #tpu.memory_space<vmem>>, vector<1x1x16x16xf32>,
    %cst_171 = arith.constant dense<0.000000e+00> : vector<16xf32>
    %734 = vector.multi_reduction <add>, %709, %cst_171 [1] : vector<16x16xf32> to vector<16xf32>
    %735 = vector.shape_cast %734 : vector<16xf32> to vector<16x1xf32>
    %cst_172 = arith.constant dense<0.000000e+00> : vector<1xf32>
    %736 = vector.multi_reduction <add>, %735, %cst_172 [0] : vector<16x1xf32> to vector<1xf32>
    %737 = vector.shape_cast %736 : vector<1xf32> to vector<1x1xf32>
    %c2_173 = arith.constant 2 : index
    %738 = memref.load %arg3[%c2_173] : memref<4xf32, #tpu.memory_space<smem>>
    %739 = vector.broadcast %738 : f32 to vector<16x16xf32>
    %740 = arith.addf %713, %739 : vector<16x16xf32>
    %c0_174 = arith.constant 0 : index
    %c2_175 = arith.constant 2 : index
    %c0_176 = arith.constant 0 : index
    %c0_177 = arith.constant 0 : index
    %741 = vector.load %arg6[%c0_174, %c2_175, %c0_176, %c0_177] : memref<1x4x16x16xf32, #tpu.memory_space<vmem>>, vector<1x1x16x16xf32>
    %742 = vector.shape_cast %741 : vector<1x1x16x16xf32> to vector<16x16xf32>
    %743 = vector.shape_cast %740 : vector<16x16xf32> to vector<1x1x16x16xf32>
    tpu.vector_store %arg6[%c0_174, %c2_175, %c0_176, %c0_177], %743 {strides = array<i32>} : memref<1x4x16x16xf32, #tpu.memory_space<vmem>>, vector<1x1x16x16xf32>,
    %cst_178 = arith.constant dense<0.000000e+00> : vector<16xf32>
    %744 = vector.multi_reduction <add>, %713, %cst_178 [1] : vector<16x16xf32> to vector<16xf32>
    %745 = vector.shape_cast %744 : vector<16xf32> to vector<16x1xf32>
    %cst_179 = arith.constant dense<0.000000e+00> : vector<1xf32>
    %746 = vector.multi_reduction <add>, %745, %cst_179 [0] : vector<16x1xf32> to vector<1xf32>
    %747 = vector.shape_cast %746 : vector<1xf32> to vector<1x1xf32>
    %c3_180 = arith.constant 3 : index
    %748 = memref.load %arg3[%c3_180] : memref<4xf32, #tpu.memory_space<smem>>
    %749 = vector.broadcast %748 : f32 to vector<16x16xf32>
    %750 = arith.addf %717, %749 : vector<16x16xf32>
    %c0_181 = arith.constant 0 : index
    %c3_182 = arith.constant 3 : index
    %c0_183 = arith.constant 0 : index
    %c0_184 = arith.constant 0 : index
    %751 = vector.load %arg6[%c0_181, %c3_182, %c0_183, %c0_184] : memref<1x4x16x16xf32, #tpu.memory_space<vmem>>, vector<1x1x16x16xf32>
    %752 = vector.shape_cast %751 : vector<1x1x16x16xf32> to vector<16x16xf32>
    %753 = vector.shape_cast %750 : vector<16x16xf32> to vector<1x1x16x16xf32>
    tpu.vector_store %arg6[%c0_181, %c3_182, %c0_183, %c0_184], %753 {strides = array<i32>} : memref<1x4x16x16xf32, #tpu.memory_space<vmem>>, vector<1x1x16x16xf32>,
    %cst_185 = arith.constant dense<0.000000e+00> : vector<16xf32>
    %754 = vector.multi_reduction <add>, %717, %cst_185 [1] : vector<16x16xf32> to vector<16xf32>
    %755 = vector.shape_cast %754 : vector<16xf32> to vector<16x1xf32>
    %cst_186 = arith.constant dense<0.000000e+00> : vector<1xf32>
    %756 = vector.multi_reduction <add>, %755, %cst_186 [0] : vector<16x1xf32> to vector<1xf32>
    %757 = vector.shape_cast %756 : vector<1xf32> to vector<1x1xf32>
    %758 = arith.mulf %705, %705 : vector<16x16xf32>
    %cst_187 = arith.constant dense<0.000000e+00> : vector<16xf32>
    %759 = vector.multi_reduction <add>, %758, %cst_187 [1] : vector<16x16xf32> to vector<16xf32>
    %760 = vector.shape_cast %759 : vector<16xf32> to vector<16x1xf32>
    %cst_188 = arith.constant dense<0.000000e+00> : vector<1xf32>
    %761 = vector.multi_reduction <add>, %760, %cst_188 [0] : vector<16x1xf32> to vector<1xf32>
    %762 = vector.shape_cast %761 : vector<1xf32> to vector<1x1xf32>
    %763 = arith.mulf %709, %709 : vector<16x16xf32>
    %cst_189 = arith.constant dense<0.000000e+00> : vector<16xf32>
    %764 = vector.multi_reduction <add>, %763, %cst_189 [1] : vector<16x16xf32> to vector<16xf32>
    %765 = vector.shape_cast %764 : vector<16xf32> to vector<16x1xf32>
    %cst_190 = arith.constant dense<0.000000e+00> : vector<1xf32>
    %766 = vector.multi_reduction <add>, %765, %cst_190 [0] : vector<16x1xf32> to vector<1xf32>
    %767 = vector.shape_cast %766 : vector<1xf32> to vector<1x1xf32>
    %768 = arith.mulf %713, %713 : vector<16x16xf32>
    %cst_191 = arith.constant dense<0.000000e+00> : vector<16xf32>
    %769 = vector.multi_reduction <add>, %768, %cst_191 [1] : vector<16x16xf32> to vector<16xf32>
    %770 = vector.shape_cast %769 : vector<16xf32> to vector<16x1xf32>
    %cst_192 = arith.constant dense<0.000000e+00> : vector<1xf32>
    %771 = vector.multi_reduction <add>, %770, %cst_192 [0] : vector<16x1xf32> to vector<1xf32>
    %772 = vector.shape_cast %771 : vector<1xf32> to vector<1x1xf32>
    %773 = arith.mulf %717, %717 : vector<16x16xf32>
    %cst_193 = arith.constant dense<0.000000e+00> : vector<16xf32>
    %774 = vector.multi_reduction <add>, %773, %cst_193 [1] : vector<16x16xf32> to vector<16xf32>
    %775 = vector.shape_cast %774 : vector<16xf32> to vector<16x1xf32>
    %cst_194 = arith.constant dense<0.000000e+00> : vector<1xf32>
    %776 = vector.multi_reduction <add>, %775, %cst_194 [0] : vector<16x1xf32> to vector<1xf32>
    %777 = vector.shape_cast %776 : vector<1xf32> to vector<1x1xf32>
    %778 = tpu.concatenate %727, %737, %747, %757, %762, %767, %772, %777 in 1 : vector<1x1xf32>, vector<1x1xf32>, vector<1x1xf32>, vector<1x1xf32>, vector<1x1xf32>, vector<1x1xf32>, vector<1x1xf32>, vector<1x1xf32> -> vector<1x8xf32>
    %779 = vector.shape_cast %778 : vector<1x8xf32> to vector<1x1x8xf32>
    %c0_195 = arith.constant 0 : index
    %c0_196 = arith.constant 0 : index
    %c0_197 = arith.constant 0 : index
    %780 = vector.load %arg7[%c0_195, %c0_196, %c0_197] : memref<1x1x8xf32, #tpu.memory_space<vmem>>, vector<1x1x8xf32>
    tpu.vector_store %arg7[%c0_195, %c0_196, %c0_197], %779 {strides = array<i32>} : memref<1x1x8xf32, #tpu.memory_space<vmem>>, vector<1x1x8xf32>,
    return
  }
  func.func @transform_0(%arg0: i32) -> (i32, i32, i32, i32) {
    %c0_i32 = arith.constant 0 : i32
    %c0_i32_0 = arith.constant 0 : i32
    %c0_i32_1 = arith.constant 0 : i32
    %c0_i32_2 = arith.constant 0 : i32
    return %arg0, %c0_i32, %c0_i32_0, %c0_i32_1 : i32, i32, i32, i32
  }
  func.func @transform_1(%arg0: i32) -> i32 {
    %c0_i32 = arith.constant 0 : i32
    %c0_i32_0 = arith.constant 0 : i32
    return %c0_i32 : i32
  }
  func.func @transform_2(%arg0: i32) -> i32 {
    %c0_i32 = arith.constant 0 : i32
    %c0_i32_0 = arith.constant 0 : i32
    return %c0_i32 : i32
  }
  func.func @transform_3(%arg0: i32) -> i32 {
    %c0_i32 = arith.constant 0 : i32
    %c0_i32_0 = arith.constant 0 : i32
    return %c0_i32 : i32
  }
  func.func @transform_4(%arg0: i32) -> i32 {
    %c0_i32 = arith.constant 0 : i32
    %c0_i32_0 = arith.constant 0 : i32
    return %c0_i32 : i32
  }
  func.func @transform_5(%arg0: i32) -> (i32, i32, i32, i32) {
    %c0_i32 = arith.constant 0 : i32
    %c0_i32_0 = arith.constant 0 : i32
    %c0_i32_1 = arith.constant 0 : i32
    %c0_i32_2 = arith.constant 0 : i32
    return %arg0, %c0_i32, %c0_i32_0, %c0_i32_1 : i32, i32, i32, i32
  }
  func.func @transform_6(%arg0: i32) -> (i32, i32, i32) {
    %c0_i32 = arith.constant 0 : i32
    %c0_i32_0 = arith.constant 0 : i32
    %c0_i32_1 = arith.constant 0 : i32
    return %arg0, %c0_i32, %c0_i32_0 : i32, i32, i32
  }
}

module attributes {stable_mosaic.version = 11 : i64} {
  func.func @bn_add_lrelu_kernel(%arg0: i32, %arg1: memref<1x4x16x16xf32, #tpu.memory_space<vmem>>, %arg2: memref<1x4x16x16xf32, #tpu.memory_space<vmem>>, %arg3: memref<4xf32, #tpu.memory_space<smem>>, %arg4: memref<4xf32, #tpu.memory_space<smem>>, %arg5: memref<1x4x16x16xf32, #tpu.memory_space<vmem>>) attributes {dimension_semantics = [#tpu.dimension_semantics<parallel>], iteration_bounds = array<i64: 2>, scalar_prefetch = 0 : i64, scratch_operands = 0 : i64, tpu.core_type = #tpu.core_type<tc>, window_params = [{transform_indices = @transform_0, window_bounds = array<i64: 1, 4, 16, 16>}, {transform_indices = @transform_1, window_bounds = array<i64: 1, 4, 16, 16>}, {transform_indices = @transform_2, window_bounds = array<i64: 4>}, {transform_indices = @transform_3, window_bounds = array<i64: 4>}, {transform_indices = @transform_4, window_bounds = array<i64: 1, 4, 16, 16>}]} {
    %c0 = arith.constant 0 : index
    %c0_0 = arith.constant 0 : index
    %c0_1 = arith.constant 0 : index
    %c0_2 = arith.constant 0 : index
    %0 = vector.load %arg1[%c0, %c0_0, %c0_1, %c0_2] : memref<1x4x16x16xf32, #tpu.memory_space<vmem>>, vector<1x1x16x16xf32>
    %1 = vector.shape_cast %0 : vector<1x1x16x16xf32> to vector<16x16xf32>
    %c0_3 = arith.constant 0 : index
    %2 = memref.load %arg3[%c0_3] : memref<4xf32, #tpu.memory_space<smem>>
    %3 = vector.broadcast %2 : f32 to vector<16x16xf32>
    %4 = arith.mulf %1, %3 : vector<16x16xf32>
    %c0_4 = arith.constant 0 : index
    %5 = memref.load %arg4[%c0_4] : memref<4xf32, #tpu.memory_space<smem>>
    %6 = vector.broadcast %5 : f32 to vector<16x16xf32>
    %7 = arith.addf %4, %6 : vector<16x16xf32>
    %c0_5 = arith.constant 0 : index
    %c0_6 = arith.constant 0 : index
    %c0_7 = arith.constant 0 : index
    %c0_8 = arith.constant 0 : index
    %8 = vector.load %arg2[%c0_5, %c0_6, %c0_7, %c0_8] : memref<1x4x16x16xf32, #tpu.memory_space<vmem>>, vector<1x1x16x16xf32>
    %9 = vector.shape_cast %8 : vector<1x1x16x16xf32> to vector<16x16xf32>
    %10 = arith.addf %7, %9 : vector<16x16xf32>
    %cst = arith.constant 0.000000e+00 : f32
    %11 = vector.broadcast %cst : f32 to vector<16x16xf32>
    %12 = arith.cmpf ogt, %10, %11 : vector<16x16xf32>
    %cst_9 = arith.constant 2.000000e-01 : f32
    %13 = vector.broadcast %cst_9 : f32 to vector<16x16xf32>
    %14 = arith.mulf %13, %10 : vector<16x16xf32>
    %15 = arith.select %12, %10, %14 : vector<16x16xi1>, vector<16x16xf32>
    %c0_10 = arith.constant 0 : index
    %c0_11 = arith.constant 0 : index
    %c0_12 = arith.constant 0 : index
    %c0_13 = arith.constant 0 : index
    %16 = vector.load %arg5[%c0_10, %c0_11, %c0_12, %c0_13] : memref<1x4x16x16xf32, #tpu.memory_space<vmem>>, vector<1x1x16x16xf32>
    %17 = vector.shape_cast %16 : vector<1x1x16x16xf32> to vector<16x16xf32>
    %18 = vector.shape_cast %15 : vector<16x16xf32> to vector<1x1x16x16xf32>
    tpu.vector_store %arg5[%c0_10, %c0_11, %c0_12, %c0_13], %18 {strides = array<i32>} : memref<1x4x16x16xf32, #tpu.memory_space<vmem>>, vector<1x1x16x16xf32>,
    %c0_14 = arith.constant 0 : index
    %c1 = arith.constant 1 : index
    %c0_15 = arith.constant 0 : index
    %c0_16 = arith.constant 0 : index
    %19 = vector.load %arg1[%c0_14, %c1, %c0_15, %c0_16] : memref<1x4x16x16xf32, #tpu.memory_space<vmem>>, vector<1x1x16x16xf32>
    %20 = vector.shape_cast %19 : vector<1x1x16x16xf32> to vector<16x16xf32>
    %c1_17 = arith.constant 1 : index
    %21 = memref.load %arg3[%c1_17] : memref<4xf32, #tpu.memory_space<smem>>
    %22 = vector.broadcast %21 : f32 to vector<16x16xf32>
    %23 = arith.mulf %20, %22 : vector<16x16xf32>
    %c1_18 = arith.constant 1 : index
    %24 = memref.load %arg4[%c1_18] : memref<4xf32, #tpu.memory_space<smem>>
    %25 = vector.broadcast %24 : f32 to vector<16x16xf32>
    %26 = arith.addf %23, %25 : vector<16x16xf32>
    %c0_19 = arith.constant 0 : index
    %c1_20 = arith.constant 1 : index
    %c0_21 = arith.constant 0 : index
    %c0_22 = arith.constant 0 : index
    %27 = vector.load %arg2[%c0_19, %c1_20, %c0_21, %c0_22] : memref<1x4x16x16xf32, #tpu.memory_space<vmem>>, vector<1x1x16x16xf32>
    %28 = vector.shape_cast %27 : vector<1x1x16x16xf32> to vector<16x16xf32>
    %29 = arith.addf %26, %28 : vector<16x16xf32>
    %cst_23 = arith.constant 0.000000e+00 : f32
    %30 = vector.broadcast %cst_23 : f32 to vector<16x16xf32>
    %31 = arith.cmpf ogt, %29, %30 : vector<16x16xf32>
    %cst_24 = arith.constant 2.000000e-01 : f32
    %32 = vector.broadcast %cst_24 : f32 to vector<16x16xf32>
    %33 = arith.mulf %32, %29 : vector<16x16xf32>
    %34 = arith.select %31, %29, %33 : vector<16x16xi1>, vector<16x16xf32>
    %c0_25 = arith.constant 0 : index
    %c1_26 = arith.constant 1 : index
    %c0_27 = arith.constant 0 : index
    %c0_28 = arith.constant 0 : index
    %35 = vector.load %arg5[%c0_25, %c1_26, %c0_27, %c0_28] : memref<1x4x16x16xf32, #tpu.memory_space<vmem>>, vector<1x1x16x16xf32>
    %36 = vector.shape_cast %35 : vector<1x1x16x16xf32> to vector<16x16xf32>
    %37 = vector.shape_cast %34 : vector<16x16xf32> to vector<1x1x16x16xf32>
    tpu.vector_store %arg5[%c0_25, %c1_26, %c0_27, %c0_28], %37 {strides = array<i32>} : memref<1x4x16x16xf32, #tpu.memory_space<vmem>>, vector<1x1x16x16xf32>,
    %c0_29 = arith.constant 0 : index
    %c2 = arith.constant 2 : index
    %c0_30 = arith.constant 0 : index
    %c0_31 = arith.constant 0 : index
    %38 = vector.load %arg1[%c0_29, %c2, %c0_30, %c0_31] : memref<1x4x16x16xf32, #tpu.memory_space<vmem>>, vector<1x1x16x16xf32>
    %39 = vector.shape_cast %38 : vector<1x1x16x16xf32> to vector<16x16xf32>
    %c2_32 = arith.constant 2 : index
    %40 = memref.load %arg3[%c2_32] : memref<4xf32, #tpu.memory_space<smem>>
    %41 = vector.broadcast %40 : f32 to vector<16x16xf32>
    %42 = arith.mulf %39, %41 : vector<16x16xf32>
    %c2_33 = arith.constant 2 : index
    %43 = memref.load %arg4[%c2_33] : memref<4xf32, #tpu.memory_space<smem>>
    %44 = vector.broadcast %43 : f32 to vector<16x16xf32>
    %45 = arith.addf %42, %44 : vector<16x16xf32>
    %c0_34 = arith.constant 0 : index
    %c2_35 = arith.constant 2 : index
    %c0_36 = arith.constant 0 : index
    %c0_37 = arith.constant 0 : index
    %46 = vector.load %arg2[%c0_34, %c2_35, %c0_36, %c0_37] : memref<1x4x16x16xf32, #tpu.memory_space<vmem>>, vector<1x1x16x16xf32>
    %47 = vector.shape_cast %46 : vector<1x1x16x16xf32> to vector<16x16xf32>
    %48 = arith.addf %45, %47 : vector<16x16xf32>
    %cst_38 = arith.constant 0.000000e+00 : f32
    %49 = vector.broadcast %cst_38 : f32 to vector<16x16xf32>
    %50 = arith.cmpf ogt, %48, %49 : vector<16x16xf32>
    %cst_39 = arith.constant 2.000000e-01 : f32
    %51 = vector.broadcast %cst_39 : f32 to vector<16x16xf32>
    %52 = arith.mulf %51, %48 : vector<16x16xf32>
    %53 = arith.select %50, %48, %52 : vector<16x16xi1>, vector<16x16xf32>
    %c0_40 = arith.constant 0 : index
    %c2_41 = arith.constant 2 : index
    %c0_42 = arith.constant 0 : index
    %c0_43 = arith.constant 0 : index
    %54 = vector.load %arg5[%c0_40, %c2_41, %c0_42, %c0_43] : memref<1x4x16x16xf32, #tpu.memory_space<vmem>>, vector<1x1x16x16xf32>
    %55 = vector.shape_cast %54 : vector<1x1x16x16xf32> to vector<16x16xf32>
    %56 = vector.shape_cast %53 : vector<16x16xf32> to vector<1x1x16x16xf32>
    tpu.vector_store %arg5[%c0_40, %c2_41, %c0_42, %c0_43], %56 {strides = array<i32>} : memref<1x4x16x16xf32, #tpu.memory_space<vmem>>, vector<1x1x16x16xf32>,
    %c0_44 = arith.constant 0 : index
    %c3 = arith.constant 3 : index
    %c0_45 = arith.constant 0 : index
    %c0_46 = arith.constant 0 : index
    %57 = vector.load %arg1[%c0_44, %c3, %c0_45, %c0_46] : memref<1x4x16x16xf32, #tpu.memory_space<vmem>>, vector<1x1x16x16xf32>
    %58 = vector.shape_cast %57 : vector<1x1x16x16xf32> to vector<16x16xf32>
    %c3_47 = arith.constant 3 : index
    %59 = memref.load %arg3[%c3_47] : memref<4xf32, #tpu.memory_space<smem>>
    %60 = vector.broadcast %59 : f32 to vector<16x16xf32>
    %61 = arith.mulf %58, %60 : vector<16x16xf32>
    %c3_48 = arith.constant 3 : index
    %62 = memref.load %arg4[%c3_48] : memref<4xf32, #tpu.memory_space<smem>>
    %63 = vector.broadcast %62 : f32 to vector<16x16xf32>
    %64 = arith.addf %61, %63 : vector<16x16xf32>
    %c0_49 = arith.constant 0 : index
    %c3_50 = arith.constant 3 : index
    %c0_51 = arith.constant 0 : index
    %c0_52 = arith.constant 0 : index
    %65 = vector.load %arg2[%c0_49, %c3_50, %c0_51, %c0_52] : memref<1x4x16x16xf32, #tpu.memory_space<vmem>>, vector<1x1x16x16xf32>
    %66 = vector.shape_cast %65 : vector<1x1x16x16xf32> to vector<16x16xf32>
    %67 = arith.addf %64, %66 : vector<16x16xf32>
    %cst_53 = arith.constant 0.000000e+00 : f32
    %68 = vector.broadcast %cst_53 : f32 to vector<16x16xf32>
    %69 = arith.cmpf ogt, %67, %68 : vector<16x16xf32>
    %cst_54 = arith.constant 2.000000e-01 : f32
    %70 = vector.broadcast %cst_54 : f32 to vector<16x16xf32>
    %71 = arith.mulf %70, %67 : vector<16x16xf32>
    %72 = arith.select %69, %67, %71 : vector<16x16xi1>, vector<16x16xf32>
    %c0_55 = arith.constant 0 : index
    %c3_56 = arith.constant 3 : index
    %c0_57 = arith.constant 0 : index
    %c0_58 = arith.constant 0 : index
    %73 = vector.load %arg5[%c0_55, %c3_56, %c0_57, %c0_58] : memref<1x4x16x16xf32, #tpu.memory_space<vmem>>, vector<1x1x16x16xf32>
    %74 = vector.shape_cast %73 : vector<1x1x16x16xf32> to vector<16x16xf32>
    %75 = vector.shape_cast %72 : vector<16x16xf32> to vector<1x1x16x16xf32>
    tpu.vector_store %arg5[%c0_55, %c3_56, %c0_57, %c0_58], %75 {strides = array<i32>} : memref<1x4x16x16xf32, #tpu.memory_space<vmem>>, vector<1x1x16x16xf32>,
    return
  }
  func.func @transform_0(%arg0: i32) -> (i32, i32, i32, i32) {
    %c0_i32 = arith.constant 0 : i32
    %c0_i32_0 = arith.constant 0 : i32
    %c0_i32_1 = arith.constant 0 : i32
    %c0_i32_2 = arith.constant 0 : i32
    return %arg0, %c0_i32, %c0_i32_0, %c0_i32_1 : i32, i32, i32, i32
  }
  func.func @transform_1(%arg0: i32) -> (i32, i32, i32, i32) {
    %c0_i32 = arith.constant 0 : i32
    %c0_i32_0 = arith.constant 0 : i32
    %c0_i32_1 = arith.constant 0 : i32
    %c0_i32_2 = arith.constant 0 : i32
    return %arg0, %c0_i32, %c0_i32_0, %c0_i32_1 : i32, i32, i32, i32
  }
  func.func @transform_2(%arg0: i32) -> i32 {
    %c0_i32 = arith.constant 0 : i32
    %c0_i32_0 = arith.constant 0 : i32
    return %c0_i32 : i32
  }
  func.func @transform_3(%arg0: i32) -> i32 {
    %c0_i32 = arith.constant 0 : i32
    %c0_i32_0 = arith.constant 0 : i32
    return %c0_i32 : i32
  }
  func.func @transform_4(%arg0: i32) -> (i32, i32, i32, i32) {
    %c0_i32 = arith.constant 0 : i32
    %c0_i32_0 = arith.constant 0 : i32
    %c0_i32_1 = arith.constant 0 : i32
    %c0_i32_2 = arith.constant 0 : i32
    return %arg0, %c0_i32, %c0_i32_0, %c0_i32_1 : i32, i32, i32, i32
  }
}

</mosaic_0001>

<bundles_post_ra>
// kernel: residual_block.5
= control target key start
LH: loop header
LB: loop body
LE: loop exit
PB: predicated region body
PF: predicated region fallthrough
CT: control target
= control target key end

     0   :  { %9 = vsyncpa [#allocation3], 0  ;;  %s1033_s0 = inlined_call_operand.hbm [shape: f32[2,4,16,16], index: 0, kind: input, shape index: {}, may-alias: {0,4}]   ;;  %s1034_s1 = inlined_call_operand.vmem [shape: f32[2,4,16,16], index: 1, kind: input, shape index: {}]   ;;  %s1035_s2 = inlined_call_operand.vmem [shape: f32[4], index: 2, kind: input, shape index: {}]   ;;  %s1036_s3 = inlined_call_operand.vmem [shape: f32[4], index: 3, kind: input, shape index: {}]   ;;  %s1037_s4 = inlined_call_operand.hbm [shape: f32[2,4,16,16], index: 4, kind: output, shape index: {}, may-alias: {0,4}]  }
   0x1   :  { %11 = vsyncpa [#allocation3 + $0x1], 0 }
   0x2   :  { %12 = vsyncpa [#allocation5], 0 }
   0x3   :  { %13 = vsyncpa [#allocation8], 0 }
   0x4   :  { %14 = vsyncpa [#allocation4], 0 }
   0x5   :  { %16 = vsyncpa [#allocation4 + $0x1], 0  ;;  %s769_s15 = smov 0   ;;  %s771_s16 = smov 0  }
   0x6   :  { %s773_s17 = smov 0   ;;  %s775_s18 = smov 0  }
   0x7 LB: > { %s790_s19 = sadd.s32 4294967295, %s734_s18   ;;  %s482_s20 = sadd.s32 4294967294, %s734_s18   ;;  %s734_s18 = sphi %s775_s18, %s1063_s18   ;;  %s730_s17 = sphi %s773_s17, %s1062_s17   ;;  %s726_s16 = sphi %s771_s16, %s1061_s16   ;;  %s722_s15 = sphi %s769_s15, %s1060_s15  }
   0x8   : > { %s794_s21 = sadd.s32 1, %s734_s18   ;;  %s29_s22 = sadd.s32 1, %s730_s17 }
   0x9   : > { %s26_s23 = ssub.s32 %s734_s18, %s794_s21  ;;  %p36_p0 = scmp.ne.s32.totalorder %s730_s17, %s726_s16 }
   0xa   : > { %p27_p1 = scmp.eq.s32.totalorder %s26_s23, 0  ;;  %p37_p2 = scmp.eq.s32.totalorder %s734_s18, 0 }
   0xb   : > { %p42_p3 = scmp.ne.s32.totalorder %s726_s16, %s722_s15  ;;  %p1038_p4 = scmp.eq.s32.totalorder %s790_s19, 0 }
   0xc   : > { %s806_s24 = scalar_select %p27_p1, %s730_s17, %s29_s22  }
   0xd   : > { %p808_p5 = por %p37_p2, %p36_p0  ;;  %p814_p6 = por %p1038_p4, %p42_p3 }
   0xe   : > { %p134_p7 = scmp.eq.s32.totalorder %s790_s19, 1  ;;  %p140_p8 = scmp.eq.s32.totalorder %s482_s20, 1 }
   0xf   : > { %s1044_s26 = scalar_select %p814_p6, 1, 0 }
  0x10   : > { %p483_p9 = scmp.ge.s32.totalorder %s734_s18, 1  ;;  %p147_p10 = scmp.lt.s32.totalorder %s734_s18, 3 }
  0x11   : > { %p821_p11 = por %p134_p7, %p36_p0  ;;  %p825_p12 = por %p140_p8, %p42_p3 }
  0x12   : > { %p829_p13 = pnand %p483_p9, %p147_p10  ;;  %s160_s6 = sshll.u32 %s1035_s2, 4  ;;  %s161_s6 = int_to_ptr.vmem [resolvable:$true] %s160_s6 }
  0x13   : > { %s1045_s27 = scalar_select %p821_p11, 1, 0 }
  0x14   : > { %s1046_s28 = scalar_select %p825_p12, 1, 0 }
  0x15   : > { %s1047_s29 = scalar_select %p829_p13, 1, 0 }
  0x16   : > { %p541_p1 = pneg %p829_p13  ;;  %p558_p2 = scmp.lt.s32.totalorder %s734_s18, 2 }
  0x17   : > { %s171_s10 = sshll.u32 %s1036_s3, 4  ;;  %s600_s12 = scalar_lea.vmem %s161_s6, 16  ;;  %s172_s10 = int_to_ptr.vmem [resolvable:$true] %s171_s10 }
  0x18   : > { %p842_p7 = pnand %p541_p1, %p1038_p4  ;;  %p851_p3 = pnand %p558_p2, %p808_p5 }
  0x19   : > { %p601_p8 = scmp.ne.s32.totalorder %s161_s6, %s600_s12  ;;  %p608_p0 = scmp.lt.s32.totalorder %s161_s6, %s161_s6 }
  0x1a   : > { %s1049_s11 = scalar_select %p851_p3, 1, 0 }
  0x1b   : > { %p602_p9 = pneg %p842_p7  ;;  %p609_p4 = scmp.lt.s32.totalorder %s600_s12, %s600_s12 }
  0x1d   : > { %p603_p10 = pnand %p602_p9, %p601_p8  ;;  %p610_p12 = por %p609_p4, %p608_p0 }
  0x1f   : > { %p604_p1 = pneg %p603_p10 }
  0x21   : > { %p611_p11 = pnand %p610_p12, %p604_p1 }
  0x23   : > { %614 = shalt.err (!%p611_p11)
}
  0x24   : > { %s736_s13 = smov [#allocation6]   ;;  %s182_s14 = sand.u32 1, %s730_s17  }
  0x25   : > { %544 = dma.vmem_to_smem (!%p842_p7), %s161_s6, 16, %s736_s13, [#allocation5]  }
  0x26   : > { %s615_s20 = scalar_lea.vmem %s172_s10, 16  ;;  %p623_p8 = scmp.lt.s32.totalorder %s172_s10, %s172_s10 }
  0x27   : > { %p616_p5 = scmp.ne.s32.totalorder %s172_s10, %s615_s20  ;;  %p624_p10 = scmp.lt.s32.totalorder %s615_s20, %s615_s20 }
  0x29   : > { %p618_p2 = pnand %p616_p5, %p602_p9  ;;  %p625_p13 = por %p624_p10, %p623_p8 }
  0x2b   : > { %p619_p6 = pneg %p618_p2 }
  0x2d   : > { %p626_p3 = pnand %p625_p13, %p619_p6 }
  0x2f   : > { %629 = shalt.err (!%p626_p3)
}
  0x30   : > { %s737_s22 = smov [#allocation7]   ;;  %s487_s23 = sshll.u32 %s182_s14, 6 }
  0x31   : > { %547 = dma.vmem_to_smem (!%p842_p7), %s172_s10, 16, %s737_s22, [#allocation8]  }
  0x32   : > { %s526_s25 = sshll.u32 %s734_s18, 10  ;;  %s186_s8 = scalar_lea.vmem [#allocation2], %s487_s23 }
  0x33   : > { %s872_s6 = scalar_lea.hbm %s1033_s0, %s526_s25  ;;  %s193_s9 = sshll.u32 %s186_s8, 4  ;;  %s874_s9 = int_to_ptr.vmem [resolvable:$true] %s193_s9 }
  0x34   : > { %s876_s7 = scalar_lea.sflag [#allocation3], %s182_s14  ;;  %s630_s12 = scalar_lea.hbm %s872_s6, 1024 }
  0x35   : > { %p631_p4 = scmp.ne.s32.totalorder %s872_s6, %s630_s12  ;;  %p1050_p6 = scmp.ne.s32.totalorder %s1049_s11, 0 }
  0x36   : > { %s635_s20 = scalar_lea.hbm %s1033_s0, 2048  ;;  %p636_p0 = scmp.lt.u32.totalorder %s872_s6, %s1033_s0 }
  0x37   : > { %p632_p11 = pneg %p1050_p6  ;;  %p637_p7 = scmp.lt.u32.totalorder %s635_s20, %s630_s12 }
  0x38   : > { %p639_p9 = scmp.lt.u32.totalorder %s630_s12, %s872_s6 }
  0x39   : > { %p633_p12 = pnand %p632_p11, %p631_p4  ;;  %p638_p3 = por %p637_p7, %p636_p0 }
  0x3b   : > { %p634_p13 = pneg %p633_p12  ;;  %p640_p1 = por %p639_p9, %p638_p3 }
  0x3d   : > { %p641_p5 = pnand %p640_p1, %p634_p13 }
  0x3f   : > { %644 = shalt.err (!%p641_p5)
}
  0x40   : > { %s645_s14 = scalar_lea.vmem %s874_s9, 1024  ;;  %s738_s23 = smov [#allocation2]  }
  0x41   : > { %p646_p2 = scmp.ne.s32.totalorder %s874_s9, %s645_s14  ;;  %s650_s30 = sshll.u32 %s738_s23, 4  ;;  %s651_s30 = int_to_ptr.vmem [resolvable:$false] %s650_s30 }
  0x42   : > { %s652_s5 = scalar_lea.vmem %s651_s30, 2048  ;;  %p653_p4 = scmp.lt.s32.totalorder %s874_s9, %s651_s30 }
  0x43   : > { %p648_p8 = pnand %p646_p2, %p632_p11  ;;  %p654_p12 = scmp.lt.s32.totalorder %s652_s5, %s645_s14 }
  0x45   : > { %p649_p10 = pneg %p648_p8  ;;  %p655_p0 = por %p654_p12, %p653_p4 }
  0x47   : > { %p656_p7 = pnand %p655_p0, %p649_p10 }
  0x49   : > { %659 = shalt.err (!%p656_p7)
}
  0x4a   : > { %s739_s8 = smov 128   ;;  %s740_s12 = smov 8  }
  0x4b   : > { %551 = dma.hbm_to_vmem [thread:$0]  (!%p1050_p6), %s872_s6, 1024, %s874_s9, %s876_s7, %s739_s8, %s739_s8, %s740_s12  }
  0x4c   : > { %p1051_p11 = scmp.ne.s32.totalorder %s1047_s29, 0 }
  0x4d   : > { %s907_s10 = sand.u32 (!%p1051_p11), 1, %s726_s16   ;;  %p1052_p13 = scmp.ne.s32.totalorder (!%p1051_p11), %s1044_s26, 0 }
  0x4e   : > { %213 = sbr.rel (%p1051_p11) target bundleno = 135 (0x87), region = 36  ;;  %s491_s13 = sshll.u32 (!%p1051_p11), %s907_s10, 6 }
  0x4f   : > { %s216_s20 = scalar_lea.sflag (!%p1051_p11), [#allocation3], %s907_s10  ;;  %s913_s22 = scalar_lea.vmem (!%p1051_p11), [#allocation2], %s491_s13 }
  0x55   : > { %705 = dma.done.wait (%p1052_p13), %s216_s20, 1024  }
  0x56   : > { %707 = vsyncadd (%p1052_p13), %s216_s20, 4294966272  ;;  %p1053_p6 = scmp.eq.s32.totalorder %s790_s19, 0 }
  0x58   : > { %709 = dma.done.wait (%p1053_p6), [#allocation5], 16   ;;  %p1054_p3 = pmov %p1053_p6 }
  0x5a   : > { %711 = vsyncadd (%p1054_p3), [#allocation5], 4294967280  ;;  %p1055_p9 = pmov %p1054_p3 }
  0x5b   : > { %p1056_p1 = pmov %p1054_p3 }
  0x5c   : > { %713 = dma.done.wait (%p1055_p9), [#allocation8], 16  }
  0x5d   : > { %715 = vsyncadd (%p1056_p1), [#allocation8], 4294967280 }
  0x5e   : > { %232 = sfence }
  0x5f   : > { %p258_p5 = scmp.lt.s32.totalorder %s790_s19, 1  ;;  %s265_s26 = sld [smem:[#allocation6]]  ;;  %v263_v0 = vld [vmem:[%s913_s22] sm:$0xff]  ;;  %v264_v1 = vld [vmem:[%s913_s22 + $0x8] sm:$0xff]  ;;  %v497_v4 = vld [vmem:[%s913_s22 + $0x10] sm:$0xff]  ;;  %vm283_vm0 = vcmask 130048  }
  0x60   : > { %s269_s29 = sld [smem:[#allocation7]]  ;;  %s499_s6 = sld [smem:[#allocation6 + $0x1]]  ;;  %v498_v5 = vld [vmem:[%s913_s22 + $0x18] sm:$0xff]  ;;  %v505_v16 = vld [vmem:[%s913_s22 + $0x20] sm:$0xff]  ;;  %v506_v23 = vld [vmem:[%s913_s22 + $0x28] sm:$0xff] }
  0x61   : > { %s259_s11 = scalar_select %p258_p5, %s790_s19, 1  ;;  %v513_v26 = vld [vmem:[%s913_s22 + $0x30] sm:$0xff]  ;;  %v514_v34 = vld [vmem:[%s913_s22 + $0x38] sm:$0xff] }
  0x62   : > { %s500_s7 = sld [smem:[#allocation7 + $0x1]]  ;;  %s936_s30 = sld [smem:[#allocation6 + $0x2]] }
  0x63   : > { %s527_s9 = sshll.u32 %s259_s11, 6  ;;  %s940_s5 = sld [smem:[#allocation7 + $0x2]] }
  0x64   : > { %s934_s23 = scalar_lea.vmem %s1034_s1, %s527_s9  ;;  %s942_s8 = sld [smem:[#allocation6 + $0x3]] }
  0x65   : > { %v266_v2 = vstv %s265_s26  ;;  %s944_s12 = sld [smem:[#allocation7 + $0x3]]  ;;  %v273_v8 = vld [vmem:[%s934_s23] sm:$0xff]  ;;  %v274_v9 = vld [vmem:[%s934_s23 + $0x8] sm:$0xff]  ;;  %v501_v20 = vld [vmem:[%s934_s23 + $0x10] sm:$0xff]  ;;  %s963_s20 = scalar_lea.vmem [#allocation9], %s491_s13 }
  0x66   : > { %v270_v3 = vstv %s269_s29  ;;  %v267_v6 = vmul.f32 %v266_v2, %v263_v0  ;;  %v268_v7 = vmul.f32 %v266_v2, %v264_v1  ;;  %v290_v10 = vstv %s499_s6  ;;  %v502_v22 = vld [vmem:[%s934_s23 + $0x18] sm:$0xff]  ;;  %v509_v37 = vld [vmem:[%s934_s23 + $0x20] sm:$0xff]  ;;  %s375_s13 = sshll.u32 %s963_s20, 4  ;;  %s528_s22 = sshll.u32 %s790_s19, 10  ;;  %s976_s13 = int_to_ptr.vmem [resolvable:$true] %s375_s13 }
  0x67   : > { %v291_v13 = vmul.f32 %v497_v4, %v290_v10  ;;  %v292_v14 = vmul.f32 %v498_v5, %v290_v10  ;;  %v510_v38 = vld [vmem:[%s934_s23 + $0x28] sm:$0xff]  ;;  %v517_v41 = vld [vmem:[%s934_s23 + $0x30] sm:$0xff]  ;;  %v518_v54 = vld [vmem:[%s934_s23 + $0x38] sm:$0xff]  ;;  %s985_s29 = scalar_lea.hbm %s1037_s4, %s528_s22  ;;  %s362_s11 = scalar_lea.sflag [#allocation4], %s907_s10 }
  0x68   : > { %v271_v11 = vadd.f32 %v270_v3, %v267_v6  ;;  %v272_v12 = vadd.f32 %v270_v3, %v268_v7  ;;  %v294_v15 = vstv %s500_s7  ;;  %v315_v24 = vstv %s936_s30  ;;  %s660_s6 = scalar_lea.vmem %s976_s13, 1024  ;;  %p1057_p8 = scmp.ne.s32.totalorder %s1045_s27, 0 }
  0x69   : > { %v295_v19 = vadd.f32 %v294_v15, %v291_v13  ;;  %v296_v21 = vadd.f32 %v294_v15, %v292_v14  ;;  %v319_v25 = vstv %s940_s5  ;;  %v316_v32 = vmul.f32 %v505_v16, %v315_v24  ;;  %p661_p2 = scmp.ne.s32.totalorder %s976_s13, %s660_s6  ;;  %s741_s9 = smov [#allocation9]  }
  0x6a   : > { %v275_v17 = vadd.f32 %v273_v8, %v271_v11  ;;  %v276_v18 = vadd.f32 %v274_v9, %v272_v12  ;;  %v340_v27 = vstv %s942_s8  ;;  %v317_v33 = vmul.f32 %v506_v23, %v315_v24  ;;  %s664_s7 = sshll.u32 %s741_s9, 4  ;;  %s665_s7 = int_to_ptr.vmem [resolvable:$false] %s664_s7 }
  0x6b   : > { %v300_v30 = vadd.f32 %v501_v20, %v295_v19  ;;  %v301_v31 = vadd.f32 %v502_v22, %v296_v21  ;;  %v341_v39 = vmul.f32 %v513_v26, %v340_v27  ;;  %v344_v40 = vstv %s944_s12  ;;  %p662_p10 = pnand %p661_p2, %p1057_p8  ;;  %s666_s25 = scalar_lea.vmem %s665_s7, 2048 }
  0x6c   : > { %vm277_vm1 = vcmp.gt.f32.partialorder %v275_v17, 0.0  ;;  %v279_v28 = vmul.f32 0.2, %v275_v17  ;;  %vm278_vm2 = vcmp.gt.f32.partialorder %v276_v18, 0.0  ;;  %v280_v29 = vmul.f32 0.2, %v276_v18  ;;  %p667_p12 = scmp.lt.s32.totalorder %s976_s13, %s665_s7  ;;  %p668_p0 = scmp.lt.s32.totalorder %s666_s25, %s660_s6 }
  0x6d   : > { %vm302_vm3 = vcmp.gt.f32.partialorder %v300_v30, 0.0  ;;  %v304_v42 = vmul.f32 0.2, %v300_v30  ;;  %vm303_vm4 = vcmp.gt.f32.partialorder %v301_v31, 0.0  ;;  %v305_v43 = vmul.f32 0.2, %v301_v31  ;;  %p663_p4 = pneg %p662_p10 }
  0x6e   : > { %v281_v35 = vsel %vm277_vm1, %v275_v17, %v279_v28  ;;  %v282_v36 = vsel %vm278_vm2, %v276_v18, %v280_v29  ;;  %v320_v44 = vadd.f32 %v319_v25, %v316_v32  ;;  %v321_v45 = vadd.f32 %v319_v25, %v317_v33  ;;  %p669_p7 = por %p668_p0, %p667_p12 }
  0x6f   : > { %284 = vst.msk [vmem:[%s963_s20] sm:$0xff] %vm283_vm0, %v281_v35  ;;  %285 = vst.msk [vmem:[%s963_s20 + $0x8] sm:$0xff] %vm283_vm0, %v282_v36  ;;  %v345_v46 = vadd.f32 %v344_v40, %v341_v39  ;;  %v342_v47 = vmul.f32 %v514_v34, %v340_v27  ;;  %v306_v48 = vsel %vm302_vm3, %v300_v30, %v304_v42 }
  0x70   : > { %v307_v49 = vsel %vm303_vm4, %v301_v31, %v305_v43  ;;  %503 = vst.msk [vmem:[%s963_s20 + $0x10] sm:$0xff] %vm283_vm0, %v306_v48  ;;  %v325_v50 = vadd.f32 %v509_v37, %v320_v44  ;;  %v326_v51 = vadd.f32 %v510_v38, %v321_v45  ;;  %p670_p11 = pnand %p669_p7, %p663_p4 }
  0x71   : > { %504 = vst.msk [vmem:[%s963_s20 + $0x18] sm:$0xff] %vm283_vm0, %v307_v49  ;;  %v350_v52 = vadd.f32 %v517_v41, %v345_v46  ;;  %v346_v53 = vadd.f32 %v344_v40, %v342_v47 }
  0x72   : > { %vm327_vm5 = vcmp.gt.f32.partialorder %v325_v50, 0.0  ;;  %v329_v55 = vmul.f32 0.2, %v325_v50  ;;  %vm328_vm6 = vcmp.gt.f32.partialorder %v326_v51, 0.0  ;;  %v330_v56 = vmul.f32 0.2, %v326_v51 }
  0x73   : > { %vm352_vm7 = vcmp.gt.f32.partialorder %v350_v52, 0.0  ;;  %v354_v57 = vmul.f32 0.2, %v350_v52  ;;  %v351_v58 = vadd.f32 %v518_v54, %v346_v53 }
  0x74   : > { %v331_v59 = vsel %vm327_vm5, %v325_v50, %v329_v55  ;;  %v332_v60 = vsel %vm328_vm6, %v326_v51, %v330_v56 }
  0x75   : > { %511 = vst.msk [vmem:[%s963_s20 + $0x20] sm:$0xff] %vm283_vm0, %v331_v59  ;;  %512 = vst.msk [vmem:[%s963_s20 + $0x28] sm:$0xff] %vm283_vm0, %v332_v60  ;;  %v356_v61 = vsel %vm352_vm7, %v350_v52, %v354_v57  ;;  %vm353_vm8 = vcmp.gt.f32.partialorder %v351_v58, 0.0  ;;  %v355_v62 = vmul.f32 0.2, %v351_v58 }
  0x76   : > { %519 = vst.msk [vmem:[%s963_s20 + $0x30] sm:$0xff] %vm283_vm0, %v356_v61 }
  0x77   : > { %v357_v63 = vsel %vm353_vm8, %v351_v58, %v355_v62 }
  0x78   : > { %520 = vst.msk [vmem:[%s963_s20 + $0x38] sm:$0xff] %vm283_vm0, %v357_v63 }
  0x79   : > { %673 = shalt.err (!%p670_p11)
}
  0x7a   : > { %s674_s14 = scalar_lea.hbm %s985_s29, 1024  ;;  %s678_s5 = scalar_lea.hbm %s1037_s4, 2048 }
  0x7b   : > { %p675_p13 = scmp.ne.s32.totalorder %s985_s29, %s674_s14  ;;  %p679_p9 = scmp.lt.u32.totalorder %s985_s29, %s1037_s4 }
  0x7c   : > { %p680_p1 = scmp.lt.u32.totalorder %s678_s5, %s674_s14  ;;  %p682_p2 = scmp.lt.u32.totalorder %s674_s14, %s985_s29 }
  0x7d   : > { %p676_p6 = pnand %p675_p13, %p1057_p8 }
  0x7e   : > { %p681_p5 = por %p680_p1, %p679_p9 }
  0x7f   : > { %p677_p3 = pneg %p676_p6 }
  0x80   : > { %p683_p10 = por %p682_p2, %p681_p5 }
  0x82   : > { %p684_p4 = pnand %p683_p10, %p677_p3 }
  0x84   : > { %687 = shalt.err (!%p684_p4)
}
  0x85   : > { %s742_s20 = smov 128   ;;  %s743_s22 = smov 8  }
  0x86   : > { %539 = dma.vmem_to_hbm [thread:$0]  (%p1057_p8), %s976_s13, 1024, %s985_s29, %s362_s11, %s742_s20, %s742_s20, %s743_s22  }
  0x87 PF: > { %s390_s19 = sand.u32 1, %s722_s15   ;;  %p1058_p12 = scmp.ne.s32.totalorder %s1046_s28, 0 }
  0x88   : > { %p1059_p0 = scmp.ge.s32.totalorder %s734_s18, 2  ;;  %s391_s26 = scalar_lea.sflag [#allocation4], %s390_s19 }
  0x8a   : > { %p553_p7 = pnand %p1059_p0, %p1058_p12 }
  0x8c   : > { %717 = dma.done.wait (!%p553_p7), %s391_s26, 1024  }
  0x8d   : > { %719 = vsyncadd (!%p553_p7), %s391_s26, 4294966272  ;;  %p19_p11 = scmp.ge.s32.totalorder %s794_s21, 4   ;;  %s1060_s15 = smov %s726_s16 }
  0x8e   : > { %s1061_s16 = smov %s730_s17  ;;  %s1062_s17 = smov %s806_s24 }
  0x8f   : > { %s1063_s18 = smov %s794_s21  ;;  %21 = sbr.rel (!%p19_p11) target bundleno = 7 (0x7), region = 102 }
  0x96   :  { %396 = vsyncpa [#allocation3], 1 }
  0x97   :  { %398 = vsyncpa [#allocation3 + $0x1], 1 }
  0x98   :  { %399 = vsyncpa [#allocation4], 1 }
  0x99   :  { %401 = vsyncpa [#allocation4 + $0x1], 1 }
  0x9a   :  { %402 = vsyncpa [#allocation5], 1 }
  0x9b   :  { %404 = vsyncpa [#allocation5 + $0x1], 1 }
  0x9c   :  { %405 = vsyncpa [#allocation8], 1 }

// kernel: residual_block.3
= control target key start
LH: loop header
LB: loop body
LE: loop exit
PB: predicated region body
PF: predicated region fallthrough
CT: control target
= control target key end

     0   :  { %10 = vsyncpa [#allocation4], 0  ;;  %s3627_s0 = inlined_call_operand.vmem [shape: f32[2,4,16,16], index: 0, kind: input, shape index: {}]   ;;  %s3628_s1 = inlined_call_operand.vmem [shape: f32[144], index: 1, kind: input, shape index: {}]   ;;  %s3629_s2 = inlined_call_operand.vmem [shape: f32[4], index: 2, kind: input, shape index: {}]   ;;  %s3630_s3 = inlined_call_operand.vmem [shape: f32[2,4,16,16], index: 3, kind: output, shape index: {0}]   ;;  %s3631_s4 = inlined_call_operand.vmem [shape: f32[2,1,8], index: 4, kind: output, shape index: {1}]  }
   0x1   :  { %11 = vsyncpa [#allocation6], 0  ;;  %s2502_s15 = smov 0  }
   0x2 LB: > { %s2508_s16 = sadd.s32 4294967295, %s2469_s15   ;;  %p2219_p0 = scmp.ge.s32.totalorder %s2469_s15, 1  ;;  %s2469_s15 = sphi %s2502_s15, %s17_s15  }
   0x3   : > { %p142_p1 = scmp.lt.s32.totalorder %s2469_s15, 3  ;;  %s155_s19 = sshll.u32 %s3628_s1, 4  ;;  %s156_s19 = int_to_ptr.vmem [resolvable:$true] %s155_s19 }
   0x4   : > { %p3632_p3 = scmp.eq.s32.totalorder %s2508_s16, 0  ;;  %s166_s23 = sshll.u32 %s3629_s2, 4  ;;  %s167_s23 = int_to_ptr.vmem [resolvable:$true] %s166_s23 }
   0x5   : > { %p2515_p2 = pnand %p2219_p0, %p142_p1  ;;  %s2425_s25 = scalar_lea.vmem %s156_s19, 32 }
   0x6   : > { %p2426_p6 = scmp.ne.s32.totalorder %s156_s19, %s2425_s25  ;;  %p2433_p10 = scmp.lt.s32.totalorder %s156_s19, %s156_s19 }
   0x7   : > { %s3634_s20 = scalar_select %p2515_p2, 1, 0 }
   0x8   : > { %p2400_p4 = pneg %p2515_p2  ;;  %p2434_p11 = scmp.lt.s32.totalorder %s2425_s25, %s2425_s25 }
   0xa   : > { %p2527_p5 = pnand %p3632_p3, %p2400_p4  ;;  %p2435_p12 = por %p2434_p11, %p2433_p10 }
   0xc   : > { %p2427_p7 = pneg %p2527_p5 }
   0xe   : > { %p2428_p8 = pnand %p2427_p7, %p2426_p6 }
  0x10   : > { %p2429_p9 = pneg %p2428_p8 }
  0x12   : > { %p2436_p13 = pnand %p2435_p12, %p2429_p9 }
  0x14   : > { %2439 = shalt.err (!%p2436_p13)
}
  0x15   : > { %s2471_s26 = smov [#allocation3]   ;;  %s2440_s27 = scalar_lea.vmem %s167_s23, 16 }
  0x16   : > { %2403 = dma.vmem_to_smem (!%p2527_p5), %s156_s19, 32, %s2471_s26, [#allocation4]  }
  0x17   : > { %p2441_p0 = scmp.ne.s32.totalorder %s167_s23, %s2440_s27  ;;  %p2448_p3 = scmp.lt.s32.totalorder %s167_s23, %s167_s23 }
  0x18   : > { %p2449_p2 = scmp.lt.s32.totalorder %s2440_s27, %s2440_s27 }
  0x19   : > { %p2443_p1 = pnand %p2441_p0, %p2427_p7 }
  0x1a   : > { %p2450_p6 = por %p2449_p2, %p2448_p3 }
  0x1b   : > { %p2444_p4 = pneg %p2443_p1 }
  0x1d   : > { %p2451_p8 = pnand %p2450_p6, %p2444_p4 }
  0x1f   : > { %2454 = shalt.err (!%p2451_p8)
}
  0x20   : > { %s2472_s28 = smov [#allocation5]   ;;  %p3636_p9 = scmp.ne.s32.totalorder %s3634_s20, 0 }
  0x21   : > { %2406 = dma.vmem_to_smem (!%p2527_p5), %s167_s23, 16, %s2472_s28, [#allocation6]  }
  0x22   : > { %187 = sbr.rel (%p3636_p9) target bundleno = 855 (0x357), region = 32  ;;  %p3637_p10 = scmp.eq.s32.totalorder (!%p3636_p9), %s2508_s16, 0 }
  0x29   : > { %2460 = dma.done.wait (%p3637_p10), [#allocation4], 32   ;;  %p3638_p11 = pmov %p3637_p10 }
  0x2a   : > { %p3639_p7 = pmov %p3637_p10 }
  0x2b   : > { %2462 = vsyncadd (%p3638_p11), [#allocation4], 4294967264 }
  0x2c   : > { %2464 = dma.done.wait (%p3639_p7), [#allocation6], 16   ;;  %p3640_p2 = pmov %p3639_p7 }
  0x2e   : > { %2466 = vsyncadd (%p3640_p2), [#allocation6], 4294967280 }
  0x2f   : > { %197 = sfence }
  0x30   : > { %p221_p3 = scmp.lt.s32.totalorder %s2508_s16, 1  ;;  %vm234_vm0 = vcmask 146432   ;;  %vm237_vm1 = vcmask 140288   ;;  %v2473_v0 = vmov 0.0   ;;  %s2474_s7 = smov 1   ;;  %vm258_vm2 = vcmask 138248  }
  0x31   : > { %235 = vst.msk [vmem:[#allocation2] sm:$0xff] %vm234_vm0, %v2473_v0  ;;  %236 = vst.msk [vmem:[#allocation2 + $0x8] sm:$0xff] %vm234_vm0, %v2473_v0  ;;  %s2239_s8 = sld [smem:[#allocation3 + $0x1]]  ;;  %s2240_s9 = sld [smem:[#allocation3 + $0x25]]  ;;  %vm1963_vm3 = vcmask 130048   ;;  %vm2099_vm4 = vcmask 7168  }
  0x32   : > { %239 = vst.msk [vmem:[#allocation2 + $0x18] sm:$0xff] %vm234_vm0, %v2473_v0  ;;  %240 = vst.msk [vmem:[#allocation2 + $0x20] sm:$0xff] %vm234_vm0, %v2473_v0  ;;  %s3642_s16 = smov (!%p221_p3, %s2508_s16), 1  ;;  %s2241_s10 = sld [smem:[#allocation3 + $0x49]]  ;;  %vm2101_vm5 = vcmask 15360   ;;  %vm2103_vm6 = vcmask 23552  }
  0x33   : > { %242 = vst.msk [vmem:[#allocation2 + $0x30] sm:$0xff] %vm234_vm0, %v2473_v0  ;;  %243 = vst.msk [vmem:[#allocation2 + $0x38] sm:$0xff] %vm234_vm0, %v2473_v0  ;;  %s2390_s29 = sshll.u32 %s3642_s16, 6  ;;  %s2242_s11 = sld [smem:[#allocation3 + $0x6d]]  ;;  %vm2105_vm7 = vcmask 31744   ;;  %vm2107_vm8 = vcmask 39936  }
  0x34   : > { %245 = vst.msk [vmem:[#allocation2 + $0x48] sm:$0xff] %vm234_vm0, %v2473_v0  ;;  %246 = vst.msk [vmem:[#allocation2 + $0x50] sm:$0xff] %vm234_vm0, %v2473_v0  ;;  %s225_s6 = scalar_lea.vmem %s3627_s0, %s2390_s29  ;;  %s2475_s12 = smov 127   ;;  %vm2109_vm9 = vcmask 48128   ;;  %vm2111_vm10 = vcmask 56320   ;;  %vm2113_vm11 = vcmask 57344  }
  0x35   : > { %238 = vst.msk [vmem:[#allocation2 + $0x10] sm:$0x3] %vm237_vm1, %v2473_v0  ;;  %241 = vst.msk [vmem:[#allocation2 + $0x28] sm:$0x3] %vm237_vm1, %v2473_v0  ;;  %v248_v1 = vld [vmem:[%s225_s6] sm:$0xff]  ;;  %v2230_v2 = vld [vmem:[%s225_s6 + $0x10] sm:$0xff] }
  0x36   : > { %244 = vst.msk [vmem:[#allocation2 + $0x40] sm:$0x3] %vm237_vm1, %v2473_v0  ;;  %247 = vst.msk [vmem:[#allocation2 + $0x58] sm:$0x3] %vm237_vm1, %v2473_v0  ;;  %252 = vrot.lane.b32.xlu0 %v248_v1, %s2474_s7  ;;  %266 = vrot.lane.b32.xlu1 %v2230_v2, %s2474_s7  ;;  %v249_v3 = vld [vmem:[%s225_s6 + $0x8] sm:$0xff]  ;;  %v2231_v4 = vld [vmem:[%s225_s6 + $0x18] sm:$0xff] }
  0x37   : > { %v2233_v5 = vld [vmem:[%s225_s6 + $0x28] sm:$0xff]  ;;  %v2232_v6 = vld [vmem:[%s225_s6 + $0x20] sm:$0xff]  ;;  %v2235_v7 = vld [vmem:[%s225_s6 + $0x38] sm:$0xff]  ;;  %v330_v13 = vstv %s2239_s8  ;;  %s2243_s13 = sld [smem:[#allocation3 + $0x2]]  ;;  %s2244_s14 = sld [smem:[#allocation3 + $0x26]] }
  0x38   : > { %v2234_v8 = vld [vmem:[%s225_s6 + $0x30] sm:$0xff]  ;;  %v344_v18 = vstv %s2240_s9  ;;  %v358_v24 = vstv %s2241_s10  ;;  %s2245_s17 = sld [smem:[#allocation3 + $0x4a]]  ;;  %s2246_s18 = sld [smem:[#allocation3 + $0x6e]] }
  0x39   : > { %v372_v27 = vstv %s2242_s11  ;;  %s2476_s19 = smov 126   ;;  %s2251_s20 = sld [smem:[#allocation3 + $0x4]] }
  0x3a   : > { %254 = vrot.lane.b32.xlu0 %v249_v3, %s2474_s7  ;;  %268 = vrot.lane.b32.xlu1 %v2231_v4, %s2474_s7  ;;  %s2252_s21 = sld [smem:[#allocation3 + $0x28]]  ;;  %s2253_s22 = sld [smem:[#allocation3 + $0x4c]] }
  0x3b   : > { %s2254_s23 = sld [smem:[#allocation3 + $0x70]]  ;;  %s2255_s24 = sld [smem:[#allocation3 + $0x5]] }
  0x3c   : > { %s2256_s25 = sld [smem:[#allocation3 + $0x29]]  ;;  %s2257_s26 = sld [smem:[#allocation3 + $0x4d]] }
  0x3d   : > { %v386_v30 = vstv %s2243_s13  ;;  %v400_v33 = vstv %s2244_s14  ;;  %s2258_s27 = sld [smem:[#allocation3 + $0x71]]  ;;  %s2263_s28 = sld [smem:[#allocation3 + $0x7]] }
  0x3e   : > { %282 = vrot.lane.b32.xlu1 %v2233_v5, %s2474_s7  ;;  %280 = vrot.lane.b32.xlu0 %v2232_v6, %s2474_s7  ;;  %v414_v36 = vstv %s2245_s17  ;;  %v428_v39 = vstv %s2246_s18  ;;  %s2264_s30 = sld [smem:[#allocation3 + $0x2b]]  ;;  %s2265_s5 = sld [smem:[#allocation3 + $0x4f]] }
  0x3f   : > { %v468_v43 = vstv %s2251_s20  ;;  %s2266_s6 = sld [smem:[#allocation3 + $0x73]]  ;;  %s2268_s8 = sld [smem:[#allocation3 + $0x2c]] }
  0x40   : > { %v482_v47 = vstv %s2252_s21  ;;  %v496_v50 = vstv %s2253_s22  ;;  %s2269_s9 = sld [smem:[#allocation3 + $0x50]]  ;;  %s2270_s10 = sld [smem:[#allocation3 + $0x74]] }
  0x41   : > { %v510_v53 = vstv %s2254_s23  ;;  %v524_v56 = vstv %s2255_s24  ;;  %s2275_s11 = sld [smem:[#allocation3 + $0xa]]  ;;  %s2276_s13 = sld [smem:[#allocation3 + $0x2e]] }
  0x42   : > { %296 = vrot.lane.b32.xlu1 %v2235_v7, %s2474_s7  ;;  %294 = vrot.lane.b32.xlu0 %v2234_v8, %s2474_s7  ;;  %v538_v59 = vstv %s2256_s25  ;;  %v552_v62 = vstv %s2257_s26  ;;  %s2267_s7 = sld [smem:[#allocation3 + $0x8]]  ;;  %s2277_s14 = sld [smem:[#allocation3 + $0x52]] }
  0x43   : > { %v566_v1 = vstv %s2258_s27  ;;  %v606_v5 = vstv %s2263_s28  ;;  %s2278_s17 = sld [smem:[#allocation3 + $0x76]]  ;;  %s2279_s18 = sld [smem:[#allocation3 + $0xb]] }
  0x44   : > { %s2280_s20 = sld [smem:[#allocation3 + $0x2f]]  ;;  %s2691_s21 = sld [smem:[#allocation3 + $0x53]] }
  0x45   : > { %s2697_s22 = sld [smem:[#allocation3 + $0x77]]  ;;  %s2704_s23 = sld [smem:[#allocation3 + $0xd]] }
  0x46   : > { %s2706_s24 = sld [smem:[#allocation3]]  ;;  %s2713_s25 = sld [smem:[#allocation3 + $0x31]] }
  0x47   : > { %s2715_s26 = sld [smem:[#allocation3 + $0x24]]  ;;  %s2719_s27 = sld [smem:[#allocation3 + $0x3]] }
  0x48   : > { %s2721_s28 = sld [smem:[#allocation3 + $0x48]] }
  0xa8   : > { %v253_v9 = vpop.permute.xlu0 %252  ;;  %v267_v10 = vpop.permute.xlu1 %266 }
  0xa9   : > { %259 = vst.msk [vmem:[#allocation2 + $0x1] sm:$0xff] %vm258_vm2, %v253_v9  ;;  %273 = vst.msk [vmem:[#allocation2 + $0x19] sm:$0xff] %vm258_vm2, %v267_v10  ;;  %v620_v9 = vstv %s2264_s30  ;;  %s2725_s30 = sld [smem:[#allocation3 + $0x55]] }
  0xac   : > { %v255_v11 = vpop.permute.xlu0 %254  ;;  %v269_v12 = vpop.permute.xlu1 %268 }
  0xad   : > { %260 = vst.msk [vmem:[#allocation2 + $0x9] sm:$0xff] %vm258_vm2, %v255_v11  ;;  %274 = vst.msk [vmem:[#allocation2 + $0x21] sm:$0xff] %vm258_vm2, %v269_v12  ;;  %v634_v12 = vstv %s2265_s5  ;;  %s2733_s5 = sld [smem:[#allocation3 + $0x6c]] }
  0xb0   : > { %v2563_v14 = vld [vmem:[#allocation2] sm:$0xff]  ;;  %v283_v15 = vpop.permute.xlu1 %282  ;;  %v281_v16 = vpop.permute.xlu0 %280 }
  0xb1   : > { %v331_v17 = vmul.f32 %v330_v13, %v2563_v14  ;;  %288 = vst.msk [vmem:[#allocation2 + $0x39] sm:$0xff] %vm258_vm2, %v283_v15  ;;  %287 = vst.msk [vmem:[#allocation2 + $0x31] sm:$0xff] %vm258_vm2, %v281_v16  ;;  %v345_v22 = vmul.f32 %v344_v18, %v2563_v14  ;;  %v359_v25 = vmul.f32 %v358_v24, %v2563_v14  ;;  %v2599_v42 = vld [vmem:[#allocation2 + $0x1] sm:$0xff]  ;;  %v648_v16 = vstv %s2266_s6  ;;  %s2735_s6 = sld [smem:[#allocation3 + $0x27]] }
  0xb2   : > { %v373_v28 = vmul.f32 %v372_v27, %v2563_v14  ;;  %v387_v31 = vmul.f32 %v386_v30, %v2563_v14  ;;  %v401_v34 = vmul.f32 %v400_v33, %v2563_v14  ;;  %v415_v37 = vmul.f32 %v414_v36, %v2563_v14 }
  0xb3   : > { %335 = vrot.lane.b32.xlu0 %v331_v17, %s2475_s12  ;;  %v429_v40 = vmul.f32 %v428_v39, %v2563_v14  ;;  %v469_v44 = vmul.f32 %v468_v43, %v2599_v42  ;;  %v483_v48 = vmul.f32 %v482_v47, %v2599_v42  ;;  %v497_v51 = vmul.f32 %v496_v50, %v2599_v42 }
  0xb4   : > { %v2569_v19 = vld [vmem:[#allocation2 + $0x8] sm:$0xff]  ;;  %v297_v20 = vpop.permute.xlu1 %296  ;;  %v295_v21 = vpop.permute.xlu0 %294  ;;  %v511_v54 = vmul.f32 %v510_v53, %v2599_v42  ;;  %v525_v57 = vmul.f32 %v524_v56, %v2599_v42  ;;  %v539_v60 = vmul.f32 %v538_v59, %v2599_v42  ;;  %v553_v63 = vmul.f32 %v552_v62, %v2599_v42 }
  0xb5   : > { %v332_v23 = vmul.f32 %v330_v13, %v2569_v19  ;;  %302 = vst.msk [vmem:[#allocation2 + $0x51] sm:$0xff] %vm258_vm2, %v297_v20  ;;  %301 = vst.msk [vmem:[#allocation2 + $0x49] sm:$0xff] %vm258_vm2, %v295_v21  ;;  %v346_v26 = vmul.f32 %v344_v18, %v2569_v19  ;;  %v360_v29 = vmul.f32 %v358_v24, %v2569_v19  ;;  %v2605_v46 = vld [vmem:[#allocation2 + $0x9] sm:$0xff]  ;;  %v662_v20 = vstv %s2267_s7  ;;  %s2737_s7 = sld [smem:[#allocation3 + $0x79]] }
  0xb6   : > { %v374_v32 = vmul.f32 %v372_v27, %v2569_v19  ;;  %v388_v35 = vmul.f32 %v386_v30, %v2569_v19  ;;  %v402_v38 = vmul.f32 %v400_v33, %v2569_v19  ;;  %v416_v41 = vmul.f32 %v414_v36, %v2569_v19  ;;  %v2635_v4 = vld [vmem:[#allocation2 + $0x2] sm:$0xff]  ;;  %v2641_v8 = vld [vmem:[#allocation2 + $0xa] sm:$0xff]  ;;  %v2669_v30 = vld [vmem:[#allocation2 + $0x18] sm:$0xff] }
  0xb7   : > { %349 = vrot.lane.b32.xlu0 %v345_v22, %s2475_s12  ;;  %337 = vrot.lane.b32.xlu1 %v332_v23, %s2475_s12  ;;  %v430_v45 = vmul.f32 %v428_v39, %v2569_v19  ;;  %v470_v49 = vmul.f32 %v468_v43, %v2605_v46  ;;  %v484_v52 = vmul.f32 %v482_v47, %v2605_v46  ;;  %v676_v23 = vstv %s2268_s8  ;;  %v2677_v36 = vld [vmem:[#allocation2 + $0x20] sm:$0xff]  ;;  %s2752_s8 = sld [smem:[#allocation3 + $0xe]] }
  0xb8   : > { %v498_v55 = vmul.f32 %v496_v50, %v2605_v46  ;;  %v512_v58 = vmul.f32 %v510_v53, %v2605_v46  ;;  %v526_v61 = vmul.f32 %v524_v56, %v2605_v46  ;;  %v540_v0 = vmul.f32 %v538_v59, %v2605_v46 }
  0xb9   : > { %v567_v2 = vmul.f32 %v566_v1, %v2599_v42  ;;  %v554_v3 = vmul.f32 %v552_v62, %v2605_v46  ;;  %v607_v6 = vmul.f32 %v606_v5, %v2635_v4  ;;  %v568_v7 = vmul.f32 %v566_v1, %v2605_v46  ;;  %v2727_v1 = vld [vmem:[#allocation2 + $0x19] sm:$0xff] }
  0xba   : > { %v621_v10 = vmul.f32 %v620_v9, %v2635_v4  ;;  %v608_v11 = vmul.f32 %v606_v5, %v2641_v8  ;;  %v635_v13 = vmul.f32 %v634_v12, %v2635_v4  ;;  %v622_v15 = vmul.f32 %v620_v9, %v2641_v8 }
  0xbb   : > { %363 = vrot.lane.b32.xlu0 %v359_v25, %s2475_s12  ;;  %351 = vrot.lane.b32.xlu1 %v346_v26, %s2475_s12  ;;  %v649_v17 = vmul.f32 %v648_v16, %v2635_v4  ;;  %v636_v18 = vmul.f32 %v634_v12, %v2641_v8  ;;  %v663_v21 = vmul.f32 %v662_v20, %v2635_v4  ;;  %v690_v26 = vstv %s2269_s9  ;;  %s2755_s9 = sld [smem:[#allocation3 + $0x4b]] }
  0xbc   : > { %v650_v22 = vmul.f32 %v648_v16, %v2641_v8  ;;  %v677_v24 = vmul.f32 %v676_v23, %v2635_v4  ;;  %v664_v25 = vmul.f32 %v662_v20, %v2641_v8  ;;  %v691_v27 = vmul.f32 %v690_v26, %v2635_v4 }
  0xbd   : > { %v692_v33 = vmul.f32 %v690_v26, %v2641_v8  ;;  %v896_v12 = vstv %s2713_s25  ;;  %s2868_s25 = sld [smem:[#allocation3 + $0x11]] }
  0xbf   : > { %377 = vrot.lane.b32.xlu0 %v373_v28, %s2475_s12  ;;  %365 = vrot.lane.b32.xlu1 %v360_v29, %s2475_s12  ;;  %v678_v28 = vmul.f32 %v676_v23, %v2641_v8  ;;  %v704_v29 = vstv %s2270_s10  ;;  %v910_v23 = vstv %s2725_s30  ;;  %s2770_s10 = sld [smem:[#allocation3 + $0x6f]]  ;;  %s2916_s30 = sld [smem:[#allocation3 + $0x7d]] }
  0xc3   : > { %391 = vrot.lane.b32.xlu0 %v387_v31, %s2476_s19  ;;  %379 = vrot.lane.b32.xlu1 %v374_v32, %s2475_s12  ;;  %v744_v31 = vstv %s2275_s11  ;;  %v705_v32 = vmul.f32 %v704_v29, %v2635_v4  ;;  %s2779_s11 = sld [smem:[#allocation3 + $0x32]] }
  0xc4   : > { %v746_v39 = vmul.f32 %v744_v31, %v2677_v36 }
  0xc7   : > { %405 = vrot.lane.b32.xlu0 %v401_v34, %s2476_s19  ;;  %393 = vrot.lane.b32.xlu1 %v388_v35, %s2476_s19  ;;  %v745_v34 = vmul.f32 %v744_v31, %v2669_v30  ;;  %v706_v35 = vmul.f32 %v704_v29, %v2641_v8  ;;  %v450_v29 = vstv %s2735_s6  ;;  %s2940_s6 = sld [smem:[#allocation3 + $0x37]] }
  0xcb   : > { %419 = vrot.lane.b32.xlu0 %v415_v37, %s2476_s19  ;;  %407 = vrot.lane.b32.xlu1 %v402_v38, %s2476_s19  ;;  %v758_v37 = vstv %s2276_s13  ;;  %s2795_s13 = sld [smem:[#allocation3 + $0x56]] }
  0xcc   : > { %v759_v38 = vmul.f32 %v758_v37, %v2669_v30  ;;  %v760_v43 = vmul.f32 %v758_v37, %v2677_v36 }
  0xcf   : > { %433 = vrot.lane.b32.xlu0 %v429_v40, %s2476_s19  ;;  %421 = vrot.lane.b32.xlu1 %v416_v41, %s2476_s19  ;;  %v772_v40 = vstv %s2277_s14  ;;  %s2812_s14 = sld [smem:[#allocation3 + $0x7a]] }
  0xd0   : > { %v773_v41 = vmul.f32 %v772_v40, %v2669_v30  ;;  %v774_v47 = vmul.f32 %v772_v40, %v2677_v36  ;;  %v911_v40 = vmul.f32 %v910_v23, %v2727_v1 }
  0xd3   : > { %473 = vrot.lane.b32.xlu0 %v469_v44, %s2475_s12  ;;  %435 = vrot.lane.b32.xlu1 %v430_v45, %s2476_s19  ;;  %v786_v44 = vstv %s2278_s17  ;;  %s2826_s17 = sld [smem:[#allocation3 + $0x10]] }
  0xd4   : > { %v787_v45 = vmul.f32 %v786_v44, %v2669_v30  ;;  %v788_v50 = vmul.f32 %v786_v44, %v2677_v36 }
  0xd7   : > { %487 = vrot.lane.b32.xlu0 %v483_v48, %s2475_s12  ;;  %475 = vrot.lane.b32.xlu1 %v470_v49, %s2475_s12  ;;  %v800_v48 = vstv %s2279_s18  ;;  %s2836_s18 = sld [smem:[#allocation3 + $0x34]] }
  0xd8   : > { %v801_v49 = vmul.f32 %v800_v48, %v2669_v30 }
  0xdb   : > { %501 = vrot.lane.b32.xlu0 %v497_v51, %s2475_s12  ;;  %489 = vrot.lane.b32.xlu1 %v484_v52, %s2475_s12  ;;  %v814_v51 = vstv %s2280_s20  ;;  %s2840_s20 = sld [smem:[#allocation3 + $0x6]] }
  0xdc   : > { %v815_v53 = vmul.f32 %v814_v51, %v2669_v30  ;;  %v816_v59 = vmul.f32 %v814_v51, %v2677_v36 }
  0xdf   : > { %515 = vrot.lane.b32.xlu0 %v511_v54, %s2475_s12  ;;  %503 = vrot.lane.b32.xlu1 %v498_v55, %s2475_s12  ;;  %v802_v54 = vmul.f32 %v800_v48, %v2677_v36  ;;  %v828_v55 = vstv %s2691_s21  ;;  %v938_v48 = vstv %s2752_s8  ;;  %s2847_s21 = sld [smem:[#allocation3 + $0x58]]  ;;  %s2951_s8 = sld [smem:[#allocation3 + $0x5b]] }
  0xe3   : > { %529 = vrot.lane.b32.xlu0 %v525_v57, %s2476_s19  ;;  %517 = vrot.lane.b32.xlu1 %v512_v58, %s2475_s12  ;;  %v829_v58 = vmul.f32 %v828_v55, %v2669_v30 }
  0xe7   : > { %543 = vrot.lane.b32.xlu0 %v539_v60, %s2476_s19  ;;  %531 = vrot.lane.b32.xlu1 %v526_v61, %s2476_s19  ;;  %v842_v60 = vstv %s2697_s22  ;;  %s2851_s22 = sld [smem:[#allocation3 + $0x2a]] }
  0xe8   : > { %v844_v9 = vmul.f32 %v842_v60, %v2677_v36 }
  0xeb   : > { %557 = vrot.lane.b32.xlu0 %v553_v63, %s2476_s19  ;;  %545 = vrot.lane.b32.xlu1 %v540_v0, %s2476_s19  ;;  %v843_v63 = vmul.f32 %v842_v60, %v2669_v30  ;;  %v830_v0 = vmul.f32 %v828_v55, %v2677_v36 }
  0xef   : > { %571 = vrot.lane.b32.xlu0 %v567_v2, %s2476_s19  ;;  %559 = vrot.lane.b32.xlu1 %v554_v3, %s2476_s19  ;;  %v882_v2 = vstv %s2704_s23  ;;  %v306_v3 = vstv %s2706_s24  ;;  %s2855_s23 = sld [smem:[#allocation3 + $0x7c]]  ;;  %s2863_s24 = sld [smem:[#allocation3 + $0x4e]] }
  0xf3   : > { %611 = vrot.lane.b32.xlu0 %v607_v6, %s2475_s12  ;;  %573 = vrot.lane.b32.xlu1 %v568_v7, %s2476_s19  ;;  %v883_v7 = vmul.f32 %v882_v2, %v2727_v1 }
  0xf7   : > { %625 = vrot.lane.b32.xlu0 %v621_v10, %s2475_s12  ;;  %613 = vrot.lane.b32.xlu1 %v608_v11, %s2475_s12  ;;  %v2745_v10 = vld [vmem:[#allocation2 + $0x21] sm:$0xff]  ;;  %v307_v11 = vmul.f32 %v306_v3, %v2563_v14 }
  0xfb   : > { %639 = vrot.lane.b32.xlu0 %v635_v13, %s2475_s12  ;;  %627 = vrot.lane.b32.xlu1 %v622_v15, %s2475_s12  ;;  %v312_v13 = vstv %s2715_s26  ;;  %v444_v15 = vstv %s2719_s27  ;;  %s2875_s26 = sld [smem:[#allocation3 + $0x72]]  ;;  %s2884_s27 = sld [smem:[#allocation3 + $0x35]] }
  0xff   : > { %653 = vrot.lane.b32.xlu0 %v649_v17, %s2475_s12  ;;  %641 = vrot.lane.b32.xlu1 %v636_v18, %s2475_s12  ;;  %v318_v17 = vstv %s2721_s28  ;;  %s2900_s28 = sld [smem:[#allocation3 + $0x59]] }
 0x100   : > { %v319_v37 = vmul.f32 %v318_v17, %v2563_v14 }
 0x103   : > { %667 = vrot.lane.b32.xlu0 %v663_v21, %s2476_s19  ;;  %655 = vrot.lane.b32.xlu1 %v650_v22, %s2475_s12  ;;  %v897_v21 = vmul.f32 %v896_v12, %v2727_v1  ;;  %v884_v22 = vmul.f32 %v882_v2, %v2745_v10 }
 0x107   : > { %681 = vrot.lane.b32.xlu0 %v677_v24, %s2476_s19  ;;  %669 = vrot.lane.b32.xlu1 %v664_v25, %s2476_s19  ;;  %v308_v24 = vmul.f32 %v306_v3, %v2569_v19  ;;  %v313_v25 = vmul.f32 %v312_v13, %v2563_v14 }
 0x10b   : > { %695 = vrot.lane.b32.xlu0 %v691_v27, %s2476_s19  ;;  %683 = vrot.lane.b32.xlu1 %v678_v28, %s2476_s19  ;;  %v445_v27 = vmul.f32 %v444_v15, %v2599_v42  ;;  %v324_v28 = vstv %s2733_s5  ;;  %s2930_s5 = sld [smem:[#allocation3 + $0x13]] }
 0x10c   : > { %v325_v55 = vmul.f32 %v324_v28, %v2563_v14  ;;  %v462_v14 = vstv %s2770_s10  ;;  %s2959_s10 = sld [smem:[#allocation3 + $0x7f]] }
 0x10f   : > { %709 = vrot.lane.b32.xlu0 %v705_v32, %s2476_s19  ;;  %697 = vrot.lane.b32.xlu1 %v692_v33, %s2476_s19  ;;  %v924_v33 = vstv %s2737_s7  ;;  %s2944_s7 = sld [smem:[#allocation3 + $0x9]] }
 0x113   : > { %749 = vrot.lane.b32.xlu0 %v745_v34, %s2475_s12  ;;  %711 = vrot.lane.b32.xlu1 %v706_v35, %s2476_s19  ;;  %v314_v35 = vmul.f32 %v312_v13, %v2569_v19  ;;  %v939_v13 = vmul.f32 %v938_v48, %v2727_v1 }
 0x117   : > { %763 = vrot.lane.b32.xlu0 %v759_v38, %s2475_s12  ;;  %751 = vrot.lane.b32.xlu1 %v746_v39, %s2475_s12 }
 0x11b   : > { %777 = vrot.lane.b32.xlu0 %v773_v41, %s2475_s12  ;;  %765 = vrot.lane.b32.xlu1 %v760_v43, %s2475_s12  ;;  %v898_v41 = vmul.f32 %v896_v12, %v2745_v10 }
 0x11f   : > { %791 = vrot.lane.b32.xlu0 %v787_v45, %s2475_s12  ;;  %779 = vrot.lane.b32.xlu1 %v774_v47, %s2475_s12  ;;  %v446_v45 = vmul.f32 %v444_v15, %v2605_v46  ;;  %v451_v47 = vmul.f32 %v450_v29, %v2599_v42  ;;  %v926_v15 = vmul.f32 %v924_v33, %v2745_v10 }
 0x123   : > { %805 = vrot.lane.b32.xlu0 %v801_v49, %s2476_s19  ;;  %793 = vrot.lane.b32.xlu1 %v788_v50, %s2475_s12  ;;  %v456_v49 = vstv %s2755_s9  ;;  %s2955_s9 = sld [smem:[#allocation3 + $0x2d]] }
 0x125   : > { %v336_v52 = vpop.permute.xlu0 %335 }
 0x126   : > { %v341_v16 = vadd.f32 %v336_v52, %v307_v11 }
 0x127   : > { %819 = vrot.lane.b32.xlu0 %v815_v53, %s2476_s19  ;;  %807 = vrot.lane.b32.xlu1 %v802_v54, %s2476_s19  ;;  %v320_v54 = vmul.f32 %v318_v17, %v2569_v19 }
 0x129   : > { %v338_v56 = vpop.permute.xlu1 %337  ;;  %v350_v57 = vpop.permute.xlu0 %349 }
 0x12a   : > { %v342_v31 = vadd.f32 %v338_v56, %v308_v24  ;;  %v355_v32 = vadd.f32 %v350_v57, %v313_v25 }
 0x12b   : > { %833 = vrot.lane.b32.xlu0 %v829_v58, %s2476_s19  ;;  %821 = vrot.lane.b32.xlu1 %v816_v59, %s2476_s19  ;;  %v925_v58 = vmul.f32 %v924_v33, %v2727_v1  ;;  %v912_v59 = vmul.f32 %v910_v23, %v2745_v10 }
 0x12d   : > { %v352_v61 = vpop.permute.xlu1 %351  ;;  %v364_v62 = vpop.permute.xlu0 %363 }
 0x12e   : > { %v356_v50 = vadd.f32 %v352_v61, %v314_v35  ;;  %v369_v51 = vadd.f32 %v364_v62, %v319_v37  ;;  %v452_v61 = vmul.f32 %v450_v29, %v2605_v46  ;;  %v457_v62 = vmul.f32 %v456_v49, %v2599_v42 }
 0x12f   : > { %847 = vrot.lane.b32.xlu0 %v843_v63, %s2476_s19  ;;  %835 = vrot.lane.b32.xlu1 %v830_v0, %s2476_s19  ;;  %v980_v35 = vstv %s2812_s14  ;;  %s2979_s14 = sld [smem:[#allocation3 + $0x75]] }
 0x131   : > { %v2739_v5 = vpop.permute.xlu1 %365  ;;  %v2741_v6 = vpop.permute.xlu0 %377 }
 0x132   : > { %v370_v0 = vadd.f32 %v2739_v5, %v320_v54  ;;  %v383_v2 = vadd.f32 %v2741_v6, %v325_v55  ;;  %v458_v5 = vmul.f32 %v456_v49, %v2605_v46  ;;  %v463_v6 = vmul.f32 %v462_v14, %v2599_v42 }
 0x133   : > { %887 = vrot.lane.b32.xlu0 %v883_v7, %s2475_s12  ;;  %849 = vrot.lane.b32.xlu1 %v844_v9, %s2476_s19  ;;  %v326_v9 = vmul.f32 %v324_v28, %v2569_v19  ;;  %v966_v28 = vstv %s2795_s13  ;;  %v464_v42 = vmul.f32 %v462_v14, %v2605_v46  ;;  %v1034_v49 = vstv %s2836_s18  ;;  %s2972_s13 = sld [smem:[#allocation3 + $0x14]] }
 0x134   : > { %s3004_s18 = sld [smem:[#allocation3 + $0x5c]] }
 0x135   : > { %v2758_v18 = vpop.permute.xlu1 %379  ;;  %v392_v20 = vpop.permute.xlu0 %391 }
 0x136   : > { %v397_v26 = vadd.f32 %v392_v20, %v341_v16  ;;  %v952_v16 = vstv %s2779_s11  ;;  %v384_v19 = vadd.f32 %v2758_v18, %v326_v9  ;;  %s2967_s11 = sld [smem:[#allocation3 + $0x51]] }
 0x137   : > { %901 = vrot.lane.b32.xlu0 %v897_v21, %s2475_s12  ;;  %889 = vrot.lane.b32.xlu1 %v884_v22, %s2475_s12  ;;  %v953_v25 = vmul.f32 %v952_v16, %v2727_v1  ;;  %v954_v33 = vmul.f32 %v952_v16, %v2745_v10 }
 0x138   : > { %v2773_v34 = vadd.f32 %v445_v27, %v397_v26  ;;  %v940_v26 = vmul.f32 %v938_v48, %v2745_v10  ;;  %v2857_v48 = vld [vmem:[#allocation2 + $0x22] sm:$0xff] }
 0x139   : > { %v394_v38 = vpop.permute.xlu1 %393  ;;  %v406_v39 = vpop.permute.xlu0 %405  ;;  %v1036_v9 = vmul.f32 %v1034_v49, %v2857_v48 }
 0x13a   : > { %v398_v43 = vadd.f32 %v394_v38, %v342_v31  ;;  %v411_v44 = vadd.f32 %v406_v39, %v355_v32  ;;  %v967_v32 = vmul.f32 %v966_v28, %v2727_v1  ;;  %v981_v38 = vmul.f32 %v980_v35, %v2727_v1 }
 0x13b   : > { %915 = vrot.lane.b32.xlu0 %v911_v40, %s2475_s12  ;;  %903 = vrot.lane.b32.xlu1 %v898_v41, %s2475_s12  ;;  %v968_v39 = vmul.f32 %v966_v28, %v2745_v10  ;;  %v2844_v40 = vld [vmem:[#allocation2 + $0x1a] sm:$0xff]  ;;  %v1020_v41 = vstv %s2826_s17  ;;  %v600_v28 = vstv %s2875_s26  ;;  %s2988_s17 = sld [smem:[#allocation3 + $0x38]]  ;;  %s3063_s26 = sld [smem:[#allocation3 + $0x82]] }
 0x13c   : > { %v2787_v52 = vadd.f32 %v446_v45, %v398_v43  ;;  %v2789_v53 = vadd.f32 %v451_v47, %v411_v44  ;;  %v1021_v45 = vmul.f32 %v1020_v41, %v2844_v40  ;;  %v982_v47 = vmul.f32 %v980_v35, %v2745_v10 }
 0x13d   : > { %v408_v56 = vpop.permute.xlu1 %407  ;;  %v420_v57 = vpop.permute.xlu0 %419 }
 0x13e   : > { %v412_v60 = vadd.f32 %v408_v56, %v356_v50  ;;  %v425_v63 = vadd.f32 %v420_v57, %v369_v51  ;;  %v582_v50 = vstv %s2840_s20  ;;  %v1035_v56 = vmul.f32 %v1034_v49, %v2844_v40  ;;  %s3020_s20 = sld [smem:[#allocation3 + $0x80]] }
 0x13f   : > { %929 = vrot.lane.b32.xlu0 %v925_v58, %s2475_s12  ;;  %917 = vrot.lane.b32.xlu1 %v912_v59, %s2475_s12  ;;  %v1022_v57 = vmul.f32 %v1020_v41, %v2857_v48  ;;  %v1048_v59 = vstv %s2847_s21  ;;  %s3034_s21 = sld [smem:[#allocation3 + $0x16]] }
 0x140   : > { %v2804_v3 = vadd.f32 %v452_v61, %v412_v60  ;;  %v2806_v7 = vadd.f32 %v457_v62, %v425_v63  ;;  %v583_v60 = vmul.f32 %v582_v50, %v2635_v4  ;;  %v588_v63 = vstv %s2851_s22  ;;  %s3044_s22 = sld [smem:[#allocation3 + $0x3a]] }
 0x141   : > { %v422_v11 = vpop.permute.xlu1 %421  ;;  %v434_v12 = vpop.permute.xlu0 %433 }
 0x142   : > { %v426_v17 = vadd.f32 %v422_v11, %v370_v0  ;;  %v439_v20 = vadd.f32 %v434_v12, %v383_v2  ;;  %v1049_v2 = vmul.f32 %v1048_v59, %v2844_v40  ;;  %v1062_v11 = vstv %s2855_s23  ;;  %s3048_s23 = sld [smem:[#allocation3 + $0xc]] }
 0x143   : > { %943 = vrot.lane.b32.xlu0 %v939_v13, %s2476_s19  ;;  %931 = vrot.lane.b32.xlu1 %v926_v15, %s2475_s12  ;;  %v584_v15 = vmul.f32 %v582_v50, %v2641_v8 }
 0x144   : > { %v2819_v21 = vadd.f32 %v458_v5, %v426_v17  ;;  %v2821_v22 = vadd.f32 %v463_v6, %v439_v20 }
 0x145   : > { %v436_v23 = vpop.permute.xlu1 %435  ;;  %v474_v24 = vpop.permute.xlu0 %473 }
 0x146   : > { %v440_v27 = vadd.f32 %v436_v23, %v384_v19  ;;  %v479_v51 = vadd.f32 %v474_v24, %v2773_v34  ;;  %v1063_v23 = vmul.f32 %v1062_v11, %v2844_v40  ;;  %v1050_v24 = vmul.f32 %v1048_v59, %v2857_v48 }
 0x147   : > { %957 = vrot.lane.b32.xlu0 %v953_v25, %s2476_s19  ;;  %945 = vrot.lane.b32.xlu1 %v940_v26, %s2476_s19  ;;  %v1076_v25 = vstv %s2868_s25  ;;  %s3059_s25 = sld [smem:[#allocation3 + $0x30]] }
 0x148   : > { %v2831_v18 = vadd.f32 %v464_v42, %v440_v27 }
 0x149   : > { %v476_v29 = vpop.permute.xlu1 %475  ;;  %v488_v31 = vpop.permute.xlu0 %487 }
 0x14a   : > { %v480_v34 = vadd.f32 %v476_v29, %v2787_v52  ;;  %v493_v61 = vadd.f32 %v488_v31, %v2789_v53  ;;  %v589_v52 = vmul.f32 %v588_v63, %v2635_v4  ;;  %v594_v53 = vstv %s2863_s24  ;;  %s3055_s24 = sld [smem:[#allocation3 + $0x5e]] }
 0x14b   : > { %971 = vrot.lane.b32.xlu0 %v967_v32, %s2476_s19  ;;  %959 = vrot.lane.b32.xlu1 %v954_v33, %s2476_s19 }
 0x14d   : > { %v490_v46 = vpop.permute.xlu1 %489  ;;  %v502_v37 = vpop.permute.xlu0 %501 }
 0x14e   : > { %v494_v16 = vadd.f32 %v490_v46, %v2804_v3  ;;  %v507_v17 = vadd.f32 %v502_v37, %v2806_v7  ;;  %v590_v3 = vmul.f32 %v588_v63, %v2641_v8  ;;  %v595_v7 = vmul.f32 %v594_v53, %v2635_v4 }
 0x14f   : > { %985 = vrot.lane.b32.xlu0 %v981_v38, %s2476_s19  ;;  %973 = vrot.lane.b32.xlu1 %v968_v39, %s2476_s19  ;;  %v1077_v46 = vmul.f32 %v1076_v25, %v2844_v40  ;;  %v1064_v37 = vmul.f32 %v1062_v11, %v2857_v48  ;;  %v1090_v38 = vstv %s2884_s27  ;;  %s3071_s27 = sld [smem:[#allocation3 + $0x54]] }
 0x150   : > { %v1091_v50 = vmul.f32 %v1090_v38, %v2844_v40  ;;  %v1092_v59 = vmul.f32 %v1090_v38, %v2857_v48 }
 0x151   : > { %v504_v43 = vpop.permute.xlu1 %503  ;;  %v516_v44 = vpop.permute.xlu0 %515 }
 0x152   : > { %v508_v42 = vadd.f32 %v504_v43, %v2819_v21  ;;  %v521_v29 = vadd.f32 %v516_v44, %v2821_v22  ;;  %v596_v21 = vmul.f32 %v594_v53, %v2641_v8  ;;  %v601_v22 = vmul.f32 %v600_v28, %v2635_v4 }
 0x153   : > { %1025 = vrot.lane.b32.xlu0 %v1021_v45, %s2475_s12  ;;  %987 = vrot.lane.b32.xlu1 %v982_v47, %s2476_s19  ;;  %v602_v4 = vmul.f32 %v600_v28, %v2641_v8 }
 0x155   : > { %v518_v54 = vpop.permute.xlu1 %517  ;;  %v530_v55 = vpop.permute.xlu0 %529 }
 0x156   : > { %v535_v58 = vadd.f32 %v530_v55, %v479_v51  ;;  %v522_v43 = vadd.f32 %v518_v54, %v2831_v18  ;;  %v1078_v51 = vmul.f32 %v1076_v25, %v2857_v48 }
 0x157   : > { %1039 = vrot.lane.b32.xlu0 %v1035_v56, %s2475_s12  ;;  %1027 = vrot.lane.b32.xlu1 %v1022_v57, %s2475_s12  ;;  %v1104_v56 = vstv %s2900_s28  ;;  %s3076_s28 = sld [smem:[#allocation3 + $0x17]] }
 0x158   : > { %v2879_v62 = vadd.f32 %v583_v60, %v535_v58  ;;  %v1105_v58 = vmul.f32 %v1104_v56, %v2844_v40  ;;  %v1118_v60 = vstv %s2916_s30  ;;  %s3083_s30 = sld [smem:[#allocation3 + $0x78]] }
 0x159   : > { %v532_v14 = vpop.permute.xlu1 %531  ;;  %v544_v0 = vpop.permute.xlu0 %543  ;;  %v1120_v11 = vmul.f32 %v1118_v60, %v2857_v48 }
 0x15a   : > { %v536_v12 = vadd.f32 %v532_v14, %v480_v34  ;;  %v549_v13 = vadd.f32 %v544_v0, %v493_v61  ;;  %v1106_v34 = vmul.f32 %v1104_v56, %v2857_v48  ;;  %v1119_v61 = vmul.f32 %v1118_v60, %v2844_v40  ;;  %v2948_v14 = vld [vmem:[#allocation2 + $0x30] sm:$0xff] }
 0x15b   : > { %1053 = vrot.lane.b32.xlu0 %v1049_v2, %s2475_s12  ;;  %1041 = vrot.lane.b32.xlu1 %v1036_v9, %s2475_s12  ;;  %v1158_v0 = vstv %s2930_s5  ;;  %v738_v56 = vstv %s2979_s14  ;;  %s3092_s5 = sld [smem:[#allocation3 + $0x3b]]  ;;  %s3167_s14 = sld [smem:[#allocation3 + $0x85]] }
 0x15c   : > { %v2893_v20 = vadd.f32 %v584_v15, %v536_v12  ;;  %v2895_v5 = vadd.f32 %v589_v52, %v549_v13  ;;  %v1159_v12 = vmul.f32 %v1158_v0, %v2948_v14  ;;  %v2961_v13 = vld [vmem:[#allocation2 + $0x38] sm:$0xff]  ;;  %v1172_v15 = vstv %s2940_s6  ;;  %s3108_s6 = sld [smem:[#allocation3 + $0x5f]] }
 0x15d   : > { %v546_v6 = vpop.permute.xlu1 %545  ;;  %v558_v19 = vpop.permute.xlu0 %557  ;;  %v720_v52 = vstv %s2944_s7  ;;  %s3124_s7 = sld [smem:[#allocation3 + $0x83]] }
 0x15e   : > { %v550_v26 = vadd.f32 %v546_v6, %v494_v16  ;;  %v563_v27 = vadd.f32 %v558_v19, %v507_v17  ;;  %v1160_v6 = vmul.f32 %v1158_v0, %v2961_v13  ;;  %v1173_v19 = vmul.f32 %v1172_v15, %v2948_v14 }
 0x15f   : > { %1067 = vrot.lane.b32.xlu0 %v1063_v23, %s2475_s12  ;;  %1055 = vrot.lane.b32.xlu1 %v1050_v24, %s2475_s12  ;;  %v1186_v24 = vstv %s2951_s8  ;;  %v721_v25 = vmul.f32 %v720_v52, %v2669_v30  ;;  %s3138_s8 = sld [smem:[#allocation3 + $0x19]] }
 0x160   : > { %v2909_v31 = vadd.f32 %v590_v3, %v550_v26  ;;  %v2911_v32 = vadd.f32 %v595_v7, %v563_v27  ;;  %v726_v26 = vstv %s2955_s9  ;;  %s3148_s9 = sld [smem:[#allocation3 + $0x3d]] }
 0x161   : > { %v560_v33 = vpop.permute.xlu1 %559  ;;  %v572_v35 = vpop.permute.xlu0 %571 }
 0x162   : > { %v564_v39 = vadd.f32 %v560_v33, %v508_v42  ;;  %v577_v41 = vadd.f32 %v572_v35, %v521_v29  ;;  %v1174_v42 = vmul.f32 %v1172_v15, %v2961_v13  ;;  %v1187_v29 = vmul.f32 %v1186_v24, %v2948_v14 }
 0x163   : > { %1081 = vrot.lane.b32.xlu0 %v1077_v46, %s2476_s19  ;;  %1069 = vrot.lane.b32.xlu1 %v1064_v37, %s2475_s12  ;;  %v1200_v33 = vstv %s2959_s10  ;;  %v722_v37 = vmul.f32 %v720_v52, %v2677_v36  ;;  %s3152_s10 = sld [smem:[#allocation3 + $0xf]] }
 0x164   : > { %v2923_v44 = vadd.f32 %v596_v21, %v564_v39  ;;  %v2925_v45 = vadd.f32 %v601_v22, %v577_v41 }
 0x165   : > { %v574_v47 = vpop.permute.xlu1 %573  ;;  %v612_v49 = vpop.permute.xlu0 %611 }
 0x166   : > { %v578_v55 = vadd.f32 %v574_v47, %v522_v43  ;;  %v617_v53 = vadd.f32 %v612_v49, %v2879_v62  ;;  %v1188_v47 = vmul.f32 %v1186_v24, %v2961_v13  ;;  %v1201_v49 = vmul.f32 %v1200_v33, %v2948_v14 }
 0x167   : > { %1095 = vrot.lane.b32.xlu0 %v1091_v50, %s2476_s19  ;;  %1083 = vrot.lane.b32.xlu1 %v1078_v51, %s2476_s19  ;;  %v1214_v50 = vstv %s2972_s13  ;;  %s3163_s13 = sld [smem:[#allocation3 + $0x33]] }
 0x168   : > { %v2935_v18 = vadd.f32 %v602_v4, %v578_v55  ;;  %v1216_v52 = vmul.f32 %v1214_v50, %v2961_v13 }
 0x169   : > { %v614_v54 = vpop.permute.xlu1 %613  ;;  %v626_v57 = vpop.permute.xlu0 %625 }
 0x16a   : > { %v618_v62 = vadd.f32 %v614_v54, %v2893_v20  ;;  %v631_v27 = vadd.f32 %v626_v57, %v2895_v5  ;;  %v727_v20 = vmul.f32 %v726_v26, %v2669_v30  ;;  %v732_v5 = vstv %s2967_s11  ;;  %s3159_s11 = sld [smem:[#allocation3 + $0x61]] }
 0x16b   : > { %1109 = vrot.lane.b32.xlu0 %v1105_v58, %s2476_s19  ;;  %1097 = vrot.lane.b32.xlu1 %v1092_v59, %s2476_s19 }
 0x16d   : > { %v628_v8 = vpop.permute.xlu1 %627  ;;  %v640_v63 = vpop.permute.xlu0 %639 }
 0x16e   : > { %v632_v38 = vadd.f32 %v628_v8, %v2909_v31  ;;  %v645_v39 = vadd.f32 %v640_v63, %v2911_v32  ;;  %v728_v31 = vmul.f32 %v726_v26, %v2677_v36  ;;  %v733_v32 = vmul.f32 %v732_v5, %v2669_v30 }
 0x16f   : > { %1111 = vrot.lane.b32.xlu1 %v1106_v34, %s2476_s19  ;;  %1123 = vrot.lane.b32.xlu0 %v1119_v61, %s2476_s19  ;;  %v1202_v8 = vmul.f32 %v1200_v33, %v2961_v13  ;;  %v1215_v63 = vmul.f32 %v1214_v50, %v2948_v14  ;;  %v1228_v34 = vstv %s2988_s17  ;;  %s3175_s17 = sld [smem:[#allocation3 + $0x57]] }
 0x171   : > { %v642_v2 = vpop.permute.xlu1 %641  ;;  %v654_v9 = vpop.permute.xlu0 %653 }
 0x172   : > { %v646_v4 = vadd.f32 %v642_v2, %v2923_v44  ;;  %v659_v54 = vadd.f32 %v654_v9, %v2925_v45  ;;  %v734_v44 = vmul.f32 %v732_v5, %v2677_v36  ;;  %v739_v45 = vmul.f32 %v738_v56, %v2669_v30 }
 0x173   : > { %1125 = vrot.lane.b32.xlu1 %v1120_v11, %s2476_s19  ;;  %1163 = vrot.lane.b32.xlu0 %v1159_v12, %s2475_s12  ;;  %v740_v30 = vmul.f32 %v738_v56, %v2677_v36 }
 0x175   : > { %v656_v16 = vpop.permute.xlu1 %655  ;;  %v668_v17 = vpop.permute.xlu0 %667 }
 0x176   : > { %v673_v23 = vadd.f32 %v668_v17, %v617_v53  ;;  %v660_v2 = vadd.f32 %v656_v16, %v2935_v18  ;;  %v1229_v53 = vmul.f32 %v1228_v34, %v2948_v14 }
 0x177   : > { %1165 = vrot.lane.b32.xlu1 %v1160_v6, %s2475_s12  ;;  %1177 = vrot.lane.b32.xlu0 %v1173_v19, %s2475_s12  ;;  %v1242_v6 = vstv %s3004_s18  ;;  %s3180_s18 = sld [smem:[#allocation3 + $0x1a]] }
 0x178   : > { %v2983_v3 = vadd.f32 %v721_v25, %v673_v23  ;;  %v1230_v23 = vmul.f32 %v1228_v34, %v2961_v13  ;;  %v1243_v24 = vmul.f32 %v1242_v6, %v2948_v14  ;;  %v1256_v25 = vstv %s3020_s20  ;;  %s3187_s20 = sld [smem:[#allocation3 + $0x7b]] }
 0x179   : > { %v670_v7 = vpop.permute.xlu1 %669  ;;  %v682_v28 = vpop.permute.xlu0 %681  ;;  %v1258_v33 = vmul.f32 %v1256_v25, %v2961_v13 }
 0x17a   : > { %v674_v35 = vadd.f32 %v670_v7, %v618_v62  ;;  %v687_v46 = vadd.f32 %v682_v28, %v631_v27  ;;  %v1244_v62 = vmul.f32 %v1242_v6, %v2961_v13  ;;  %v1257_v27 = vmul.f32 %v1256_v25, %v2948_v14  ;;  %v3052_v7 = vld [vmem:[#allocation2 + $0x31] sm:$0xff] }
 0x17b   : > { %1179 = vrot.lane.b32.xlu1 %v1174_v42, %s2475_s12  ;;  %1191 = vrot.lane.b32.xlu0 %v1187_v29, %s2475_s12  ;;  %v1296_v28 = vstv %s3034_s21  ;;  %v876_v6 = vstv %s3083_s30  ;;  %s3196_s21 = sld [smem:[#allocation3 + $0x3e]]  ;;  %s3271_s30 = sld [smem:[#allocation3 + $0x88]] }
 0x17c   : > { %v2997_v41 = vadd.f32 %v722_v37, %v674_v35  ;;  %v2999_v21 = vadd.f32 %v727_v20, %v687_v46  ;;  %v1297_v35 = vmul.f32 %v1296_v28, %v3052_v7  ;;  %v3065_v46 = vld [vmem:[#allocation2 + $0x39] sm:$0xff]  ;;  %v1310_v37 = vstv %s3044_s22  ;;  %s3212_s22 = sld [smem:[#allocation3 + $0x62]] }
 0x17d   : > { %v684_v22 = vpop.permute.xlu1 %683  ;;  %v696_v43 = vpop.permute.xlu0 %695  ;;  %v858_v20 = vstv %s3048_s23  ;;  %s3228_s23 = sld [smem:[#allocation3 + $0x86]] }
 0x17e   : > { %v688_v51 = vadd.f32 %v684_v22, %v632_v38  ;;  %v701_v55 = vadd.f32 %v696_v43, %v645_v39  ;;  %v1298_v22 = vmul.f32 %v1296_v28, %v3065_v46  ;;  %v1311_v43 = vmul.f32 %v1310_v37, %v3052_v7 }
 0x17f   : > { %1193 = vrot.lane.b32.xlu1 %v1188_v47, %s2475_s12  ;;  %1205 = vrot.lane.b32.xlu0 %v1201_v49, %s2475_s12  ;;  %v1324_v49 = vstv %s3055_s24  ;;  %v859_v50 = vmul.f32 %v858_v20, %v2727_v1  ;;  %s3242_s24 = sld [smem:[#allocation3 + $0x1c]] }
 0x180   : > { %v3013_v57 = vadd.f32 %v728_v31, %v688_v51  ;;  %v3015_v58 = vadd.f32 %v733_v32, %v701_v55  ;;  %v864_v51 = vstv %s3059_s25  ;;  %s3252_s25 = sld [smem:[#allocation3 + $0x40]] }
 0x181   : > { %v698_v59 = vpop.permute.xlu1 %697  ;;  %v710_v60 = vpop.permute.xlu0 %709 }
 0x182   : > { %v702_v61 = vadd.f32 %v698_v59, %v646_v4  ;;  %v715_v0 = vadd.f32 %v710_v60, %v659_v54  ;;  %v1312_v4 = vmul.f32 %v1310_v37, %v3065_v46  ;;  %v1325_v54 = vmul.f32 %v1324_v49, %v3052_v7 }
 0x183   : > { %1207 = vrot.lane.b32.xlu1 %v1202_v8, %s2475_s12  ;;  %1219 = vrot.lane.b32.xlu0 %v1215_v63, %s2476_s19  ;;  %v1338_v59 = vstv %s3063_s26  ;;  %v860_v63 = vmul.f32 %v858_v20, %v2745_v10  ;;  %s3256_s26 = sld [smem:[#allocation3 + $0x12]] }
 0x184   : > { %v3027_v9 = vadd.f32 %v734_v44, %v702_v61  ;;  %v3029_v11 = vadd.f32 %v739_v45, %v715_v0 }
 0x185   : > { %v712_v12 = vpop.permute.xlu1 %711  ;;  %v750_v15 = vpop.permute.xlu0 %749 }
 0x186   : > { %v716_v17 = vadd.f32 %v712_v12, %v660_v2  ;;  %v755_v5 = vadd.f32 %v750_v15, %v2983_v3  ;;  %v1326_v12 = vmul.f32 %v1324_v49, %v3065_v46  ;;  %v1339_v15 = vmul.f32 %v1338_v59, %v3052_v7 }
 0x187   : > { %1221 = vrot.lane.b32.xlu1 %v1216_v52, %s2476_s19  ;;  %1233 = vrot.lane.b32.xlu0 %v1229_v53, %s2476_s19  ;;  %v1352_v52 = vstv %s3076_s28  ;;  %s3267_s28 = sld [smem:[#allocation3 + $0x36]] }
 0x188   : > { %v3039_v18 = vadd.f32 %v740_v30, %v716_v17  ;;  %v1354_v20 = vmul.f32 %v1352_v52, %v3065_v46 }
 0x189   : > { %v752_v16 = vpop.permute.xlu1 %751  ;;  %v764_v19 = vpop.permute.xlu0 %763 }
 0x18a   : > { %v756_v3 = vadd.f32 %v752_v16, %v2997_v41  ;;  %v769_v55 = vadd.f32 %v764_v19, %v2999_v21  ;;  %v865_v41 = vmul.f32 %v864_v51, %v2727_v1  ;;  %v870_v21 = vstv %s3071_s27  ;;  %s3263_s27 = sld [smem:[#allocation3 + $0x64]] }
 0x18b   : > { %1235 = vrot.lane.b32.xlu1 %v1230_v23, %s2476_s19  ;;  %1247 = vrot.lane.b32.xlu0 %v1243_v24, %s2476_s19 }
 0x18d   : > { %v766_v36 = vpop.permute.xlu1 %765  ;;  %v778_v26 = vpop.permute.xlu0 %777 }
 0x18e   : > { %v770_v34 = vadd.f32 %v766_v36, %v3013_v57  ;;  %v783_v61 = vadd.f32 %v778_v26, %v3015_v58  ;;  %v866_v57 = vmul.f32 %v864_v51, %v2745_v10  ;;  %v871_v58 = vmul.f32 %v870_v21, %v2727_v1 }
 0x18f   : > { %1249 = vrot.lane.b32.xlu1 %v1244_v62, %s2476_s19  ;;  %1261 = vrot.lane.b32.xlu0 %v1257_v27, %s2476_s19  ;;  %v1340_v36 = vmul.f32 %v1338_v59, %v3065_v46  ;;  %v1353_v26 = vmul.f32 %v1352_v52, %v3052_v7  ;;  %v1366_v62 = vstv %s3092_s5  ;;  %s3279_s5 = sld [smem:[#allocation3 + $0x5a]] }
 0x191   : > { %v780_v42 = vpop.permute.xlu1 %779  ;;  %v792_v29 = vpop.permute.xlu0 %791 }
 0x192   : > { %v784_v30 = vadd.f32 %v780_v42, %v3027_v9  ;;  %v797_v16 = vadd.f32 %v792_v29, %v3029_v11  ;;  %v872_v9 = vmul.f32 %v870_v21, %v2745_v10  ;;  %v877_v11 = vmul.f32 %v876_v6, %v2727_v1 }
 0x193   : > { %1263 = vrot.lane.b32.xlu1 %v1258_v33, %s2476_s19  ;;  %1301 = vrot.lane.b32.xlu0 %v1297_v35, %s2475_s12  ;;  %v878_v1 = vmul.f32 %v876_v6, %v2745_v10 }
 0x195   : > { %v794_v38 = vpop.permute.xlu1 %793  ;;  %v806_v39 = vpop.permute.xlu0 %805 }
 0x196   : > { %v811_v47 = vadd.f32 %v806_v39, %v755_v5  ;;  %v798_v42 = vadd.f32 %v794_v38, %v3039_v18  ;;  %v1367_v5 = vmul.f32 %v1366_v62, %v3052_v7 }
 0x197   : > { %1303 = vrot.lane.b32.xlu1 %v1298_v22, %s2475_s12  ;;  %1315 = vrot.lane.b32.xlu0 %v1311_v43, %s2475_s12  ;;  %v1380_v22 = vstv %s3108_s6  ;;  %s3284_s6 = sld [smem:[#allocation3 + $0x1d]] }
 0x198   : > { %v3087_v31 = vadd.f32 %v859_v50, %v811_v47  ;;  %v1368_v47 = vmul.f32 %v1366_v62, %v3065_v46  ;;  %v1381_v49 = vmul.f32 %v1380_v22, %v3052_v7  ;;  %v1394_v50 = vstv %s3124_s7  ;;  %s3291_s7 = sld [smem:[#allocation3 + $0x7e]] }
 0x199   : > { %v808_v32 = vpop.permute.xlu1 %807  ;;  %v820_v56 = vpop.permute.xlu0 %819  ;;  %v1396_v59 = vmul.f32 %v1394_v50, %v3065_v46 }
 0x19a   : > { %v812_v60 = vadd.f32 %v808_v32, %v756_v3  ;;  %v825_v8 = vadd.f32 %v820_v56, %v769_v55  ;;  %v1382_v3 = vmul.f32 %v1380_v22, %v3065_v46  ;;  %v1395_v55 = vmul.f32 %v1394_v50, %v3052_v7  ;;  %v3156_v32 = vld [vmem:[#allocation2 + $0x32] sm:$0xff] }
 0x19b   : > { %1317 = vrot.lane.b32.xlu1 %v1312_v4, %s2475_s12  ;;  %1329 = vrot.lane.b32.xlu0 %v1325_v54, %s2475_s12  ;;  %v1434_v56 = vstv %s3138_s8  ;;  %v1014_v22 = vstv %s3187_s20  ;;  %s3300_s8 = sld [smem:[#allocation3 + $0x41]]  ;;  %s3375_s20 = sld [smem:[#allocation3 + $0x8b]] }
 0x19c   : > { %v3101_v0 = vadd.f32 %v860_v63, %v812_v60  ;;  %v3103_v44 = vadd.f32 %v865_v41, %v825_v8  ;;  %v1435_v60 = vmul.f32 %v1434_v56, %v3156_v32  ;;  %v3169_v8 = vld [vmem:[#allocation2 + $0x3a] sm:$0xff]  ;;  %v1448_v63 = vstv %s3148_s9  ;;  %s3316_s9 = sld [smem:[#allocation3 + $0x65]] }
 0x19d   : > { %v822_v45 = vpop.permute.xlu1 %821  ;;  %v834_v2 = vpop.permute.xlu0 %833  ;;  %v996_v41 = vstv %s3152_s10  ;;  %s3332_s10 = sld [smem:[#allocation3 + $0x89]] }
 0x19e   : > { %v826_v53 = vadd.f32 %v822_v45, %v770_v34  ;;  %v839_v17 = vadd.f32 %v834_v2, %v783_v61  ;;  %v1436_v45 = vmul.f32 %v1434_v56, %v3169_v8  ;;  %v1449_v2 = vmul.f32 %v1448_v63, %v3156_v32 }
 0x19f   : > { %1331 = vrot.lane.b32.xlu1 %v1326_v12, %s2475_s12  ;;  %1343 = vrot.lane.b32.xlu0 %v1339_v15, %s2475_s12  ;;  %v1462_v15 = vstv %s3159_s11  ;;  %v997_v52 = vmul.f32 %v996_v41, %v2844_v40  ;;  %s3346_s11 = sld [smem:[#allocation3 + $0x1f]] }
 0x1a0   : > { %v3117_v19 = vadd.f32 %v866_v57, %v826_v53  ;;  %v3119_v23 = vadd.f32 %v871_v58, %v839_v17  ;;  %v1002_v53 = vstv %s3163_s13  ;;  %s3356_s13 = sld [smem:[#allocation3 + $0x43]] }
 0x1a1   : > { %v836_v24 = vpop.permute.xlu1 %835  ;;  %v848_v25 = vpop.permute.xlu0 %847 }
 0x1a2   : > { %v840_v27 = vadd.f32 %v836_v24, %v784_v30  ;;  %v853_v28 = vadd.f32 %v848_v25, %v797_v16  ;;  %v1450_v30 = vmul.f32 %v1448_v63, %v3169_v8  ;;  %v1463_v16 = vmul.f32 %v1462_v15, %v3156_v32 }
 0x1a3   : > { %1345 = vrot.lane.b32.xlu1 %v1340_v36, %s2475_s12  ;;  %1357 = vrot.lane.b32.xlu0 %v1353_v26, %s2476_s19  ;;  %v1476_v24 = vstv %s3167_s14  ;;  %v998_v26 = vmul.f32 %v996_v41, %v2857_v48  ;;  %s3360_s14 = sld [smem:[#allocation3 + $0x15]] }
 0x1a4   : > { %v3131_v29 = vadd.f32 %v872_v9, %v840_v27  ;;  %v3133_v33 = vadd.f32 %v877_v11, %v853_v28 }
 0x1a5   : > { %v850_v35 = vpop.permute.xlu1 %849  ;;  %v888_v37 = vpop.permute.xlu0 %887 }
 0x1a6   : > { %v854_v39 = vadd.f32 %v850_v35, %v798_v42  ;;  %v893_v21 = vadd.f32 %v888_v37, %v3087_v31  ;;  %v1464_v35 = vmul.f32 %v1462_v15, %v3169_v8  ;;  %v1477_v37 = vmul.f32 %v1476_v24, %v3156_v32 }
 0x1a7   : > { %1359 = vrot.lane.b32.xlu1 %v1354_v20, %s2476_s19  ;;  %1371 = vrot.lane.b32.xlu0 %v1367_v5, %s2476_s19  ;;  %v1490_v20 = vstv %s3180_s18  ;;  %s3371_s18 = sld [smem:[#allocation3 + $0x39]] }
 0x1a8   : > { %v3143_v18 = vadd.f32 %v878_v1, %v854_v39  ;;  %v1492_v41 = vmul.f32 %v1490_v20, %v3169_v8 }
 0x1a9   : > { %v890_v38 = vpop.permute.xlu1 %889  ;;  %v902_v43 = vpop.permute.xlu0 %901 }
 0x1aa   : > { %v894_v31 = vadd.f32 %v890_v38, %v3101_v0  ;;  %v907_v17 = vadd.f32 %v902_v43, %v3103_v44  ;;  %v1003_v0 = vmul.f32 %v1002_v53, %v2844_v40  ;;  %v1008_v44 = vstv %s3175_s17  ;;  %s3367_s17 = sld [smem:[#allocation3 + $0x67]] }
 0x1ab   : > { %1373 = vrot.lane.b32.xlu1 %v1368_v47, %s2476_s19  ;;  %1385 = vrot.lane.b32.xlu0 %v1381_v49, %s2476_s19 }
 0x1ad   : > { %v904_v10 = vpop.permute.xlu1 %903  ;;  %v916_v51 = vpop.permute.xlu0 %915 }
 0x1ae   : > { %v908_v62 = vadd.f32 %v904_v10, %v3117_v19  ;;  %v921_v27 = vadd.f32 %v916_v51, %v3119_v23  ;;  %v1004_v19 = vmul.f32 %v1002_v53, %v2857_v48  ;;  %v1009_v23 = vmul.f32 %v1008_v44, %v2844_v40 }
 0x1af   : > { %1387 = vrot.lane.b32.xlu1 %v1382_v3, %s2476_s19  ;;  %1399 = vrot.lane.b32.xlu0 %v1395_v55, %s2476_s19  ;;  %v1478_v10 = vmul.f32 %v1476_v24, %v3169_v8  ;;  %v1491_v51 = vmul.f32 %v1490_v20, %v3156_v32  ;;  %v1504_v3 = vstv %s3196_s21  ;;  %s3383_s21 = sld [smem:[#allocation3 + $0x5d]] }
 0x1b1   : > { %v918_v4 = vpop.permute.xlu1 %917  ;;  %v930_v54 = vpop.permute.xlu0 %929 }
 0x1b2   : > { %v922_v1 = vadd.f32 %v918_v4, %v3131_v29  ;;  %v935_v38 = vadd.f32 %v930_v54, %v3133_v33  ;;  %v1010_v29 = vmul.f32 %v1008_v44, %v2857_v48  ;;  %v1015_v33 = vmul.f32 %v1014_v22, %v2844_v40 }
 0x1b3   : > { %1401 = vrot.lane.b32.xlu1 %v1396_v59, %s2476_s19  ;;  %1439 = vrot.lane.b32.xlu0 %v1435_v60, %s2475_s12  ;;  %v1016_v40 = vmul.f32 %v1014_v22, %v2857_v48 }
 0x1b5   : > { %v932_v34 = vpop.permute.xlu1 %931  ;;  %v944_v61 = vpop.permute.xlu0 %943 }
 0x1b6   : > { %v949_v12 = vadd.f32 %v944_v61, %v893_v21  ;;  %v936_v4 = vadd.f32 %v932_v34, %v3143_v18  ;;  %v1505_v21 = vmul.f32 %v1504_v3, %v3156_v32 }
 0x1b7   : > { %1441 = vrot.lane.b32.xlu1 %v1436_v45, %s2475_s12  ;;  %1453 = vrot.lane.b32.xlu0 %v1449_v2, %s2475_s12  ;;  %v1518_v45 = vstv %s3212_s22  ;;  %s3388_s22 = sld [smem:[#allocation3 + $0x20]] }
 0x1b8   : > { %v3191_v57 = vadd.f32 %v997_v52, %v949_v12  ;;  %v1506_v12 = vmul.f32 %v1504_v3, %v3169_v8  ;;  %v1519_v15 = vmul.f32 %v1518_v45, %v3156_v32  ;;  %v1532_v52 = vstv %s3228_s23  ;;  %s3395_s23 = sld [smem:[#allocation3 + $0x81]] }
 0x1b9   : > { %v946_v58 = vpop.permute.xlu1 %945  ;;  %v958_v6 = vpop.permute.xlu0 %957  ;;  %v1534_v24 = vmul.f32 %v1532_v52, %v3169_v8 }
 0x1ba   : > { %v950_v25 = vadd.f32 %v946_v58, %v894_v31  ;;  %v963_v36 = vadd.f32 %v958_v6, %v907_v17  ;;  %v1520_v31 = vmul.f32 %v1518_v45, %v3169_v8  ;;  %v1533_v17 = vmul.f32 %v1532_v52, %v3156_v32  ;;  %v3260_v58 = vld [vmem:[#allocation2 + $0x48] sm:$0xff] }
 0x1bb   : > { %1455 = vrot.lane.b32.xlu1 %v1450_v30, %s2475_s12  ;;  %1467 = vrot.lane.b32.xlu0 %v1463_v16, %s2475_s12  ;;  %v1572_v6 = vstv %s3242_s24  ;;  %v1152_v45 = vstv %s3291_s7  ;;  %s3402_s24 = sld [smem:[#allocation3 + $0x44]]  ;;  %s3463_s7 = sld [smem:[#allocation3 + $0x8e]] }
 0x1bc   : > { %v3205_v28 = vadd.f32 %v998_v26, %v950_v25  ;;  %v3207_v9 = vadd.f32 %v1003_v0, %v963_v36  ;;  %v1573_v25 = vmul.f32 %v1572_v6, %v3260_v58  ;;  %v3273_v36 = vld [vmem:[#allocation2 + $0x50] sm:$0xff]  ;;  %v1586_v26 = vstv %s3252_s25  ;;  %s3414_s25 = sld [smem:[#allocation3 + $0x68]] }
 0x1bd   : > { %v960_v11 = vpop.permute.xlu1 %959  ;;  %v972_v42 = vpop.permute.xlu0 %971  ;;  %v1134_v0 = vstv %s3256_s26  ;;  %s3426_s26 = sld [smem:[#allocation3 + $0x8c]] }
 0x1be   : > { %v964_v5 = vadd.f32 %v960_v11, %v908_v62  ;;  %v977_v39 = vadd.f32 %v972_v42, %v921_v27  ;;  %v1574_v11 = vmul.f32 %v1572_v6, %v3273_v36  ;;  %v1587_v42 = vmul.f32 %v1586_v26, %v3260_v58 }
 0x1bf   : > { %1469 = vrot.lane.b32.xlu1 %v1464_v35, %s2475_s12  ;;  %1481 = vrot.lane.b32.xlu0 %v1477_v37, %s2475_s12  ;;  %v1600_v37 = vstv %s3263_s27  ;;  %v1135_v20 = vmul.f32 %v1134_v0, %v2948_v14  ;;  %s3436_s27 = sld [smem:[#allocation3 + $0x22]] }
 0x1c0   : > { %v3221_v43 = vadd.f32 %v1004_v19, %v964_v5  ;;  %v3223_v47 = vadd.f32 %v1009_v23, %v977_v39  ;;  %v1140_v5 = vstv %s3267_s28  ;;  %s3444_s28 = sld [smem:[#allocation3 + $0x46]] }
 0x1c1   : > { %v974_v49 = vpop.permute.xlu1 %973  ;;  %v986_v50 = vpop.permute.xlu0 %985 }
 0x1c2   : > { %v978_v55 = vadd.f32 %v974_v49, %v922_v1  ;;  %v991_v56 = vadd.f32 %v986_v50, %v935_v38  ;;  %v1588_v1 = vmul.f32 %v1586_v26, %v3273_v36  ;;  %v1601_v38 = vmul.f32 %v1600_v37, %v3260_v58 }
 0x1c3   : > { %1483 = vrot.lane.b32.xlu1 %v1478_v10, %s2475_s12  ;;  %1495 = vrot.lane.b32.xlu0 %v1491_v51, %s2476_s19  ;;  %v1614_v49 = vstv %s3271_s30  ;;  %v1136_v51 = vmul.f32 %v1134_v0, %v2961_v13  ;;  %s3448_s30 = sld [smem:[#allocation3 + $0x18]] }
 0x1c4   : > { %v3235_v54 = vadd.f32 %v1010_v29, %v978_v55  ;;  %v3237_v59 = vadd.f32 %v1015_v33, %v991_v56 }
 0x1c5   : > { %v988_v60 = vpop.permute.xlu1 %987  ;;  %v1026_v63 = vpop.permute.xlu0 %1025 }
 0x1c6   : > { %v992_v61 = vadd.f32 %v988_v60, %v936_v4  ;;  %v1031_v44 = vadd.f32 %v1026_v63, %v3191_v57  ;;  %v1602_v60 = vmul.f32 %v1600_v37, %v3273_v36  ;;  %v1615_v63 = vmul.f32 %v1614_v49, %v3260_v58 }
 0x1c7   : > { %1497 = vrot.lane.b32.xlu1 %v1492_v41, %s2476_s19  ;;  %1509 = vrot.lane.b32.xlu0 %v1505_v21, %s2476_s19  ;;  %v1628_v41 = vstv %s3284_s6  ;;  %s3459_s6 = sld [smem:[#allocation3 + $0x3c]] }
 0x1c8   : > { %v3247_v18 = vadd.f32 %v1016_v40, %v992_v61  ;;  %v1630_v0 = vmul.f32 %v1628_v41, %v3273_v36 }
 0x1c9   : > { %v1028_v34 = vpop.permute.xlu1 %1027  ;;  %v1040_v2 = vpop.permute.xlu0 %1039 }
 0x1ca   : > { %v1032_v57 = vadd.f32 %v1028_v34, %v3205_v28  ;;  %v1045_v39 = vadd.f32 %v1040_v2, %v3207_v9  ;;  %v1141_v28 = vmul.f32 %v1140_v5, %v2948_v14  ;;  %v1146_v9 = vstv %s3279_s5  ;;  %s3455_s5 = sld [smem:[#allocation3 + $0x6a]] }
 0x1cb   : > { %1511 = vrot.lane.b32.xlu1 %v1506_v12, %s2476_s19  ;;  %1523 = vrot.lane.b32.xlu0 %v1519_v15, %s2476_s19 }
 0x1cd   : > { %v1042_v48 = vpop.permute.xlu1 %1041  ;;  %v1054_v53 = vpop.permute.xlu0 %1053 }
 0x1ce   : > { %v1046_v3 = vadd.f32 %v1042_v48, %v3221_v43  ;;  %v1059_v55 = vadd.f32 %v1054_v53, %v3223_v47  ;;  %v1142_v43 = vmul.f32 %v1140_v5, %v2961_v13  ;;  %v1147_v47 = vmul.f32 %v1146_v9, %v2948_v14 }
 0x1cf   : > { %1525 = vrot.lane.b32.xlu1 %v1520_v31, %s2476_s19  ;;  %1537 = vrot.lane.b32.xlu0 %v1533_v17, %s2476_s19  ;;  %v1616_v48 = vmul.f32 %v1614_v49, %v3273_v36  ;;  %v1629_v53 = vmul.f32 %v1628_v41, %v3260_v58  ;;  %v1642_v31 = vstv %s3300_s8  ;;  %s3471_s8 = sld [smem:[#allocation3 + $0x60]] }
 0x1d1   : > { %v1056_v30 = vpop.permute.xlu1 %1055  ;;  %v1068_v16 = vpop.permute.xlu0 %1067 }
 0x1d2   : > { %v1060_v40 = vadd.f32 %v1056_v30, %v3235_v54  ;;  %v1073_v34 = vadd.f32 %v1068_v16, %v3237_v59  ;;  %v1148_v54 = vmul.f32 %v1146_v9, %v2961_v13  ;;  %v1153_v59 = vmul.f32 %v1152_v45, %v2948_v14 }
 0x1d3   : > { %1539 = vrot.lane.b32.xlu1 %v1534_v24, %s2476_s19  ;;  %1577 = vrot.lane.b32.xlu0 %v1573_v25, %s2475_s12  ;;  %v1154_v14 = vmul.f32 %v1152_v45, %v2961_v13 }
 0x1d5   : > { %v1070_v62 = vpop.permute.xlu1 %1069  ;;  %v1082_v27 = vpop.permute.xlu0 %1081 }
 0x1d6   : > { %v1087_v35 = vadd.f32 %v1082_v27, %v1031_v44  ;;  %v1074_v30 = vadd.f32 %v1070_v62, %v3247_v18  ;;  %v1643_v44 = vmul.f32 %v1642_v31, %v3260_v58 }
 0x1d7   : > { %1579 = vrot.lane.b32.xlu1 %v1574_v11, %s2475_s12  ;;  %1591 = vrot.lane.b32.xlu0 %v1587_v42, %s2475_s12  ;;  %v1656_v11 = vstv %s3316_s9  ;;  %s3475_s9 = sld [smem:[#allocation3 + $0x23]] }
 0x1d8   : > { %v3295_v19 = vadd.f32 %v1135_v20, %v1087_v35  ;;  %v1644_v35 = vmul.f32 %v1642_v31, %v3273_v36  ;;  %v1657_v37 = vmul.f32 %v1656_v11, %v3260_v58  ;;  %v1670_v20 = vstv %s3332_s10  ;;  %s3482_s10 = sld [smem:[#allocation3 + $0x84]] }
 0x1d9   : > { %v1084_v23 = vpop.permute.xlu1 %1083  ;;  %v1096_v22 = vpop.permute.xlu0 %1095  ;;  %v1672_v49 = vmul.f32 %v1670_v20, %v3273_v36 }
 0x1da   : > { %v1088_v50 = vadd.f32 %v1084_v23, %v1032_v57  ;;  %v1101_v10 = vadd.f32 %v1096_v22, %v1045_v39  ;;  %v1658_v57 = vmul.f32 %v1656_v11, %v3273_v36  ;;  %v1671_v39 = vmul.f32 %v1670_v20, %v3260_v58  ;;  %v3364_v23 = vld [vmem:[#allocation2 + $0x49] sm:$0xff] }
 0x1db   : > { %1593 = vrot.lane.b32.xlu1 %v1588_v1, %s2475_s12  ;;  %1605 = vrot.lane.b32.xlu0 %v1601_v38, %s2475_s12  ;;  %v1710_v22 = vstv %s3346_s11  ;;  %s3487_s11 = sld [smem:[#allocation3 + $0x47]] }
 0x1dc   : > { %v3309_v56 = vadd.f32 %v1136_v51, %v1088_v50  ;;  %v3311_v29 = vadd.f32 %v1141_v28, %v1101_v10  ;;  %v1711_v50 = vmul.f32 %v1710_v22, %v3364_v23  ;;  %v3377_v10 = vld [vmem:[#allocation2 + $0x51] sm:$0xff]  ;;  %v1724_v51 = vstv %s3356_s13  ;;  %s3497_s13 = sld [smem:[#allocation3 + $0x6b]] }
 0x1dd   : > { %v1098_v33 = vpop.permute.xlu1 %1097  ;;  %v1110_v4 = vpop.permute.xlu0 %1109  ;;  %v1272_v28 = vstv %s3360_s14  ;;  %s3507_s14 = sld [smem:[#allocation3 + $0x8f]] }
 0x1de   : > { %v1102_v21 = vadd.f32 %v1098_v33, %v1046_v3  ;;  %v1115_v61 = vadd.f32 %v1110_v4, %v1059_v55  ;;  %v1712_v33 = vmul.f32 %v1710_v22, %v3377_v10  ;;  %v1725_v4 = vmul.f32 %v1724_v51, %v3364_v23 }
 0x1df   : > { %1607 = vrot.lane.b32.xlu1 %v1602_v60, %s2475_s12  ;;  %1619 = vrot.lane.b32.xlu0 %v1615_v63, %s2475_s12  ;;  %v1738_v63 = vstv %s3367_s17  ;;  %v1273_v41 = vmul.f32 %v1272_v28, %v3052_v7  ;;  %s2344_s17 = sld [smem:[#allocation3 + $0x3f]] }
 0x1e0   : > { %v3325_v2 = vadd.f32 %v1142_v43, %v1102_v21  ;;  %v3327_v12 = vadd.f32 %v1147_v47, %v1115_v61  ;;  %v1278_v21 = vstv %s3371_s18  ;;  %s3530_s18 = sld [smem:[#allocation3 + $0x63]] }
 0x1e1   : > { %v1112_v15 = vpop.permute.xlu1 %1111  ;;  %v1124_v52 = vpop.permute.xlu0 %1123  ;;  %v1279_v31 = vmul.f32 %v1278_v21, %v3052_v7  ;;  %v1280_v11 = vmul.f32 %v1278_v21, %v3065_v46 }
 0x1e2   : > { %v1116_v17 = vadd.f32 %v1112_v15, %v1060_v40  ;;  %v1129_v6 = vadd.f32 %v1124_v52, %v1073_v34  ;;  %v1726_v40 = vmul.f32 %v1724_v51, %v3377_v10  ;;  %v1739_v34 = vmul.f32 %v1738_v63, %v3364_v23 }
 0x1e3   : > { %1621 = vrot.lane.b32.xlu1 %v1616_v48, %s2475_s12  ;;  %1633 = vrot.lane.b32.xlu0 %v1629_v53, %s2476_s19  ;;  %v1752_v15 = vstv %s3375_s20  ;;  %v1274_v53 = vmul.f32 %v1272_v28, %v3065_v46  ;;  %s3533_s20 = sld [smem:[#allocation3 + $0x87]] }
 0x1e4   : > { %v3339_v16 = vadd.f32 %v1148_v54, %v1116_v17  ;;  %v3341_v24 = vadd.f32 %v1153_v59, %v1129_v6 }
 0x1e5   : > { %v1126_v25 = vpop.permute.xlu1 %1125  ;;  %v1164_v26 = vpop.permute.xlu0 %1163 }
 0x1e6   : > { %v1130_v27 = vadd.f32 %v1126_v25, %v1074_v30  ;;  %v1169_v9 = vadd.f32 %v1164_v26, %v3295_v19  ;;  %v1740_v25 = vmul.f32 %v1738_v63, %v3377_v10  ;;  %v1753_v26 = vmul.f32 %v1752_v15, %v3364_v23 }
 0x1e7   : > { %1635 = vrot.lane.b32.xlu1 %v1630_v0, %s2476_s19  ;;  %1647 = vrot.lane.b32.xlu0 %v1643_v44, %s2476_s19  ;;  %v1766_v0 = vstv %s3388_s22  ;;  %s3544_s22 = sld [smem:[#allocation3 + $0x66]] }
 0x1e8   : > { %v3351_v18 = vadd.f32 %v1154_v14, %v1130_v27  ;;  %v1768_v28 = vmul.f32 %v1766_v0, %v3377_v10 }
 0x1e9   : > { %v1166_v62 = vpop.permute.xlu1 %1165  ;;  %v1178_v42 = vpop.permute.xlu0 %1177 }
 0x1ea   : > { %v1170_v19 = vadd.f32 %v1166_v62, %v3309_v56  ;;  %v1183_v61 = vadd.f32 %v1178_v42, %v3311_v29  ;;  %v1284_v56 = vstv %s3383_s21  ;;  %s2356_s21 = sld [smem:[#allocation3 + $0x42]] }
 0x1eb   : > { %1649 = vrot.lane.b32.xlu1 %v1644_v35, %s2476_s19  ;;  %1661 = vrot.lane.b32.xlu0 %v1657_v37, %s2476_s19 }
 0x1ed   : > { %v1180_v13 = vpop.permute.xlu1 %1179  ;;  %v1192_v5 = vpop.permute.xlu0 %1191 }
 0x1ee   : > { %v1184_v29 = vadd.f32 %v1180_v13, %v3325_v2  ;;  %v1197_v17 = vadd.f32 %v1192_v5, %v3327_v12  ;;  %v1285_v2 = vmul.f32 %v1284_v56, %v3052_v7  ;;  %v1290_v12 = vstv %s3395_s23  ;;  %s3547_s23 = sld [smem:[#allocation3 + $0x8a]] }
 0x1ef   : > { %1663 = vrot.lane.b32.xlu1 %v1658_v57, %s2476_s19  ;;  %1675 = vrot.lane.b32.xlu0 %v1671_v39, %s2476_s19  ;;  %v1754_v13 = vmul.f32 %v1752_v15, %v3377_v10  ;;  %v1767_v5 = vmul.f32 %v1766_v0, %v3364_v23  ;;  %v1780_v57 = vstv %s3402_s24  ;;  %s2367_s24 = sld [smem:[#allocation3 + $0x21]] }
 0x1f0   : > { %v1782_v63 = vmul.f32 %v1780_v57, %v3377_v10 }
 0x1f1   : > { %v1194_v1 = vpop.permute.xlu1 %1193  ;;  %v1206_v38 = vpop.permute.xlu0 %1205 }
 0x1f2   : > { %v1198_v14 = vadd.f32 %v1194_v1, %v3339_v16  ;;  %v1211_v62 = vadd.f32 %v1206_v38, %v3341_v24  ;;  %v1291_v16 = vmul.f32 %v1290_v12, %v3052_v7  ;;  %v1292_v7 = vmul.f32 %v1290_v12, %v3065_v46 }
 0x1f3   : > { %1677 = vrot.lane.b32.xlu1 %v1672_v49, %s2476_s19  ;;  %1715 = vrot.lane.b32.xlu0 %v1711_v50, %s2475_s12  ;;  %v1286_v49 = vmul.f32 %v1284_v56, %v3065_v46  ;;  %v1416_v12 = vstv %s3459_s6 }
 0x1f5   : > { %v1208_v3 = vpop.permute.xlu1 %1207  ;;  %v1220_v55 = vpop.permute.xlu0 %1219 }
 0x1f6   : > { %v1225_v60 = vadd.f32 %v1220_v55, %v1169_v9  ;;  %v1212_v24 = vadd.f32 %v1208_v3, %v3351_v18  ;;  %v1781_v9 = vmul.f32 %v1780_v57, %v3364_v23 }
 0x1f7   : > { %1717 = vrot.lane.b32.xlu1 %v1712_v33, %s2475_s12  ;;  %1729 = vrot.lane.b32.xlu0 %v1725_v4, %s2475_s12  ;;  %v1794_v4 = vstv %s3414_s25  ;;  %s2368_s25 = sld [smem:[#allocation3 + $0x45]] }
 0x1f8   : > { %v1275_v43 = vadd.f32 %v1273_v41, %v1225_v60  ;;  %v1795_v41 = vmul.f32 %v1794_v4, %v3364_v23 }
 0x1f9   : > { %v1222_v47 = vpop.permute.xlu1 %1221  ;;  %v1234_v45 = vpop.permute.xlu0 %1233 }
 0x1fa   : > { %v1226_v52 = vadd.f32 %v1222_v47, %v1170_v19  ;;  %v1239_v48 = vadd.f32 %v1234_v45, %v1183_v61  ;;  %v1808_v61 = vstv %s3426_s26  ;;  %v1796_v47 = vmul.f32 %v1794_v4, %v3377_v10  ;;  %s3558_s26 = sld [smem:[#allocation3 + $0x69]] }
 0x1fb   : > { %1731 = vrot.lane.b32.xlu1 %v1726_v40, %s2475_s12  ;;  %1743 = vrot.lane.b32.xlu0 %v1739_v34, %s2475_s12  ;;  %v1809_v45 = vmul.f32 %v1808_v61, %v3364_v23  ;;  %v3452_v40 = vld [vmem:[#allocation2 + $0x4a] sm:$0xff]  ;;  %v1428_v4 = vstv %s3482_s10 }
 0x1fc   : > { %v1276_v6 = vadd.f32 %v1274_v53, %v1226_v52  ;;  %v1281_v54 = vadd.f32 %v1279_v31, %v1239_v48  ;;  %v1848_v52 = vstv %s3436_s27  ;;  %v1810_v31 = vmul.f32 %v1808_v61, %v3377_v10  ;;  %s3561_s27 = sld [smem:[#allocation3 + $0x8d]] }
 0x1fd   : > { %v1236_v59 = vpop.permute.xlu1 %1235  ;;  %v1248_v30 = vpop.permute.xlu0 %1247  ;;  %v1849_v56 = vmul.f32 %v1848_v52, %v3452_v40 }
 0x1fe   : > { %v1240_v44 = vadd.f32 %v1236_v59, %v1184_v29  ;;  %v1253_v27 = vadd.f32 %v1248_v30, %v1197_v17  ;;  %v3465_v29 = vld [vmem:[#allocation2 + $0x52] sm:$0xff]  ;;  %v1410_v59 = vstv %s3448_s30  ;;  %s3572_s30 = sld [smem:[#allocation5 + $0x1]] }
 0x1ff   : > { %1745 = vrot.lane.b32.xlu1 %v1740_v25, %s2475_s12  ;;  %1757 = vrot.lane.b32.xlu0 %v1753_v26, %s2475_s12  ;;  %v1850_v26 = vmul.f32 %v1848_v52, %v3465_v29  ;;  %v1412_v57 = vmul.f32 %v1410_v59, %v3169_v8 }
 0x200   : > { %v1282_v42 = vadd.f32 %v1280_v11, %v1240_v44  ;;  %v1287_v35 = vadd.f32 %v1285_v2, %v1253_v27  ;;  %v1876_v11 = vstv %s3455_s5  ;;  %v1411_v2 = vmul.f32 %v1410_v59, %v3156_v32  ;;  %s3574_s5 = sld [smem:[#allocation5 + $0x2]] }
 0x201   : > { %v1250_v37 = vpop.permute.xlu1 %1249  ;;  %v1262_v20 = vpop.permute.xlu0 %1261 }
 0x202   : > { %v1254_v39 = vadd.f32 %v1250_v37, %v1198_v14  ;;  %v1267_v22 = vadd.f32 %v1262_v20, %v1211_v62  ;;  %v1877_v37 = vmul.f32 %v1876_v11, %v3452_v40  ;;  %v1890_v20 = vstv %s3463_s7 }
 0x203   : > { %1759 = vrot.lane.b32.xlu1 %v1754_v13, %s2475_s12  ;;  %1771 = vrot.lane.b32.xlu0 %v1767_v5, %s2476_s19 }
 0x204   : > { %v1288_v1 = vadd.f32 %v1286_v49, %v1254_v39  ;;  %v1293_v38 = vadd.f32 %v1291_v16, %v1267_v22  ;;  %v1417_v39 = vmul.f32 %v1416_v12, %v3156_v32  ;;  %v1422_v22 = vstv %s3471_s8  ;;  %s3581_s8 = scalar_lea.vmem %s3630_s3, %s2390_s29 }
 0x205   : > { %v1264_v50 = vpop.permute.xlu1 %1263  ;;  %v1302_v51 = vpop.permute.xlu0 %1301 }
 0x206   : > { %v1268_v55 = vadd.f32 %v1264_v50, %v1212_v24  ;;  %v1307_v33 = vadd.f32 %v1302_v51, %v1275_v43  ;;  %v1891_v50 = vmul.f32 %v1890_v20, %v3452_v40  ;;  %v1904_v51 = vstv %s3475_s9  ;;  %s3585_s9 = sld [smem:[#allocation5 + $0x3]] }
 0x207   : > { %1773 = vrot.lane.b32.xlu1 %v1768_v28, %s2476_s19  ;;  %1785 = vrot.lane.b32.xlu0 %v1781_v9, %s2476_s19  ;;  %v1906_v52 = vmul.f32 %v1904_v51, %v3465_v29 }
 0x208   : > { %v1294_v18 = vadd.f32 %v1292_v7, %v1268_v55  ;;  %v1418_v55 = vmul.f32 %v1416_v12, %v3169_v8 }
 0x209   : > { %v1304_v3 = vpop.permute.xlu1 %1303  ;;  %v1316_v60 = vpop.permute.xlu0 %1315 }
 0x20a   : > { %v1308_v21 = vadd.f32 %v1304_v3, %v1276_v6  ;;  %v1321_v19 = vadd.f32 %v1316_v60, %v1281_v54  ;;  %v1862_v54 = vstv %s3444_s28  ;;  %s1959_s28 = sld [smem:[#allocation5]] }
 0x20b   : > { %1787 = vrot.lane.b32.xlu1 %v1782_v63, %s2476_s19  ;;  %1799 = vrot.lane.b32.xlu0 %v1795_v41, %s2476_s19  ;;  %v1863_v0 = vmul.f32 %v1862_v54, %v3452_v40  ;;  %v1892_v63 = vmul.f32 %v1890_v20, %v3465_v29  ;;  %v1905_v41 = vmul.f32 %v1904_v51, %v3452_v40 }
 0x20d   : > { %v1318_v46 = vpop.permute.xlu1 %1317  ;;  %v1330_v43 = vpop.permute.xlu0 %1329 }
 0x20e   : > { %v1322_v34 = vadd.f32 %v1318_v46, %v1282_v42  ;;  %v1335_v15 = vadd.f32 %v1330_v43, %v1287_v35  ;;  %v1864_v35 = vmul.f32 %v1862_v54, %v3465_v29  ;;  %v1424_v46 = vmul.f32 %v1422_v22, %v3169_v8 }
 0x20f   : > { %1801 = vrot.lane.b32.xlu1 %v1796_v47, %s2476_s19  ;;  %1813 = vrot.lane.b32.xlu0 %v1809_v45, %s2476_s19  ;;  %v1429_v43 = vmul.f32 %v1428_v4, %v3156_v32 }
 0x211   : > { %v1332_v48 = vpop.permute.xlu1 %1331  ;;  %v1344_v53 = vpop.permute.xlu0 %1343 }
 0x212   : > { %v1336_v17 = vadd.f32 %v1332_v48, %v1288_v1  ;;  %v1349_v6 = vadd.f32 %v1344_v53, %v1293_v38  ;;  %v1878_v38 = vmul.f32 %v1876_v11, %v3465_v29 }
 0x213   : > { %1815 = vrot.lane.b32.xlu1 %v1810_v31, %s2476_s19  ;;  %1853 = vrot.lane.b32.xlu0 %v1849_v56, %s2475_s12  ;;  %v1932_v56 = vstv %s3497_s13 }
 0x215   : > { %v1346_v30 = vpop.permute.xlu1 %1345  ;;  %v1358_v25 = vpop.permute.xlu0 %1357 }
 0x216   : > { %v1350_v44 = vadd.f32 %v1346_v30, %v1294_v18  ;;  %v1363_v27 = vadd.f32 %v1358_v25, %v1307_v33  ;;  %v1423_v33 = vmul.f32 %v1422_v22, %v3156_v32  ;;  %v1933_v30 = vmul.f32 %v1932_v56, %v3452_v40 }
 0x217   : > { %1855 = vrot.lane.b32.xlu1 %v1850_v26, %s2475_s12  ;;  %1867 = vrot.lane.b32.xlu0 %v1863_v0, %s2475_s12  ;;  %v1946_v0 = vstv %s3507_s14 }
 0x218   : > { %v1413_v14 = vadd.f32 %v1411_v2, %v1363_v27  ;;  %v1934_v27 = vmul.f32 %v1932_v56, %v3465_v29  ;;  %v1947_v11 = vmul.f32 %v1946_v0, %v3452_v40 }
 0x219   : > { %v1360_v62 = vpop.permute.xlu1 %1359  ;;  %v1372_v42 = vpop.permute.xlu0 %1371 }
 0x21a   : > { %v1364_v13 = vadd.f32 %v1360_v62, %v1308_v21  ;;  %v1377_v5 = vadd.f32 %v1372_v42, %v1321_v19  ;;  %v1918_v21 = vstv %s3487_s11  ;;  %v1948_v42 = vmul.f32 %v1946_v0, %v3465_v29  ;;  %s233_s11 = scalar_lea.vmem %s3631_s4, %s3642_s16 }
 0x21b   : > { %1869 = vrot.lane.b32.xlu1 %v1864_v35, %s2475_s12  ;;  %1881 = vrot.lane.b32.xlu0 %v1877_v37, %s2475_s12  ;;  %v1919_v48 = vmul.f32 %v1918_v21, %v3452_v40  ;;  %v1920_v59 = vmul.f32 %v1918_v21, %v3465_v29 }
 0x21c   : > { %v1414_v49 = vadd.f32 %v1412_v57, %v1364_v13  ;;  %v1419_v16 = vadd.f32 %v1417_v39, %v1377_v5 }
 0x21d   : > { %v1374_v24 = vpop.permute.xlu1 %1373  ;;  %v1386_v1 = vpop.permute.xlu0 %1385 }
 0x21e   : > { %v1378_v28 = vadd.f32 %v1374_v24, %v1322_v34  ;;  %v1391_v9 = vadd.f32 %v1386_v1, %v1335_v15 }
 0x21f   : > { %1883 = vrot.lane.b32.xlu1 %v1878_v38, %s2475_s12  ;;  %1895 = vrot.lane.b32.xlu0 %v1891_v50, %s2475_s12 }
 0x220   : > { %v1420_v7 = vadd.f32 %v1418_v55, %v1378_v28  ;;  %v1425_v18 = vadd.f32 %v1423_v33, %v1391_v9  ;;  %v1560_v9 = vstv %s3530_s18 }
 0x221   : > { %v1388_v3 = vpop.permute.xlu1 %1387  ;;  %v1400_v60 = vpop.permute.xlu0 %1399 }
 0x222   : > { %v1392_v19 = vadd.f32 %v1388_v3, %v1336_v17  ;;  %v1405_v61 = vadd.f32 %v1400_v60, %v1349_v6  ;;  %v1430_v17 = vmul.f32 %v1428_v4, %v3169_v8 }
 0x223   : > { %1897 = vrot.lane.b32.xlu1 %v1892_v63, %s2475_s12  ;;  %1909 = vrot.lane.b32.xlu0 %v1905_v41, %s2476_s19  ;;  %s2343_s12 = sld [smem:[#allocation3 + $0x1b]]  ;;  %v1561_v63 = vmul.f32 %v1560_v9, %v3260_v58  ;;  %v1566_v41 = vstv %s3533_s20 }
 0x224   : > { %v1426_v47 = vadd.f32 %v1424_v46, %v1392_v19  ;;  %v1431_v45 = vadd.f32 %v1429_v43, %v1405_v61 }
 0x225   : > { %v1402_v34 = vpop.permute.xlu1 %1401  ;;  %v1440_v15 = vpop.permute.xlu0 %1439 }
 0x226   : > { %v1406_v53 = vadd.f32 %v1402_v34, %v1350_v44  ;;  %v1445_v31 = vadd.f32 %v1440_v15, %v1413_v14  ;;  %v1567_v34 = vmul.f32 %v1566_v41, %v3260_v58 }
 0x227   : > { %1911 = vrot.lane.b32.xlu1 %v1906_v52, %s2476_s19  ;;  %1923 = vrot.lane.b32.xlu0 %v1919_v48, %s2476_s19 }
 0x228   : > { %v1432_v32 = vadd.f32 %v1430_v17, %v1406_v53  ;;  %v1568_v17 = vmul.f32 %v1566_v41, %v3273_v36 }
 0x229   : > { %v1442_v6 = vpop.permute.xlu1 %1441  ;;  %v1454_v54 = vpop.permute.xlu0 %1453  ;;  %v1548_v20 = vstv %s2343_s12 }
 0x22a   : > { %v1446_v25 = vadd.f32 %v1442_v6, %v1414_v49  ;;  %v1459_v26 = vadd.f32 %v1454_v54, %v1419_v16  ;;  %v1549_v22 = vmul.f32 %v1548_v20, %v3260_v58  ;;  %v1554_v49 = vstv %s2344_s17 }
 0x22b   : > { %1925 = vrot.lane.b32.xlu1 %v1920_v59, %s2476_s19  ;;  %1937 = vrot.lane.b32.xlu0 %v1933_v30, %s2476_s19  ;;  %v1550_v51 = vmul.f32 %v1548_v20, %v3273_v36  ;;  %v1555_v28 = vmul.f32 %v1554_v49, %v3260_v58  ;;  %v1556_v60 = vmul.f32 %v1554_v49, %v3273_v36  ;;  %v1698_v49 = vstv %s3544_s22 }
 0x22d   : > { %v1456_v8 = vpop.permute.xlu1 %1455  ;;  %v1468_v44 = vpop.permute.xlu0 %1467 }
 0x22e   : > { %v1460_v2 = vadd.f32 %v1456_v8, %v1420_v7  ;;  %v1473_v12 = vadd.f32 %v1468_v44, %v1425_v18 }
 0x22f   : > { %1939 = vrot.lane.b32.xlu1 %v1934_v27, %s2476_s19  ;;  %1951 = vrot.lane.b32.xlu0 %v1947_v11, %s2476_s19 }
 0x231   : > { %v1470_v14 = vpop.permute.xlu1 %1469  ;;  %v1482_v62 = vpop.permute.xlu0 %1481 }
 0x232   : > { %v1474_v35 = vadd.f32 %v1470_v14, %v1426_v47  ;;  %v1487_v37 = vadd.f32 %v1482_v62, %v1431_v45  ;;  %v1562_v45 = vmul.f32 %v1560_v9, %v3273_v36  ;;  %v1699_v9 = vmul.f32 %v1698_v49, %v3364_v23 }
 0x233   : > { %1953 = vrot.lane.b32.xlu1 %v1948_v42, %s2476_s19  ;;  %s2355_s19 = sld [smem:[#allocation3 + $0x1e]] }
 0x235   : > { %v1484_v13 = vpop.permute.xlu1 %1483  ;;  %v1496_v5 = vpop.permute.xlu0 %1495 }
 0x236   : > { %v1488_v57 = vadd.f32 %v1484_v13, %v1432_v32  ;;  %v1501_v39 = vadd.f32 %v1496_v5, %v1445_v31 }
 0x238   : > { %v1551_v16 = vadd.f32 %v1549_v22, %v1501_v39 }
 0x239   : > { %v1498_v24 = vpop.permute.xlu1 %1497  ;;  %v1510_v1 = vpop.permute.xlu0 %1509 }
 0x23a   : > { %v1502_v38 = vadd.f32 %v1498_v24, %v1446_v25  ;;  %v1515_v50 = vadd.f32 %v1510_v1, %v1459_v26 }
 0x23c   : > { %v1552_v55 = vadd.f32 %v1550_v51, %v1502_v38  ;;  %v1557_v33 = vadd.f32 %v1555_v28, %v1515_v50 }
 0x23d   : > { %v1512_v4 = vpop.permute.xlu1 %1511  ;;  %v1524_v7 = vpop.permute.xlu0 %1523 }
 0x23e   : > { %v1516_v18 = vadd.f32 %v1512_v4, %v1460_v2  ;;  %v1529_v3 = vadd.f32 %v1524_v7, %v1473_v12  ;;  %v1686_v2 = vstv %s2355_s19 }
 0x23f   : > { %v1687_v42 = vmul.f32 %v1686_v2, %v3364_v23  ;;  %v1688_v39 = vmul.f32 %v1686_v2, %v3377_v10 }
 0x240   : > { %v1558_v21 = vadd.f32 %v1556_v60, %v1516_v18  ;;  %v1563_v19 = vadd.f32 %v1561_v63, %v1529_v3  ;;  %v1700_v63 = vmul.f32 %v1698_v49, %v3377_v10 }
 0x241   : > { %v1526_v61 = vpop.permute.xlu1 %1525  ;;  %v1538_v46 = vpop.permute.xlu0 %1537 }
 0x242   : > { %v1530_v43 = vadd.f32 %v1526_v61, %v1474_v35  ;;  %v1543_v47 = vadd.f32 %v1538_v46, %v1487_v37  ;;  %v1692_v35 = vstv %s2356_s21 }
 0x243   : > { %v1693_v22 = vmul.f32 %v1692_v35, %v3364_v23  ;;  %v1694_v28 = vmul.f32 %v1692_v35, %v3377_v10 }
 0x244   : > { %v1564_v15 = vadd.f32 %v1562_v45, %v1530_v43  ;;  %v1569_v52 = vadd.f32 %v1567_v34, %v1543_v47 }
 0x245   : > { %v1540_v48 = vpop.permute.xlu1 %1539  ;;  %v1578_v53 = vpop.permute.xlu0 %1577 }
 0x246   : > { %v1544_v31 = vadd.f32 %v1540_v48, %v1488_v57  ;;  %v1583_v56 = vadd.f32 %v1578_v53, %v1551_v16 }
 0x248   : > { %v1570_v32 = vadd.f32 %v1568_v17, %v1544_v31 }
 0x249   : > { %v1580_v6 = vpop.permute.xlu1 %1579  ;;  %v1592_v54 = vpop.permute.xlu0 %1591 }
 0x24a   : > { %v1584_v59 = vadd.f32 %v1580_v6, %v1552_v55  ;;  %v1597_v30 = vadd.f32 %v1592_v54, %v1557_v33  ;;  %v1704_v55 = vstv %s3547_s23 }
 0x24b   : > { %v1705_v41 = vmul.f32 %v1704_v55, %v3364_v23  ;;  %v1706_v47 = vmul.f32 %v1704_v55, %v3377_v10  ;;  %v1830_v10 = vstv %s2368_s25 }
 0x24d   : > { %v1594_v25 = vpop.permute.xlu1 %1593  ;;  %v1606_v26 = vpop.permute.xlu0 %1605 }
 0x24e   : > { %v1598_v0 = vadd.f32 %v1594_v25, %v1558_v21  ;;  %v1611_v8 = vadd.f32 %v1606_v26, %v1563_v19 }
 0x251   : > { %v1608_v58 = vpop.permute.xlu1 %1607  ;;  %v1620_v44 = vpop.permute.xlu0 %1619 }
 0x252   : > { %v1612_v27 = vadd.f32 %v1608_v58, %v1564_v15  ;;  %v1625_v11 = vadd.f32 %v1620_v44, %v1569_v52 }
 0x255   : > { %v1622_v36 = vpop.permute.xlu1 %1621  ;;  %v1634_v12 = vpop.permute.xlu0 %1633 }
 0x256   : > { %v1626_v14 = vadd.f32 %v1622_v36, %v1570_v32  ;;  %v1639_v62 = vadd.f32 %v1634_v12, %v1583_v56  ;;  %v1824_v56 = vstv %s2367_s24 }
 0x257   : > { %v1825_v54 = vmul.f32 %v1824_v56, %v3452_v40  ;;  %v1826_v44 = vmul.f32 %v1824_v56, %v3465_v29 }
 0x258   : > { %v1689_v37 = vadd.f32 %v1687_v42, %v1639_v62 }
 0x259   : > { %v1636_v20 = vpop.permute.xlu1 %1635  ;;  %v1648_v13 = vpop.permute.xlu0 %1647 }
 0x25a   : > { %v1640_v5 = vadd.f32 %v1636_v20, %v1584_v59  ;;  %v1653_v57 = vadd.f32 %v1648_v13, %v1597_v30  ;;  %v1832_v20 = vmul.f32 %v1830_v10, %v3465_v29 }
 0x25c   : > { %v1690_v16 = vadd.f32 %v1688_v39, %v1640_v5  ;;  %v1695_v24 = vadd.f32 %v1693_v22, %v1653_v57  ;;  %v1842_v5 = vstv %s3561_s27 }
 0x25d   : > { %v1650_v1 = vpop.permute.xlu1 %1649  ;;  %v1662_v38 = vpop.permute.xlu0 %1661 }
 0x25e   : > { %v1654_v50 = vadd.f32 %v1650_v1, %v1598_v0  ;;  %v1667_v51 = vadd.f32 %v1662_v38, %v1611_v8 }
 0x260   : > { %v1696_v33 = vadd.f32 %v1694_v28, %v1654_v50  ;;  %v1701_v4 = vadd.f32 %v1699_v9, %v1667_v51  ;;  %v1843_v51 = vmul.f32 %v1842_v5, %v3452_v40 }
 0x261   : > { %v1664_v7 = vpop.permute.xlu1 %1663  ;;  %v1676_v18 = vpop.permute.xlu0 %1675 }
 0x262   : > { %v1668_v3 = vadd.f32 %v1664_v7, %v1612_v27  ;;  %v1681_v60 = vadd.f32 %v1676_v18, %v1625_v11  ;;  %v1831_v27 = vmul.f32 %v1830_v10, %v3452_v40  ;;  %v1836_v11 = vstv %s3558_s26 }
 0x263   : > { %v1837_v13 = vmul.f32 %v1836_v11, %v3452_v40  ;;  %v1838_v50 = vmul.f32 %v1836_v11, %v3465_v29  ;;  %v1844_v18 = vmul.f32 %v1842_v5, %v3465_v29 }
 0x264   : > { %v1702_v21 = vadd.f32 %v1700_v63, %v1668_v3  ;;  %v1707_v19 = vadd.f32 %v1705_v41, %v1681_v60 }
 0x265   : > { %v1678_v61 = vpop.permute.xlu1 %1677  ;;  %v1716_v46 = vpop.permute.xlu0 %1715 }
 0x266   : > { %v1682_v43 = vadd.f32 %v1678_v61, %v1626_v14  ;;  %v1721_v23 = vadd.f32 %v1716_v46, %v1689_v37 }
 0x268   : > { %v1708_v45 = vadd.f32 %v1706_v47, %v1682_v43  ;;  %v1960_v43 = vstv %s1959_s28 }
 0x269   : > { %v1718_v34 = vpop.permute.xlu1 %1717  ;;  %v1730_v15 = vpop.permute.xlu0 %1729 }
 0x26a   : > { %v1722_v59 = vadd.f32 %v1718_v34, %v1690_v16  ;;  %v1735_v30 = vadd.f32 %v1730_v15, %v1695_v24 }
 0x26d   : > { %v1732_v52 = vpop.permute.xlu1 %1731  ;;  %v1744_v48 = vpop.permute.xlu0 %1743 }
 0x26e   : > { %v1736_v2 = vadd.f32 %v1732_v52, %v1696_v33  ;;  %v1749_v36 = vadd.f32 %v1744_v48, %v1701_v4 }
 0x271   : > { %v1746_v53 = vpop.permute.xlu1 %1745  ;;  %v1758_v31 = vpop.permute.xlu0 %1757 }
 0x272   : > { %v1750_v57 = vadd.f32 %v1746_v53, %v1702_v21  ;;  %v1763_v39 = vadd.f32 %v1758_v31, %v1707_v19  ;;  %v1980_v53 = vstv %s3572_s30 }
 0x275   : > { %v1760_v17 = vpop.permute.xlu1 %1759  ;;  %v1772_v32 = vpop.permute.xlu0 %1771 }
 0x276   : > { %v1777_v6 = vadd.f32 %v1772_v32, %v1721_v23  ;;  %v1764_v28 = vadd.f32 %v1760_v17, %v1708_v45 }
 0x278   : > { %v1827_v25 = vadd.f32 %v1825_v54, %v1777_v6 }
 0x279   : > { %v1774_v26 = vpop.permute.xlu1 %1773  ;;  %v1786_v0 = vpop.permute.xlu0 %1785 }
 0x27a   : > { %v1778_v8 = vadd.f32 %v1774_v26, %v1722_v59  ;;  %v1791_v58 = vadd.f32 %v1786_v0, %v1735_v30 }
 0x27c   : > { %v1828_v12 = vadd.f32 %v1826_v44, %v1778_v8  ;;  %v1833_v14 = vadd.f32 %v1831_v27, %v1791_v58 }
 0x27d   : > { %v1788_v62 = vpop.permute.xlu1 %1787  ;;  %v1800_v42 = vpop.permute.xlu0 %1799 }
 0x27e   : > { %v1792_v35 = vadd.f32 %v1788_v62, %v1736_v2  ;;  %v1805_v37 = vadd.f32 %v1800_v42, %v1749_v36 }
 0x280   : > { %v1834_v22 = vadd.f32 %v1832_v20, %v1792_v35  ;;  %v1839_v49 = vadd.f32 %v1837_v13, %v1805_v37 }
 0x281   : > { %v1802_v16 = vpop.permute.xlu1 %1801  ;;  %v1814_v24 = vpop.permute.xlu0 %1813 }
 0x282   : > { %v1806_v1 = vadd.f32 %v1802_v16, %v1750_v57  ;;  %v1819_v38 = vadd.f32 %v1814_v24, %v1763_v39 }
 0x284   : > { %v1840_v9 = vadd.f32 %v1838_v50, %v1806_v1  ;;  %v1845_v55 = vadd.f32 %v1843_v51, %v1819_v38 }
 0x285   : > { %v1816_v33 = vpop.permute.xlu1 %1815  ;;  %v1854_v4 = vpop.permute.xlu0 %1853 }
 0x286   : > { %v1820_v7 = vadd.f32 %v1816_v33, %v1764_v28  ;;  %v1859_v40 = vadd.f32 %v1854_v4, %v1827_v25  ;;  %v2000_v25 = vstv %s3574_s5 }
 0x288   : > { %v1846_v3 = vadd.f32 %v1844_v18, %v1820_v7 }
 0x289   : > { %v1856_v60 = vpop.permute.xlu1 %1855  ;;  %v1868_v63 = vpop.permute.xlu0 %1867 }
 0x28a   : > { %v1860_v45 = vadd.f32 %v1856_v60, %v1828_v12  ;;  %v1873_v34 = vadd.f32 %v1868_v63, %v1833_v14  ;;  %v2020_v14 = vstv %s3585_s9 }
 0x28d   : > { %v1870_v41 = vpop.permute.xlu1 %1869  ;;  %v1882_v21 = vpop.permute.xlu0 %1881 }
 0x28e   : > { %v1874_v17 = vadd.f32 %v1870_v41, %v1834_v22  ;;  %v1887_v32 = vadd.f32 %v1882_v21, %v1839_v49 }
 0x291   : > { %v1884_v19 = vpop.permute.xlu1 %1883  ;;  %v1896_v61 = vpop.permute.xlu0 %1895 }
 0x292   : > { %v1888_v58 = vadd.f32 %v1884_v19, %v1840_v9  ;;  %v1901_v44 = vadd.f32 %v1896_v61, %v1845_v55 }
 0x295   : > { %v1898_v46 = vpop.permute.xlu1 %1897  ;;  %v1910_v47 = vpop.permute.xlu0 %1909 }
 0x296   : > { %v1915_v29 = vadd.f32 %v1910_v47, %v1859_v40  ;;  %v1902_v37 = vadd.f32 %v1898_v46, %v1846_v3 }
 0x298   : > { %v1961_v15 = vadd.f32 %v1960_v43, %v1915_v29  ;;  %v1966_v52 = vsel %vm1963_vm3, %v1915_v29, 0.0  ;;  %v2039_v20 = vmul.f32 %v1915_v29, %v1915_v29 }
 0x299   : > { %v1912_v48 = vpop.permute.xlu1 %1911  ;;  %1967 = vadd.xlane.f32.xlu0 %v1966_v52  ;;  %v1924_v31 = vpop.permute.xlu0 %1923 }
 0x29a   : > { %1964 = vst.msk [vmem:[%s3581_s8] sm:$0xff] %vm1963_vm3, %v1961_v15  ;;  %v1916_v56 = vadd.f32 %v1912_v48, %v1860_v45  ;;  %v1929_v23 = vadd.f32 %v1924_v31, %v1873_v34  ;;  %v2041_v16 = vsel %vm1963_vm3, %v2039_v20, 0.0 }
 0x29c   : > { %v1962_v6 = vadd.f32 %v1960_v43, %v1916_v56  ;;  %v1981_v54 = vadd.f32 %v1980_v53, %v1929_v23  ;;  %v1969_v10 = vsel %vm1963_vm3, %v1916_v56, 0.0  ;;  %v1986_v59 = vsel %vm1963_vm3, %v1929_v23, 0.0 }
 0x29d   : > { %v1926_v30 = vpop.permute.xlu1 %1925  ;;  %1970 = vadd.xlane.f32.xlu1 %v1969_v10  ;;  %1987 = vadd.xlane.f32.xlu0 %v1986_v59  ;;  %v1938_v26 = vpop.permute.xlu0 %1937  ;;  %v2040_v38 = vmul.f32 %v1916_v56, %v1916_v56  ;;  %v2054_v50 = vmul.f32 %v1929_v23, %v1929_v23 }
 0x29e   : > { %1965 = vst.msk [vmem:[%s3581_s8 + $0x8] sm:$0xff] %vm1963_vm3, %v1962_v6  ;;  %2380 = vst.msk [vmem:[%s3581_s8 + $0x10] sm:$0xff] %vm1963_vm3, %v1981_v54  ;;  %v1930_v0 = vadd.f32 %v1926_v30, %v1874_v17  ;;  %v1943_v8 = vadd.f32 %v1938_v26, %v1887_v32 }
 0x29f   : > { %v2044_v51 = vsel %vm1963_vm3, %v2040_v38, 0.0  ;;  %v2056_v28 = vsel %vm1963_vm3, %v2054_v50, 0.0 }
 0x2a0   : > { %v1982_v27 = vadd.f32 %v1980_v53, %v1930_v0  ;;  %v2001_v11 = vadd.f32 %v2000_v25, %v1943_v8  ;;  %v1989_v2 = vsel %vm1963_vm3, %v1930_v0, 0.0  ;;  %v2006_v36 = vsel %vm1963_vm3, %v1943_v8, 0.0 }
 0x2a1   : > { %v1940_v12 = vpop.permute.xlu1 %1939  ;;  %1990 = vadd.xlane.f32.xlu0 %v1989_v2  ;;  %2007 = vadd.xlane.f32.xlu1 %v2006_v36  ;;  %v1952_v62 = vpop.permute.xlu0 %1951  ;;  %v2055_v9 = vmul.f32 %v1930_v0, %v1930_v0  ;;  %v2069_v55 = vmul.f32 %v1943_v8, %v1943_v8 }
 0x2a2   : > { %2381 = vst.msk [vmem:[%s3581_s8 + $0x18] sm:$0xff] %vm1963_vm3, %v1982_v27  ;;  %2383 = vst.msk [vmem:[%s3581_s8 + $0x20] sm:$0xff] %vm1963_vm3, %v2001_v11  ;;  %v1944_v42 = vadd.f32 %v1940_v12, %v1888_v58  ;;  %v1957_v35 = vadd.f32 %v1952_v62, %v1901_v44 }
 0x2a3   : > { %v2059_v33 = vsel %vm1963_vm3, %v2055_v9, 0.0  ;;  %v2071_v4 = vsel %vm1963_vm3, %v2069_v55, 0.0 }
 0x2a4   : > { %v2002_v13 = vadd.f32 %v2000_v25, %v1944_v42  ;;  %v2021_v5 = vadd.f32 %v2020_v14, %v1957_v35  ;;  %v2009_v57 = vsel %vm1963_vm3, %v1944_v42, 0.0  ;;  %v2026_v39 = vsel %vm1963_vm3, %v1957_v35, 0.0 }
 0x2a5   : > { %v1954_v22 = vpop.permute.xlu1 %1953  ;;  %2010 = vadd.xlane.f32.xlu0 %v2009_v57  ;;  %2027 = vadd.xlane.f32.xlu1 %v2026_v39  ;;  %v2070_v7 = vmul.f32 %v1944_v42, %v1944_v42  ;;  %v2084_v18 = vmul.f32 %v1957_v35, %v1957_v35 }
 0x2a6   : > { %2384 = vst.msk [vmem:[%s3581_s8 + $0x28] sm:$0xff] %vm1963_vm3, %v2002_v13  ;;  %2386 = vst.msk [vmem:[%s3581_s8 + $0x30] sm:$0xff] %vm1963_vm3, %v2021_v5  ;;  %v1958_v49 = vadd.f32 %v1954_v22, %v1902_v37 }
 0x2a7   : > { %v2074_v3 = vsel %vm1963_vm3, %v2070_v7, 0.0  ;;  %v2086_v60 = vsel %vm1963_vm3, %v2084_v18, 0.0 }
 0x2a8   : > { %v2022_v24 = vadd.f32 %v2020_v14, %v1958_v49  ;;  %v2029_v1 = vsel %vm1963_vm3, %v1958_v49, 0.0  ;;  %v2085_v63 = vmul.f32 %v1958_v49, %v1958_v49 }
 0x2a9   : > { %2030 = vadd.xlane.f32.xlu0 %v2029_v1  ;;  %2042 = vadd.xlane.f32.xlu1 %v2041_v16 }
 0x2aa   : > { %2387 = vst.msk [vmem:[%s3581_s8 + $0x38] sm:$0xff] %vm1963_vm3, %v2022_v24  ;;  %v2089_v41 = vsel %vm1963_vm3, %v2085_v63, 0.0 }
 0x2ad   : > { %2045 = vadd.xlane.f32.xlu0 %v2044_v51  ;;  %2057 = vadd.xlane.f32.xlu1 %v2056_v28 }
 0x2b1   : > { %2060 = vadd.xlane.f32.xlu0 %v2059_v33  ;;  %2072 = vadd.xlane.f32.xlu1 %v2071_v4 }
 0x2b5   : > { %2075 = vadd.xlane.f32.xlu0 %v2074_v3  ;;  %2087 = vadd.xlane.f32.xlu1 %v2086_v60 }
 0x2b9   : > { %2090 = vadd.xlane.f32.xlu0 %v2089_v41 }
 0x326   : > { %v1968_v21 = vpop.xlane.xlu0 %1967 }
 0x32a   : > { %v1971_v19 = vpop.xlane.xlu1 %1970  ;;  %v1988_v61 = vpop.xlane.xlu0 %1987 }
 0x32b   : > { %v1972_v34 = vadd.f32 %v1971_v19, %v1968_v21 }
 0x32d   : > { %v1973_v56 = vrot.slane %v1972_v34, 4 }
 0x32e   : > { %v2008_v40 = vpop.xlane.xlu1 %2007  ;;  %v1991_v46 = vpop.xlane.xlu0 %1990 }
 0x32f   : > { %v1992_v29 = vadd.f32 %v1991_v46, %v1988_v61  ;;  %v1974_v59 = vadd.f32 %v1973_v56, %v1972_v34 }
 0x331   : > { %v1993_v48 = vrot.slane %v1992_v29, 4  ;;  %v1975_v11 = vrot.slane %v1974_v59, 2 }
 0x332   : > { %v2028_v43 = vpop.xlane.xlu1 %2027  ;;  %v2011_v47 = vpop.xlane.xlu0 %2010 }
 0x333   : > { %v2012_v45 = vadd.f32 %v2011_v47, %v2008_v40  ;;  %v1994_v6 = vadd.f32 %v1993_v48, %v1992_v29  ;;  %v1976_v20 = vadd.f32 %v1975_v11, %v1974_v59 }
 0x335   : > { %v2013_v31 = vrot.slane %v2012_v45, 4  ;;  %v1995_v0 = vrot.slane %v1994_v6, 2  ;;  %v1977_v51 = vrot.slane %v1976_v20, 1 }
 0x336   : > { %v2043_v15 = vpop.xlane.xlu1 %2042  ;;  %v2031_v52 = vpop.xlane.xlu0 %2030 }
 0x337   : > { %v2032_v53 = vadd.f32 %v2031_v52, %v2028_v43  ;;  %v2014_v10 = vadd.f32 %v2013_v31, %v2012_v45  ;;  %v1996_v62 = vadd.f32 %v1995_v0, %v1994_v6  ;;  %v1978_v63 = vadd.f32 %v1977_v51, %v1976_v20 }
 0x339   : > { %v2033_v23 = vrot.slane %v2032_v53, 4  ;;  %v2015_v44 = vrot.slane %v2014_v10, 2  ;;  %v1997_v16 = vrot.slane %v1996_v62, 1 }
 0x33a   : > { %v2058_v17 = vpop.xlane.xlu1 %2057  ;;  %v2046_v32 = vpop.xlane.xlu0 %2045 }
 0x33b   : > { %v2047_v54 = vadd.f32 %v2046_v32, %v2043_v15  ;;  %v2034_v30 = vadd.f32 %v2033_v23, %v2032_v53  ;;  %v2016_v37 = vadd.f32 %v2015_v44, %v2014_v10  ;;  %v1998_v4 = vadd.f32 %v1997_v16, %v1996_v62 }
 0x33d   : > { %v2048_v25 = vrot.slane %v2047_v54, 4  ;;  %v2035_v2 = vrot.slane %v2034_v30, 2  ;;  %v2017_v50 = vrot.slane %v2016_v37, 1  ;;  %v2100_v40 = vsel %vm2099_vm4, %v1978_v63, %v1998_v4 }
 0x33e   : > { %v2061_v26 = vpop.xlane.xlu0 %2060  ;;  %v2073_v27 = vpop.xlane.xlu1 %2072 }
 0x33f   : > { %v2049_v8 = vadd.f32 %v2048_v25, %v2047_v54  ;;  %v2062_v58 = vadd.f32 %v2061_v26, %v2058_v17  ;;  %v2036_v13 = vadd.f32 %v2035_v2, %v2034_v30  ;;  %v2018_v60 = vadd.f32 %v2017_v50, %v2016_v37 }
 0x341   : > { %v2063_v36 = vrot.slane %v2062_v58, 4  ;;  %v2050_v12 = vrot.slane %v2049_v8, 2  ;;  %v2037_v28 = vrot.slane %v2036_v13, 1  ;;  %v2102_v47 = vsel %vm2101_vm5, %v2100_v40, %v2018_v60 }
 0x342   : > { %v2076_v14 = vpop.xlane.xlu0 %2075  ;;  %v2088_v22 = vpop.xlane.xlu1 %2087 }
 0x343   : > { %v2064_v42 = vadd.f32 %v2063_v36, %v2062_v58  ;;  %v2077_v35 = vadd.f32 %v2076_v14, %v2073_v27  ;;  %v2051_v39 = vadd.f32 %v2050_v12, %v2049_v8  ;;  %v2038_v41 = vadd.f32 %v2037_v28, %v2036_v13 }
 0x345   : > { %v2065_v5 = vrot.slane %v2064_v42, 2  ;;  %v2078_v57 = vrot.slane %v2077_v35, 4  ;;  %v2052_v33 = vrot.slane %v2051_v39, 1  ;;  %v2104_v45 = vsel %vm2103_vm6, %v2102_v47, %v2038_v41 }
 0x346   : > { %v2091_v49 = vpop.xlane.xlu0 %2090 }
 0x347   : > { %v2066_v24 = vadd.f32 %v2065_v5, %v2064_v42  ;;  %v2079_v1 = vadd.f32 %v2078_v57, %v2077_v35  ;;  %v2092_v38 = vadd.f32 %v2091_v49, %v2088_v22  ;;  %v2053_v61 = vadd.f32 %v2052_v33, %v2051_v39 }
 0x349   : > { %v2080_v9 = vrot.slane %v2079_v1, 2  ;;  %v2093_v55 = vrot.slane %v2092_v38, 4  ;;  %v2067_v7 = vrot.slane %v2066_v24, 1  ;;  %v2106_v15 = vsel %vm2105_vm7, %v2104_v45, %v2053_v61 }
 0x34b   : > { %v2081_v18 = vadd.f32 %v2080_v9, %v2079_v1  ;;  %v2094_v3 = vadd.f32 %v2093_v55, %v2092_v38  ;;  %v2068_v46 = vadd.f32 %v2067_v7, %v2066_v24 }
 0x34d   : > { %v2082_v21 = vrot.slane %v2081_v18, 1  ;;  %v2095_v19 = vrot.slane %v2094_v3, 2  ;;  %v2108_v52 = vsel %vm2107_vm8, %v2106_v15, %v2068_v46 }
 0x34f   : > { %v2096_v43 = vadd.f32 %v2095_v19, %v2094_v3  ;;  %v2083_v29 = vadd.f32 %v2082_v21, %v2081_v18 }
 0x351   : > { %v2097_v34 = vrot.slane %v2096_v43, 1  ;;  %v2110_v53 = vsel %vm2109_vm9, %v2108_v52, %v2083_v29 }
 0x353   : > { %v2098_v48 = vadd.f32 %v2097_v34, %v2096_v43 }
 0x355   : > { %v2112_v31 = vsel %vm2111_vm10, %v2110_v53, %v2098_v48 }
 0x356   : > { %2114 = vst.msk [vmem:[%s233_s11] sm:$0x1] %vm2113_vm11, %v2112_v31 }
 0x357 PF: > { %s17_s15 = sadd.s32 1, %s2469_s15  }
 0x358   : > { %p14_p5 = scmp.ge.s32.totalorder %s17_s15, 4  }
 0x35a   :  { %16 = sbr.rel (!%p14_p5) target bundleno = 2 (0x2), region = 92 }
 0x361   :  { %2148 = vsyncpa [#allocation4], 1 }
 0x362   :  { %2150 = vsyncpa [#allocation4 + $0x1], 1 }
 0x363   :  { %2151 = vsyncpa [#allocation6], 1 }

// kernel: residual_block.4
= control target key start
LH: loop header
LB: loop body
LE: loop exit
PB: predicated region body
PF: predicated region fallthrough
CT: control target
= control target key end

     0   :  { %12 = vsyncpa [#allocation4], 0  ;;  %s3944_s0 = inlined_call_operand.vmem [shape: f32[2,4,16,16], index: 0, kind: input, shape index: {}, may-alias: {0,5}]   ;;  %s3945_s1 = inlined_call_operand.vmem [shape: f32[144], index: 1, kind: input, shape index: {}]   ;;  %s3946_s2 = inlined_call_operand.vmem [shape: f32[4], index: 2, kind: input, shape index: {}]   ;;  %s3947_s3 = inlined_call_operand.vmem [shape: f32[4], index: 3, kind: input, shape index: {}]   ;;  %s3948_s4 = inlined_call_operand.vmem [shape: f32[4], index: 4, kind: input, shape index: {}]   ;;  %s3949_s5 = inlined_call_operand.vmem [shape: f32[2,4,16,16], index: 5, kind: output, shape index: {0}, may-alias: {0,5}]   ;;  %s3950_s6 = inlined_call_operand.vmem [shape: f32[2,1,8], index: 6, kind: output, shape index: {1}]  }
   0x1   :  { %13 = vsyncpa [#allocation6], 0 }
   0x2   :  { %14 = vsyncpa [#allocation9], 0  ;;  %s2732_s21 = smov 0  }
   0x3 LB: > { %s211_s24 = sshll.u32 %s3946_s2, 4  ;;  %s2741_s25 = sadd.s32 4294967295, %s2687_s21   ;;  %s2687_s21 = sphi %s2732_s21, %s20_s21   ;;  %s212_s24 = int_to_ptr.vmem [resolvable:$true] %s211_s24 }
   0x4   : > { %p2373_p0 = scmp.ge.s32.totalorder %s2687_s21, 1  ;;  %p187_p1 = scmp.lt.s32.totalorder %s2687_s21, 3 }
   0x5   : > { %p2585_p2 = scmp.eq.s32.totalorder %s2741_s25, 0  ;;  %s200_s29 = sshll.u32 %s3945_s1, 4  ;;  %s2753_s29 = int_to_ptr.vmem [resolvable:$true] %s200_s29 }
   0x6   : > { %p2746_p3 = pnand %p2373_p0, %p187_p1  ;;  %s222_s8 = sshll.u32 %s3947_s3, 4  ;;  %s2760_s8 = int_to_ptr.vmem [resolvable:$true] %s222_s8 }
   0x7   : > { %s233_s12 = sshll.u32 %s3948_s4, 4  ;;  %s2609_s13 = scalar_lea.vmem %s212_s24, 16  ;;  %s2771_s12 = int_to_ptr.vmem [resolvable:$true] %s233_s12 }
   0x8   : > { %p2572_p4 = pneg %p2746_p3  ;;  %p2610_p6 = scmp.ne.s32.totalorder %s212_s24, %s2609_s13 }
   0x9   : > { %p2617_p10 = scmp.lt.s32.totalorder %s212_s24, %s212_s24  ;;  %p2618_p11 = scmp.lt.s32.totalorder %s2609_s13, %s2609_s13 }
   0xa   : > { %p2764_p5 = pnand %p2585_p2, %p2572_p4 }
   0xb   : > { %p2619_p12 = por %p2618_p11, %p2617_p10 }
   0xc   : > { %p2611_p7 = pneg %p2764_p5 }
   0xe   : > { %p2612_p8 = pnand %p2611_p7, %p2610_p6 }
  0x10   : > { %p2613_p9 = pneg %p2612_p8 }
  0x12   : > { %p2620_p13 = pnand %p2619_p12, %p2613_p9 }
  0x14   : > { %2623 = shalt.err (!%p2620_p13)
}
  0x15   : > { %s2689_s14 = smov [#allocation5]   ;;  %s2624_s15 = scalar_lea.vmem %s2753_s29, 32 }
  0x16   : > { %2578 = dma.vmem_to_smem (!%p2764_p5), %s212_s24, 16, %s2689_s14, [#allocation6]  }
  0x17   : > { %p2625_p0 = scmp.ne.s32.totalorder %s2753_s29, %s2624_s15  ;;  %p2632_p6 = scmp.lt.s32.totalorder %s2753_s29, %s2753_s29 }
  0x18   : > { %p2633_p8 = scmp.lt.s32.totalorder %s2624_s15, %s2624_s15 }
  0x19   : > { %p2627_p1 = pnand %p2625_p0, %p2611_p7 }
  0x1a   : > { %p2634_p10 = por %p2633_p8, %p2632_p6 }
  0x1b   : > { %p2628_p4 = pneg %p2627_p1 }
  0x1d   : > { %p2635_p9 = pnand %p2634_p10, %p2628_p4 }
  0x1f   : > { %2638 = shalt.err (!%p2635_p9)
}
  0x20   : > { %s2690_s16 = smov [#allocation3]   ;;  %s2639_s17 = scalar_lea.vmem %s2760_s8, 16 }
  0x21   : > { %2575 = dma.vmem_to_smem (!%p2764_p5), %s2753_s29, 32, %s2690_s16, [#allocation4]  }
  0x22   : > { %p2640_p11 = scmp.ne.s32.totalorder %s2760_s8, %s2639_s17  ;;  %p2647_p0 = scmp.lt.s32.totalorder %s2760_s8, %s2760_s8 }
  0x23   : > { %p2648_p1 = scmp.lt.s32.totalorder %s2639_s17, %s2639_s17 }
  0x24   : > { %p2642_p12 = pnand %p2640_p11, %p2611_p7 }
  0x25   : > { %p2649_p4 = por %p2648_p1, %p2647_p0 }
  0x26   : > { %p2643_p13 = pneg %p2642_p12 }
  0x28   : > { %p2650_p6 = pnand %p2649_p4, %p2643_p13 }
  0x2a   : > { %2653 = shalt.err (!%p2650_p6)
}
  0x2b   : > { %s2691_s18 = smov [#allocation7]   ;;  %s2654_s19 = scalar_lea.vmem %s2771_s12, 16 }
  0x2c   : > { %2581 = dma.vmem_to_smem (!%p2764_p5), %s2760_s8, 16, %s2691_s18, [#allocation6]  }
  0x2d   : > { %p2655_p8 = scmp.ne.s32.totalorder %s2771_s12, %s2654_s19  ;;  %p2662_p11 = scmp.lt.s32.totalorder %s2771_s12, %s2771_s12 }
  0x2e   : > { %p2663_p12 = scmp.lt.s32.totalorder %s2654_s19, %s2654_s19 }
  0x2f   : > { %p2657_p10 = pnand %p2655_p8, %p2611_p7 }
  0x30   : > { %p2664_p13 = por %p2663_p12, %p2662_p11 }
  0x31   : > { %p2658_p9 = pneg %p2657_p10 }
  0x33   : > { %p2665_p0 = pnand %p2664_p13, %p2658_p9 }
  0x35   : > { %2668 = shalt.err (!%p2665_p0)
}
  0x36   : > { %s2692_s20 = smov [#allocation8]   ;;  %254 = sbr.rel (%p2746_p3) target bundleno = 883 (0x373), region = 40 }
  0x37   : > { %2584 = dma.vmem_to_smem (!%p2764_p5), %s2771_s12, 16, %s2692_s20, [#allocation9]  }
  0x3d   : > { %2674 = dma.done.wait (%p2585_p2), [#allocation4], 32  }
  0x3e   : > { %2676 = vsyncadd (%p2585_p2), [#allocation4], 4294967264 }
  0x3f   : > { %2678 = dma.done.wait (%p2585_p2), [#allocation6], 32  }
  0x40   : > { %2680 = vsyncadd (%p2585_p2), [#allocation6], 4294967264 }
  0x41   : > { %2682 = dma.done.wait (%p2585_p2), [#allocation9], 16  }
  0x42   : > { %2684 = vsyncadd (%p2585_p2), [#allocation9], 4294967280 }
  0x43   : > { %272 = sfence }
  0x44   : > { %p300_p3 = scmp.lt.s32.totalorder %s2741_s25, 1  ;;  %s329_s22 = sld [smem:[#allocation7]]  ;;  %vm313_vm0 = vcmask 146432   ;;  %v2693_v0 = vmov 0.0   ;;  %vm316_vm1 = vcmask 140288   ;;  %vm351_vm10 = vcmask 138248  }
  0x45   : > { %s2825_s23 = sld [smem:[#allocation8]]  ;;  %314 = vst.msk [vmem:[#allocation2] sm:$0xff] %vm313_vm0, %v2693_v0  ;;  %315 = vst.msk [vmem:[#allocation2 + $0x8] sm:$0xff] %vm313_vm0, %v2693_v0  ;;  %s2390_s24 = sld [smem:[#allocation7 + $0x1]]  ;;  %vm2098_vm11 = vcmask 130048   ;;  %vm2234_vm12 = vcmask 7168  }
  0x46   : > { %318 = vst.msk [vmem:[#allocation2 + $0x18] sm:$0xff] %vm313_vm0, %v2693_v0  ;;  %319 = vst.msk [vmem:[#allocation2 + $0x20] sm:$0xff] %vm313_vm0, %v2693_v0  ;;  %s3954_s25 = smov (!%p300_p3, %s2741_s25), 1  ;;  %s2830_s26 = sld [smem:[#allocation8 + $0x1]]  ;;  %vm2236_vm13 = vcmask 15360   ;;  %vm2238_vm14 = vcmask 23552  }
  0x47   : > { %321 = vst.msk [vmem:[#allocation2 + $0x30] sm:$0xff] %vm313_vm0, %v2693_v0  ;;  %322 = vst.msk [vmem:[#allocation2 + $0x38] sm:$0xff] %vm313_vm0, %v2693_v0  ;;  %s2554_s27 = sshll.u32 %s3954_s25, 6  ;;  %s2833_s28 = sld [smem:[#allocation7 + $0x2]]  ;;  %vm2240_vm15 = vcmask 31744  }
  0x48   : > { %324 = vst.msk [vmem:[#allocation2 + $0x48] sm:$0xff] %vm313_vm0, %v2693_v0  ;;  %325 = vst.msk [vmem:[#allocation2 + $0x50] sm:$0xff] %vm313_vm0, %v2693_v0  ;;  %s2840_s7 = scalar_lea.vmem %s3944_s0, %s2554_s27  ;;  %s2844_s8 = sld [smem:[#allocation8 + $0x2]]  ;;  %vm2242_vm0 = vcmask 39936  }
  0x49   : > { %317 = vst.msk [vmem:[#allocation2 + $0x10] sm:$0x3] %vm316_vm1, %v2693_v0  ;;  %320 = vst.msk [vmem:[#allocation2 + $0x28] sm:$0x3] %vm316_vm1, %v2693_v0  ;;  %v327_v1 = vld [vmem:[%s2840_s7] sm:$0xff]  ;;  %v328_v3 = vld [vmem:[%s2840_s7 + $0x8] sm:$0xff] }
  0x4a   : > { %323 = vst.msk [vmem:[#allocation2 + $0x40] sm:$0x3] %vm316_vm1, %v2693_v0  ;;  %326 = vst.msk [vmem:[#allocation2 + $0x58] sm:$0x3] %vm316_vm1, %v2693_v0  ;;  %v330_v2 = vstv %s329_s22  ;;  %v2388_v7 = vld [vmem:[%s2840_s7 + $0x10] sm:$0xff]  ;;  %v2389_v8 = vld [vmem:[%s2840_s7 + $0x18] sm:$0xff] }
  0x4b   : > { %v331_v4 = vmul.f32 %v330_v2, %v327_v1  ;;  %v334_v5 = vstv %s2825_s23  ;;  %v332_v6 = vmul.f32 %v330_v2, %v328_v3  ;;  %s2849_s9 = sld [smem:[#allocation7 + $0x3]]  ;;  %v358_v11 = vstv %s2390_s24  ;;  %v2393_v13 = vld [vmem:[%s2840_s7 + $0x28] sm:$0xff]  ;;  %v2392_v17 = vld [vmem:[%s2840_s7 + $0x20] sm:$0xff]  ;;  %s2694_s11 = smov 1  }
  0x4c   : > { %s2851_s10 = sld [smem:[#allocation8 + $0x3]]  ;;  %v362_v12 = vstv %s2830_s26  ;;  %v359_v14 = vmul.f32 %v2388_v7, %v358_v11  ;;  %v360_v15 = vmul.f32 %v2389_v8, %v358_v11  ;;  %v2397_v24 = vld [vmem:[%s2840_s7 + $0x38] sm:$0xff]  ;;  %v2396_v29 = vld [vmem:[%s2840_s7 + $0x30] sm:$0xff]  ;;  %s2403_s12 = sld [smem:[#allocation3 + $0x1]]  ;;  %vm2244_vm1 = vcmask 48128  }
  0x4d   : > { %v335_v9 = vadd.f32 %v334_v5, %v331_v4  ;;  %v336_v10 = vadd.f32 %v334_v5, %v332_v6  ;;  %v386_v16 = vstv %s2833_s28  ;;  %s2871_s13 = sld [smem:[#allocation3 + $0x25]]  ;;  %s2875_s14 = sld [smem:[#allocation3 + $0x49]] }
  0x4e   : > { %v363_v20 = vadd.f32 %v362_v12, %v359_v14  ;;  %v364_v21 = vadd.f32 %v362_v12, %v360_v15  ;;  %v388_v22 = vmul.f32 %v2393_v13, %v386_v16  ;;  %v390_v23 = vstv %s2844_s8  ;;  %s2406_s15 = sld [smem:[#allocation3 + $0x6d]]  ;;  %s2695_s16 = smov 127  }
  0x4f   : > { %vm337_vm2 = vcmp.gt.f32.partialorder %v335_v9, 0.0  ;;  %v339_v18 = vmul.f32 0.2, %v335_v9  ;;  %vm338_vm3 = vcmp.gt.f32.partialorder %v336_v10, 0.0  ;;  %v340_v19 = vmul.f32 0.2, %v336_v10 }
  0x50   : > { %v387_v27 = vmul.f32 %v2392_v17, %v386_v16  ;;  %vm365_vm4 = vcmp.gt.f32.partialorder %v363_v20, 0.0  ;;  %v367_v30 = vmul.f32 0.2, %v363_v20  ;;  %vm366_vm5 = vcmp.gt.f32.partialorder %v364_v21, 0.0  ;;  %s2407_s17 = sld [smem:[#allocation3 + $0x2]]  ;;  %s2408_s18 = sld [smem:[#allocation3 + $0x26]] }
  0x51   : > { %v341_v25 = vsel %vm337_vm2, %v335_v9, %v339_v18  ;;  %v342_v26 = vsel %vm338_vm3, %v336_v10, %v340_v19  ;;  %v414_v28 = vstv %s2849_s9  ;;  %v368_v31 = vmul.f32 0.2, %v364_v21  ;;  %s2409_s19 = sld [smem:[#allocation3 + $0x4a]]  ;;  %s2410_s20 = sld [smem:[#allocation3 + $0x6e]] }
  0x52   : > { %345 = vrot.lane.b32.xlu0 %v341_v25, %s2694_s11  ;;  %v392_v32 = vadd.f32 %v390_v23, %v388_v22  ;;  %v391_v33 = vadd.f32 %v390_v23, %v387_v27  ;;  %v416_v34 = vmul.f32 %v2397_v24, %v414_v28  ;;  %v418_v35 = vstv %s2851_s10  ;;  %s2696_s22 = smov 126   ;;  %s2415_s23 = sld [smem:[#allocation3 + $0x4]] }
  0x53   : > { %v369_v36 = vsel %vm365_vm4, %v363_v20, %v367_v30  ;;  %v415_v37 = vmul.f32 %v2396_v29, %v414_v28  ;;  %v370_v39 = vsel %vm366_vm5, %v364_v21, %v368_v31  ;;  %v465_v52 = vstv %s2403_s12  ;;  %s2416_s24 = sld [smem:[#allocation3 + $0x28]]  ;;  %s2417_s26 = sld [smem:[#allocation3 + $0x4c]] }
  0x54   : > { %373 = vrot.lane.b32.xlu1 %v369_v36, %s2694_s11  ;;  %vm393_vm6 = vcmp.gt.f32.partialorder %v391_v33, 0.0  ;;  %v395_v38 = vmul.f32 0.2, %v391_v33  ;;  %v396_v40 = vmul.f32 0.2, %v392_v32  ;;  %v420_v41 = vadd.f32 %v418_v35, %v416_v34  ;;  %s2418_s28 = sld [smem:[#allocation3 + $0x70]] }
  0x55   : > { %v419_v42 = vadd.f32 %v418_v35, %v415_v37  ;;  %vm394_vm7 = vcmp.gt.f32.partialorder %v392_v32, 0.0  ;;  %v479_v57 = vstv %s2871_s13  ;;  %v493_v63 = vstv %s2875_s14  ;;  %s2419_s29 = sld [smem:[#allocation3 + $0x5]]  ;;  %s2420_s30 = sld [smem:[#allocation3 + $0x29]] }
  0x56   : > { %347 = vrot.lane.b32.xlu0 %v342_v26, %s2694_s11  ;;  %v397_v43 = vsel %vm393_vm6, %v391_v33, %v395_v38  ;;  %v398_v45 = vsel %vm394_vm7, %v392_v32, %v396_v40  ;;  %v424_v46 = vmul.f32 0.2, %v420_v41  ;;  %vm422_vm9 = vcmp.gt.f32.partialorder %v420_v41, 0.0  ;;  %s2421_s7 = sld [smem:[#allocation3 + $0x4d]]  ;;  %s2422_s8 = sld [smem:[#allocation3 + $0x71]] }
  0x57   : > { %vm421_vm8 = vcmp.gt.f32.partialorder %v419_v42, 0.0  ;;  %v423_v44 = vmul.f32 0.2, %v419_v42  ;;  %v507_v3 = vstv %s2406_s15  ;;  %v521_v6 = vstv %s2407_s17  ;;  %s2427_s9 = sld [smem:[#allocation3 + $0x7]]  ;;  %s2428_s10 = sld [smem:[#allocation3 + $0x2b]] }
  0x58   : > { %375 = vrot.lane.b32.xlu1 %v370_v39, %s2694_s11  ;;  %v426_v48 = vsel %vm422_vm9, %v420_v41, %v424_v46  ;;  %v535_v9 = vstv %s2408_s18  ;;  %v549_v12 = vstv %s2409_s19  ;;  %v563_v15 = vstv %s2410_s20  ;;  %s2430_s12 = sld [smem:[#allocation3 + $0x73]]  ;;  %s2431_s13 = sld [smem:[#allocation3 + $0x8]] }
  0x59   : > { %v425_v47 = vsel %vm421_vm8, %v419_v42, %v423_v44  ;;  %v603_v19 = vstv %s2415_s23  ;;  %v617_v23 = vstv %s2416_s24  ;;  %v631_v26 = vstv %s2417_s26  ;;  %s2432_s14 = sld [smem:[#allocation3 + $0x2c]]  ;;  %s2433_s15 = sld [smem:[#allocation3 + $0x50]] }
  0x5a   : > { %401 = vrot.lane.b32.xlu0 %v397_v43, %s2694_s11  ;;  %v645_v29 = vstv %s2418_s28  ;;  %s2434_s17 = sld [smem:[#allocation3 + $0x74]]  ;;  %s2439_s18 = sld [smem:[#allocation3 + $0xa]]  ;;  %vm2246_vm2 = vcmask 56320   ;;  %vm2248_vm3 = vcmask 57344  }
  0x5b   : > { %v659_v32 = vstv %s2419_s29  ;;  %v673_v35 = vstv %s2420_s30  ;;  %s2440_s19 = sld [smem:[#allocation3 + $0x2e]]  ;;  %s2441_s20 = sld [smem:[#allocation3 + $0x52]] }
  0x5c   : > { %403 = vrot.lane.b32.xlu1 %v398_v45, %s2694_s11  ;;  %v687_v38 = vstv %s2421_s7  ;;  %v701_v41 = vstv %s2422_s8  ;;  %s2442_s23 = sld [smem:[#allocation3 + $0x76]]  ;;  %s2443_s24 = sld [smem:[#allocation3 + $0xb]] }
  0x5d   : > { %v741_v45 = vstv %s2427_s9  ;;  %s2444_s26 = sld [smem:[#allocation3 + $0x2f]]  ;;  %s3008_s28 = sld [smem:[#allocation3 + $0x53]] }
  0x5e   : > { %429 = vrot.lane.b32.xlu0 %v425_v47, %s2694_s11  ;;  %s3014_s29 = sld [smem:[#allocation3 + $0x77]]  ;;  %s3021_s30 = sld [smem:[#allocation3 + $0xd]] }
  0x5f   : > { %s3023_s7 = sld [smem:[#allocation3]]  ;;  %s3030_s8 = sld [smem:[#allocation3 + $0x31]] }
  0x60   : > { %431 = vrot.lane.b32.xlu1 %v426_v48, %s2694_s11  ;;  %s2429_s11 = sld [smem:[#allocation3 + $0x4f]]  ;;  %s3032_s9 = sld [smem:[#allocation3 + $0x24]] }
  0xc4   : > { %v346_v49 = vpop.permute.xlu0 %345 }
  0xc5   : > { %352 = vst.msk [vmem:[#allocation2 + $0x1] sm:$0xff] %vm351_vm10, %v346_v49  ;;  %v755_v49 = vstv %s2428_s10  ;;  %s3036_s10 = sld [smem:[#allocation3 + $0x3]] }
  0xc6   : > { %v374_v50 = vpop.permute.xlu1 %373 }
  0xc7   : > { %380 = vst.msk [vmem:[#allocation2 + $0x19] sm:$0xff] %vm351_vm10, %v374_v50 }
  0xc8   : > { %v348_v51 = vpop.permute.xlu0 %347 }
  0xc9   : > { %353 = vst.msk [vmem:[#allocation2 + $0x9] sm:$0xff] %vm351_vm10, %v348_v51 }
  0xca   : > { %v376_v53 = vpop.permute.xlu1 %375 }
  0xcb   : > { %381 = vst.msk [vmem:[#allocation2 + $0x21] sm:$0xff] %vm351_vm10, %v376_v53 }
  0xcc   : > { %v2877_v54 = vld [vmem:[#allocation2] sm:$0xff]  ;;  %v402_v55 = vpop.permute.xlu0 %401 }
  0xcd   : > { %v466_v56 = vmul.f32 %v465_v52, %v2877_v54  ;;  %408 = vst.msk [vmem:[#allocation2 + $0x31] sm:$0xff] %vm351_vm10, %v402_v55  ;;  %v480_v61 = vmul.f32 %v479_v57, %v2877_v54  ;;  %v494_v1 = vmul.f32 %v493_v63, %v2877_v54  ;;  %v508_v4 = vmul.f32 %v507_v3, %v2877_v54  ;;  %v2916_v18 = vld [vmem:[#allocation2 + $0x1] sm:$0xff] }
  0xce   : > { %v404_v58 = vpop.permute.xlu1 %403  ;;  %v522_v7 = vmul.f32 %v521_v6, %v2877_v54  ;;  %v536_v10 = vmul.f32 %v535_v9, %v2877_v54  ;;  %v550_v13 = vmul.f32 %v549_v12, %v2877_v54  ;;  %v564_v16 = vmul.f32 %v563_v15, %v2877_v54 }
  0xcf   : > { %470 = vrot.lane.b32.xlu0 %v466_v56, %s2695_s16  ;;  %409 = vst.msk [vmem:[#allocation2 + $0x39] sm:$0xff] %vm351_vm10, %v404_v58  ;;  %v604_v20 = vmul.f32 %v603_v19, %v2916_v18  ;;  %v618_v24 = vmul.f32 %v617_v23, %v2916_v18  ;;  %v632_v27 = vmul.f32 %v631_v26, %v2916_v18  ;;  %v783_v56 = vstv %s2430_s12  ;;  %s3042_s12 = sld [smem:[#allocation3 + $0x55]] }
  0xd0   : > { %v2884_v59 = vld [vmem:[#allocation2 + $0x8] sm:$0xff]  ;;  %v430_v60 = vpop.permute.xlu0 %429  ;;  %v646_v30 = vmul.f32 %v645_v29, %v2916_v18  ;;  %v660_v33 = vmul.f32 %v659_v32, %v2916_v18  ;;  %v674_v36 = vmul.f32 %v673_v35, %v2916_v18  ;;  %v688_v39 = vmul.f32 %v687_v38, %v2916_v18 }
  0xd1   : > { %v467_v62 = vmul.f32 %v465_v52, %v2884_v59  ;;  %436 = vst.msk [vmem:[#allocation2 + $0x49] sm:$0xff] %vm351_vm10, %v430_v60  ;;  %v481_v2 = vmul.f32 %v479_v57, %v2884_v59  ;;  %v495_v5 = vmul.f32 %v493_v63, %v2884_v59  ;;  %v509_v8 = vmul.f32 %v507_v3, %v2884_v59  ;;  %v2922_v22 = vld [vmem:[#allocation2 + $0x9] sm:$0xff] }
  0xd2   : > { %v432_v0 = vpop.permute.xlu1 %431  ;;  %v523_v11 = vmul.f32 %v521_v6, %v2884_v59  ;;  %v537_v14 = vmul.f32 %v535_v9, %v2884_v59  ;;  %v551_v17 = vmul.f32 %v549_v12, %v2884_v59  ;;  %v565_v21 = vmul.f32 %v563_v15, %v2884_v59  ;;  %v2952_v44 = vld [vmem:[#allocation2 + $0x2] sm:$0xff]  ;;  %v2958_v48 = vld [vmem:[#allocation2 + $0xa] sm:$0xff]  ;;  %v2986_v6 = vld [vmem:[#allocation2 + $0x18] sm:$0xff] }
  0xd3   : > { %484 = vrot.lane.b32.xlu0 %v480_v61, %s2695_s16  ;;  %472 = vrot.lane.b32.xlu1 %v467_v62, %s2695_s16  ;;  %437 = vst.msk [vmem:[#allocation2 + $0x51] sm:$0xff] %vm351_vm10, %v432_v0  ;;  %v605_v25 = vmul.f32 %v603_v19, %v2922_v22  ;;  %v619_v28 = vmul.f32 %v617_v23, %v2922_v22  ;;  %v769_v52 = vstv %s2429_s11  ;;  %v797_v60 = vstv %s2431_s13  ;;  %v2994_v12 = vld [vmem:[#allocation2 + $0x20] sm:$0xff]  ;;  %s3038_s11 = sld [smem:[#allocation3 + $0x48]]  ;;  %s3050_s13 = sld [smem:[#allocation3 + $0x6c]] }
  0xd4   : > { %v633_v31 = vmul.f32 %v631_v26, %v2922_v22  ;;  %v647_v34 = vmul.f32 %v645_v29, %v2922_v22  ;;  %v661_v37 = vmul.f32 %v659_v32, %v2922_v22  ;;  %v675_v40 = vmul.f32 %v673_v35, %v2922_v22 }
  0xd5   : > { %v702_v42 = vmul.f32 %v701_v41, %v2916_v18  ;;  %v689_v43 = vmul.f32 %v687_v38, %v2922_v22  ;;  %v742_v46 = vmul.f32 %v741_v45, %v2952_v44  ;;  %v703_v47 = vmul.f32 %v701_v41, %v2922_v22  ;;  %v3044_v41 = vld [vmem:[#allocation2 + $0x19] sm:$0xff] }
  0xd6   : > { %v756_v50 = vmul.f32 %v755_v49, %v2952_v44  ;;  %v743_v51 = vmul.f32 %v741_v45, %v2958_v48  ;;  %v770_v53 = vmul.f32 %v769_v52, %v2952_v44  ;;  %v757_v55 = vmul.f32 %v755_v49, %v2958_v48 }
  0xd7   : > { %498 = vrot.lane.b32.xlu0 %v494_v1, %s2695_s16  ;;  %486 = vrot.lane.b32.xlu1 %v481_v2, %s2695_s16  ;;  %v784_v57 = vmul.f32 %v783_v56, %v2952_v44  ;;  %v771_v58 = vmul.f32 %v769_v52, %v2958_v48  ;;  %v798_v61 = vmul.f32 %v797_v60, %v2952_v44  ;;  %v811_v63 = vstv %s2432_s14  ;;  %s3052_s14 = sld [smem:[#allocation3 + $0x27]] }
  0xd8   : > { %v785_v62 = vmul.f32 %v783_v56, %v2958_v48  ;;  %v812_v0 = vmul.f32 %v811_v63, %v2952_v44  ;;  %v799_v1 = vmul.f32 %v797_v60, %v2958_v48  ;;  %v825_v2 = vstv %s2433_s15  ;;  %s3054_s15 = sld [smem:[#allocation3 + $0x79]] }
  0xd9   : > { %v826_v3 = vmul.f32 %v825_v2, %v2952_v44  ;;  %v827_v9 = vmul.f32 %v825_v2, %v2958_v48  ;;  %v1031_v52 = vstv %s3030_s8  ;;  %s3172_s8 = sld [smem:[#allocation3 + $0x7c]] }
  0xdb   : > { %512 = vrot.lane.b32.xlu0 %v508_v4, %s2695_s16  ;;  %500 = vrot.lane.b32.xlu1 %v495_v5, %s2695_s16  ;;  %v813_v4 = vmul.f32 %v811_v63, %v2958_v48  ;;  %v839_v5 = vstv %s2434_s17  ;;  %s3069_s17 = sld [smem:[#allocation3 + $0xe]]  ;;  %v1045_v63 = vstv %s3042_s12  ;;  %s3201_s12 = sld [smem:[#allocation3 + $0x35]] }
  0xdf   : > { %526 = vrot.lane.b32.xlu0 %v522_v7, %s2696_s22  ;;  %514 = vrot.lane.b32.xlu1 %v509_v8, %s2695_s16  ;;  %v879_v7 = vstv %s2439_s18  ;;  %v840_v8 = vmul.f32 %v839_v5, %v2952_v44  ;;  %s3072_s18 = sld [smem:[#allocation3 + $0x4b]] }
  0xe0   : > { %v881_v15 = vmul.f32 %v879_v7, %v2994_v12 }
  0xe3   : > { %540 = vrot.lane.b32.xlu0 %v536_v10, %s2696_s22  ;;  %528 = vrot.lane.b32.xlu1 %v523_v11, %s2696_s22  ;;  %v880_v10 = vmul.f32 %v879_v7, %v2986_v6  ;;  %v841_v11 = vmul.f32 %v839_v5, %v2958_v48  ;;  %v585_v5 = vstv %s3052_s14  ;;  %s3233_s14 = sld [smem:[#allocation3 + $0x7d]] }
  0xe7   : > { %554 = vrot.lane.b32.xlu0 %v550_v13, %s2696_s22  ;;  %542 = vrot.lane.b32.xlu1 %v537_v14, %s2696_s22  ;;  %v893_v13 = vstv %s2440_s19  ;;  %s3087_s19 = sld [smem:[#allocation3 + $0x6f]] }
  0xe8   : > { %v894_v14 = vmul.f32 %v893_v13, %v2986_v6  ;;  %v895_v19 = vmul.f32 %v893_v13, %v2994_v12 }
  0xeb   : > { %568 = vrot.lane.b32.xlu0 %v564_v16, %s2696_s22  ;;  %556 = vrot.lane.b32.xlu1 %v551_v17, %s2696_s22  ;;  %v907_v16 = vstv %s2441_s20  ;;  %s3096_s20 = sld [smem:[#allocation3 + $0x32]] }
  0xec   : > { %v908_v17 = vmul.f32 %v907_v16, %v2986_v6  ;;  %v909_v23 = vmul.f32 %v907_v16, %v2994_v12  ;;  %v1046_v16 = vmul.f32 %v1045_v63, %v3044_v41 }
  0xef   : > { %608 = vrot.lane.b32.xlu0 %v604_v20, %s2695_s16  ;;  %570 = vrot.lane.b32.xlu1 %v565_v21, %s2696_s22  ;;  %v921_v20 = vstv %s2442_s23  ;;  %s3112_s23 = sld [smem:[#allocation3 + $0x56]] }
  0xf0   : > { %v922_v21 = vmul.f32 %v921_v20, %v2986_v6  ;;  %v923_v26 = vmul.f32 %v921_v20, %v2994_v12 }
  0xf3   : > { %622 = vrot.lane.b32.xlu0 %v618_v24, %s2695_s16  ;;  %610 = vrot.lane.b32.xlu1 %v605_v25, %s2695_s16  ;;  %v935_v24 = vstv %s2443_s24  ;;  %s3129_s24 = sld [smem:[#allocation3 + $0x7a]] }
  0xf4   : > { %v936_v25 = vmul.f32 %v935_v24, %v2986_v6 }
  0xf7   : > { %636 = vrot.lane.b32.xlu0 %v632_v27, %s2695_s16  ;;  %624 = vrot.lane.b32.xlu1 %v619_v28, %s2695_s16  ;;  %v949_v27 = vstv %s2444_s26  ;;  %s3143_s26 = sld [smem:[#allocation3 + $0x10]] }
  0xf8   : > { %v950_v29 = vmul.f32 %v949_v27, %v2986_v6  ;;  %v951_v35 = vmul.f32 %v949_v27, %v2994_v12 }
  0xfb   : > { %650 = vrot.lane.b32.xlu0 %v646_v30, %s2695_s16  ;;  %638 = vrot.lane.b32.xlu1 %v633_v31, %s2695_s16  ;;  %v937_v30 = vmul.f32 %v935_v24, %v2994_v12  ;;  %v963_v31 = vstv %s3008_s28  ;;  %v1073_v24 = vstv %s3069_s17  ;;  %s3153_s28 = sld [smem:[#allocation3 + $0x34]]  ;;  %s3257_s17 = sld [smem:[#allocation3 + $0x37]] }
  0xff   : > { %664 = vrot.lane.b32.xlu0 %v660_v33, %s2696_s22  ;;  %652 = vrot.lane.b32.xlu1 %v647_v34, %s2695_s16  ;;  %v964_v34 = vmul.f32 %v963_v31, %v2986_v6 }
 0x103   : > { %678 = vrot.lane.b32.xlu0 %v674_v36, %s2696_s22  ;;  %666 = vrot.lane.b32.xlu1 %v661_v37, %s2696_s22  ;;  %v977_v36 = vstv %s3014_s29  ;;  %s3157_s29 = sld [smem:[#allocation3 + $0x6]] }
 0x104   : > { %v979_v49 = vmul.f32 %v977_v36, %v2994_v12 }
 0x107   : > { %692 = vrot.lane.b32.xlu0 %v688_v39, %s2696_s22  ;;  %680 = vrot.lane.b32.xlu1 %v675_v40, %s2696_s22  ;;  %v978_v39 = vmul.f32 %v977_v36, %v2986_v6  ;;  %v965_v40 = vmul.f32 %v963_v31, %v2994_v12 }
 0x10b   : > { %706 = vrot.lane.b32.xlu0 %v702_v42, %s2696_s22  ;;  %694 = vrot.lane.b32.xlu1 %v689_v43, %s2696_s22  ;;  %v1017_v42 = vstv %s3021_s30  ;;  %v441_v43 = vstv %s3023_s7  ;;  %s3164_s30 = sld [smem:[#allocation3 + $0x58]]  ;;  %s3168_s7 = sld [smem:[#allocation3 + $0x2a]] }
 0x10f   : > { %746 = vrot.lane.b32.xlu0 %v742_v46, %s2695_s16  ;;  %708 = vrot.lane.b32.xlu1 %v703_v47, %s2696_s22  ;;  %v1018_v47 = vmul.f32 %v1017_v42, %v3044_v41 }
 0x113   : > { %760 = vrot.lane.b32.xlu0 %v756_v50, %s2695_s16  ;;  %748 = vrot.lane.b32.xlu1 %v743_v51, %s2695_s16  ;;  %v3062_v50 = vld [vmem:[#allocation2 + $0x21] sm:$0xff]  ;;  %v442_v51 = vmul.f32 %v441_v43, %v2877_v54 }
 0x117   : > { %774 = vrot.lane.b32.xlu0 %v770_v53, %s2695_s16  ;;  %762 = vrot.lane.b32.xlu1 %v757_v55, %s2695_s16  ;;  %v447_v53 = vstv %s3032_s9  ;;  %v579_v55 = vstv %s3036_s10  ;;  %s3180_s9 = sld [smem:[#allocation3 + $0x4e]]  ;;  %s3185_s10 = sld [smem:[#allocation3 + $0x11]] }
 0x11b   : > { %788 = vrot.lane.b32.xlu0 %v784_v57, %s2695_s16  ;;  %776 = vrot.lane.b32.xlu1 %v771_v58, %s2695_s16  ;;  %v453_v57 = vstv %s3038_s11  ;;  %s3192_s11 = sld [smem:[#allocation3 + $0x72]] }
 0x11c   : > { %v454_v13 = vmul.f32 %v453_v57, %v2877_v54 }
 0x11f   : > { %802 = vrot.lane.b32.xlu0 %v798_v61, %s2696_s22  ;;  %790 = vrot.lane.b32.xlu1 %v785_v62, %s2695_s16  ;;  %v1032_v61 = vmul.f32 %v1031_v52, %v3044_v41  ;;  %v1019_v62 = vmul.f32 %v1017_v42, %v3062_v50 }
 0x123   : > { %816 = vrot.lane.b32.xlu0 %v812_v0, %s2696_s22  ;;  %804 = vrot.lane.b32.xlu1 %v799_v1, %s2696_s22  ;;  %v443_v0 = vmul.f32 %v441_v43, %v2884_v59  ;;  %v448_v1 = vmul.f32 %v447_v53, %v2877_v54 }
 0x127   : > { %830 = vrot.lane.b32.xlu0 %v826_v3, %s2696_s22  ;;  %818 = vrot.lane.b32.xlu1 %v813_v4, %s2696_s22  ;;  %v580_v3 = vmul.f32 %v579_v55, %v2916_v18  ;;  %v459_v4 = vstv %s3050_s13  ;;  %s3217_s13 = sld [smem:[#allocation3 + $0x59]] }
 0x128   : > { %v460_v31 = vmul.f32 %v459_v4, %v2877_v54  ;;  %v597_v54 = vstv %s3087_s19  ;;  %s3268_s19 = sld [smem:[#allocation3 + $0x5b]] }
 0x12b   : > { %844 = vrot.lane.b32.xlu0 %v840_v8, %s2696_s22  ;;  %832 = vrot.lane.b32.xlu1 %v827_v9, %s2696_s22  ;;  %v1059_v9 = vstv %s3054_s15  ;;  %s3247_s15 = sld [smem:[#allocation3 + $0x13]] }
 0x12f   : > { %884 = vrot.lane.b32.xlu0 %v880_v10, %s2695_s16  ;;  %846 = vrot.lane.b32.xlu1 %v841_v11, %s2696_s22  ;;  %v449_v11 = vmul.f32 %v447_v53, %v2884_v59  ;;  %v1074_v53 = vmul.f32 %v1073_v24, %v3044_v41 }
 0x133   : > { %898 = vrot.lane.b32.xlu0 %v894_v14, %s2695_s16  ;;  %886 = vrot.lane.b32.xlu1 %v881_v15, %s2695_s16 }
 0x137   : > { %912 = vrot.lane.b32.xlu0 %v908_v17, %s2695_s16  ;;  %900 = vrot.lane.b32.xlu1 %v895_v19, %s2695_s16  ;;  %v1033_v17 = vmul.f32 %v1031_v52, %v3062_v50 }
 0x13b   : > { %926 = vrot.lane.b32.xlu0 %v922_v21, %s2695_s16  ;;  %914 = vrot.lane.b32.xlu1 %v909_v23, %s2695_s16  ;;  %v581_v21 = vmul.f32 %v579_v55, %v2922_v22  ;;  %v586_v23 = vmul.f32 %v585_v5, %v2916_v18  ;;  %v1061_v55 = vmul.f32 %v1059_v9, %v3062_v50 }
 0x13f   : > { %940 = vrot.lane.b32.xlu0 %v936_v25, %s2696_s22  ;;  %928 = vrot.lane.b32.xlu1 %v923_v26, %s2695_s16  ;;  %v591_v25 = vstv %s3072_s18  ;;  %s3261_s18 = sld [smem:[#allocation3 + $0x9]] }
 0x141   : > { %v471_v28 = vpop.permute.xlu0 %470 }
 0x142   : > { %v476_v56 = vadd.f32 %v471_v28, %v442_v51 }
 0x143   : > { %954 = vrot.lane.b32.xlu0 %v950_v29, %s2696_s22  ;;  %942 = vrot.lane.b32.xlu1 %v937_v30, %s2696_s22  ;;  %v455_v30 = vmul.f32 %v453_v57, %v2884_v59 }
 0x145   : > { %v473_v32 = vpop.permute.xlu1 %472  ;;  %v485_v33 = vpop.permute.xlu0 %484 }
 0x146   : > { %v477_v7 = vadd.f32 %v473_v32, %v443_v0  ;;  %v490_v8 = vadd.f32 %v485_v33, %v448_v1 }
 0x147   : > { %968 = vrot.lane.b32.xlu0 %v964_v34, %s2696_s22  ;;  %956 = vrot.lane.b32.xlu1 %v951_v35, %s2696_s22  ;;  %v1060_v34 = vmul.f32 %v1059_v9, %v3044_v41  ;;  %v1047_v35 = vmul.f32 %v1045_v63, %v3062_v50 }
 0x149   : > { %v487_v37 = vpop.permute.xlu1 %486  ;;  %v499_v38 = vpop.permute.xlu0 %498 }
 0x14a   : > { %v491_v26 = vadd.f32 %v487_v37, %v449_v11  ;;  %v504_v27 = vadd.f32 %v499_v38, %v454_v13  ;;  %v587_v37 = vmul.f32 %v585_v5, %v2922_v22  ;;  %v592_v38 = vmul.f32 %v591_v25, %v2916_v18 }
 0x14b   : > { %982 = vrot.lane.b32.xlu0 %v978_v39, %s2696_s22  ;;  %970 = vrot.lane.b32.xlu1 %v965_v40, %s2696_s22  ;;  %v1115_v11 = vstv %s3129_s24  ;;  %s3284_s24 = sld [smem:[#allocation3 + $0x51]] }
 0x14d   : > { %v3056_v45 = vpop.permute.xlu1 %500  ;;  %v3058_v46 = vpop.permute.xlu0 %512 }
 0x14e   : > { %v505_v40 = vadd.f32 %v3056_v45, %v455_v30  ;;  %v518_v42 = vadd.f32 %v3058_v46, %v460_v31  ;;  %v593_v45 = vmul.f32 %v591_v25, %v2922_v22  ;;  %v598_v46 = vmul.f32 %v597_v54, %v2916_v18 }
 0x14f   : > { %1022 = vrot.lane.b32.xlu0 %v1018_v47, %s2695_s16  ;;  %984 = vrot.lane.b32.xlu1 %v979_v49, %s2696_s22  ;;  %v461_v49 = vmul.f32 %v459_v4, %v2884_v59  ;;  %v1101_v4 = vstv %s3112_s23  ;;  %v599_v18 = vmul.f32 %v597_v54, %v2922_v22  ;;  %v1169_v25 = vstv %s3153_s28  ;;  %s3276_s23 = sld [smem:[#allocation3 + $0x7f]]  ;;  %s3296_s28 = sld [smem:[#allocation3 + $0x75]] }
 0x151   : > { %v3075_v58 = vpop.permute.xlu1 %514  ;;  %v527_v60 = vpop.permute.xlu0 %526 }
 0x152   : > { %v532_v2 = vadd.f32 %v527_v60, %v476_v56  ;;  %v1087_v56 = vstv %s3096_s20  ;;  %v519_v59 = vadd.f32 %v3075_v58, %v461_v49  ;;  %s3272_s20 = sld [smem:[#allocation3 + $0x2d]] }
 0x153   : > { %1036 = vrot.lane.b32.xlu0 %v1032_v61, %s2695_s16  ;;  %1024 = vrot.lane.b32.xlu1 %v1019_v62, %s2695_s16  ;;  %v1088_v1 = vmul.f32 %v1087_v56, %v3044_v41  ;;  %v1089_v9 = vmul.f32 %v1087_v56, %v3062_v50 }
 0x154   : > { %v3090_v10 = vadd.f32 %v580_v3, %v532_v2  ;;  %v1075_v2 = vmul.f32 %v1073_v24, %v3062_v50  ;;  %v3174_v24 = vld [vmem:[#allocation2 + $0x22] sm:$0xff] }
 0x155   : > { %v529_v14 = vpop.permute.xlu1 %528  ;;  %v541_v15 = vpop.permute.xlu0 %540  ;;  %v1171_v49 = vmul.f32 %v1169_v25, %v3174_v24 }
 0x156   : > { %v533_v19 = vadd.f32 %v529_v14, %v477_v7  ;;  %v546_v20 = vadd.f32 %v541_v15, %v490_v8  ;;  %v1102_v8 = vmul.f32 %v1101_v4, %v3044_v41  ;;  %v1116_v14 = vmul.f32 %v1115_v11, %v3044_v41 }
 0x157   : > { %1050 = vrot.lane.b32.xlu0 %v1046_v16, %s2695_s16  ;;  %1038 = vrot.lane.b32.xlu1 %v1033_v17, %s2695_s16  ;;  %v1103_v15 = vmul.f32 %v1101_v4, %v3062_v50  ;;  %v3161_v16 = vld [vmem:[#allocation2 + $0x1a] sm:$0xff]  ;;  %v1155_v17 = vstv %s3143_s26  ;;  %v735_v4 = vstv %s3192_s11  ;;  %s3289_s26 = sld [smem:[#allocation3 + $0x14]]  ;;  %s3372_s11 = sld [smem:[#allocation3 + $0x5e]] }
 0x158   : > { %v3104_v28 = vadd.f32 %v581_v21, %v533_v19  ;;  %v3106_v29 = vadd.f32 %v586_v23, %v546_v20  ;;  %v1156_v21 = vmul.f32 %v1155_v17, %v3161_v16  ;;  %v1117_v23 = vmul.f32 %v1115_v11, %v3062_v50 }
 0x159   : > { %v543_v32 = vpop.permute.xlu1 %542  ;;  %v555_v33 = vpop.permute.xlu0 %554 }
 0x15a   : > { %v547_v36 = vadd.f32 %v543_v32, %v491_v26  ;;  %v560_v39 = vadd.f32 %v555_v33, %v504_v27  ;;  %v717_v26 = vstv %s3157_s29  ;;  %v1170_v32 = vmul.f32 %v1169_v25, %v3161_v16  ;;  %s3305_s29 = sld [smem:[#allocation3 + $0x38]] }
 0x15b   : > { %1064 = vrot.lane.b32.xlu0 %v1060_v34, %s2695_s16  ;;  %1052 = vrot.lane.b32.xlu1 %v1047_v35, %s2695_s16  ;;  %v1157_v33 = vmul.f32 %v1155_v17, %v3174_v24  ;;  %v1183_v35 = vstv %s3164_s30  ;;  %s3321_s30 = sld [smem:[#allocation3 + $0x5c]] }
 0x15c   : > { %v3121_v43 = vadd.f32 %v587_v37, %v547_v36  ;;  %v3123_v47 = vadd.f32 %v592_v38, %v560_v39  ;;  %v718_v36 = vmul.f32 %v717_v26, %v2952_v44  ;;  %v723_v39 = vstv %s3168_s7  ;;  %s3337_s7 = sld [smem:[#allocation3 + $0x80]] }
 0x15d   : > { %v557_v51 = vpop.permute.xlu1 %556  ;;  %v569_v52 = vpop.permute.xlu0 %568 }
 0x15e   : > { %v561_v57 = vadd.f32 %v557_v51, %v505_v40  ;;  %v574_v60 = vadd.f32 %v569_v52, %v518_v42  ;;  %v1184_v42 = vmul.f32 %v1183_v35, %v3161_v16  ;;  %v1197_v51 = vstv %s3172_s8  ;;  %s3351_s8 = sld [smem:[#allocation3 + $0x16]] }
 0x15f   : > { %1078 = vrot.lane.b32.xlu0 %v1074_v53, %s2696_s22  ;;  %1066 = vrot.lane.b32.xlu1 %v1061_v55, %s2695_s16  ;;  %v719_v55 = vmul.f32 %v717_v26, %v2958_v48 }
 0x160   : > { %v3136_v61 = vadd.f32 %v593_v45, %v561_v57  ;;  %v3138_v62 = vadd.f32 %v598_v46, %v574_v60 }
 0x161   : > { %v571_v63 = vpop.permute.xlu1 %570  ;;  %v609_v0 = vpop.permute.xlu0 %608 }
 0x162   : > { %v575_v3 = vadd.f32 %v571_v63, %v519_v59  ;;  %v614_v27 = vadd.f32 %v609_v0, %v3090_v10  ;;  %v1198_v63 = vmul.f32 %v1197_v51, %v3161_v16  ;;  %v1185_v0 = vmul.f32 %v1183_v35, %v3174_v24 }
 0x163   : > { %1092 = vrot.lane.b32.xlu0 %v1088_v1, %s2696_s22  ;;  %1080 = vrot.lane.b32.xlu1 %v1075_v2, %s2696_s22  ;;  %v1211_v1 = vstv %s3185_s10  ;;  %s3365_s10 = sld [smem:[#allocation3 + $0xc]] }
 0x164   : > { %v3148_v58 = vadd.f32 %v599_v18, %v575_v3 }
 0x165   : > { %v611_v5 = vpop.permute.xlu1 %610  ;;  %v623_v7 = vpop.permute.xlu0 %622 }
 0x166   : > { %v615_v10 = vadd.f32 %v611_v5, %v3104_v28  ;;  %v628_v37 = vadd.f32 %v623_v7, %v3106_v29  ;;  %v724_v28 = vmul.f32 %v723_v39, %v2952_v44  ;;  %v729_v29 = vstv %s3180_s9  ;;  %s3361_s9 = sld [smem:[#allocation3 + $0x3a]] }
 0x167   : > { %1106 = vrot.lane.b32.xlu0 %v1102_v8, %s2696_s22  ;;  %1094 = vrot.lane.b32.xlu1 %v1089_v9, %s2696_s22 }
 0x169   : > { %v625_v22 = vpop.permute.xlu1 %624  ;;  %v637_v13 = vpop.permute.xlu0 %636 }
 0x16a   : > { %v629_v56 = vadd.f32 %v625_v22, %v3121_v43  ;;  %v642_v57 = vadd.f32 %v637_v13, %v3123_v47  ;;  %v725_v43 = vmul.f32 %v723_v39, %v2958_v48  ;;  %v730_v47 = vmul.f32 %v729_v29, %v2952_v44 }
 0x16b   : > { %1120 = vrot.lane.b32.xlu0 %v1116_v14, %s2696_s22  ;;  %1108 = vrot.lane.b32.xlu1 %v1103_v15, %s2696_s22  ;;  %v1212_v22 = vmul.f32 %v1211_v1, %v3161_v16  ;;  %v1199_v13 = vmul.f32 %v1197_v51, %v3174_v24  ;;  %v1225_v14 = vstv %s3201_s12  ;;  %s3376_s12 = sld [smem:[#allocation3 + $0x30]] }
 0x16c   : > { %v1226_v26 = vmul.f32 %v1225_v14, %v3161_v16  ;;  %v1227_v35 = vmul.f32 %v1225_v14, %v3174_v24 }
 0x16d   : > { %v639_v19 = vpop.permute.xlu1 %638  ;;  %v651_v20 = vpop.permute.xlu0 %650 }
 0x16e   : > { %v643_v18 = vadd.f32 %v639_v19, %v3136_v61  ;;  %v656_v5 = vadd.f32 %v651_v20, %v3138_v62  ;;  %v731_v61 = vmul.f32 %v729_v29, %v2958_v48  ;;  %v736_v62 = vmul.f32 %v735_v4, %v2952_v44 }
 0x16f   : > { %1160 = vrot.lane.b32.xlu0 %v1156_v21, %s2695_s16  ;;  %1122 = vrot.lane.b32.xlu1 %v1117_v23, %s2696_s22  ;;  %v737_v44 = vmul.f32 %v735_v4, %v2958_v48 }
 0x171   : > { %v653_v30 = vpop.permute.xlu1 %652  ;;  %v665_v31 = vpop.permute.xlu0 %664 }
 0x172   : > { %v670_v34 = vadd.f32 %v665_v31, %v614_v27  ;;  %v657_v19 = vadd.f32 %v653_v30, %v3148_v58  ;;  %v1213_v27 = vmul.f32 %v1211_v1, %v3174_v24 }
 0x173   : > { %1174 = vrot.lane.b32.xlu0 %v1170_v32, %s2695_s16  ;;  %1162 = vrot.lane.b32.xlu1 %v1157_v33, %s2695_s16  ;;  %v1239_v32 = vstv %s3217_s13  ;;  %s3380_s13 = sld [smem:[#allocation3 + $0x82]] }
 0x174   : > { %v3196_v38 = vadd.f32 %v718_v36, %v670_v34  ;;  %v1240_v34 = vmul.f32 %v1239_v32, %v3161_v16  ;;  %v1253_v36 = vstv %s3233_s14  ;;  %s3388_s14 = sld [smem:[#allocation3 + $0x54]] }
 0x175   : > { %v667_v54 = vpop.permute.xlu1 %666  ;;  %v679_v40 = vpop.permute.xlu0 %678  ;;  %v1255_v51 = vmul.f32 %v1253_v36, %v3174_v24 }
 0x176   : > { %v671_v52 = vadd.f32 %v667_v54, %v615_v10  ;;  %v684_v53 = vadd.f32 %v679_v40, %v628_v37  ;;  %v1241_v10 = vmul.f32 %v1239_v32, %v3174_v24  ;;  %v1254_v37 = vmul.f32 %v1253_v36, %v3161_v16  ;;  %v3265_v54 = vld [vmem:[#allocation2 + $0x30] sm:$0xff] }
 0x177   : > { %1188 = vrot.lane.b32.xlu0 %v1184_v42, %s2695_s16  ;;  %1176 = vrot.lane.b32.xlu1 %v1171_v49, %s2695_s16  ;;  %v1293_v40 = vstv %s3247_s15  ;;  %v873_v32 = vstv %s3296_s28  ;;  %s3393_s15 = sld [smem:[#allocation3 + $0x17]]  ;;  %s3476_s28 = sld [smem:[#allocation3 + $0x61]] }
 0x178   : > { %v3210_v60 = vadd.f32 %v719_v55, %v671_v52  ;;  %v3212_v45 = vadd.f32 %v724_v28, %v684_v53  ;;  %v1294_v52 = vmul.f32 %v1293_v40, %v3265_v54  ;;  %v3278_v53 = vld [vmem:[#allocation2 + $0x38] sm:$0xff]  ;;  %v1307_v55 = vstv %s3257_s17  ;;  %s3400_s17 = sld [smem:[#allocation3 + $0x78]] }
 0x179   : > { %v681_v46 = vpop.permute.xlu1 %680  ;;  %v693_v59 = vpop.permute.xlu0 %692  ;;  %v855_v28 = vstv %s3261_s18  ;;  %s3409_s18 = sld [smem:[#allocation3 + $0x3b]] }
 0x17a   : > { %v685_v2 = vadd.f32 %v681_v46, %v629_v56  ;;  %v698_v3 = vadd.f32 %v693_v59, %v642_v57  ;;  %v1295_v46 = vmul.f32 %v1293_v40, %v3278_v53  ;;  %v1308_v59 = vmul.f32 %v1307_v55, %v3265_v54 }
 0x17b   : > { %1202 = vrot.lane.b32.xlu0 %v1198_v63, %s2695_s16  ;;  %1190 = vrot.lane.b32.xlu1 %v1185_v0, %s2695_s16  ;;  %v1321_v0 = vstv %s3268_s19  ;;  %v856_v1 = vmul.f32 %v855_v28, %v2986_v6  ;;  %s3425_s19 = sld [smem:[#allocation3 + $0x5f]] }
 0x17c   : > { %v3226_v7 = vadd.f32 %v725_v43, %v685_v2  ;;  %v3228_v8 = vadd.f32 %v730_v47, %v698_v3  ;;  %v861_v2 = vstv %s3272_s20  ;;  %s3441_s20 = sld [smem:[#allocation3 + $0x83]] }
 0x17d   : > { %v695_v9 = vpop.permute.xlu1 %694  ;;  %v707_v11 = vpop.permute.xlu0 %706 }
 0x17e   : > { %v699_v15 = vadd.f32 %v695_v9, %v643_v18  ;;  %v712_v17 = vadd.f32 %v707_v11, %v656_v5  ;;  %v1309_v18 = vmul.f32 %v1307_v55, %v3278_v53  ;;  %v1322_v5 = vmul.f32 %v1321_v0, %v3265_v54 }
 0x17f   : > { %1216 = vrot.lane.b32.xlu0 %v1212_v22, %s2696_s22  ;;  %1204 = vrot.lane.b32.xlu1 %v1199_v13, %s2695_s16  ;;  %v1335_v9 = vstv %s3276_s23  ;;  %v857_v13 = vmul.f32 %v855_v28, %v2994_v12  ;;  %s3455_s23 = sld [smem:[#allocation3 + $0x19]] }
 0x180   : > { %v3240_v20 = vadd.f32 %v731_v61, %v699_v15  ;;  %v3242_v21 = vadd.f32 %v736_v62, %v712_v17 }
 0x181   : > { %v709_v23 = vpop.permute.xlu1 %708  ;;  %v747_v25 = vpop.permute.xlu0 %746 }
 0x182   : > { %v713_v31 = vadd.f32 %v709_v23, %v657_v19  ;;  %v752_v29 = vadd.f32 %v747_v25, %v3196_v38  ;;  %v1323_v23 = vmul.f32 %v1321_v0, %v3278_v53  ;;  %v1336_v25 = vmul.f32 %v1335_v9, %v3265_v54 }
 0x183   : > { %1230 = vrot.lane.b32.xlu0 %v1226_v26, %s2696_s22  ;;  %1218 = vrot.lane.b32.xlu1 %v1213_v27, %s2696_s22  ;;  %v1349_v26 = vstv %s3289_s26  ;;  %s3469_s26 = sld [smem:[#allocation3 + $0xf]] }
 0x184   : > { %v3252_v58 = vadd.f32 %v737_v44, %v713_v31  ;;  %v1351_v28 = vmul.f32 %v1349_v26, %v3278_v53 }
 0x185   : > { %v749_v30 = vpop.permute.xlu1 %748  ;;  %v761_v33 = vpop.permute.xlu0 %760 }
 0x186   : > { %v753_v38 = vadd.f32 %v749_v30, %v3210_v60  ;;  %v766_v3 = vadd.f32 %v761_v33, %v3212_v45  ;;  %v862_v60 = vmul.f32 %v861_v2, %v2986_v6  ;;  %v867_v45 = vstv %s3284_s24  ;;  %s3465_s24 = sld [smem:[#allocation3 + $0x3d]] }
 0x187   : > { %1244 = vrot.lane.b32.xlu0 %v1240_v34, %s2696_s22  ;;  %1232 = vrot.lane.b32.xlu1 %v1227_v35, %s2696_s22 }
 0x189   : > { %v763_v48 = vpop.permute.xlu1 %762  ;;  %v775_v39 = vpop.permute.xlu0 %774 }
 0x18a   : > { %v767_v14 = vadd.f32 %v763_v48, %v3226_v7  ;;  %v780_v15 = vadd.f32 %v775_v39, %v3228_v8  ;;  %v863_v7 = vmul.f32 %v861_v2, %v2994_v12  ;;  %v868_v8 = vmul.f32 %v867_v45, %v2986_v6 }
 0x18b   : > { %1246 = vrot.lane.b32.xlu1 %v1241_v10, %s2696_s22  ;;  %1258 = vrot.lane.b32.xlu0 %v1254_v37, %s2696_s22  ;;  %v1337_v48 = vmul.f32 %v1335_v9, %v3278_v53  ;;  %v1350_v39 = vmul.f32 %v1349_v26, %v3265_v54  ;;  %v1363_v10 = vstv %s3305_s29  ;;  %s3480_s29 = sld [smem:[#allocation3 + $0x33]] }
 0x18d   : > { %v777_v42 = vpop.permute.xlu1 %776  ;;  %v789_v49 = vpop.permute.xlu0 %788 }
 0x18e   : > { %v781_v44 = vadd.f32 %v777_v42, %v3240_v20  ;;  %v794_v30 = vadd.f32 %v789_v49, %v3242_v21  ;;  %v869_v20 = vmul.f32 %v867_v45, %v2994_v12  ;;  %v874_v21 = vmul.f32 %v873_v32, %v2986_v6 }
 0x18f   : > { %1260 = vrot.lane.b32.xlu1 %v1255_v51, %s2696_s22  ;;  %1298 = vrot.lane.b32.xlu0 %v1294_v52, %s2695_s16  ;;  %v875_v6 = vmul.f32 %v873_v32, %v2994_v12 }
 0x191   : > { %v791_v56 = vpop.permute.xlu1 %790  ;;  %v803_v57 = vpop.permute.xlu0 %802 }
 0x192   : > { %v808_v63 = vadd.f32 %v803_v57, %v752_v29  ;;  %v795_v42 = vadd.f32 %v791_v56, %v3252_v58  ;;  %v1364_v29 = vmul.f32 %v1363_v10, %v3265_v54 }
 0x193   : > { %1300 = vrot.lane.b32.xlu1 %v1295_v46, %s2695_s16  ;;  %1312 = vrot.lane.b32.xlu0 %v1308_v59, %s2695_s16  ;;  %v1377_v46 = vstv %s3321_s30  ;;  %s3484_s30 = sld [smem:[#allocation3 + $0x85]] }
 0x194   : > { %v3300_v43 = vadd.f32 %v856_v1, %v808_v63  ;;  %v1365_v63 = vmul.f32 %v1363_v10, %v3278_v53  ;;  %v1378_v0 = vmul.f32 %v1377_v46, %v3265_v54  ;;  %v1391_v1 = vstv %s3337_s7  ;;  %s3492_s7 = sld [smem:[#allocation3 + $0x57]] }
 0x195   : > { %v805_v47 = vpop.permute.xlu1 %804  ;;  %v817_v4 = vpop.permute.xlu0 %816  ;;  %v1393_v9 = vmul.f32 %v1391_v1, %v3278_v53 }
 0x196   : > { %v809_v11 = vadd.f32 %v805_v47, %v753_v38  ;;  %v822_v22 = vadd.f32 %v817_v4, %v766_v3  ;;  %v1379_v38 = vmul.f32 %v1377_v46, %v3278_v53  ;;  %v1392_v3 = vmul.f32 %v1391_v1, %v3265_v54  ;;  %v3369_v47 = vld [vmem:[#allocation2 + $0x31] sm:$0xff] }
 0x197   : > { %1314 = vrot.lane.b32.xlu1 %v1309_v18, %s2695_s16  ;;  %1326 = vrot.lane.b32.xlu0 %v1322_v5, %s2695_s16  ;;  %v1431_v4 = vstv %s3351_s8  ;;  %v1011_v46 = vstv %s3400_s17  ;;  %s3497_s8 = sld [smem:[#allocation3 + $0x1a]]  ;;  %s3580_s17 = sld [smem:[#allocation3 + $0x64]] }
 0x198   : > { %v3314_v17 = vadd.f32 %v857_v13, %v809_v11  ;;  %v3316_v61 = vadd.f32 %v862_v60, %v822_v22  ;;  %v1432_v11 = vmul.f32 %v1431_v4, %v3369_v47  ;;  %v3382_v22 = vld [vmem:[#allocation2 + $0x39] sm:$0xff]  ;;  %v1445_v13 = vstv %s3361_s9  ;;  %s3504_s9 = sld [smem:[#allocation3 + $0x7b]] }
 0x199   : > { %v819_v62 = vpop.permute.xlu1 %818  ;;  %v831_v19 = vpop.permute.xlu0 %830  ;;  %v993_v60 = vstv %s3365_s10  ;;  %s3513_s10 = sld [smem:[#allocation3 + $0x3e]] }
 0x19a   : > { %v823_v27 = vadd.f32 %v819_v62, %v767_v14  ;;  %v836_v31 = vadd.f32 %v831_v19, %v780_v15  ;;  %v1433_v62 = vmul.f32 %v1431_v4, %v3382_v22  ;;  %v1446_v19 = vmul.f32 %v1445_v13, %v3369_v47 }
 0x19b   : > { %1328 = vrot.lane.b32.xlu1 %v1323_v23, %s2695_s16  ;;  %1340 = vrot.lane.b32.xlu0 %v1336_v25, %s2695_s16  ;;  %v1459_v25 = vstv %s3372_s11  ;;  %v994_v26 = vmul.f32 %v993_v60, %v3044_v41  ;;  %s3529_s11 = sld [smem:[#allocation3 + $0x62]] }
 0x19c   : > { %v3330_v33 = vadd.f32 %v863_v7, %v823_v27  ;;  %v3332_v34 = vadd.f32 %v868_v8, %v836_v31  ;;  %v999_v27 = vstv %s3376_s12  ;;  %s3545_s12 = sld [smem:[#allocation3 + $0x86]] }
 0x19d   : > { %v833_v35 = vpop.permute.xlu1 %832  ;;  %v845_v36 = vpop.permute.xlu0 %844 }
 0x19e   : > { %v837_v37 = vadd.f32 %v833_v35, %v781_v44  ;;  %v850_v40 = vadd.f32 %v845_v36, %v794_v30  ;;  %v1447_v44 = vmul.f32 %v1445_v13, %v3382_v22  ;;  %v1460_v30 = vmul.f32 %v1459_v25, %v3369_v47 }
 0x19f   : > { %1342 = vrot.lane.b32.xlu1 %v1337_v48, %s2695_s16  ;;  %1354 = vrot.lane.b32.xlu0 %v1350_v39, %s2696_s22  ;;  %v1473_v35 = vstv %s3380_s13  ;;  %v995_v39 = vmul.f32 %v993_v60, %v3062_v50  ;;  %s3559_s13 = sld [smem:[#allocation3 + $0x1c]] }
 0x1a0   : > { %v3344_v49 = vadd.f32 %v869_v20, %v837_v37  ;;  %v3346_v51 = vadd.f32 %v874_v21, %v850_v40 }
 0x1a1   : > { %v847_v52 = vpop.permute.xlu1 %846  ;;  %v885_v55 = vpop.permute.xlu0 %884 }
 0x1a2   : > { %v851_v57 = vadd.f32 %v847_v52, %v795_v42  ;;  %v890_v45 = vadd.f32 %v885_v55, %v3300_v43  ;;  %v1461_v52 = vmul.f32 %v1459_v25, %v3382_v22  ;;  %v1474_v55 = vmul.f32 %v1473_v35, %v3369_v47 }
 0x1a3   : > { %1356 = vrot.lane.b32.xlu1 %v1351_v28, %s2696_s22  ;;  %1368 = vrot.lane.b32.xlu0 %v1364_v29, %s2696_s22  ;;  %v1487_v28 = vstv %s3393_s15  ;;  %s3573_s15 = sld [smem:[#allocation3 + $0x12]] }
 0x1a4   : > { %v3356_v58 = vadd.f32 %v875_v6, %v851_v57  ;;  %v1489_v60 = vmul.f32 %v1487_v28, %v3382_v22 }
 0x1a5   : > { %v887_v56 = vpop.permute.xlu1 %886  ;;  %v899_v59 = vpop.permute.xlu0 %898 }
 0x1a6   : > { %v891_v43 = vadd.f32 %v887_v56, %v3314_v17  ;;  %v904_v31 = vadd.f32 %v899_v59, %v3316_v61  ;;  %v1000_v17 = vmul.f32 %v999_v27, %v3044_v41  ;;  %v1005_v61 = vstv %s3388_s14  ;;  %s3569_s14 = sld [smem:[#allocation3 + $0x40]] }
 0x1a7   : > { %1370 = vrot.lane.b32.xlu1 %v1365_v63, %s2696_s22  ;;  %1382 = vrot.lane.b32.xlu0 %v1378_v0, %s2696_s22 }
 0x1a9   : > { %v901_v12 = vpop.permute.xlu1 %900  ;;  %v913_v2 = vpop.permute.xlu0 %912 }
 0x1aa   : > { %v905_v10 = vadd.f32 %v901_v12, %v3330_v33  ;;  %v918_v37 = vadd.f32 %v913_v2, %v3332_v34  ;;  %v1001_v33 = vmul.f32 %v999_v27, %v3062_v50  ;;  %v1006_v34 = vmul.f32 %v1005_v61, %v3044_v41 }
 0x1ab   : > { %1384 = vrot.lane.b32.xlu1 %v1379_v38, %s2696_s22  ;;  %1396 = vrot.lane.b32.xlu0 %v1392_v3, %s2696_s22  ;;  %v1475_v12 = vmul.f32 %v1473_v35, %v3382_v22  ;;  %v1488_v2 = vmul.f32 %v1487_v28, %v3369_v47  ;;  %v1501_v38 = vstv %s3409_s18  ;;  %s3584_s18 = sld [smem:[#allocation3 + $0x36]] }
 0x1ad   : > { %v915_v18 = vpop.permute.xlu1 %914  ;;  %v927_v5 = vpop.permute.xlu0 %926 }
 0x1ae   : > { %v919_v6 = vadd.f32 %v915_v18, %v3344_v49  ;;  %v932_v56 = vadd.f32 %v927_v5, %v3346_v51  ;;  %v1007_v49 = vmul.f32 %v1005_v61, %v3062_v50  ;;  %v1012_v51 = vmul.f32 %v1011_v46, %v3044_v41 }
 0x1af   : > { %1398 = vrot.lane.b32.xlu1 %v1393_v9, %s2696_s22  ;;  %1436 = vrot.lane.b32.xlu0 %v1432_v11, %s2695_s16  ;;  %v1013_v41 = vmul.f32 %v1011_v46, %v3062_v50 }
 0x1b1   : > { %v929_v14 = vpop.permute.xlu1 %928  ;;  %v941_v15 = vpop.permute.xlu0 %940 }
 0x1b2   : > { %v946_v23 = vadd.f32 %v941_v15, %v890_v45  ;;  %v933_v18 = vadd.f32 %v929_v14, %v3356_v58  ;;  %v1502_v45 = vmul.f32 %v1501_v38, %v3369_v47 }
 0x1b3   : > { %1438 = vrot.lane.b32.xlu1 %v1433_v62, %s2695_s16  ;;  %1450 = vrot.lane.b32.xlu0 %v1446_v19, %s2695_s16  ;;  %v1515_v62 = vstv %s3425_s19  ;;  %s3588_s19 = sld [smem:[#allocation3 + $0x88]] }
 0x1b4   : > { %v3404_v7 = vadd.f32 %v994_v26, %v946_v23  ;;  %v1503_v23 = vmul.f32 %v1501_v38, %v3382_v22  ;;  %v1516_v25 = vmul.f32 %v1515_v62, %v3369_v47  ;;  %v1529_v26 = vstv %s3441_s20  ;;  %s3596_s20 = sld [smem:[#allocation3 + $0x5a]] }
 0x1b5   : > { %v943_v8 = vpop.permute.xlu1 %942  ;;  %v955_v32 = vpop.permute.xlu0 %954  ;;  %v1531_v35 = vmul.f32 %v1529_v26, %v3382_v22 }
 0x1b6   : > { %v947_v36 = vadd.f32 %v943_v8, %v891_v43  ;;  %v960_v48 = vadd.f32 %v955_v32, %v904_v31  ;;  %v1517_v43 = vmul.f32 %v1515_v62, %v3382_v22  ;;  %v1530_v31 = vmul.f32 %v1529_v26, %v3369_v47  ;;  %v3473_v8 = vld [vmem:[#allocation2 + $0x32] sm:$0xff] }
 0x1b7   : > { %1452 = vrot.lane.b32.xlu1 %v1447_v44, %s2695_s16  ;;  %1464 = vrot.lane.b32.xlu0 %v1460_v30, %s2695_s16  ;;  %v1569_v32 = vstv %s3455_s23  ;;  %v1149_v62 = vstv %s3504_s9  ;;  %s3601_s23 = sld [smem:[#allocation3 + $0x1d]]  ;;  %s3684_s9 = sld [smem:[#allocation3 + $0x67]] }
 0x1b8   : > { %v3418_v40 = vadd.f32 %v995_v39, %v947_v36  ;;  %v3420_v20 = vadd.f32 %v1000_v17, %v960_v48  ;;  %v1570_v36 = vmul.f32 %v1569_v32, %v3473_v8  ;;  %v3486_v48 = vld [vmem:[#allocation2 + $0x3a] sm:$0xff]  ;;  %v1583_v39 = vstv %s3465_s24  ;;  %s3608_s24 = sld [smem:[#allocation3 + $0x7e]] }
 0x1b9   : > { %v957_v21 = vpop.permute.xlu1 %956  ;;  %v969_v42 = vpop.permute.xlu0 %968  ;;  %v1131_v17 = vstv %s3469_s26  ;;  %s3617_s26 = sld [smem:[#allocation3 + $0x41]] }
 0x1ba   : > { %v961_v29 = vadd.f32 %v957_v21, %v905_v10  ;;  %v974_v57 = vadd.f32 %v969_v42, %v918_v37  ;;  %v1571_v21 = vmul.f32 %v1569_v32, %v3486_v48  ;;  %v1584_v42 = vmul.f32 %v1583_v39, %v3473_v8 }
 0x1bb   : > { %1466 = vrot.lane.b32.xlu1 %v1461_v52, %s2695_s16  ;;  %1478 = vrot.lane.b32.xlu0 %v1474_v55, %s2695_s16  ;;  %v1597_v55 = vstv %s3476_s28  ;;  %v1132_v28 = vmul.f32 %v1131_v17, %v3161_v16  ;;  %s3633_s28 = sld [smem:[#allocation3 + $0x65]] }
 0x1bc   : > { %v3434_v59 = vadd.f32 %v1001_v33, %v961_v29  ;;  %v3436_v63 = vadd.f32 %v1006_v34, %v974_v57  ;;  %v1137_v29 = vstv %s3480_s29  ;;  %s3649_s29 = sld [smem:[#allocation3 + $0x89]] }
 0x1bd   : > { %v971_v0 = vpop.permute.xlu1 %970  ;;  %v983_v1 = vpop.permute.xlu0 %982 }
 0x1be   : > { %v975_v3 = vadd.f32 %v971_v0, %v919_v6  ;;  %v988_v4 = vadd.f32 %v983_v1, %v932_v56  ;;  %v1585_v6 = vmul.f32 %v1583_v39, %v3486_v48  ;;  %v1598_v56 = vmul.f32 %v1597_v55, %v3473_v8 }
 0x1bf   : > { %1480 = vrot.lane.b32.xlu1 %v1475_v12, %s2695_s16  ;;  %1492 = vrot.lane.b32.xlu0 %v1488_v2, %s2696_s22  ;;  %v1611_v0 = vstv %s3484_s30  ;;  %v1133_v2 = vmul.f32 %v1131_v17, %v3174_v24  ;;  %s3663_s30 = sld [smem:[#allocation3 + $0x1f]] }
 0x1c0   : > { %v3448_v5 = vadd.f32 %v1007_v49, %v975_v3  ;;  %v3450_v9 = vadd.f32 %v1012_v51, %v988_v4 }
 0x1c1   : > { %v985_v11 = vpop.permute.xlu1 %984  ;;  %v1023_v13 = vpop.permute.xlu0 %1022 }
 0x1c2   : > { %v989_v15 = vadd.f32 %v985_v11, %v933_v18  ;;  %v1028_v61 = vadd.f32 %v1023_v13, %v3404_v7  ;;  %v1599_v11 = vmul.f32 %v1597_v55, %v3486_v48  ;;  %v1612_v13 = vmul.f32 %v1611_v0, %v3473_v8 }
 0x1c3   : > { %1494 = vrot.lane.b32.xlu1 %v1489_v60, %s2696_s22  ;;  %1506 = vrot.lane.b32.xlu0 %v1502_v45, %s2696_s22  ;;  %v1625_v60 = vstv %s3497_s8  ;;  %s3677_s8 = sld [smem:[#allocation3 + $0x15]] }
 0x1c4   : > { %v3460_v58 = vadd.f32 %v1013_v41, %v989_v15  ;;  %v1627_v17 = vmul.f32 %v1625_v60, %v3486_v48 }
 0x1c5   : > { %v1025_v14 = vpop.permute.xlu1 %1024  ;;  %v1037_v19 = vpop.permute.xlu0 %1036 }
 0x1c6   : > { %v1029_v7 = vadd.f32 %v1025_v14, %v3418_v40  ;;  %v1042_v57 = vadd.f32 %v1037_v19, %v3420_v20  ;;  %v1138_v40 = vmul.f32 %v1137_v29, %v3161_v16  ;;  %v1143_v20 = vstv %s3492_s7  ;;  %s3673_s7 = sld [smem:[#allocation3 + $0x43]] }
 0x1c7   : > { %1508 = vrot.lane.b32.xlu1 %v1503_v23, %s2696_s22  ;;  %1520 = vrot.lane.b32.xlu0 %v1516_v25, %s2696_s22 }
 0x1c9   : > { %v1039_v50 = vpop.permute.xlu1 %1038  ;;  %v1051_v27 = vpop.permute.xlu0 %1050 }
 0x1ca   : > { %v1043_v38 = vadd.f32 %v1039_v50, %v3434_v59  ;;  %v1056_v3 = vadd.f32 %v1051_v27, %v3436_v63  ;;  %v1139_v59 = vmul.f32 %v1137_v29, %v3174_v24  ;;  %v1144_v63 = vmul.f32 %v1143_v20, %v3161_v16 }
 0x1cb   : > { %1522 = vrot.lane.b32.xlu1 %v1517_v43, %s2696_s22  ;;  %1534 = vrot.lane.b32.xlu0 %v1530_v31, %s2696_s22  ;;  %v1613_v50 = vmul.f32 %v1611_v0, %v3486_v48  ;;  %v1626_v27 = vmul.f32 %v1625_v60, %v3473_v8  ;;  %v1639_v43 = vstv %s3513_s10  ;;  %s3688_s10 = sld [smem:[#allocation3 + $0x39]] }
 0x1cd   : > { %v1053_v44 = vpop.permute.xlu1 %1052  ;;  %v1065_v30 = vpop.permute.xlu0 %1064 }
 0x1ce   : > { %v1057_v41 = vadd.f32 %v1053_v44, %v3448_v5  ;;  %v1070_v14 = vadd.f32 %v1065_v30, %v3450_v9  ;;  %v1145_v5 = vmul.f32 %v1143_v20, %v3174_v24  ;;  %v1150_v9 = vmul.f32 %v1149_v62, %v3161_v16 }
 0x1cf   : > { %1536 = vrot.lane.b32.xlu1 %v1531_v35, %s2696_s22  ;;  %1574 = vrot.lane.b32.xlu0 %v1570_v36, %s2695_s16  ;;  %v1151_v16 = vmul.f32 %v1149_v62, %v3174_v24 }
 0x1d1   : > { %v1067_v10 = vpop.permute.xlu1 %1066  ;;  %v1079_v37 = vpop.permute.xlu0 %1078 }
 0x1d2   : > { %v1084_v52 = vadd.f32 %v1079_v37, %v1028_v61  ;;  %v1071_v44 = vadd.f32 %v1067_v10, %v3460_v58  ;;  %v1640_v61 = vmul.f32 %v1639_v43, %v3473_v8 }
 0x1d3   : > { %1576 = vrot.lane.b32.xlu1 %v1571_v21, %s2695_s16  ;;  %1588 = vrot.lane.b32.xlu0 %v1584_v42, %s2695_s16  ;;  %v1653_v21 = vstv %s3529_s11  ;;  %s3692_s11 = sld [smem:[#allocation3 + $0x8b]] }
 0x1d4   : > { %v3508_v33 = vadd.f32 %v1132_v28, %v1084_v52  ;;  %v1641_v52 = vmul.f32 %v1639_v43, %v3486_v48  ;;  %v1654_v55 = vmul.f32 %v1653_v21, %v3473_v8  ;;  %v1667_v28 = vstv %s3545_s12  ;;  %s3700_s12 = sld [smem:[#allocation3 + $0x5d]] }
 0x1d5   : > { %v1081_v34 = vpop.permute.xlu1 %1080  ;;  %v1093_v46 = vpop.permute.xlu0 %1092  ;;  %v1669_v0 = vmul.f32 %v1667_v28, %v3486_v48 }
 0x1d6   : > { %v1085_v1 = vadd.f32 %v1081_v34, %v1029_v7  ;;  %v1098_v12 = vadd.f32 %v1093_v46, %v1042_v57  ;;  %v1655_v7 = vmul.f32 %v1653_v21, %v3486_v48  ;;  %v1668_v57 = vmul.f32 %v1667_v28, %v3473_v8  ;;  %v3577_v34 = vld [vmem:[#allocation2 + $0x48] sm:$0xff] }
 0x1d7   : > { %1590 = vrot.lane.b32.xlu1 %v1585_v6, %s2695_s16  ;;  %1602 = vrot.lane.b32.xlu0 %v1598_v56, %s2695_s16  ;;  %v1707_v46 = vstv %s3559_s13  ;;  %v1287_v21 = vstv %s3608_s24  ;;  %s3705_s13 = sld [smem:[#allocation3 + $0x20]]  ;;  %s3772_s24 = sld [smem:[#allocation3 + $0x6a]] }
 0x1d8   : > { %v3522_v4 = vadd.f32 %v1133_v2, %v1085_v1  ;;  %v3524_v49 = vadd.f32 %v1138_v40, %v1098_v12  ;;  %v1708_v1 = vmul.f32 %v1707_v46, %v3577_v34  ;;  %v3590_v12 = vld [vmem:[#allocation2 + $0x50] sm:$0xff]  ;;  %v1721_v2 = vstv %s3569_s14  ;;  %s3712_s14 = sld [smem:[#allocation3 + $0x81]] }
 0x1d9   : > { %v1095_v51 = vpop.permute.xlu1 %1094  ;;  %v1107_v18 = vpop.permute.xlu0 %1106  ;;  %v1269_v40 = vstv %s3573_s15  ;;  %s3719_s15 = sld [smem:[#allocation3 + $0x44]] }
 0x1da   : > { %v1099_v45 = vadd.f32 %v1095_v51, %v1043_v38  ;;  %v1112_v15 = vadd.f32 %v1107_v18, %v1056_v3  ;;  %v1709_v51 = vmul.f32 %v1707_v46, %v3590_v12  ;;  %v1722_v18 = vmul.f32 %v1721_v2, %v3577_v34 }
 0x1db   : > { %1604 = vrot.lane.b32.xlu1 %v1599_v11, %s2695_s16  ;;  %1616 = vrot.lane.b32.xlu0 %v1612_v13, %s2695_s16  ;;  %v1735_v13 = vstv %s3580_s17  ;;  %v1270_v60 = vmul.f32 %v1269_v40, %v3265_v54  ;;  %s3731_s17 = sld [smem:[#allocation3 + $0x68]] }
 0x1dc   : > { %v3538_v19 = vadd.f32 %v1139_v59, %v1099_v45  ;;  %v3540_v23 = vadd.f32 %v1144_v63, %v1112_v15  ;;  %v1275_v45 = vstv %s3584_s18  ;;  %s3743_s18 = sld [smem:[#allocation3 + $0x8c]] }
 0x1dd   : > { %v1109_v25 = vpop.permute.xlu1 %1108  ;;  %v1121_v26 = vpop.permute.xlu0 %1120 }
 0x1de   : > { %v1113_v31 = vadd.f32 %v1109_v25, %v1057_v41  ;;  %v1126_v32 = vadd.f32 %v1121_v26, %v1070_v14  ;;  %v1723_v41 = vmul.f32 %v1721_v2, %v3590_v12  ;;  %v1736_v14 = vmul.f32 %v1735_v13, %v3577_v34 }
 0x1df   : > { %1618 = vrot.lane.b32.xlu1 %v1613_v50, %s2695_s16  ;;  %1630 = vrot.lane.b32.xlu0 %v1626_v27, %s2696_s22  ;;  %v1749_v25 = vstv %s3588_s19  ;;  %v1271_v27 = vmul.f32 %v1269_v40, %v3278_v53  ;;  %s3753_s19 = sld [smem:[#allocation3 + $0x22]] }
 0x1e0   : > { %v3552_v30 = vadd.f32 %v1145_v5, %v1113_v31  ;;  %v3554_v35 = vadd.f32 %v1150_v9, %v1126_v32 }
 0x1e1   : > { %v1123_v36 = vpop.permute.xlu1 %1122  ;;  %v1161_v39 = vpop.permute.xlu0 %1160 }
 0x1e2   : > { %v1127_v37 = vadd.f32 %v1123_v36, %v1071_v44  ;;  %v1166_v20 = vadd.f32 %v1161_v39, %v3508_v33  ;;  %v1737_v36 = vmul.f32 %v1735_v13, %v3590_v12  ;;  %v1750_v39 = vmul.f32 %v1749_v25, %v3577_v34 }
 0x1e3   : > { %1632 = vrot.lane.b32.xlu1 %v1627_v17, %s2696_s22  ;;  %1644 = vrot.lane.b32.xlu0 %v1640_v61, %s2696_s22  ;;  %v1763_v17 = vstv %s3601_s23  ;;  %s3765_s23 = sld [smem:[#allocation3 + $0x18]] }
 0x1e4   : > { %v3564_v58 = vadd.f32 %v1151_v16, %v1127_v37  ;;  %v1765_v40 = vmul.f32 %v1763_v17, %v3590_v12 }
 0x1e5   : > { %v1163_v10 = vpop.permute.xlu1 %1162  ;;  %v1175_v42 = vpop.permute.xlu0 %1174 }
 0x1e6   : > { %v1167_v33 = vadd.f32 %v1163_v10, %v3522_v4  ;;  %v1180_v15 = vadd.f32 %v1175_v42, %v3524_v49  ;;  %v1276_v4 = vmul.f32 %v1275_v45, %v3265_v54  ;;  %v1281_v49 = vstv %s3596_s20  ;;  %s3761_s20 = sld [smem:[#allocation3 + $0x46]] }
 0x1e7   : > { %1646 = vrot.lane.b32.xlu1 %v1641_v52, %s2696_s22  ;;  %1658 = vrot.lane.b32.xlu0 %v1654_v55, %s2696_s22 }
 0x1e9   : > { %v1177_v24 = vpop.permute.xlu1 %1176  ;;  %v1189_v29 = vpop.permute.xlu0 %1188 }
 0x1ea   : > { %v1181_v43 = vadd.f32 %v1177_v24, %v3538_v19  ;;  %v1194_v31 = vadd.f32 %v1189_v29, %v3540_v23  ;;  %v1277_v19 = vmul.f32 %v1275_v45, %v3278_v53  ;;  %v1282_v23 = vmul.f32 %v1281_v49, %v3265_v54 }
 0x1eb   : > { %1660 = vrot.lane.b32.xlu1 %v1655_v7, %s2696_s22  ;;  %1672 = vrot.lane.b32.xlu0 %v1668_v57, %s2696_s22  ;;  %v1751_v24 = vmul.f32 %v1749_v25, %v3590_v12  ;;  %v1764_v29 = vmul.f32 %v1763_v17, %v3577_v34  ;;  %v1777_v7 = vstv %s3617_s26  ;;  %s3776_s26 = sld [smem:[#allocation3 + $0x3c]] }
 0x1ed   : > { %v1191_v6 = vpop.permute.xlu1 %1190  ;;  %v1203_v56 = vpop.permute.xlu0 %1202 }
 0x1ee   : > { %v1195_v16 = vadd.f32 %v1191_v6, %v3552_v30  ;;  %v1208_v10 = vadd.f32 %v1203_v56, %v3554_v35  ;;  %v1283_v30 = vmul.f32 %v1281_v49, %v3278_v53  ;;  %v1288_v35 = vmul.f32 %v1287_v21, %v3265_v54 }
 0x1ef   : > { %1674 = vrot.lane.b32.xlu1 %v1669_v0, %s2696_s22  ;;  %1712 = vrot.lane.b32.xlu0 %v1708_v1, %s2695_s16  ;;  %v1289_v54 = vmul.f32 %v1287_v21, %v3278_v53 }
 0x1f1   : > { %v1205_v38 = vpop.permute.xlu1 %1204  ;;  %v1217_v3 = vpop.permute.xlu0 %1216 }
 0x1f2   : > { %v1222_v11 = vadd.f32 %v1217_v3, %v1166_v20  ;;  %v1209_v6 = vadd.f32 %v1205_v38, %v3564_v58  ;;  %v1778_v20 = vmul.f32 %v1777_v7, %v3577_v34 }
 0x1f3   : > { %1714 = vrot.lane.b32.xlu1 %v1709_v51, %s2695_s16  ;;  %1726 = vrot.lane.b32.xlu0 %v1722_v18, %s2695_s16  ;;  %v1791_v51 = vstv %s3633_s28  ;;  %s3780_s28 = sld [smem:[#allocation3 + $0x8e]] }
 0x1f4   : > { %v3612_v59 = vadd.f32 %v1270_v60, %v1222_v11  ;;  %v1779_v11 = vmul.f32 %v1777_v7, %v3590_v12  ;;  %v1792_v13 = vmul.f32 %v1791_v51, %v3577_v34  ;;  %v1805_v60 = vstv %s3649_s29  ;;  %s3788_s29 = sld [smem:[#allocation3 + $0x60]] }
 0x1f5   : > { %v1219_v63 = vpop.permute.xlu1 %1218  ;;  %v1231_v62 = vpop.permute.xlu0 %1230  ;;  %v1807_v25 = vmul.f32 %v1805_v60, %v3590_v12 }
 0x1f6   : > { %v1223_v26 = vadd.f32 %v1219_v63, %v1167_v33  ;;  %v1236_v50 = vadd.f32 %v1231_v62, %v1180_v15  ;;  %v1793_v33 = vmul.f32 %v1791_v51, %v3590_v12  ;;  %v1806_v15 = vmul.f32 %v1805_v60, %v3577_v34  ;;  %v3681_v63 = vld [vmem:[#allocation2 + $0x49] sm:$0xff] }
 0x1f7   : > { %1728 = vrot.lane.b32.xlu1 %v1723_v41, %s2695_s16  ;;  %1740 = vrot.lane.b32.xlu0 %v1736_v14, %s2695_s16  ;;  %v1845_v62 = vstv %s3663_s30  ;;  %s3792_s30 = sld [smem:[#allocation3 + $0x23]] }
 0x1f8   : > { %v3626_v32 = vadd.f32 %v1271_v27, %v1223_v26  ;;  %v3628_v5 = vadd.f32 %v1276_v4, %v1236_v50  ;;  %v1846_v26 = vmul.f32 %v1845_v62, %v3681_v63  ;;  %v3694_v50 = vld [vmem:[#allocation2 + $0x51] sm:$0xff]  ;;  %v1859_v27 = vstv %s3673_s7  ;;  %s3799_s7 = sld [smem:[#allocation3 + $0x84]] }
 0x1f9   : > { %v1233_v9 = vpop.permute.xlu1 %1232  ;;  %v1245_v44 = vpop.permute.xlu0 %1244  ;;  %v1407_v4 = vstv %s3677_s8  ;;  %s3804_s8 = sld [smem:[#allocation3 + $0x47]] }
 0x1fa   : > { %v1237_v61 = vadd.f32 %v1233_v9, %v1181_v43  ;;  %v1250_v37 = vadd.f32 %v1245_v44, %v1194_v31  ;;  %v1847_v9 = vmul.f32 %v1845_v62, %v3694_v50  ;;  %v1860_v44 = vmul.f32 %v1859_v27, %v3681_v63 }
 0x1fb   : > { %1742 = vrot.lane.b32.xlu1 %v1737_v36, %s2695_s16  ;;  %1754 = vrot.lane.b32.xlu0 %v1750_v39, %s2695_s16  ;;  %v1873_v39 = vstv %s3684_s9  ;;  %v1408_v17 = vmul.f32 %v1407_v4, %v3369_v47  ;;  %s3814_s9 = sld [smem:[#allocation3 + $0x6b]] }
 0x1fc   : > { %v3642_v42 = vadd.f32 %v1277_v19, %v1237_v61  ;;  %v3644_v52 = vadd.f32 %v1282_v23, %v1250_v37  ;;  %v1413_v61 = vstv %s3688_s10  ;;  %s3824_s10 = sld [smem:[#allocation3 + $0x8f]] }
 0x1fd   : > { %v1247_v55 = vpop.permute.xlu1 %1246  ;;  %v1259_v28 = vpop.permute.xlu0 %1258  ;;  %v1414_v7 = vmul.f32 %v1413_v61, %v3369_v47  ;;  %v1415_v51 = vmul.f32 %v1413_v61, %v3382_v22 }
 0x1fe   : > { %v1251_v57 = vadd.f32 %v1247_v55, %v1195_v16  ;;  %v1264_v46 = vadd.f32 %v1259_v28, %v1208_v10  ;;  %v1861_v16 = vmul.f32 %v1859_v27, %v3694_v50  ;;  %v1874_v10 = vmul.f32 %v1873_v39, %v3681_v63 }
 0x1ff   : > { %1756 = vrot.lane.b32.xlu1 %v1751_v24, %s2695_s16  ;;  %1768 = vrot.lane.b32.xlu0 %v1764_v29, %s2696_s22  ;;  %v1887_v55 = vstv %s3692_s11  ;;  %v1409_v29 = vmul.f32 %v1407_v4, %v3382_v22  ;;  %s2508_s11 = sld [smem:[#allocation3 + $0x3f]] }
 0x200   : > { %v3656_v56 = vadd.f32 %v1283_v30, %v1251_v57  ;;  %v3658_v0 = vadd.f32 %v1288_v35, %v1264_v46 }
 0x201   : > { %v1261_v1 = vpop.permute.xlu1 %1260  ;;  %v1299_v2 = vpop.permute.xlu0 %1298 }
 0x202   : > { %v1265_v3 = vadd.f32 %v1261_v1, %v1209_v6  ;;  %v1304_v49 = vadd.f32 %v1299_v2, %v3612_v59  ;;  %v1875_v1 = vmul.f32 %v1873_v39, %v3694_v50  ;;  %v1888_v2 = vmul.f32 %v1887_v55, %v3681_v63 }
 0x203   : > { %1770 = vrot.lane.b32.xlu1 %v1765_v40, %s2696_s22  ;;  %1782 = vrot.lane.b32.xlu0 %v1778_v20, %s2696_s22  ;;  %v1901_v40 = vstv %s3705_s13  ;;  %s3850_s13 = sld [smem:[#allocation3 + $0x87]] }
 0x204   : > { %v3668_v58 = vadd.f32 %v1289_v54, %v1265_v3  ;;  %v1903_v4 = vmul.f32 %v1901_v40, %v3694_v50 }
 0x205   : > { %v1301_v38 = vpop.permute.xlu1 %1300  ;;  %v1313_v18 = vpop.permute.xlu0 %1312 }
 0x206   : > { %v1305_v59 = vadd.f32 %v1301_v38, %v3626_v32  ;;  %v1318_v37 = vadd.f32 %v1313_v18, %v3628_v5  ;;  %v1419_v32 = vstv %s3700_s12  ;;  %s3847_s12 = sld [smem:[#allocation3 + $0x63]] }
 0x207   : > { %1784 = vrot.lane.b32.xlu1 %v1779_v11, %s2696_s22  ;;  %1796 = vrot.lane.b32.xlu0 %v1792_v13, %s2696_s22 }
 0x209   : > { %v1315_v53 = vpop.permute.xlu1 %1314  ;;  %v1327_v45 = vpop.permute.xlu0 %1326 }
 0x20a   : > { %v1319_v5 = vadd.f32 %v1315_v53, %v3642_v42  ;;  %v1332_v57 = vadd.f32 %v1327_v45, %v3644_v52  ;;  %v1420_v42 = vmul.f32 %v1419_v32, %v3369_v47  ;;  %v1425_v52 = vstv %s3712_s14  ;;  %s2520_s14 = sld [smem:[#allocation3 + $0x42]] }
 0x20b   : > { %1798 = vrot.lane.b32.xlu1 %v1793_v33, %s2696_s22  ;;  %1810 = vrot.lane.b32.xlu0 %v1806_v15, %s2696_s22  ;;  %v1889_v53 = vmul.f32 %v1887_v55, %v3694_v50  ;;  %v1902_v45 = vmul.f32 %v1901_v40, %v3681_v63  ;;  %v1915_v33 = vstv %s3719_s15  ;;  %s3861_s15 = sld [smem:[#allocation3 + $0x66]] }
 0x20c   : > { %v1917_v39 = vmul.f32 %v1915_v33, %v3694_v50 }
 0x20d   : > { %v1329_v41 = vpop.permute.xlu1 %1328  ;;  %v1341_v14 = vpop.permute.xlu0 %1340 }
 0x20e   : > { %v1333_v54 = vadd.f32 %v1329_v41, %v3656_v56  ;;  %v1346_v38 = vadd.f32 %v1341_v14, %v3658_v0  ;;  %v1426_v56 = vmul.f32 %v1425_v52, %v3369_v47  ;;  %v1427_v47 = vmul.f32 %v1425_v52, %v3382_v22 }
 0x20f   : > { %1812 = vrot.lane.b32.xlu1 %v1807_v25, %s2696_s22  ;;  %1850 = vrot.lane.b32.xlu0 %v1846_v26, %s2695_s16  ;;  %v1421_v25 = vmul.f32 %v1419_v32, %v3382_v22  ;;  %v1551_v52 = vstv %s3776_s26  ;;  %s3889_s26 = sld [smem:[#allocation5 + $0x1]] }
 0x211   : > { %v1343_v43 = vpop.permute.xlu1 %1342  ;;  %v1355_v31 = vpop.permute.xlu0 %1354 }
 0x212   : > { %v1360_v36 = vadd.f32 %v1355_v31, %v1304_v49  ;;  %v1347_v0 = vadd.f32 %v1343_v43, %v3668_v58  ;;  %v1916_v49 = vmul.f32 %v1915_v33, %v3681_v63 }
 0x213   : > { %1852 = vrot.lane.b32.xlu1 %v1847_v9, %s2695_s16  ;;  %1864 = vrot.lane.b32.xlu0 %v1860_v44, %s2695_s16  ;;  %v1929_v44 = vstv %s3731_s17  ;;  %s3864_s17 = sld [smem:[#allocation3 + $0x8a]] }
 0x214   : > { %v1410_v19 = vadd.f32 %v1408_v17, %v1360_v36  ;;  %v1930_v17 = vmul.f32 %v1929_v44, %v3681_v63 }
 0x215   : > { %v1357_v23 = vpop.permute.xlu1 %1356  ;;  %v1369_v21 = vpop.permute.xlu0 %1368 }
 0x216   : > { %v1361_v28 = vadd.f32 %v1357_v23, %v1305_v59  ;;  %v1374_v24 = vadd.f32 %v1369_v21, %v1318_v37  ;;  %v1943_v37 = vstv %s3743_s18  ;;  %v1931_v23 = vmul.f32 %v1929_v44, %v3694_v50  ;;  %s2531_s18 = sld [smem:[#allocation3 + $0x21]] }
 0x217   : > { %1866 = vrot.lane.b32.xlu1 %v1861_v16, %s2695_s16  ;;  %1878 = vrot.lane.b32.xlu0 %v1874_v10, %s2695_s16  ;;  %v1944_v21 = vmul.f32 %v1943_v37, %v3681_v63  ;;  %v3769_v16 = vld [vmem:[#allocation2 + $0x4a] sm:$0xff]  ;;  %v1563_v44 = vstv %s3799_s7  ;;  %s3898_s7 = scalar_lea.vmem %s3949_s5, %s2554_s27 }
 0x218   : > { %v1411_v46 = vadd.f32 %v1409_v29, %v1361_v28  ;;  %v1416_v30 = vadd.f32 %v1414_v7, %v1374_v24  ;;  %v1983_v28 = vstv %s3753_s19  ;;  %v1945_v7 = vmul.f32 %v1943_v37, %v3694_v50  ;;  %s2532_s19 = sld [smem:[#allocation3 + $0x45]] }
 0x219   : > { %v1371_v35 = vpop.permute.xlu1 %1370  ;;  %v1383_v6 = vpop.permute.xlu0 %1382  ;;  %v1984_v32 = vmul.f32 %v1983_v28, %v3769_v16 }
 0x21a   : > { %v1375_v20 = vadd.f32 %v1371_v35, %v1319_v5  ;;  %v1388_v3 = vadd.f32 %v1383_v6, %v1332_v57  ;;  %v3782_v5 = vld [vmem:[#allocation2 + $0x52] sm:$0xff]  ;;  %v1545_v35 = vstv %s3765_s23  ;;  %s3878_s23 = sld [smem:[#allocation3 + $0x8d]] }
 0x21b   : > { %1880 = vrot.lane.b32.xlu1 %v1875_v1, %s2695_s16  ;;  %1892 = vrot.lane.b32.xlu0 %v1888_v2, %s2695_s16  ;;  %v1985_v2 = vmul.f32 %v1983_v28, %v3782_v5  ;;  %v1547_v33 = vmul.f32 %v1545_v35, %v3486_v48 }
 0x21c   : > { %v1417_v18 = vadd.f32 %v1415_v51, %v1375_v20  ;;  %v1422_v11 = vadd.f32 %v1420_v42, %v1388_v3  ;;  %v2011_v51 = vstv %s3772_s24  ;;  %v1546_v42 = vmul.f32 %v1545_v35, %v3473_v8  ;;  %s2094_s24 = sld [smem:[#allocation5]] }
 0x21d   : > { %v1385_v13 = vpop.permute.xlu1 %1384  ;;  %v1397_v60 = vpop.permute.xlu0 %1396 }
 0x21e   : > { %v1389_v15 = vadd.f32 %v1385_v13, %v1333_v54  ;;  %v1402_v62 = vadd.f32 %v1397_v60, %v1346_v38  ;;  %v2012_v13 = vmul.f32 %v2011_v51, %v3769_v16  ;;  %v2025_v60 = vstv %s3780_s28  ;;  %s3891_s28 = sld [smem:[#allocation5 + $0x2]] }
 0x21f   : > { %1894 = vrot.lane.b32.xlu1 %v1889_v53, %s2695_s16  ;;  %1906 = vrot.lane.b32.xlu0 %v1902_v45, %s2696_s22 }
 0x220   : > { %v1423_v41 = vadd.f32 %v1421_v25, %v1389_v15  ;;  %v1428_v14 = vadd.f32 %v1426_v56, %v1402_v62  ;;  %v1552_v15 = vmul.f32 %v1551_v52, %v3473_v8  ;;  %v1557_v62 = vstv %s3788_s29 }
 0x221   : > { %v1399_v26 = vpop.permute.xlu1 %1398  ;;  %v1437_v27 = vpop.permute.xlu0 %1436 }
 0x222   : > { %v1403_v31 = vadd.f32 %v1399_v26, %v1347_v0  ;;  %v1442_v9 = vadd.f32 %v1437_v27, %v1410_v19  ;;  %v2026_v26 = vmul.f32 %v2025_v60, %v3769_v16  ;;  %v2039_v27 = vstv %s3792_s30 }
 0x223   : > { %1908 = vrot.lane.b32.xlu1 %v1903_v4, %s2696_s22  ;;  %1920 = vrot.lane.b32.xlu0 %v1916_v49, %s2696_s22  ;;  %v2041_v28 = vmul.f32 %v2039_v27, %v3782_v5 }
 0x224   : > { %v1429_v58 = vadd.f32 %v1427_v47, %v1403_v31  ;;  %v1553_v31 = vmul.f32 %v1551_v52, %v3486_v48 }
 0x225   : > { %v1439_v43 = vpop.permute.xlu1 %1438  ;;  %v1451_v36 = vpop.permute.xlu0 %1450 }
 0x226   : > { %v1443_v61 = vadd.f32 %v1439_v43, %v1411_v46  ;;  %v1456_v59 = vadd.f32 %v1451_v36, %v1416_v30  ;;  %v1997_v30 = vstv %s3761_s20  ;;  %s3875_s20 = sld [smem:[#allocation3 + $0x69]] }
 0x227   : > { %1922 = vrot.lane.b32.xlu1 %v1917_v39, %s2696_s22  ;;  %1934 = vrot.lane.b32.xlu0 %v1930_v17, %s2696_s22  ;;  %v1998_v40 = vmul.f32 %v1997_v30, %v3769_v16  ;;  %v2027_v39 = vmul.f32 %v2025_v60, %v3782_v5  ;;  %v2040_v17 = vmul.f32 %v2039_v27, %v3769_v16 }
 0x229   : > { %v1453_v22 = vpop.permute.xlu1 %1452  ;;  %v1465_v19 = vpop.permute.xlu0 %1464 }
 0x22a   : > { %v1457_v10 = vadd.f32 %v1453_v22, %v1417_v18  ;;  %v1470_v55 = vadd.f32 %v1465_v19, %v1422_v11  ;;  %v1999_v11 = vmul.f32 %v1997_v30, %v3782_v5  ;;  %v1559_v22 = vmul.f32 %v1557_v62, %v3486_v48 }
 0x22b   : > { %1936 = vrot.lane.b32.xlu1 %v1931_v23, %s2696_s22  ;;  %1948 = vrot.lane.b32.xlu0 %v1944_v21, %s2696_s22  ;;  %v1564_v19 = vmul.f32 %v1563_v44, %v3473_v8 }
 0x22d   : > { %v1467_v24 = vpop.permute.xlu1 %1466  ;;  %v1479_v29 = vpop.permute.xlu0 %1478 }
 0x22e   : > { %v1471_v57 = vadd.f32 %v1467_v24, %v1423_v41  ;;  %v1484_v46 = vadd.f32 %v1479_v29, %v1428_v14  ;;  %v2013_v14 = vmul.f32 %v2011_v51, %v3782_v5 }
 0x22f   : > { %1950 = vrot.lane.b32.xlu1 %v1945_v7, %s2696_s22  ;;  %1988 = vrot.lane.b32.xlu0 %v1984_v32, %s2695_s16  ;;  %v2067_v32 = vstv %s3814_s9 }
 0x231   : > { %v1481_v6 = vpop.permute.xlu1 %1480  ;;  %v1493_v1 = vpop.permute.xlu0 %1492 }
 0x232   : > { %v1485_v20 = vadd.f32 %v1481_v6, %v1429_v58  ;;  %v1498_v3 = vadd.f32 %v1493_v1, %v1442_v9  ;;  %v1558_v9 = vmul.f32 %v1557_v62, %v3473_v8  ;;  %v2068_v6 = vmul.f32 %v2067_v32, %v3769_v16 }
 0x233   : > { %1990 = vrot.lane.b32.xlu1 %v1985_v2, %s2695_s16  ;;  %2002 = vrot.lane.b32.xlu0 %v1998_v40, %s2695_s16  ;;  %v2081_v40 = vstv %s3824_s10  ;;  %s312_s10 = scalar_lea.vmem %s3950_s6, %s3954_s25 }
 0x234   : > { %v1548_v54 = vadd.f32 %v1546_v42, %v1498_v3  ;;  %v2069_v3 = vmul.f32 %v2067_v32, %v3782_v5  ;;  %v2082_v51 = vmul.f32 %v2081_v40, %v3769_v16 }
 0x235   : > { %v1495_v38 = vpop.permute.xlu1 %1494  ;;  %v1507_v18 = vpop.permute.xlu0 %1506 }
 0x236   : > { %v1499_v53 = vadd.f32 %v1495_v38, %v1443_v61  ;;  %v1512_v45 = vadd.f32 %v1507_v18, %v1456_v59  ;;  %v2053_v61 = vstv %s3804_s8  ;;  %v2083_v18 = vmul.f32 %v2081_v40, %v3782_v5  ;;  %s3902_s8 = sld [smem:[#allocation5 + $0x3]] }
 0x237   : > { %2004 = vrot.lane.b32.xlu1 %v1999_v11, %s2695_s16  ;;  %2016 = vrot.lane.b32.xlu0 %v2012_v13, %s2695_s16  ;;  %v2054_v24 = vmul.f32 %v2053_v61, %v3769_v16  ;;  %v2055_v35 = vmul.f32 %v2053_v61, %v3782_v5 }
 0x238   : > { %v1549_v25 = vadd.f32 %v1547_v33, %v1499_v53  ;;  %v1554_v56 = vadd.f32 %v1552_v15, %v1512_v45 }
 0x239   : > { %v1509_v0 = vpop.permute.xlu1 %1508  ;;  %v1521_v41 = vpop.permute.xlu0 %1520 }
 0x23a   : > { %v1513_v4 = vadd.f32 %v1509_v0, %v1457_v10  ;;  %v1526_v49 = vadd.f32 %v1521_v41, %v1470_v55 }
 0x23b   : > { %2018 = vrot.lane.b32.xlu1 %v2013_v14, %s2695_s16  ;;  %2030 = vrot.lane.b32.xlu0 %v2026_v26, %s2695_s16 }
 0x23c   : > { %v1555_v47 = vadd.f32 %v1553_v31, %v1513_v4  ;;  %v1560_v58 = vadd.f32 %v1558_v9, %v1526_v49  ;;  %v1695_v49 = vstv %s3847_s12 }
 0x23d   : > { %v1523_v43 = vpop.permute.xlu1 %1522  ;;  %v1535_v36 = vpop.permute.xlu0 %1534 }
 0x23e   : > { %v1527_v59 = vadd.f32 %v1523_v43, %v1471_v57  ;;  %v1540_v37 = vadd.f32 %v1535_v36, %v1484_v46  ;;  %v1565_v57 = vmul.f32 %v1563_v44, %v3486_v48 }
 0x23f   : > { %2032 = vrot.lane.b32.xlu1 %v2027_v39, %s2695_s16  ;;  %2044 = vrot.lane.b32.xlu0 %v2040_v17, %s2696_s22  ;;  %s2507_s16 = sld [smem:[#allocation3 + $0x1b]]  ;;  %v1696_v39 = vmul.f32 %v1695_v49, %v3577_v34  ;;  %v1701_v17 = vstv %s3850_s13 }
 0x240   : > { %v1561_v23 = vadd.f32 %v1559_v22, %v1527_v59  ;;  %v1566_v21 = vadd.f32 %v1564_v19, %v1540_v37 }
 0x241   : > { %v1537_v10 = vpop.permute.xlu1 %1536  ;;  %v1575_v55 = vpop.permute.xlu0 %1574 }
 0x242   : > { %v1541_v29 = vadd.f32 %v1537_v10, %v1485_v20  ;;  %v1580_v7 = vadd.f32 %v1575_v55, %v1548_v54  ;;  %v1702_v10 = vmul.f32 %v1701_v17, %v3577_v34 }
 0x243   : > { %2046 = vrot.lane.b32.xlu1 %v2041_v28, %s2696_s22  ;;  %2058 = vrot.lane.b32.xlu0 %v2054_v24, %s2696_s22 }
 0x244   : > { %v1567_v8 = vadd.f32 %v1565_v57, %v1541_v29  ;;  %v1703_v57 = vmul.f32 %v1701_v17, %v3590_v12 }
 0x245   : > { %v1577_v46 = vpop.permute.xlu1 %1576  ;;  %v1589_v30 = vpop.permute.xlu0 %1588  ;;  %v1683_v60 = vstv %s2507_s16 }
 0x246   : > { %v1581_v1 = vadd.f32 %v1577_v46, %v1549_v25  ;;  %v1594_v2 = vadd.f32 %v1589_v30, %v1554_v56  ;;  %v1684_v62 = vmul.f32 %v1683_v60, %v3577_v34  ;;  %v1689_v25 = vstv %s2508_s11 }
 0x247   : > { %2060 = vrot.lane.b32.xlu1 %v2055_v35, %s2696_s22  ;;  %2072 = vrot.lane.b32.xlu0 %v2068_v6, %s2696_s22  ;;  %v1685_v27 = vmul.f32 %v1683_v60, %v3590_v12  ;;  %v1690_v4 = vmul.f32 %v1689_v25, %v3577_v34  ;;  %v1691_v36 = vmul.f32 %v1689_v25, %v3590_v12  ;;  %v1833_v25 = vstv %s3861_s15 }
 0x249   : > { %v1591_v48 = vpop.permute.xlu1 %1590  ;;  %v1603_v20 = vpop.permute.xlu0 %1602 }
 0x24a   : > { %v1595_v42 = vadd.f32 %v1591_v48, %v1555_v47  ;;  %v1608_v52 = vadd.f32 %v1603_v20, %v1560_v58 }
 0x24b   : > { %2074 = vrot.lane.b32.xlu1 %v2069_v3, %s2696_s22  ;;  %2086 = vrot.lane.b32.xlu0 %v2082_v51, %s2696_s22 }
 0x24d   : > { %v1605_v54 = vpop.permute.xlu1 %1604  ;;  %v1617_v38 = vpop.permute.xlu0 %1616 }
 0x24e   : > { %v1609_v11 = vadd.f32 %v1605_v54, %v1561_v23  ;;  %v1622_v13 = vadd.f32 %v1617_v38, %v1566_v21  ;;  %v1697_v21 = vmul.f32 %v1695_v49, %v3590_v12  ;;  %v1834_v49 = vmul.f32 %v1833_v25, %v3681_v63 }
 0x24f   : > { %2088 = vrot.lane.b32.xlu1 %v2083_v18, %s2696_s22  ;;  %s2519_s22 = sld [smem:[#allocation3 + $0x1e]] }
 0x251   : > { %v1619_v53 = vpop.permute.xlu1 %1618  ;;  %v1631_v45 = vpop.permute.xlu0 %1630 }
 0x252   : > { %v1623_v33 = vadd.f32 %v1619_v53, %v1567_v8  ;;  %v1636_v15 = vadd.f32 %v1631_v45, %v1580_v7 }
 0x254   : > { %v1686_v56 = vadd.f32 %v1684_v62, %v1636_v15 }
 0x255   : > { %v1633_v0 = vpop.permute.xlu1 %1632  ;;  %v1645_v41 = vpop.permute.xlu0 %1644 }
 0x256   : > { %v1637_v14 = vadd.f32 %v1633_v0, %v1581_v1  ;;  %v1650_v26 = vadd.f32 %v1645_v41, %v1594_v2 }
 0x258   : > { %v1687_v31 = vadd.f32 %v1685_v27, %v1637_v14  ;;  %v1692_v9 = vadd.f32 %v1690_v4, %v1650_v26 }
 0x259   : > { %v1647_v44 = vpop.permute.xlu1 %1646  ;;  %v1659_v47 = vpop.permute.xlu0 %1658 }
 0x25a   : > { %v1651_v58 = vadd.f32 %v1647_v44, %v1595_v42  ;;  %v1664_v43 = vadd.f32 %v1659_v47, %v1608_v52  ;;  %v1821_v42 = vstv %s2519_s22 }
 0x25b   : > { %v1822_v18 = vmul.f32 %v1821_v42, %v3681_v63  ;;  %v1823_v15 = vmul.f32 %v1821_v42, %v3694_v50 }
 0x25c   : > { %v1693_v61 = vadd.f32 %v1691_v36, %v1651_v58  ;;  %v1698_v59 = vadd.f32 %v1696_v39, %v1664_v43  ;;  %v1835_v39 = vmul.f32 %v1833_v25, %v3694_v50 }
 0x25d   : > { %v1661_v37 = vpop.permute.xlu1 %1660  ;;  %v1673_v22 = vpop.permute.xlu0 %1672 }
 0x25e   : > { %v1665_v19 = vadd.f32 %v1661_v37, %v1609_v11  ;;  %v1678_v23 = vadd.f32 %v1673_v22, %v1622_v13  ;;  %v1827_v11 = vstv %s2520_s14 }
 0x25f   : > { %v1828_v62 = vmul.f32 %v1827_v11, %v3681_v63  ;;  %v1829_v4 = vmul.f32 %v1827_v11, %v3694_v50 }
 0x260   : > { %v1699_v55 = vadd.f32 %v1697_v21, %v1665_v19  ;;  %v1704_v28 = vadd.f32 %v1702_v10, %v1678_v23 }
 0x261   : > { %v1675_v24 = vpop.permute.xlu1 %1674  ;;  %v1713_v29 = vpop.permute.xlu0 %1712 }
 0x262   : > { %v1679_v7 = vadd.f32 %v1675_v24, %v1623_v33  ;;  %v1718_v32 = vadd.f32 %v1713_v29, %v1686_v56 }
 0x264   : > { %v1705_v8 = vadd.f32 %v1703_v57, %v1679_v7 }
 0x265   : > { %v1715_v46 = vpop.permute.xlu1 %1714  ;;  %v1727_v30 = vpop.permute.xlu0 %1726 }
 0x266   : > { %v1719_v35 = vadd.f32 %v1715_v46, %v1687_v31  ;;  %v1732_v6 = vadd.f32 %v1727_v30, %v1692_v9  ;;  %v1839_v31 = vstv %s3864_s17 }
 0x267   : > { %v1840_v17 = vmul.f32 %v1839_v31, %v3681_v63  ;;  %v1841_v23 = vmul.f32 %v1839_v31, %v3694_v50  ;;  %v1965_v50 = vstv %s2532_s19 }
 0x269   : > { %v1729_v1 = vpop.permute.xlu1 %1728  ;;  %v1741_v2 = vpop.permute.xlu0 %1740 }
 0x26a   : > { %v1733_v40 = vadd.f32 %v1729_v1, %v1693_v61  ;;  %v1746_v48 = vadd.f32 %v1741_v2, %v1698_v59 }
 0x26d   : > { %v1743_v34 = vpop.permute.xlu1 %1742  ;;  %v1755_v20 = vpop.permute.xlu0 %1754 }
 0x26e   : > { %v1747_v3 = vadd.f32 %v1743_v34, %v1699_v55  ;;  %v1760_v51 = vadd.f32 %v1755_v20, %v1704_v28 }
 0x271   : > { %v1757_v12 = vpop.permute.xlu1 %1756  ;;  %v1769_v52 = vpop.permute.xlu0 %1768 }
 0x272   : > { %v1761_v54 = vadd.f32 %v1757_v12, %v1705_v8  ;;  %v1774_v38 = vadd.f32 %v1769_v52, %v1718_v32  ;;  %v1959_v32 = vstv %s2531_s18 }
 0x273   : > { %v1960_v30 = vmul.f32 %v1959_v32, %v3769_v16  ;;  %v1961_v20 = vmul.f32 %v1959_v32, %v3782_v5 }
 0x274   : > { %v1824_v13 = vadd.f32 %v1822_v18, %v1774_v38 }
 0x275   : > { %v1771_v60 = vpop.permute.xlu1 %1770  ;;  %v1783_v53 = vpop.permute.xlu0 %1782 }
 0x276   : > { %v1775_v45 = vadd.f32 %v1771_v60, %v1719_v35  ;;  %v1788_v33 = vadd.f32 %v1783_v53, %v1732_v6  ;;  %v1967_v60 = vmul.f32 %v1965_v50, %v3782_v5 }
 0x278   : > { %v1825_v56 = vadd.f32 %v1823_v15, %v1775_v45  ;;  %v1830_v0 = vadd.f32 %v1828_v62, %v1788_v33  ;;  %v1977_v45 = vstv %s3878_s23 }
 0x279   : > { %v1785_v41 = vpop.permute.xlu1 %1784  ;;  %v1797_v14 = vpop.permute.xlu0 %1796 }
 0x27a   : > { %v1789_v26 = vadd.f32 %v1785_v41, %v1733_v40  ;;  %v1802_v27 = vadd.f32 %v1797_v14, %v1746_v48 }
 0x27c   : > { %v1831_v9 = vadd.f32 %v1829_v4, %v1789_v26  ;;  %v1836_v44 = vadd.f32 %v1834_v49, %v1802_v27  ;;  %v1978_v27 = vmul.f32 %v1977_v45, %v3769_v16 }
 0x27d   : > { %v1799_v47 = vpop.permute.xlu1 %1798  ;;  %v1811_v58 = vpop.permute.xlu0 %1810 }
 0x27e   : > { %v1803_v43 = vadd.f32 %v1799_v47, %v1747_v3  ;;  %v1816_v36 = vadd.f32 %v1811_v58, %v1760_v51  ;;  %v1966_v3 = vmul.f32 %v1965_v50, %v3769_v16  ;;  %v1971_v51 = vstv %s3875_s20 }
 0x27f   : > { %v1972_v53 = vmul.f32 %v1971_v51, %v3769_v16  ;;  %v1973_v26 = vmul.f32 %v1971_v51, %v3782_v5  ;;  %v1979_v58 = vmul.f32 %v1977_v45, %v3782_v5 }
 0x280   : > { %v1837_v61 = vadd.f32 %v1835_v39, %v1803_v43  ;;  %v1842_v59 = vadd.f32 %v1840_v17, %v1816_v36 }
 0x281   : > { %v1813_v37 = vpop.permute.xlu1 %1812  ;;  %v1851_v22 = vpop.permute.xlu0 %1850 }
 0x282   : > { %v1817_v19 = vadd.f32 %v1813_v37, %v1761_v54  ;;  %v1856_v63 = vadd.f32 %v1851_v22, %v1824_v13 }
 0x284   : > { %v1843_v21 = vadd.f32 %v1841_v23, %v1817_v19  ;;  %v2095_v19 = vstv %s2094_s24 }
 0x285   : > { %v1853_v10 = vpop.permute.xlu1 %1852  ;;  %v1865_v55 = vpop.permute.xlu0 %1864 }
 0x286   : > { %v1857_v35 = vadd.f32 %v1853_v10, %v1825_v56  ;;  %v1870_v6 = vadd.f32 %v1865_v55, %v1830_v0 }
 0x289   : > { %v1867_v28 = vpop.permute.xlu1 %1866  ;;  %v1879_v24 = vpop.permute.xlu0 %1878 }
 0x28a   : > { %v1871_v42 = vadd.f32 %v1867_v28, %v1831_v9  ;;  %v1884_v12 = vadd.f32 %v1879_v24, %v1836_v44 }
 0x28d   : > { %v1881_v29 = vpop.permute.xlu1 %1880  ;;  %v1893_v7 = vpop.permute.xlu0 %1892 }
 0x28e   : > { %v1885_v33 = vadd.f32 %v1881_v29, %v1837_v61  ;;  %v1898_v15 = vadd.f32 %v1893_v7, %v1842_v59  ;;  %v2115_v29 = vstv %s3889_s26 }
 0x291   : > { %v1895_v57 = vpop.permute.xlu1 %1894  ;;  %v1907_v8 = vpop.permute.xlu0 %1906 }
 0x292   : > { %v1912_v46 = vadd.f32 %v1907_v8, %v1856_v63  ;;  %v1899_v4 = vadd.f32 %v1895_v57, %v1843_v21 }
 0x294   : > { %v1962_v1 = vadd.f32 %v1960_v30, %v1912_v46 }
 0x295   : > { %v1909_v2 = vpop.permute.xlu1 %1908  ;;  %v1921_v40 = vpop.permute.xlu0 %1920 }
 0x296   : > { %v1913_v48 = vadd.f32 %v1909_v2, %v1857_v35  ;;  %v1926_v34 = vadd.f32 %v1921_v40, %v1870_v6 }
 0x298   : > { %v1963_v52 = vadd.f32 %v1961_v20, %v1913_v48  ;;  %v1968_v54 = vadd.f32 %v1966_v3, %v1926_v34 }
 0x299   : > { %v1923_v38 = vpop.permute.xlu1 %1922  ;;  %v1935_v18 = vpop.permute.xlu0 %1934 }
 0x29a   : > { %v1927_v11 = vadd.f32 %v1923_v38, %v1871_v42  ;;  %v1940_v13 = vadd.f32 %v1935_v18, %v1884_v12 }
 0x29c   : > { %v1969_v62 = vadd.f32 %v1967_v60, %v1927_v11  ;;  %v1974_v25 = vadd.f32 %v1972_v53, %v1940_v13 }
 0x29d   : > { %v1937_v56 = vpop.permute.xlu1 %1936  ;;  %v1949_v0 = vpop.permute.xlu0 %1948 }
 0x29e   : > { %v1941_v41 = vadd.f32 %v1937_v56, %v1885_v33  ;;  %v1954_v14 = vadd.f32 %v1949_v0, %v1898_v15 }
 0x2a0   : > { %v1975_v49 = vadd.f32 %v1973_v26, %v1941_v41  ;;  %v1980_v31 = vadd.f32 %v1978_v27, %v1954_v14 }
 0x2a1   : > { %v1951_v9 = vpop.permute.xlu1 %1950  ;;  %v1989_v44 = vpop.permute.xlu0 %1988 }
 0x2a2   : > { %v1955_v47 = vadd.f32 %v1951_v9, %v1899_v4  ;;  %v1994_v16 = vadd.f32 %v1989_v44, %v1962_v1  ;;  %v2135_v1 = vstv %s3891_s28 }
 0x2a4   : > { %v1981_v43 = vadd.f32 %v1979_v58, %v1955_v47 }
 0x2a5   : > { %v1991_v36 = vpop.permute.xlu1 %1990  ;;  %v2003_v39 = vpop.permute.xlu0 %2002 }
 0x2a6   : > { %v1995_v21 = vadd.f32 %v1991_v36, %v1963_v52  ;;  %v2008_v10 = vadd.f32 %v2003_v39, %v1968_v54  ;;  %v2155_v54 = vstv %s3902_s8 }
 0x2a9   : > { %v2005_v17 = vpop.permute.xlu1 %2004  ;;  %v2017_v61 = vpop.permute.xlu0 %2016 }
 0x2aa   : > { %v2009_v57 = vadd.f32 %v2005_v17, %v1969_v62  ;;  %v2022_v8 = vadd.f32 %v2017_v61, %v1974_v25 }
 0x2ad   : > { %v2019_v59 = vpop.permute.xlu1 %2018  ;;  %v2031_v37 = vpop.permute.xlu0 %2030 }
 0x2ae   : > { %v2023_v34 = vadd.f32 %v2019_v59, %v1975_v49  ;;  %v2036_v20 = vadd.f32 %v2031_v37, %v1980_v31 }
 0x2b1   : > { %v2033_v22 = vpop.permute.xlu1 %2032  ;;  %v2045_v23 = vpop.permute.xlu0 %2044 }
 0x2b2   : > { %v2050_v5 = vadd.f32 %v2045_v23, %v1994_v16  ;;  %v2037_v13 = vadd.f32 %v2033_v22, %v1981_v43 }
 0x2b4   : > { %v2096_v55 = vadd.f32 %v2095_v19, %v2050_v5  ;;  %v2101_v28 = vsel %vm2098_vm11, %v2050_v5, 0.0  ;;  %v2174_v60 = vmul.f32 %v2050_v5, %v2050_v5 }
 0x2b5   : > { %v2047_v24 = vpop.permute.xlu1 %2046  ;;  %2102 = vadd.xlane.f32.xlu0 %v2101_v28  ;;  %v2059_v7 = vpop.permute.xlu0 %2058 }
 0x2b6   : > { %2099 = vst.msk [vmem:[%s3898_s7] sm:$0xff] %vm2098_vm11, %v2096_v55  ;;  %v2051_v32 = vadd.f32 %v2047_v24, %v1995_v21  ;;  %v2064_v63 = vadd.f32 %v2059_v7, %v2008_v10  ;;  %v2176_v56 = vsel %vm2098_vm11, %v2174_v60, 0.0 }
 0x2b8   : > { %v2097_v46 = vadd.f32 %v2095_v19, %v2051_v32  ;;  %v2116_v30 = vadd.f32 %v2115_v29, %v2064_v63  ;;  %v2104_v50 = vsel %vm2098_vm11, %v2051_v32, 0.0  ;;  %v2121_v35 = vsel %vm2098_vm11, %v2064_v63, 0.0 }
 0x2b9   : > { %v2061_v6 = vpop.permute.xlu1 %2060  ;;  %2105 = vadd.xlane.f32.xlu1 %v2104_v50  ;;  %2122 = vadd.xlane.f32.xlu0 %v2121_v35  ;;  %v2073_v2 = vpop.permute.xlu0 %2072  ;;  %v2175_v14 = vmul.f32 %v2051_v32, %v2051_v32  ;;  %v2189_v26 = vmul.f32 %v2064_v63, %v2064_v63 }
 0x2ba   : > { %2100 = vst.msk [vmem:[%s3898_s7 + $0x8] sm:$0xff] %vm2098_vm11, %v2097_v46  ;;  %2544 = vst.msk [vmem:[%s3898_s7 + $0x10] sm:$0xff] %vm2098_vm11, %v2116_v30  ;;  %v2065_v40 = vadd.f32 %v2061_v6, %v2009_v57  ;;  %v2078_v48 = vadd.f32 %v2073_v2, %v2022_v8 }
 0x2bb   : > { %v2179_v27 = vsel %vm2098_vm11, %v2175_v14, 0.0  ;;  %v2191_v4 = vsel %vm2098_vm11, %v2189_v26, 0.0 }
 0x2bc   : > { %v2117_v3 = vadd.f32 %v2115_v29, %v2065_v40  ;;  %v2136_v51 = vadd.f32 %v2135_v1, %v2078_v48  ;;  %v2124_v42 = vsel %vm2098_vm11, %v2065_v40, 0.0  ;;  %v2141_v12 = vsel %vm2098_vm11, %v2078_v48, 0.0 }
 0x2bd   : > { %v2075_v52 = vpop.permute.xlu1 %2074  ;;  %2125 = vadd.xlane.f32.xlu0 %v2124_v42  ;;  %2142 = vadd.xlane.f32.xlu1 %v2141_v12  ;;  %v2087_v38 = vpop.permute.xlu0 %2086  ;;  %v2190_v49 = vmul.f32 %v2065_v40, %v2065_v40  ;;  %v2204_v31 = vmul.f32 %v2078_v48, %v2078_v48 }
 0x2be   : > { %2545 = vst.msk [vmem:[%s3898_s7 + $0x18] sm:$0xff] %vm2098_vm11, %v2117_v3  ;;  %2547 = vst.msk [vmem:[%s3898_s7 + $0x20] sm:$0xff] %vm2098_vm11, %v2136_v51  ;;  %v2079_v18 = vadd.f32 %v2075_v52, %v2023_v34  ;;  %v2092_v11 = vadd.f32 %v2087_v38, %v2036_v20 }
 0x2bf   : > { %v2194_v9 = vsel %vm2098_vm11, %v2190_v49, 0.0  ;;  %v2206_v44 = vsel %vm2098_vm11, %v2204_v31, 0.0 }
 0x2c0   : > { %v2137_v53 = vadd.f32 %v2135_v1, %v2079_v18  ;;  %v2156_v45 = vadd.f32 %v2155_v54, %v2092_v11  ;;  %v2144_v33 = vsel %vm2098_vm11, %v2079_v18, 0.0  ;;  %v2161_v15 = vsel %vm2098_vm11, %v2092_v11, 0.0 }
 0x2c1   : > { %v2089_v62 = vpop.permute.xlu1 %2088  ;;  %2145 = vadd.xlane.f32.xlu0 %v2144_v33  ;;  %2162 = vadd.xlane.f32.xlu1 %v2161_v15  ;;  %v2205_v47 = vmul.f32 %v2079_v18, %v2079_v18  ;;  %v2219_v58 = vmul.f32 %v2092_v11, %v2092_v11 }
 0x2c2   : > { %2548 = vst.msk [vmem:[%s3898_s7 + $0x28] sm:$0xff] %vm2098_vm11, %v2137_v53  ;;  %2550 = vst.msk [vmem:[%s3898_s7 + $0x30] sm:$0xff] %vm2098_vm11, %v2156_v45  ;;  %v2093_v25 = vadd.f32 %v2089_v62, %v2037_v13 }
 0x2c3   : > { %v2209_v43 = vsel %vm2098_vm11, %v2205_v47, 0.0  ;;  %v2221_v36 = vsel %vm2098_vm11, %v2219_v58, 0.0 }
 0x2c4   : > { %v2157_v0 = vadd.f32 %v2155_v54, %v2093_v25  ;;  %v2164_v41 = vsel %vm2098_vm11, %v2093_v25, 0.0  ;;  %v2220_v39 = vmul.f32 %v2093_v25, %v2093_v25 }
 0x2c5   : > { %2165 = vadd.xlane.f32.xlu0 %v2164_v41  ;;  %2177 = vadd.xlane.f32.xlu1 %v2176_v56 }
 0x2c6   : > { %2551 = vst.msk [vmem:[%s3898_s7 + $0x38] sm:$0xff] %vm2098_vm11, %v2157_v0  ;;  %v2224_v17 = vsel %vm2098_vm11, %v2220_v39, 0.0 }
 0x2c9   : > { %2180 = vadd.xlane.f32.xlu0 %v2179_v27  ;;  %2192 = vadd.xlane.f32.xlu1 %v2191_v4 }
 0x2cd   : > { %2195 = vadd.xlane.f32.xlu0 %v2194_v9  ;;  %2207 = vadd.xlane.f32.xlu1 %v2206_v44 }
 0x2d1   : > { %2210 = vadd.xlane.f32.xlu0 %v2209_v43  ;;  %2222 = vadd.xlane.f32.xlu1 %v2221_v36 }
 0x2d5   : > { %2225 = vadd.xlane.f32.xlu0 %v2224_v17 }
 0x342   : > { %v2103_v61 = vpop.xlane.xlu0 %2102 }
 0x346   : > { %v2106_v59 = vpop.xlane.xlu1 %2105  ;;  %v2123_v37 = vpop.xlane.xlu0 %2122 }
 0x347   : > { %v2107_v10 = vadd.f32 %v2106_v59, %v2103_v61 }
 0x349   : > { %v2108_v32 = vrot.slane %v2107_v10, 4 }
 0x34a   : > { %v2143_v16 = vpop.xlane.xlu1 %2142  ;;  %v2126_v22 = vpop.xlane.xlu0 %2125 }
 0x34b   : > { %v2127_v5 = vadd.f32 %v2126_v22, %v2123_v37  ;;  %v2109_v35 = vadd.f32 %v2108_v32, %v2107_v10 }
 0x34d   : > { %v2128_v24 = vrot.slane %v2127_v5, 4  ;;  %v2110_v51 = vrot.slane %v2109_v35, 2 }
 0x34e   : > { %v2163_v19 = vpop.xlane.xlu1 %2162  ;;  %v2146_v23 = vpop.xlane.xlu0 %2145 }
 0x34f   : > { %v2147_v21 = vadd.f32 %v2146_v23, %v2143_v16  ;;  %v2129_v46 = vadd.f32 %v2128_v24, %v2127_v5  ;;  %v2111_v60 = vadd.f32 %v2110_v51, %v2109_v35 }
 0x351   : > { %v2148_v7 = vrot.slane %v2147_v21, 4  ;;  %v2130_v40 = vrot.slane %v2129_v46, 2  ;;  %v2112_v27 = vrot.slane %v2111_v60, 1 }
 0x352   : > { %v2178_v55 = vpop.xlane.xlu1 %2177  ;;  %v2166_v28 = vpop.xlane.xlu0 %2165 }
 0x353   : > { %v2167_v29 = vadd.f32 %v2166_v28, %v2163_v19  ;;  %v2149_v50 = vadd.f32 %v2148_v7, %v2147_v21  ;;  %v2131_v38 = vadd.f32 %v2130_v40, %v2129_v46  ;;  %v2113_v39 = vadd.f32 %v2112_v27, %v2111_v60 }
 0x355   : > { %v2168_v63 = vrot.slane %v2167_v29, 4  ;;  %v2150_v20 = vrot.slane %v2149_v50, 2  ;;  %v2132_v56 = vrot.slane %v2131_v38, 1 }
 0x356   : > { %v2193_v57 = vpop.xlane.xlu1 %2192  ;;  %v2181_v8 = vpop.xlane.xlu0 %2180 }
 0x357   : > { %v2182_v30 = vadd.f32 %v2181_v8, %v2178_v55  ;;  %v2169_v6 = vadd.f32 %v2168_v63, %v2167_v29  ;;  %v2151_v13 = vadd.f32 %v2150_v20, %v2149_v50  ;;  %v2133_v44 = vadd.f32 %v2132_v56, %v2131_v38 }
 0x359   : > { %v2183_v1 = vrot.slane %v2182_v30, 4  ;;  %v2170_v42 = vrot.slane %v2169_v6, 2  ;;  %v2152_v26 = vrot.slane %v2151_v13, 1  ;;  %v2235_v16 = vsel %vm2234_vm12, %v2113_v39, %v2133_v44 }
 0x35a   : > { %v2196_v2 = vpop.xlane.xlu0 %2195  ;;  %v2208_v3 = vpop.xlane.xlu1 %2207 }
 0x35b   : > { %v2184_v48 = vadd.f32 %v2183_v1, %v2182_v30  ;;  %v2197_v34 = vadd.f32 %v2196_v2, %v2193_v57  ;;  %v2171_v53 = vadd.f32 %v2170_v42, %v2169_v6  ;;  %v2153_v36 = vadd.f32 %v2152_v26, %v2151_v13 }
 0x35d   : > { %v2198_v12 = vrot.slane %v2197_v34, 4  ;;  %v2185_v52 = vrot.slane %v2184_v48, 2  ;;  %v2172_v4 = vrot.slane %v2171_v53, 1  ;;  %v2237_v23 = vsel %vm2236_vm13, %v2235_v16, %v2153_v36 }
 0x35e   : > { %v2211_v54 = vpop.xlane.xlu0 %2210  ;;  %v2223_v62 = vpop.xlane.xlu1 %2222 }
 0x35f   : > { %v2199_v18 = vadd.f32 %v2198_v12, %v2197_v34  ;;  %v2212_v11 = vadd.f32 %v2211_v54, %v2208_v3  ;;  %v2186_v15 = vadd.f32 %v2185_v52, %v2184_v48  ;;  %v2173_v17 = vadd.f32 %v2172_v4, %v2171_v53 }
 0x361   : > { %v2200_v45 = vrot.slane %v2199_v18, 2  ;;  %v2213_v33 = vrot.slane %v2212_v11, 4  ;;  %v2187_v9 = vrot.slane %v2186_v15, 1  ;;  %v2239_v21 = vsel %vm2238_vm14, %v2237_v23, %v2173_v17 }
 0x362   : > { %v2226_v25 = vpop.xlane.xlu0 %2225 }
 0x363   : > { %v2201_v0 = vadd.f32 %v2200_v45, %v2199_v18  ;;  %v2214_v41 = vadd.f32 %v2213_v33, %v2212_v11  ;;  %v2227_v14 = vadd.f32 %v2226_v25, %v2223_v62  ;;  %v2188_v37 = vadd.f32 %v2187_v9, %v2186_v15 }
 0x365   : > { %v2215_v49 = vrot.slane %v2214_v41, 2  ;;  %v2228_v31 = vrot.slane %v2227_v14, 4  ;;  %v2202_v47 = vrot.slane %v2201_v0, 1  ;;  %v2241_v55 = vsel %vm2240_vm15, %v2239_v21, %v2188_v37 }
 0x367   : > { %v2216_v58 = vadd.f32 %v2215_v49, %v2214_v41  ;;  %v2229_v43 = vadd.f32 %v2228_v31, %v2227_v14  ;;  %v2203_v22 = vadd.f32 %v2202_v47, %v2201_v0 }
 0x369   : > { %v2217_v61 = vrot.slane %v2216_v58, 1  ;;  %v2230_v59 = vrot.slane %v2229_v43, 2  ;;  %v2243_v28 = vsel %vm2242_vm0, %v2241_v55, %v2203_v22 }
 0x36b   : > { %v2231_v19 = vadd.f32 %v2230_v59, %v2229_v43  ;;  %v2218_v5 = vadd.f32 %v2217_v61, %v2216_v58 }
 0x36d   : > { %v2232_v10 = vrot.slane %v2231_v19, 1  ;;  %v2245_v29 = vsel %vm2244_vm1, %v2243_v28, %v2218_v5 }
 0x36f   : > { %v2233_v24 = vadd.f32 %v2232_v10, %v2231_v19 }
 0x371   : > { %v2247_v7 = vsel %vm2246_vm2, %v2245_v29, %v2233_v24 }
 0x372   : > { %2249 = vst.msk [vmem:[%s312_s10] sm:$0x1] %vm2248_vm3, %v2247_v7 }
 0x373 PF: > { %s20_s21 = sadd.s32 1, %s2687_s21  }
 0x374   : > { %p17_p2 = scmp.ge.s32.totalorder %s20_s21, 4  }
 0x376   :  { %19 = sbr.rel (!%p17_p2) target bundleno = 3 (0x3), region = 108 }
 0x37d   :  { %2283 = vsyncpa [#allocation4], 1 }
 0x37e   :  { %2285 = vsyncpa [#allocation4 + $0x1], 1 }
 0x37f   :  { %2286 = vsyncpa [#allocation6], 1 }
 0x380   :  { %2287 = vsyncpa [#allocation9], 1 }

</bundles_post_ra>
